<compile_context>
chip_gen: v6e
topology: v6e:2x2x1
jax: 0.10.0
libtpu: 0.0.40
codegen_flags: <defaults>
</compile_context>

<pallas_src>
import jax
import jax.numpy as jnp
from jax.experimental import pallas as pl
from jax.experimental.pallas import tpu as pltpu

# Architecture constants fixed by the PyTorch module definition.
F1, F2, D, C_EEG = 8, 16, 2, 56
DF1 = D * F1                    # 16 channels after the grouped depthwise conv
T = 256                         # time length implied by Linear(8*F2, 1)
K1, K2 = 64, 16                 # temporal kernel sizes (block1 / block2)
T1 = T // 4                     # 64 (after AvgPool(1,4))
T2 = T1 // 8                    # 8  (after AvgPool(1,8))
TPAD = 384                      # lane-aligned padded time: 31 + 256 + 97 zeros
BT = 8                          # samples processed per grid step
NR = BT * DF1                   # 128 fused (sample, channel) rows per step
BN_EPS = 1e-5


def _elu(h):
    # clamp before exp so the untaken positive branch never produces inf
    return jnp.where(h > 0, h, jnp.exp(jnp.minimum(h, 0.0)) - 1.0)


def eegnet_kernel(x_ref, wmix_ref, tall_ref, beff_ref, wd2_ref, p1_ref,
                  mpw_ref, bpw_ref, p2_ref, wlin_ref, ssel_ref, blin_ref,
                  o_ref):
    # x block: (BT*56, 384) -- BT samples, rows = b*56 + electrode, time padded.
    x = x_ref[...]

    # block1, reordered: grouped depthwise (56,1) channel mix first (BN1/BN2
    # scales folded into the block-diagonal constant), one MXU matmul.
    # Output rows are grouped filter-major: row = f*(2*BT) + b*2 + p.
    g = jnp.dot(wmix_ref[...], x, preferred_element_type=jnp.float32)       # (128, 384)

    # temporal (1,64) conv as per-filter Toeplitz matmuls on the MXU.
    g3 = g.reshape(F1, D * BT, TPAD)                                        # (8, 16, 384)
    h2 = jnp.einsum('fmk,fkt->fmt', g3, tall_ref[...],
                    preferred_element_type=jnp.float32)                     # (8, 16, 256)
    h2 = h2.reshape(NR, T) + beff_ref[...]          # folded BN1/BN2 shifts
    h2 = _elu(h2)

    # AvgPool(1,4) as an MXU matmul with a constant pooling matrix.
    h3 = jnp.dot(h2, p1_ref[...], preferred_element_type=jnp.float32)       # (128, 64)
    # Dropout: identity in inference mode.

    # block2: SamePadding(7,8) + depthwise (1,16) conv (16 per-row taps, VPU).
    h3p = jnp.concatenate([jnp.zeros((NR, 7), jnp.float32), h3,
                           jnp.zeros((NR, 8), jnp.float32)], axis=1)        # (128, 79)
    wd2 = wd2_ref[...]                                                      # (128, 16)
    h4 = jnp.zeros((NR, T1), jnp.float32)
    for k in range(K2):
        h4 = h4 + wd2[:, k:k + 1] * h3p[:, k:k + T1]

    # pointwise 1x1 conv + separable biases + BN3 all folded into one
    # block-diagonal MXU matmul; rows come back sample-major (b, i).
    h5 = jnp.dot(mpw_ref[...], h4, preferred_element_type=jnp.float32) + bpw_ref[...]
    h5 = _elu(h5)

    # AvgPool(1,8) as matmul, then the per-sample linear head + sigmoid.
    h6 = jnp.dot(h5, p2_ref[...], preferred_element_type=jnp.float32)       # (128, 8)
    scores = jnp.sum(h6 * wlin_ref[...], axis=1, keepdims=True)             # (128, 1)
    logits = jnp.dot(ssel_ref[...], scores,
                     preferred_element_type=jnp.float32) + blin_ref[...]    # (BT, 1)
    o_ref[...] = (1.0 / (1.0 + jnp.exp(-logits))).reshape(1, BT, 1)


_PARAM_ORDER = ("wmix", "tall", "beff", "wd2f", "p1", "mpw", "bpwf", "p2",
                "wlinf", "ssel", "blin")


def _rep_spec(arr):
    nd = arr.ndim
    return pl.BlockSpec(arr.shape, lambda b, _nd=nd: (0,) * _nd)


@jax.jit
def eegnet_forward(x, packed):
    """x: (B, 56, 256) float32 -> (B, 1) sigmoid outputs."""
    B = x.shape[0]
    nblk = pl.cdiv(B, BT)
    b_pad = nblk * BT
    # pad batch to a multiple of BT; pad time 31 left (SamePadding) and out to a
    # lane-aligned 384 on the right (the Toeplitz band never reads past col 318).
    xp = jnp.pad(x.astype(jnp.float32),
                 ((0, b_pad - B), (0, 0), (31, TPAD - T - 31)))
    x_flat = xp.reshape(b_pad * C_EEG, TPAD)

    plist = [packed[k] for k in _PARAM_ORDER]
    in_specs = [pl.BlockSpec((BT * C_EEG, TPAD), lambda b: (b, 0))]
    in_specs += [_rep_spec(p) for p in plist]

    out = pl.pallas_call(
        eegnet_kernel,
        out_shape=jax.ShapeDtypeStruct((nblk, BT, 1), jnp.float32),
        grid_spec=pltpu.PrefetchScalarGridSpec(
            num_scalar_prefetch=0,
            grid=(nblk,),
            in_specs=in_specs,
            out_specs=pl.BlockSpec((1, BT, 1), lambda b: (b, 0, 0)),
        ),
        compiler_params=pltpu.CompilerParams(
            dimension_semantics=("parallel",),          # batch blocks independent
            vmem_limit_bytes=32 * 1024 * 1024),
    )(x_flat, *plist)
    return out.reshape(b_pad, 1)[:B]


def fold_and_pack(raw):
    """Fold BN / biases into conv weights and build the batched kernel constants."""
    f32 = jnp.float32
    w1 = raw["w1"].reshape(F1, K1).astype(f32)
    wd1 = raw["wd1"].reshape(DF1, C_EEG).astype(f32)
    wd2 = raw["wd2"].reshape(DF1, K2).astype(f32)
    bd2 = raw["bd2"].reshape(DF1).astype(f32)
    wpw = raw["wpw"].reshape(F2, DF1).astype(f32)
    bpw = raw["bpw"].reshape(F2).astype(f32)
    wlin = raw["wlin"].reshape(F2, T2).astype(f32)     # flatten order i*8 + w
    blin = raw["blin"].reshape(1, 1).astype(f32)

    def bn_fold(p):
        gamma, beta, mean, var = p
        s = gamma / jnp.sqrt(var + BN_EPS)
        return s, beta - mean * s

    s1, b1 = bn_fold(raw["bn1"])        # per F1
    s2, b2 = bn_fold(raw["bn2"])        # per DF1
    s3, b3 = bn_fold(raw["bn3"])        # per F2

    grp = jnp.arange(DF1) // D          # output channel j -> temporal filter f

    # BN1/BN2 scales folded into the channel mix; BN1 shift propagated through
    # the depthwise channel sum; BN2 shift added directly.
    wd1eff = (s2 * s1[grp])[:, None] * wd1                    # (16, 56)
    beff = s2 * b1[grp] * jnp.sum(wd1, axis=1) + b2           # (16,)

    # BN3 + separable biases folded into the pointwise conv.
    wpw_eff = s3[:, None] * wpw                               # (16, 16)
    bpw_eff = s3 * (wpw @ bd2 + bpw) + b3                     # (16,)

    eye_b = jnp.eye(BT, dtype=f32)

    # block-diagonal channel-mix matrix, filter-major output rows:
    # wmix[f*2*BT + b*2 + p, b*56 + c] = wd1eff[2f+p, c]
    wd1eff_fp = wd1eff.reshape(F1, D, C_EEG)
    wmix = jnp.einsum('bB,fpc->fbpBc', eye_b, wd1eff_fp).reshape(NR, BT * C_EEG)

    # per-filter Toeplitz band matrices: tall[f, tau, t] = w1[f, tau - t]
    diff = jnp.arange(TPAD)[:, None] - jnp.arange(T)[None, :]          # (384, 256)
    band = (diff >= 0) & (diff < K1)
    tall = jnp.where(band[None, :, :], w1[:, jnp.clip(diff, 0, K1 - 1)], 0.0)

    beff_fm = jnp.broadcast_to(beff.reshape(F1, 1, D), (F1, BT, D)).reshape(NR, 1)
    wd2_fm = jnp.broadcast_to(wd2.reshape(F1, 1, D, K2), (F1, BT, D, K2)).reshape(NR, K2)

    # pooling matrices (AvgPool(1,4) and AvgPool(1,8) as matmuls)
    p1 = (jnp.arange(T)[:, None] // 4 == jnp.arange(T1)[None, :]).astype(f32) / 4.0
    p2 = (jnp.arange(T1)[:, None] // 8 == jnp.arange(T2)[None, :]).astype(f32) / 8.0

    # pointwise conv as a (b,i) <- (f,b,p) constant mixing matrix
    wpw_eff_fp = wpw_eff.reshape(F2, F1, D)
    mpw = jnp.einsum('bB,ifp->bifBp', eye_b, wpw_eff_fp).reshape(BT * F2, NR)

    bpw_sm = jnp.broadcast_to(bpw_eff[None, :], (BT, F2)).reshape(NR, 1)
    wlin_sm = jnp.broadcast_to(wlin[None], (BT, F2, T2)).reshape(NR, T2)
    ssel = jnp.kron(eye_b, jnp.ones((1, F2), f32))            # (BT, 128) per-sample sum

    return dict(wmix=wmix, tall=tall, beff=beff_fm, wd2f=wd2_fm, p1=p1,
                mpw=mpw, bpwf=bpw_sm, p2=p2, wlinf=wlin_sm, ssel=ssel, blin=blin)


def init_raw_params(key):
    """Deterministic synthetic parameters with the PyTorch module's shapes."""
    ks = jax.random.split(key, 12)

    def n(i, shape, scale=0.1):
        return scale * jax.random.normal(ks[i], shape, jnp.float32)

    def bn(i, ch):
        k0, k1, k2, k3 = jax.random.split(ks[i], 4)
        gamma = 1.0 + 0.1 * jax.random.normal(k0, (ch,), jnp.float32)
        beta = 0.1 * jax.random.normal(k1, (ch,), jnp.float32)
        mean = 0.1 * jax.random.normal(k2, (ch,), jnp.float32)
        var = 1.0 + 0.1 * jnp.abs(jax.random.normal(k3, (ch,), jnp.float32))
        return (gamma, beta, mean, var)

    return dict(
        w1=n(0, (F1, 1, 1, K1)), bn1=bn(1, F1),
        wd1=n(2, (DF1, 1, C_EEG, 1)), bn2=bn(3, DF1),
        wd2=n(4, (DF1, 1, 1, K2)), bd2=n(5, (DF1,)),
        wpw=n(6, (F2, DF1, 1, 1)), bpw=n(7, (F2,)),
        bn3=bn(8, F2),
        wlin=n(9, (1, F2 * T2)), blin=n(10, (1,)),
    )


def eegnet_reference(x, raw):
    """Straightforward pure-JAX forward (eval mode), used only for validation."""
    B = x.shape[0]
    hi = jax.lax.Precision.HIGHEST
    w1 = raw["w1"].reshape(F1, K1)
    wd1 = raw["wd1"].reshape(DF1, C_EEG)
    wd2 = raw["wd2"].reshape(DF1, K2)
    bd2 = raw["bd2"].reshape(DF1)
    wpw = raw["wpw"].reshape(F2, DF1)
    bpw = raw["bpw"].reshape(F2)
    wlin = raw["wlin"].reshape(1, F2 * T2)
    blin = raw["blin"].reshape(1)

    def bn(p, h):                       # channel axis = 1
        gamma, beta, mean, var = p
        sh = (1, -1) + (1,) * (h.ndim - 2)
        return (h - mean.reshape(sh)) / jnp.sqrt(var.reshape(sh) + BN_EPS) \
            * gamma.reshape(sh) + beta.reshape(sh)

    xp = jnp.pad(x, ((0, 0), (0, 0), (31, 32)))                       # (B,56,319)
    win = jnp.stack([xp[:, :, k:k + T] for k in range(K1)], -1)       # (B,56,256,64)
    h1 = bn(raw["bn1"], jnp.einsum('bctk,fk->bfct', win, w1, precision=hi))
    h1g = h1[:, jnp.arange(DF1) // D]                                 # (B,16,56,256)
    h2 = _elu(bn(raw["bn2"], jnp.einsum('bjct,jc->bjt', h1g, wd1, precision=hi)))
    h3 = h2.reshape(B, DF1, T1, 4).mean(-1)                           # (B,16,64)
    h3p = jnp.pad(h3, ((0, 0), (0, 0), (7, 8)))                       # (B,16,79)
    win2 = jnp.stack([h3p[:, :, k:k + T1] for k in range(K2)], -1)    # (B,16,64,16)
    h4 = jnp.einsum('bjtk,jk->bjt', win2, wd2, precision=hi) + bd2[None, :, None]
    h5 = jnp.einsum('bjt,ij->bit', h4, wpw, precision=hi) + bpw[None, :, None]
    h5 = _elu(bn(raw["bn3"], h5))
    h6 = h5.reshape(B, F2, T2, 8).mean(-1)                            # (B,16,8)
    logits = jnp.dot(h6.reshape(B, F2 * T2), wlin.T, precision=hi) + blin[None, :]
    return jax.nn.sigmoid(logits)                                     # (B,1)


if __name__ == "__main__":
    B = 2
    key = jax.random.PRNGKey(0)
    kx, kp = jax.random.split(key)
    # EEG input: (batch, electrodes=56, time=256); shapes are fixed by the
    # architecture (C=56 depthwise kernel, Linear expects 8*F2 = 128 features).
    x = jax.random.normal(kx, (B, C_EEG, T), jnp.float32)
    raw = init_raw_params(kp)
    packed = fold_and_pack(raw)

    y = eegnet_forward(x, packed)
    y = jax.block_until_ready(y)

    assert y.shape == (B, 1), y.shape
    assert bool(jnp.all(jnp.isfinite(y))), "non-finite output"

    # cross-check against the pure-JAX reference (loose tol: different matmul
    # summation orders / MXU accumulation).
    y_ref = eegnet_reference(x, raw)
    assert bool(jnp.max(jnp.abs(y - y_ref)) < 2e-2), "mismatch vs reference"

    print("KERNEL_OK")
</pallas_src>

<mosaic_0001>
module attributes {stable_mosaic.version = 11 : i64} {
  func.func @eegnet_kernel(%arg0: i32, %arg1: memref<448x384xf32, #tpu.memory_space<vmem>>, %arg2: memref<128x448xf32, #tpu.memory_space<vmem>>, %arg3: memref<8x384x256xf32, #tpu.memory_space<vmem>>, %arg4: memref<128x1xf32, #tpu.memory_space<vmem>>, %arg5: memref<128x16xf32, #tpu.memory_space<vmem>>, %arg6: memref<256x64xf32, #tpu.memory_space<vmem>>, %arg7: memref<128x128xf32, #tpu.memory_space<vmem>>, %arg8: memref<128x1xf32, #tpu.memory_space<vmem>>, %arg9: memref<64x8xf32, #tpu.memory_space<vmem>>, %arg10: memref<128x8xf32, #tpu.memory_space<vmem>>, %arg11: memref<8x128xf32, #tpu.memory_space<vmem>>, %arg12: memref<1x1xf32, #tpu.memory_space<vmem>>, %arg13: memref<1x8x1xf32, #tpu.memory_space<vmem>>) attributes {dimension_semantics = [#tpu.dimension_semantics<parallel>], iteration_bounds = array<i64: 1>, scalar_prefetch = 0 : i64, scratch_operands = 0 : i64, tpu.core_type = #tpu.core_type<tc>, window_params = [{transform_indices = @transform_0, window_bounds = array<i64: 448, 384>}, {pipeline_mode = #tpu.pipeline_mode<synchronous>, transform_indices = @transform_1, window_bounds = array<i64: 128, 448>}, {pipeline_mode = #tpu.pipeline_mode<synchronous>, transform_indices = @transform_2, window_bounds = array<i64: 8, 384, 256>}, {pipeline_mode = #tpu.pipeline_mode<synchronous>, transform_indices = @transform_3, window_bounds = array<i64: 128, 1>}, {pipeline_mode = #tpu.pipeline_mode<synchronous>, transform_indices = @transform_4, window_bounds = array<i64: 128, 16>}, {pipeline_mode = #tpu.pipeline_mode<synchronous>, transform_indices = @transform_5, window_bounds = array<i64: 256, 64>}, {pipeline_mode = #tpu.pipeline_mode<synchronous>, transform_indices = @transform_6, window_bounds = array<i64: 128, 128>}, {pipeline_mode = #tpu.pipeline_mode<synchronous>, transform_indices = @transform_7, window_bounds = array<i64: 128, 1>}, {pipeline_mode = #tpu.pipeline_mode<synchronous>, transform_indices = @transform_8, window_bounds = array<i64: 64, 8>}, {pipeline_mode = #tpu.pipeline_mode<synchronous>, transform_indices = @transform_9, window_bounds = array<i64: 128, 8>}, {pipeline_mode = #tpu.pipeline_mode<synchronous>, transform_indices = @transform_10, window_bounds = array<i64: 8, 128>}, {pipeline_mode = #tpu.pipeline_mode<synchronous>, transform_indices = @transform_11, window_bounds = array<i64: 1, 1>}, {transform_indices = @transform_12, window_bounds = array<i64: 1, 8, 1>}]} {
    %c0 = arith.constant 0 : index
    %c0_0 = arith.constant 0 : index
    %0 = vector.load %arg1[%c0, %c0_0] : memref<448x384xf32, #tpu.memory_space<vmem>>, vector<448x384xf32>
    %c0_1 = arith.constant 0 : index
    %c0_2 = arith.constant 0 : index
    %1 = vector.load %arg2[%c0_1, %c0_2] : memref<128x448xf32, #tpu.memory_space<vmem>>, vector<128x448xf32>
    %cst = arith.constant dense<0.000000e+00> : vector<128x384xf32>
    %2 = tpu.matmul %1, %0, %cst {dimension_numbers = #tpu.dot_dimension_numbers<[1], [0], [0], [1], [0, 0, 1, 1], [], []>} : vector<128x448xf32>, vector<448x384xf32>, vector<128x384xf32> -> vector<128x384xf32>
    %3 = vector.shape_cast %2 : vector<128x384xf32> to vector<8x16x384xf32>
    %c0_3 = arith.constant 0 : index
    %c0_4 = arith.constant 0 : index
    %c0_5 = arith.constant 0 : index
    %4 = vector.load %arg3[%c0_3, %c0_4, %c0_5] : memref<8x384x256xf32, #tpu.memory_space<vmem>>, vector<8x384x256xf32>
    "tpu.trace_start"() <{level = 10 : i32, message = "fmk,fkt->fmt"}> : () -> ()
    %cst_6 = arith.constant dense<0.000000e+00> : vector<8x16x256xf32>
    %5 = tpu.matmul %3, %4, %cst_6 {dimension_numbers = #tpu.dot_dimension_numbers<[2], [1], [1], [2], [0, 0, 0, 1, 1, 2], [0], [0]>} : vector<8x16x384xf32>, vector<8x384x256xf32>, vector<8x16x256xf32> -> vector<8x16x256xf32>
    "tpu.trace_stop"() : () -> ()
    %6 = vector.shape_cast %5 : vector<8x16x256xf32> to vector<128x256xf32>
    %c0_7 = arith.constant 0 : index
    %c0_8 = arith.constant 0 : index
    %7 = vector.load %arg4[%c0_7, %c0_8] : memref<128x1xf32, #tpu.memory_space<vmem>>, vector<128x1xf32>
    %8 = vector.broadcast %7 : vector<128x1xf32> to vector<128x256xf32>
    %9 = arith.addf %6, %8 : vector<128x256xf32>
    %cst_9 = arith.constant 0.000000e+00 : f32
    %10 = vector.broadcast %cst_9 : f32 to vector<128x256xf32>
    %11 = arith.cmpf ogt, %9, %10 : vector<128x256xf32>
    %cst_10 = arith.constant 0.000000e+00 : f32
    %12 = vector.broadcast %cst_10 : f32 to vector<128x256xf32>
    %13 = arith.minimumf %9, %12 : vector<128x256xf32>
    %14 = math.exp %13 : vector<128x256xf32>
    %cst_11 = arith.constant 1.000000e+00 : f32
    %15 = vector.broadcast %cst_11 : f32 to vector<128x256xf32>
    %16 = arith.subf %14, %15 : vector<128x256xf32>
    %17 = arith.select %11, %9, %16 : vector<128x256xi1>, vector<128x256xf32>
    %c0_12 = arith.constant 0 : index
    %c0_13 = arith.constant 0 : index
    %18 = vector.load %arg6[%c0_12, %c0_13] : memref<256x64xf32, #tpu.memory_space<vmem>>, vector<256x64xf32>
    %cst_14 = arith.constant dense<0.000000e+00> : vector<128x64xf32>
    %19 = tpu.matmul %17, %18, %cst_14 {dimension_numbers = #tpu.dot_dimension_numbers<[1], [0], [0], [1], [0, 0, 1, 1], [], []>} : vector<128x256xf32>, vector<256x64xf32>, vector<128x64xf32> -> vector<128x64xf32>
    %cst_15 = arith.constant 0.000000e+00 : f32
    %20 = vector.broadcast %cst_15 : f32 to vector<128x7xf32>
    %cst_16 = arith.constant 0.000000e+00 : f32
    %21 = vector.broadcast %cst_16 : f32 to vector<128x8xf32>
    %22 = tpu.concatenate %20, %19, %21 in 1 : vector<128x7xf32>, vector<128x64xf32>, vector<128x8xf32> -> vector<128x79xf32>
    %c0_17 = arith.constant 0 : index
    %c0_18 = arith.constant 0 : index
    %23 = vector.load %arg5[%c0_17, %c0_18] : memref<128x16xf32, #tpu.memory_space<vmem>>, vector<128x16xf32>
    %cst_19 = arith.constant 0.000000e+00 : f32
    %24 = vector.broadcast %cst_19 : f32 to vector<128x64xf32>
    %25 = vector.extract_strided_slice %23 {offsets = [0, 0], sizes = [128, 1], strides = [1, 1]} : vector<128x16xf32> to vector<128x1xf32>
    %26 = vector.extract_strided_slice %22 {offsets = [0, 0], sizes = [128, 64], strides = [1, 1]} : vector<128x79xf32> to vector<128x64xf32>
    %27 = vector.broadcast %25 : vector<128x1xf32> to vector<128x64xf32>
    %28 = arith.mulf %27, %26 : vector<128x64xf32>
    %29 = arith.addf %24, %28 : vector<128x64xf32>
    %30 = vector.extract_strided_slice %23 {offsets = [0, 1], sizes = [128, 1], strides = [1, 1]} : vector<128x16xf32> to vector<128x1xf32>
    %31 = vector.extract_strided_slice %22 {offsets = [0, 1], sizes = [128, 64], strides = [1, 1]} : vector<128x79xf32> to vector<128x64xf32>
    %32 = vector.broadcast %30 : vector<128x1xf32> to vector<128x64xf32>
    %33 = arith.mulf %32, %31 : vector<128x64xf32>
    %34 = arith.addf %29, %33 : vector<128x64xf32>
    %35 = vector.extract_strided_slice %23 {offsets = [0, 2], sizes = [128, 1], strides = [1, 1]} : vector<128x16xf32> to vector<128x1xf32>
    %36 = vector.extract_strided_slice %22 {offsets = [0, 2], sizes = [128, 64], strides = [1, 1]} : vector<128x79xf32> to vector<128x64xf32>
    %37 = vector.broadcast %35 : vector<128x1xf32> to vector<128x64xf32>
    %38 = arith.mulf %37, %36 : vector<128x64xf32>
    %39 = arith.addf %34, %38 : vector<128x64xf32>
    %40 = vector.extract_strided_slice %23 {offsets = [0, 3], sizes = [128, 1], strides = [1, 1]} : vector<128x16xf32> to vector<128x1xf32>
    %41 = vector.extract_strided_slice %22 {offsets = [0, 3], sizes = [128, 64], strides = [1, 1]} : vector<128x79xf32> to vector<128x64xf32>
    %42 = vector.broadcast %40 : vector<128x1xf32> to vector<128x64xf32>
    %43 = arith.mulf %42, %41 : vector<128x64xf32>
    %44 = arith.addf %39, %43 : vector<128x64xf32>
    %45 = vector.extract_strided_slice %23 {offsets = [0, 4], sizes = [128, 1], strides = [1, 1]} : vector<128x16xf32> to vector<128x1xf32>
    %46 = vector.extract_strided_slice %22 {offsets = [0, 4], sizes = [128, 64], strides = [1, 1]} : vector<128x79xf32> to vector<128x64xf32>
    %47 = vector.broadcast %45 : vector<128x1xf32> to vector<128x64xf32>
    %48 = arith.mulf %47, %46 : vector<128x64xf32>
    %49 = arith.addf %44, %48 : vector<128x64xf32>
    %50 = vector.extract_strided_slice %23 {offsets = [0, 5], sizes = [128, 1], strides = [1, 1]} : vector<128x16xf32> to vector<128x1xf32>
    %51 = vector.extract_strided_slice %22 {offsets = [0, 5], sizes = [128, 64], strides = [1, 1]} : vector<128x79xf32> to vector<128x64xf32>
    %52 = vector.broadcast %50 : vector<128x1xf32> to vector<128x64xf32>
    %53 = arith.mulf %52, %51 : vector<128x64xf32>
    %54 = arith.addf %49, %53 : vector<128x64xf32>
    %55 = vector.extract_strided_slice %23 {offsets = [0, 6], sizes = [128, 1], strides = [1, 1]} : vector<128x16xf32> to vector<128x1xf32>
    %56 = vector.extract_strided_slice %22 {offsets = [0, 6], sizes = [128, 64], strides = [1, 1]} : vector<128x79xf32> to vector<128x64xf32>
    %57 = vector.broadcast %55 : vector<128x1xf32> to vector<128x64xf32>
    %58 = arith.mulf %57, %56 : vector<128x64xf32>
    %59 = arith.addf %54, %58 : vector<128x64xf32>
    %60 = vector.extract_strided_slice %23 {offsets = [0, 7], sizes = [128, 1], strides = [1, 1]} : vector<128x16xf32> to vector<128x1xf32>
    %61 = vector.extract_strided_slice %22 {offsets = [0, 7], sizes = [128, 64], strides = [1, 1]} : vector<128x79xf32> to vector<128x64xf32>
    %62 = vector.broadcast %60 : vector<128x1xf32> to vector<128x64xf32>
    %63 = arith.mulf %62, %61 : vector<128x64xf32>
    %64 = arith.addf %59, %63 : vector<128x64xf32>
    %65 = vector.extract_strided_slice %23 {offsets = [0, 8], sizes = [128, 1], strides = [1, 1]} : vector<128x16xf32> to vector<128x1xf32>
    %66 = vector.extract_strided_slice %22 {offsets = [0, 8], sizes = [128, 64], strides = [1, 1]} : vector<128x79xf32> to vector<128x64xf32>
    %67 = vector.broadcast %65 : vector<128x1xf32> to vector<128x64xf32>
    %68 = arith.mulf %67, %66 : vector<128x64xf32>
    %69 = arith.addf %64, %68 : vector<128x64xf32>
    %70 = vector.extract_strided_slice %23 {offsets = [0, 9], sizes = [128, 1], strides = [1, 1]} : vector<128x16xf32> to vector<128x1xf32>
    %71 = vector.extract_strided_slice %22 {offsets = [0, 9], sizes = [128, 64], strides = [1, 1]} : vector<128x79xf32> to vector<128x64xf32>
    %72 = vector.broadcast %70 : vector<128x1xf32> to vector<128x64xf32>
    %73 = arith.mulf %72, %71 : vector<128x64xf32>
    %74 = arith.addf %69, %73 : vector<128x64xf32>
    %75 = vector.extract_strided_slice %23 {offsets = [0, 10], sizes = [128, 1], strides = [1, 1]} : vector<128x16xf32> to vector<128x1xf32>
    %76 = vector.extract_strided_slice %22 {offsets = [0, 10], sizes = [128, 64], strides = [1, 1]} : vector<128x79xf32> to vector<128x64xf32>
    %77 = vector.broadcast %75 : vector<128x1xf32> to vector<128x64xf32>
    %78 = arith.mulf %77, %76 : vector<128x64xf32>
    %79 = arith.addf %74, %78 : vector<128x64xf32>
    %80 = vector.extract_strided_slice %23 {offsets = [0, 11], sizes = [128, 1], strides = [1, 1]} : vector<128x16xf32> to vector<128x1xf32>
    %81 = vector.extract_strided_slice %22 {offsets = [0, 11], sizes = [128, 64], strides = [1, 1]} : vector<128x79xf32> to vector<128x64xf32>
    %82 = vector.broadcast %80 : vector<128x1xf32> to vector<128x64xf32>
    %83 = arith.mulf %82, %81 : vector<128x64xf32>
    %84 = arith.addf %79, %83 : vector<128x64xf32>
    %85 = vector.extract_strided_slice %23 {offsets = [0, 12], sizes = [128, 1], strides = [1, 1]} : vector<128x16xf32> to vector<128x1xf32>
    %86 = vector.extract_strided_slice %22 {offsets = [0, 12], sizes = [128, 64], strides = [1, 1]} : vector<128x79xf32> to vector<128x64xf32>
    %87 = vector.broadcast %85 : vector<128x1xf32> to vector<128x64xf32>
    %88 = arith.mulf %87, %86 : vector<128x64xf32>
    %89 = arith.addf %84, %88 : vector<128x64xf32>
    %90 = vector.extract_strided_slice %23 {offsets = [0, 13], sizes = [128, 1], strides = [1, 1]} : vector<128x16xf32> to vector<128x1xf32>
    %91 = vector.extract_strided_slice %22 {offsets = [0, 13], sizes = [128, 64], strides = [1, 1]} : vector<128x79xf32> to vector<128x64xf32>
    %92 = vector.broadcast %90 : vector<128x1xf32> to vector<128x64xf32>
    %93 = arith.mulf %92, %91 : vector<128x64xf32>
    %94 = arith.addf %89, %93 : vector<128x64xf32>
    %95 = vector.extract_strided_slice %23 {offsets = [0, 14], sizes = [128, 1], strides = [1, 1]} : vector<128x16xf32> to vector<128x1xf32>
    %96 = vector.extract_strided_slice %22 {offsets = [0, 14], sizes = [128, 64], strides = [1, 1]} : vector<128x79xf32> to vector<128x64xf32>
    %97 = vector.broadcast %95 : vector<128x1xf32> to vector<128x64xf32>
    %98 = arith.mulf %97, %96 : vector<128x64xf32>
    %99 = arith.addf %94, %98 : vector<128x64xf32>
    %100 = vector.extract_strided_slice %23 {offsets = [0, 15], sizes = [128, 1], strides = [1, 1]} : vector<128x16xf32> to vector<128x1xf32>
    %101 = vector.extract_strided_slice %22 {offsets = [0, 15], sizes = [128, 64], strides = [1, 1]} : vector<128x79xf32> to vector<128x64xf32>
    %102 = vector.broadcast %100 : vector<128x1xf32> to vector<128x64xf32>
    %103 = arith.mulf %102, %101 : vector<128x64xf32>
    %104 = arith.addf %99, %103 : vector<128x64xf32>
    %c0_20 = arith.constant 0 : index
    %c0_21 = arith.constant 0 : index
    %105 = vector.load %arg7[%c0_20, %c0_21] : memref<128x128xf32, #tpu.memory_space<vmem>>, vector<128x128xf32>
    %cst_22 = arith.constant dense<0.000000e+00> : vector<128x64xf32>
    %106 = tpu.matmul %105, %104, %cst_22 {dimension_numbers = #tpu.dot_dimension_numbers<[1], [0], [0], [1], [0, 0, 1, 1], [], []>} : vector<128x128xf32>, vector<128x64xf32>, vector<128x64xf32> -> vector<128x64xf32>
    %c0_23 = arith.constant 0 : index
    %c0_24 = arith.constant 0 : index
    %107 = vector.load %arg8[%c0_23, %c0_24] : memref<128x1xf32, #tpu.memory_space<vmem>>, vector<128x1xf32>
    %108 = vector.broadcast %107 : vector<128x1xf32> to vector<128x64xf32>
    %109 = arith.addf %106, %108 : vector<128x64xf32>
    %cst_25 = arith.constant 0.000000e+00 : f32
    %110 = vector.broadcast %cst_25 : f32 to vector<128x64xf32>
    %111 = arith.cmpf ogt, %109, %110 : vector<128x64xf32>
    %cst_26 = arith.constant 0.000000e+00 : f32
    %112 = vector.broadcast %cst_26 : f32 to vector<128x64xf32>
    %113 = arith.minimumf %109, %112 : vector<128x64xf32>
    %114 = math.exp %113 : vector<128x64xf32>
    %cst_27 = arith.constant 1.000000e+00 : f32
    %115 = vector.broadcast %cst_27 : f32 to vector<128x64xf32>
    %116 = arith.subf %114, %115 : vector<128x64xf32>
    %117 = arith.select %111, %109, %116 : vector<128x64xi1>, vector<128x64xf32>
    %c0_28 = arith.constant 0 : index
    %c0_29 = arith.constant 0 : index
    %118 = vector.load %arg9[%c0_28, %c0_29] : memref<64x8xf32, #tpu.memory_space<vmem>>, vector<64x8xf32>
    %cst_30 = arith.constant dense<0.000000e+00> : vector<128x8xf32>
    %119 = tpu.matmul %117, %118, %cst_30 {dimension_numbers = #tpu.dot_dimension_numbers<[1], [0], [0], [1], [0, 0, 1, 1], [], []>} : vector<128x64xf32>, vector<64x8xf32>, vector<128x8xf32> -> vector<128x8xf32>
    %c0_31 = arith.constant 0 : index
    %c0_32 = arith.constant 0 : index
    %120 = vector.load %arg10[%c0_31, %c0_32] : memref<128x8xf32, #tpu.memory_space<vmem>>, vector<128x8xf32>
    %121 = arith.mulf %119, %120 : vector<128x8xf32>
    %cst_33 = arith.constant dense<0.000000e+00> : vector<128xf32>
    %122 = vector.multi_reduction <add>, %121, %cst_33 [1] : vector<128x8xf32> to vector<128xf32>
    %123 = vector.shape_cast %122 : vector<128xf32> to vector<128x1xf32>
    %c0_34 = arith.constant 0 : index
    %c0_35 = arith.constant 0 : index
    %124 = vector.load %arg11[%c0_34, %c0_35] : memref<8x128xf32, #tpu.memory_space<vmem>>, vector<8x128xf32>
    %cst_36 = arith.constant dense<0.000000e+00> : vector<8x1xf32>
    %125 = tpu.matmul %124, %123, %cst_36 {dimension_numbers = #tpu.dot_dimension_numbers<[1], [0], [0], [1], [0, 0, 1, 1], [], []>} : vector<8x128xf32>, vector<128x1xf32>, vector<8x1xf32> -> vector<8x1xf32>
    %c0_37 = arith.constant 0 : index
    %c0_38 = arith.constant 0 : index
    %126 = vector.load %arg12[%c0_37, %c0_38] : memref<1x1xf32, #tpu.memory_space<vmem>>, vector<1x1xf32>
    %127 = vector.broadcast %126 : vector<1x1xf32> to vector<8x1xf32>
    %128 = arith.addf %125, %127 : vector<8x1xf32>
    %cst_39 = arith.constant 0.000000e+00 : f32
    %129 = vector.broadcast %cst_39 : f32 to vector<8x1xf32>
    %130 = arith.subf %129, %128 : vector<8x1xf32>
    %131 = math.exp %130 : vector<8x1xf32>
    %cst_40 = arith.constant 1.000000e+00 : f32
    %132 = vector.broadcast %cst_40 : f32 to vector<8x1xf32>
    %133 = arith.addf %132, %131 : vector<8x1xf32>
    %cst_41 = arith.constant 1.000000e+00 : f32
    %134 = vector.broadcast %cst_41 : f32 to vector<8x1xf32>
    %135 = arith.divf %134, %133 : vector<8x1xf32>
    %136 = vector.shape_cast %135 : vector<8x1xf32> to vector<1x8x1xf32>
    %c0_42 = arith.constant 0 : index
    %c0_43 = arith.constant 0 : index
    %c0_44 = arith.constant 0 : index
    %137 = vector.load %arg13[%c0_42, %c0_43, %c0_44] : memref<1x8x1xf32, #tpu.memory_space<vmem>>, vector<1x8x1xf32>
    tpu.vector_store %arg13[%c0_42, %c0_43, %c0_44], %136 {strides = array<i32>} : memref<1x8x1xf32, #tpu.memory_space<vmem>>, vector<1x8x1xf32>,
    return
  }
  func.func @transform_0(%arg0: i32) -> (i32, i32) {
    %c0_i32 = arith.constant 0 : i32
    %c0_i32_0 = arith.constant 0 : i32
    return %arg0, %c0_i32 : i32, i32
  }
  func.func @transform_1(%arg0: i32) -> (i32, i32) {
    %c0_i32 = arith.constant 0 : i32
    %c0_i32_0 = arith.constant 0 : i32
    %c0_i32_1 = arith.constant 0 : i32
    return %c0_i32, %c0_i32_0 : i32, i32
  }
  func.func @transform_2(%arg0: i32) -> (i32, i32, i32) {
    %c0_i32 = arith.constant 0 : i32
    %c0_i32_0 = arith.constant 0 : i32
    %c0_i32_1 = arith.constant 0 : i32
    %c0_i32_2 = arith.constant 0 : i32
    return %c0_i32, %c0_i32_0, %c0_i32_1 : i32, i32, i32
  }
  func.func @transform_3(%arg0: i32) -> (i32, i32) {
    %c0_i32 = arith.constant 0 : i32
    %c0_i32_0 = arith.constant 0 : i32
    %c0_i32_1 = arith.constant 0 : i32
    return %c0_i32, %c0_i32_0 : i32, i32
  }
  func.func @transform_4(%arg0: i32) -> (i32, i32) {
    %c0_i32 = arith.constant 0 : i32
    %c0_i32_0 = arith.constant 0 : i32
    %c0_i32_1 = arith.constant 0 : i32
    return %c0_i32, %c0_i32_0 : i32, i32
  }
  func.func @transform_5(%arg0: i32) -> (i32, i32) {
    %c0_i32 = arith.constant 0 : i32
    %c0_i32_0 = arith.constant 0 : i32
    %c0_i32_1 = arith.constant 0 : i32
    return %c0_i32, %c0_i32_0 : i32, i32
  }
  func.func @transform_6(%arg0: i32) -> (i32, i32) {
    %c0_i32 = arith.constant 0 : i32
    %c0_i32_0 = arith.constant 0 : i32
    %c0_i32_1 = arith.constant 0 : i32
    return %c0_i32, %c0_i32_0 : i32, i32
  }
  func.func @transform_7(%arg0: i32) -> (i32, i32) {
    %c0_i32 = arith.constant 0 : i32
    %c0_i32_0 = arith.constant 0 : i32
    %c0_i32_1 = arith.constant 0 : i32
    return %c0_i32, %c0_i32_0 : i32, i32
  }
  func.func @transform_8(%arg0: i32) -> (i32, i32) {
    %c0_i32 = arith.constant 0 : i32
    %c0_i32_0 = arith.constant 0 : i32
    %c0_i32_1 = arith.constant 0 : i32
    return %c0_i32, %c0_i32_0 : i32, i32
  }
  func.func @transform_9(%arg0: i32) -> (i32, i32) {
    %c0_i32 = arith.constant 0 : i32
    %c0_i32_0 = arith.constant 0 : i32
    %c0_i32_1 = arith.constant 0 : i32
    return %c0_i32, %c0_i32_0 : i32, i32
  }
  func.func @transform_10(%arg0: i32) -> (i32, i32) {
    %c0_i32 = arith.constant 0 : i32
    %c0_i32_0 = arith.constant 0 : i32
    %c0_i32_1 = arith.constant 0 : i32
    return %c0_i32, %c0_i32_0 : i32, i32
  }
  func.func @transform_11(%arg0: i32) -> (i32, i32) {
    %c0_i32 = arith.constant 0 : i32
    %c0_i32_0 = arith.constant 0 : i32
    %c0_i32_1 = arith.constant 0 : i32
    return %c0_i32, %c0_i32_0 : i32, i32
  }
  func.func @transform_12(%arg0: i32) -> (i32, i32, i32) {
    %c0_i32 = arith.constant 0 : i32
    %c0_i32_0 = arith.constant 0 : i32
    %c0_i32_1 = arith.constant 0 : i32
    return %arg0, %c0_i32, %c0_i32_0 : i32, i32, i32
  }
}

</mosaic_0001>

<bundles_post_ra>
// kernel: eegnet_forward.1
= control target key start
LH: loop header
LB: loop body
LE: loop exit
PB: predicated region body
PF: predicated region fallthrough
CT: control target
= control target key end

     0   :  { %s12174_s0 = inlined_call_operand.vmem [shape: f32[448,384], index: 0, kind: input, shape index: {}]   ;;  %s12175_s1 = inlined_call_operand.vmem [shape: f32[128,448], index: 1, kind: input, shape index: {}]   ;;  %s12176_s2 = inlined_call_operand.hbm [shape: f32[8,384,256], index: 2, kind: input, shape index: {}]   ;;  %s12177_s3 = inlined_call_operand.vmem [shape: f32[128,1], index: 3, kind: input, shape index: {}]   ;;  %s12178_s4 = inlined_call_operand.vmem [shape: f32[128,16], index: 4, kind: input, shape index: {}]   ;;  %s12179_s5 = inlined_call_operand.vmem [shape: f32[256,64], index: 5, kind: input, shape index: {}]   ;;  %s12180_s6 = inlined_call_operand.hbm [shape: f32[128,128], index: 6, kind: input, shape index: {}]   ;;  %s12181_s7 = inlined_call_operand.vmem [shape: f32[128,1], index: 7, kind: input, shape index: {}]   ;;  %s12182_s8 = inlined_call_operand.vmem [shape: f32[64,8], index: 8, kind: input, shape index: {}]   ;;  %s12183_s9 = inlined_call_operand.vmem [shape: f32[128,8], index: 9, kind: input, shape index: {}]   ;;  %s12184_s10 = inlined_call_operand.hbm [shape: f32[8,128], index: 10, kind: input, shape index: {}]   ;;  %s12185_s11 = inlined_call_operand.<no memory space> [shape: f32[1,1], index: 11, kind: input, shape index: {}]   ;;  %s12186_s12 = inlined_call_operand.vmem [shape: f32[1,8,1], index: 12, kind: output, shape index: {}]  }
   0x1   :  { %v17_v0 = vstv %s12185_s11 }
   0x2   :  { %18 = vst [vmem:[#allocation2] sm:$0x1] %v17_v0 }
   0x3   :  { %19 = vsyncpa [#allocation4], 0 }
   0x4   :  { %20 = vsyncpa [#allocation6], 0  ;;  %s7662_s23 = smov [#allocation5]  }
   0x5   :  { %s48_s24 = sshll.u32 %s7662_s23, 4  ;;  %s49_s24 = int_to_ptr.vmem [resolvable:$true] %s48_s24 }
   0x6   :  { %s7606_s25 = scalar_lea.vmem %s49_s24, 2048  ;;  %p7611_p1 = scmp.lt.s32.totalorder %s49_s24, %s49_s24 }
   0x7   :  { %p7607_p0 = scmp.ne.s32.totalorder %s49_s24, %s7606_s25  ;;  %p7612_p2 = scmp.lt.s32.totalorder %s7606_s25, %s7606_s25 }
   0x9   :  { %p7613_p3 = por %p7612_p2, %p7611_p1 }
   0xb   :  { %p7614_p4 = pnand %p7613_p3, %p7607_p0 }
   0xd   :  { %7617 = shalt.err (!%p7614_p4)
}
   0xe   :  { %s7663_s26 = smov 128   ;;  %s7664_s27 = smov 8  }
   0xf   :  { %54 = dma.hbm_to_vmem [thread:$0]  %s12180_s6, 2048, %s49_s24, [#allocation6], %s7663_s26, %s7663_s26, %s7664_s27  }
  0x10   :  { %s7665_s11 = smov [#allocation3]  }
  0x11   :  { %s30_s30 = sshll.u32 %s7665_s11, 4  ;;  %s31_s30 = int_to_ptr.vmem [resolvable:$true] %s30_s30 }
  0x12   :  { %s7626_s13 = scalar_lea.vmem %s31_s30, 98304  ;;  %p7631_p6 = scmp.lt.s32.totalorder %s31_s30, %s31_s30 }
  0x13   :  { %p7627_p5 = scmp.ne.s32.totalorder %s31_s30, %s7626_s13  ;;  %p7632_p7 = scmp.lt.s32.totalorder %s7626_s13, %s7626_s13 }
  0x15   :  { %p7633_p8 = por %p7632_p7, %p7631_p6 }
  0x17   :  { %p7634_p9 = pnand %p7633_p8, %p7627_p5 }
  0x19   :  { %7637 = shalt.err (!%p7634_p9)
}
  0x1a   :  { %s7666_s14 = smov 256   ;;  %s7667_s15 = smov 16  }
  0x1b   :  { %36 = dma.hbm_to_vmem [thread:$0]  %s12176_s2, 98304, %s31_s30, [#allocation4], %s7666_s14, %s7666_s14, %s7667_s15  }
  0x1c   :  { %s7668_s18 = smov [#allocation7]  }
  0x1d   :  { %s67_s19 = sshll.u32 %s7668_s18, 4  ;;  %s68_s19 = int_to_ptr.vmem [resolvable:$true] %s67_s19 }
  0x1e   :  { %s7646_s6 = scalar_lea.vmem %s68_s19, 128  ;;  %p7651_p11 = scmp.lt.s32.totalorder %s68_s19, %s68_s19 }
  0x1f   :  { %p7647_p10 = scmp.ne.s32.totalorder %s68_s19, %s7646_s6  ;;  %p7652_p12 = scmp.lt.s32.totalorder %s7646_s6, %s7646_s6 }
  0x21   :  { %p7653_p13 = por %p7652_p12, %p7651_p11 }
  0x23   :  { %p7654_p0 = pnand %p7653_p13, %p7647_p10 }
  0x25   :  { %7657 = shalt.err (!%p7654_p0)
}
  0x26   :  { %70 = dma.hbm_to_vmem [thread:$0]  %s12184_s10, 128, %s68_s19, [#allocation6]  }
  0x27   :  { %7658 = dma.done.wait [#allocation4], 98304  }
  0x28   :  { %7659 = vsyncadd [#allocation4], 4294868992 }
  0x29   :  { %7660 = dma.done.wait [#allocation6], 2176  }
  0x2a   :  { %7661 = vsyncadd [#allocation6], 4294965120  ;;  %v12192_v1 = vmov 1   ;;  %v12187_v2 = vmov 0   ;;  %v7785_v3 = vld [vmem:[%s12178_s4] sm:$0xff]  ;;  %v128_v4 = vld [vmem:[%s12174_s0 + $0x170] sm:$0xff] }
  0x2b   :  { %7328 = vset.pattern.permute.xlu0 %v12192_v1  ;;  %7327 = vset.pattern.permute.xlu1 %v12187_v2  ;;  %v127_v5 = vld [vmem:[%s12174_s0 + $0x168] sm:$0xff]  ;;  %v125_v6 = vld [vmem:[%s12174_s0 + $0x158] sm:$0xff]  ;;  %v124_v7 = vld [vmem:[%s12174_s0 + $0x150] sm:$0xff]  ;;  %vm314_vm0 = vcmask 523264   ;;  %s7687_s26 = smov 126   ;;  %s7688_s27 = smov 127  }
  0x2c   :  { %3699 = vperm.xlu0 %7328, %v7785_v3   ;;  %363 = vmatprep.subr.mxu0 %v128_v4  ;;  %v7803_v8 = vld [vmem:[%s12178_s4 + $0x18] sm:$0xff]  ;;  %v122_v9 = vld [vmem:[%s12174_s0 + $0x140] sm:$0xff]  ;;  %v119_v11 = vld [vmem:[%s12174_s0 + $0x128] sm:$0xff]  ;;  %s7690_s28 = smov 125   ;;  %s7691_s29 = smov 122  }
  0x2d   :  { %364 = vmatpush1.msra.mxu0 %v127_v5  ;;  %v121_v10 = vld [vmem:[%s12174_s0 + $0x138] sm:$0xff]  ;;  %v224_v12 = vld [vmem:[%s12174_s0 + $0x470] sm:$0xff]  ;;  %v118_v13 = vld [vmem:[%s12174_s0 + $0x120] sm:$0xff]  ;;  %s7692_s11 = smov 123   ;;  %s7694_s30 = smov 121  }
  0x2e   :  { %365 = vmatprep.subr.mxu0 %v125_v6  ;;  %v223_v14 = vld [vmem:[%s12174_s0 + $0x468] sm:$0xff]  ;;  %v116_v16 = vld [vmem:[%s12174_s0 + $0x110] sm:$0xff]  ;;  %524 = vmatprep.subr.mxu1 %v224_v12  ;;  %v221_v17 = vld [vmem:[%s12174_s0 + $0x458] sm:$0xff]  ;;  %s7695_s13 = smov 119   ;;  %s7696_s14 = smov 118  }
  0x2f   :  { %366 = vmatpush1.msra.mxu0 %v124_v7  ;;  %v7827_v15 = vld [vmem:[%s12178_s4 + $0x28] sm:$0xff]  ;;  %525 = vmatpush1.msra.mxu1 %v223_v14  ;;  %v220_v19 = vld [vmem:[%s12174_s0 + $0x450] sm:$0xff]  ;;  %v113_v20 = vld [vmem:[%s12174_s0 + $0xf8] sm:$0xff]  ;;  %s7697_s15 = smov 117   ;;  %s7698_s16 = smov 116  }
  0x30   :  { %3711 = vperm.xlu0 %7328, %v7803_v8   ;;  %367 = vmatprep.subr.mxu0 %v122_v9  ;;  %v115_v18 = vld [vmem:[%s12174_s0 + $0x108] sm:$0xff]  ;;  %v218_v21 = vld [vmem:[%s12174_s0 + $0x440] sm:$0xff]  ;;  %v112_v22 = vld [vmem:[%s12174_s0 + $0xf0] sm:$0xff]  ;;  %v12191_v9 = vmov 2   ;;  %s7699_s17 = smov 115   ;;  %s7700_s18 = smov 114  }
  0x31   :  { %368 = vmatpush1.msra.mxu0 %v121_v10  ;;  %526 = vmatprep.subr.mxu1 %v221_v17  ;;  %v217_v23 = vld [vmem:[%s12174_s0 + $0x438] sm:$0xff]  ;;  %v110_v25 = vld [vmem:[%s12174_s0 + $0xe0] sm:$0xff]  ;;  %v215_v27 = vld [vmem:[%s12174_s0 + $0x428] sm:$0xff] }
  0x32   :  { %369 = vmatprep.subr.mxu0 %v119_v11  ;;  %v7857_v24 = vld [vmem:[%s12178_s4 + $0x38] sm:$0xff]  ;;  %527 = vmatpush1.msra.mxu1 %v220_v19  ;;  %v107_v28 = vld [vmem:[%s12174_s0 + $0xc8] sm:$0xff]  ;;  %v214_v29 = vld [vmem:[%s12174_s0 + $0x420] sm:$0xff] }
  0x33   :  { %370 = vmatpush1.msra.mxu0 %v118_v13  ;;  %v109_v26 = vld [vmem:[%s12174_s0 + $0xd8] sm:$0xff]  ;;  %528 = vmatprep.subr.mxu1 %v218_v21  ;;  %v106_v30 = vld [vmem:[%s12174_s0 + $0xc0] sm:$0xff]  ;;  %v212_v31 = vld [vmem:[%s12174_s0 + $0x410] sm:$0xff] }
  0x34   :  { %3719 = vperm.xlu0 %7328, %v7827_v15   ;;  %371 = vmatprep.subr.mxu0 %v116_v16  ;;  %v7884_v32 = vld [vmem:[%s12178_s4 + $0x48] sm:$0xff]  ;;  %v104_v33 = vld [vmem:[%s12174_s0 + $0xb0] sm:$0xff]  ;;  %v101_v36 = vld [vmem:[%s12174_s0 + $0x98] sm:$0xff] }
  0x35   :  { %372 = vmatpush1.msra.mxu0 %v115_v18  ;;  %529 = vmatpush1.msra.mxu1 %v217_v23  ;;  %v103_v34 = vld [vmem:[%s12174_s0 + $0xa8] sm:$0xff]  ;;  %v209_v37 = vld [vmem:[%s12174_s0 + $0x3f8] sm:$0xff]  ;;  %v100_v38 = vld [vmem:[%s12174_s0 + $0x90] sm:$0xff] }
  0x36   :  { %373 = vmatprep.subr.mxu0 %v113_v20  ;;  %530 = vmatprep.subr.mxu1 %v215_v27  ;;  %v211_v35 = vld [vmem:[%s12174_s0 + $0x408] sm:$0xff]  ;;  %v208_v39 = vld [vmem:[%s12174_s0 + $0x3f0] sm:$0xff]  ;;  %v7911_v40 = vld [vmem:[%s12178_s4 + $0x58] sm:$0xff] }
  0x37   :  { %374 = vmatpush1.msra.mxu0 %v112_v22  ;;  %531 = vmatpush1.msra.mxu1 %v214_v29  ;;  %v98_v41 = vld [vmem:[%s12174_s0 + $0x80] sm:$0xff]  ;;  %v97_v42 = vld [vmem:[%s12174_s0 + $0x78] sm:$0xff]  ;;  %v95_v44 = vld [vmem:[%s12174_s0 + $0x68] sm:$0xff] }
  0x38   :  { %3727 = vperm.xlu0 %7328, %v7857_v24   ;;  %375 = vmatprep.subr.mxu0 %v110_v25  ;;  %v206_v43 = vld [vmem:[%s12174_s0 + $0x3e0] sm:$0xff]  ;;  %v205_v45 = vld [vmem:[%s12174_s0 + $0x3d8] sm:$0xff]  ;;  %v203_v47 = vld [vmem:[%s12174_s0 + $0x3c8] sm:$0xff] }
  0x39   :  { %376 = vmatpush1.msra.mxu0 %v109_v26  ;;  %532 = vmatprep.subr.mxu1 %v212_v31  ;;  %v94_v46 = vld [vmem:[%s12174_s0 + $0x60] sm:$0xff]  ;;  %v7938_v48 = vld [vmem:[%s12178_s4 + $0x68] sm:$0xff]  ;;  %v92_v49 = vld [vmem:[%s12174_s0 + $0x50] sm:$0xff] }
  0x3a   :  { %377 = vmatprep.subr.mxu0 %v107_v28  ;;  %533 = vmatpush1.msra.mxu1 %v211_v35  ;;  %v91_v50 = vld [vmem:[%s12174_s0 + $0x48] sm:$0xff]  ;;  %v202_v51 = vld [vmem:[%s12174_s0 + $0x3c0] sm:$0xff]  ;;  %v89_v52 = vld [vmem:[%s12174_s0 + $0x38] sm:$0xff] }
  0x3b   :  { %378 = vmatpush1.msra.mxu0 %v106_v30  ;;  %534 = vmatprep.subr.mxu1 %v209_v37  ;;  %v200_v53 = vld [vmem:[%s12174_s0 + $0x3b0] sm:$0xff]  ;;  %v199_v55 = vld [vmem:[%s12174_s0 + $0x3a8] sm:$0xff]  ;;  %v7965_v56 = vld [vmem:[%s12178_s4 + $0x78] sm:$0xff] }
  0x3c   :  { %3735 = vperm.xlu0 %7328, %v7884_v32   ;;  %379 = vmatprep.subr.mxu0 %v104_v33  ;;  %v88_v54 = vld [vmem:[%s12174_s0 + $0x30] sm:$0xff]  ;;  %v86_v57 = vld [vmem:[%s12174_s0 + $0x20] sm:$0xff]  ;;  %v197_v58 = vld [vmem:[%s12174_s0 + $0x398] sm:$0xff] }
  0x3d   :  { %380 = vmatpush1.msra.mxu0 %v103_v34  ;;  %535 = vmatpush1.msra.mxu1 %v208_v39  ;;  %v85_v59 = vld [vmem:[%s12174_s0 + $0x18] sm:$0xff]  ;;  %v196_v60 = vld [vmem:[%s12174_s0 + $0x390] sm:$0xff]  ;;  %v83_v61 = vld [vmem:[%s12174_s0 + $0x8] sm:$0xff] }
  0x3e   :  { %381 = vmatprep.subr.mxu0 %v101_v36  ;;  %536 = vmatprep.subr.mxu1 %v206_v43  ;;  %v194_v62 = vld [vmem:[%s12174_s0 + $0x380] sm:$0xff]  ;;  %v193_v0 = vld [vmem:[%s12174_s0 + $0x378] sm:$0xff]  ;;  %v176_v4 = vld [vmem:[%s12174_s0 + $0x2f0] sm:$0xff] }
  0x3f   :  { %382 = vmatpush1.msra.mxu0 %v100_v38  ;;  %537 = vmatpush1.msra.mxu1 %v205_v45  ;;  %v82_v63 = vld [vmem:[%s12174_s0] sm:$0xff]  ;;  %v191_v5 = vld [vmem:[%s12174_s0 + $0x368] sm:$0xff]  ;;  %v173_v11 = vld [vmem:[%s12174_s0 + $0x2d8] sm:$0xff] }
  0x40   :  { %3743 = vperm.xlu0 %7328, %v7911_v40   ;;  %383 = vmatprep.subr.mxu0 %v98_v41  ;;  %v8001_v6 = vld [vmem:[%s12178_s4 + $0x8] sm:$0xff]  ;;  %v190_v10 = vld [vmem:[%s12174_s0 + $0x360] sm:$0xff]  ;;  %v188_v12 = vld [vmem:[%s12174_s0 + $0x350] sm:$0xff] }
  0x41   :  { %384 = vmatpush1.msra.mxu0 %v97_v42  ;;  %538 = vmatprep.subr.mxu1 %v203_v47  ;;  %v175_v7 = vld [vmem:[%s12174_s0 + $0x2e8] sm:$0xff]  ;;  %v172_v13 = vld [vmem:[%s12174_s0 + $0x2d0] sm:$0xff]  ;;  %v170_v16 = vld [vmem:[%s12174_s0 + $0x2c0] sm:$0xff] }
  0x42   :  { %385 = vmatprep.subr.mxu0 %v95_v44  ;;  %539 = vmatpush1.msra.mxu1 %v202_v51  ;;  %v187_v14 = vld [vmem:[%s12174_s0 + $0x348] sm:$0xff]  ;;  %v185_v17 = vld [vmem:[%s12174_s0 + $0x338] sm:$0xff]  ;;  %v8032_v18 = vld [vmem:[%s12178_s4 + $0x20] sm:$0xff] }
  0x43   :  { %386 = vmatpush1.msra.mxu0 %v94_v46  ;;  %540 = vmatprep.subr.mxu1 %v200_v53  ;;  %v169_v19 = vld [vmem:[%s12174_s0 + $0x2b8] sm:$0xff]  ;;  %v184_v20 = vld [vmem:[%s12174_s0 + $0x330] sm:$0xff]  ;;  %v167_v21 = vld [vmem:[%s12174_s0 + $0x2a8] sm:$0xff] }
  0x44   :  { %3751 = vperm.xlu0 %7328, %v7938_v48   ;;  %387 = vmatprep.subr.mxu0 %v92_v49  ;;  %v182_v22 = vld [vmem:[%s12174_s0 + $0x320] sm:$0xff]  ;;  %v181_v25 = vld [vmem:[%s12174_s0 + $0x318] sm:$0xff]  ;;  %v164_v26 = vld [vmem:[%s12174_s0 + $0x290] sm:$0xff] }
  0x45   :  { %388 = vmatpush1.msra.mxu0 %v91_v50  ;;  %541 = vmatpush1.msra.mxu1 %v199_v55  ;;  %v166_v23 = vld [vmem:[%s12174_s0 + $0x2a0] sm:$0xff]  ;;  %v179_v27 = vld [vmem:[%s12174_s0 + $0x308] sm:$0xff]  ;;  %v8062_v28 = vld [vmem:[%s12178_s4 + $0x30] sm:$0xff] }
  0x46   :  { %389 = vmatprep.subr.mxu0 %v89_v52  ;;  %542 = vmatprep.subr.mxu1 %v197_v58  ;;  %v163_v29 = vld [vmem:[%s12174_s0 + $0x288] sm:$0xff]  ;;  %v178_v30 = vld [vmem:[%s12174_s0 + $0x300] sm:$0xff]  ;;  %v161_v31 = vld [vmem:[%s12174_s0 + $0x278] sm:$0xff] }
  0x47   :  { %390 = vmatpush1.msra.mxu0 %v88_v54  ;;  %543 = vmatpush1.msra.mxu1 %v196_v60  ;;  %v248_v33 = vld [vmem:[%s12174_s0 + $0x530] sm:$0xff]  ;;  %v247_v35 = vld [vmem:[%s12174_s0 + $0x528] sm:$0xff]  ;;  %v158_v36 = vld [vmem:[%s12174_s0 + $0x260] sm:$0xff] }
  0x48   :  { %3759 = vperm.xlu0 %7328, %v7965_v56   ;;  %391 = vmatprep.subr.mxu0 %v86_v57  ;;  %v160_v34 = vld [vmem:[%s12174_s0 + $0x270] sm:$0xff]  ;;  %v245_v37 = vld [vmem:[%s12174_s0 + $0x518] sm:$0xff]  ;;  %v8092_v38 = vld [vmem:[%s12178_s4 + $0x40] sm:$0xff] }
  0x49   :  { %392 = vmatpush1.msra.mxu0 %v85_v59  ;;  %544 = vmatprep.subr.mxu1 %v194_v62  ;;  %v157_v39 = vld [vmem:[%s12174_s0 + $0x258] sm:$0xff]  ;;  %v244_v41 = vld [vmem:[%s12174_s0 + $0x510] sm:$0xff]  ;;  %v155_v42 = vld [vmem:[%s12174_s0 + $0x248] sm:$0xff] }
  0x4a   :  { %393 = vmatprep.subr.mxu0 %v83_v61  ;;  %545 = vmatpush1.msra.mxu1 %v193_v0  ;;  %v242_v43 = vld [vmem:[%s12174_s0 + $0x500] sm:$0xff]  ;;  %v241_v45 = vld [vmem:[%s12174_s0 + $0x4f8] sm:$0xff]  ;;  %v152_v46 = vld [vmem:[%s12174_s0 + $0x230] sm:$0xff] }
  0x4b   :  { %394 = vmatpush1.msra.mxu0 %v82_v63  ;;  %546 = vmatprep.subr.mxu1 %v191_v5  ;;  %v154_v44 = vld [vmem:[%s12174_s0 + $0x240] sm:$0xff]  ;;  %v239_v47 = vld [vmem:[%s12174_s0 + $0x4e8] sm:$0xff]  ;;  %v8122_v49 = vld [vmem:[%s12178_s4 + $0x50] sm:$0xff] }
  0x4c   :  { %7331 = vset.pattern.permute.xlu0 %v12191_v9  ;;  %395 = vmatprep.subr.mxu0 %v176_v4  ;;  %v151_v50 = vld [vmem:[%s12174_s0 + $0x228] sm:$0xff]  ;;  %v238_v51 = vld [vmem:[%s12174_s0 + $0x4e0] sm:$0xff]  ;;  %v149_v52 = vld [vmem:[%s12174_s0 + $0x218] sm:$0xff] }
  0x4d   :  { %3863 = vperm.xlu0 %7331, %v8001_v6   ;;  %396 = vmatpush2.msra.mxu0 %v175_v7  ;;  %v236_v53 = vld [vmem:[%s12174_s0 + $0x4d0] sm:$0xff]  ;;  %v235_v55 = vld [vmem:[%s12174_s0 + $0x4c8] sm:$0xff]  ;;  %v146_v57 = vld [vmem:[%s12174_s0 + $0x200] sm:$0xff] }
  0x4e   :  { %547 = vmatpush1.msra.mxu1 %v190_v10  ;;  %397 = vmatprep.subr.mxu0 %v173_v11  ;;  %v148_v54 = vld [vmem:[%s12174_s0 + $0x210] sm:$0xff]  ;;  %v233_v58 = vld [vmem:[%s12174_s0 + $0x4b8] sm:$0xff]  ;;  %v8152_v59 = vld [vmem:[%s12178_s4 + $0x60] sm:$0xff] }
  0x4f   :  { %548 = vmatprep.subr.mxu1 %v188_v12  ;;  %398 = vmatpush2.msra.mxu0 %v172_v13  ;;  %v145_v60 = vld [vmem:[%s12174_s0 + $0x1f8] sm:$0xff]  ;;  %v232_v61 = vld [vmem:[%s12174_s0 + $0x4b0] sm:$0xff]  ;;  %v143_v62 = vld [vmem:[%s12174_s0 + $0x1e8] sm:$0xff] }
  0x50   :  { %549 = vmatpush1.msra.mxu1 %v187_v14  ;;  %399 = vmatprep.subr.mxu0 %v170_v16  ;;  %v230_v63 = vld [vmem:[%s12174_s0 + $0x4a0] sm:$0xff]  ;;  %v229_v4 = vld [vmem:[%s12174_s0 + $0x498] sm:$0xff]  ;;  %v140_v5 = vld [vmem:[%s12174_s0 + $0x1d0] sm:$0xff] }
  0x51   :  { %550 = vmatprep.subr.mxu1 %v185_v17  ;;  %3875 = vperm.xlu0 %7331, %v8032_v18   ;;  %v142_v0 = vld [vmem:[%s12174_s0 + $0x1e0] sm:$0xff]  ;;  %v227_v7 = vld [vmem:[%s12174_s0 + $0x488] sm:$0xff]  ;;  %v8182_v10 = vld [vmem:[%s12178_s4 + $0x70] sm:$0xff] }
  0x52   :  { %400 = vmatpush2.msra.mxu0 %v169_v19  ;;  %551 = vmatpush1.msra.mxu1 %v184_v20  ;;  %v139_v11 = vld [vmem:[%s12174_s0 + $0x1c8] sm:$0xff]  ;;  %v226_v12 = vld [vmem:[%s12174_s0 + $0x480] sm:$0xff]  ;;  %v8193_v13 = vld [vmem:[%s12175_s1 + $0x18] sm:$0xff] }
  0x53   :  { %401 = vmatprep.subr.mxu0 %v167_v21  ;;  %552 = vmatprep.subr.mxu1 %v182_v22  ;;  %v137_v14 = vld [vmem:[%s12174_s0 + $0x1b8] sm:$0xff]  ;;  %v8201_v16 = vld [vmem:[%s12175_s1 + $0x10] sm:$0xff]  ;;  %v134_v20 = vld [vmem:[%s12174_s0 + $0x1a0] sm:$0xff] }
  0x54   :  { %402 = vmatpush2.msra.mxu0 %v166_v23  ;;  %553 = vmatpush1.msra.mxu1 %v181_v25  ;;  %v136_v17 = vld [vmem:[%s12174_s0 + $0x1b0] sm:$0xff]  ;;  %v8210_v19 = vld [vmem:[%s12175_s1 + $0x38] sm:$0xff]  ;;  %v131_v22 = vld [vmem:[%s12174_s0 + $0x188] sm:$0xff]  ;;  %v12190_v25 = vmov 3  }
  0x55   :  { %403 = vmatprep.subr.mxu0 %v164_v26  ;;  %554 = vmatprep.subr.mxu1 %v179_v27  ;;  %v133_v21 = vld [vmem:[%s12174_s0 + $0x198] sm:$0xff]  ;;  %v8229_v23 = vld [vmem:[%s12175_s1 + $0x30] sm:$0xff]  ;;  %v130_v26 = vld [vmem:[%s12174_s0 + $0x180] sm:$0xff] }
  0x56   :  { %3883 = vperm.xlu0 %7331, %v8062_v28   ;;  %404 = vmatpush2.msra.mxu0 %v163_v29  ;;  %v8238_v27 = vld [vmem:[%s12175_s1 + $0x8] sm:$0xff]  ;;  %v8244_v29 = vld [vmem:[%s12175_s1] sm:$0xff]  ;;  %v189_v2 = vld [vmem:[%s12174_s0 + $0x358] sm:$0xff] }
  0x57   :  { %555 = vmatpush1.msra.mxu1 %v178_v30  ;;  %405 = vmatprep.subr.mxu0 %v161_v31  ;;  %v8249_v30 = vld [vmem:[%s12175_s1 + $0x58] sm:$0xff]  ;;  %v8255_v31 = vld [vmem:[%s12175_s1 + $0x28] sm:$0xff]  ;;  %v102_v9 = vld [vmem:[%s12174_s0 + $0xa0] sm:$0xff] }
  0x58   :  { %572 = vmatprep.subr.mxu1 %v248_v33  ;;  %406 = vmatpush2.msra.mxu0 %v160_v34  ;;  %v8269_v33 = vld [vmem:[%s12175_s1 + $0x78] sm:$0xff]  ;;  %v183_v1 = vld [vmem:[%s12174_s0 + $0x328] sm:$0xff] }
  0x59   :  { %573 = vmatpush2.msra.mxu1 %v247_v35  ;;  %407 = vmatprep.subr.mxu0 %v158_v36  ;;  %v225_v34 = vld [vmem:[%s12174_s0 + $0x478] sm:$0xff]  ;;  %v8279_v35 = vld [vmem:[%s12175_s1 + $0x20] sm:$0xff]  ;;  %v8285_v36 = vld [vmem:[%s12175_s1 + $0x48] sm:$0xff] }
  0x5a   :  { %574 = vmatprep.subr.mxu1 %v245_v37  ;;  %3891 = vperm.xlu0 %7331, %v8092_v38   ;;  %v12193_v37 = vmov 0.0  }
  0x5b   :  { %408 = vmatpush2.msra.mxu0 %v157_v39  ;;  %575 = vmatpush2.msra.mxu1 %v244_v41  ;;  %v222_v39 = vld [vmem:[%s12174_s0 + $0x460] sm:$0xff]  ;;  %v8302_v41 = vld [vmem:[%s12175_s1 + $0x98] sm:$0xff] }
  0x5c   :  { %409 = vmatprep.subr.mxu0 %v155_v42  ;;  %576 = vmatprep.subr.mxu1 %v242_v43  ;;  %v2977_v42 = vld [vmem:[%s12177_s3 + $0x10] sm:$0xff]  ;;  %v8313_v43 = vld [vmem:[%s12175_s1 + $0x40] sm:$0xff] }
  0x5d   :  { %410 = vmatpush2.msra.mxu0 %v154_v44  ;;  %577 = vmatpush2.msra.mxu1 %v241_v45  ;;  %v8319_v44 = vld [vmem:[%s12175_s1 + $0x68] sm:$0xff] }
  0x5e   :  { %411 = vmatprep.subr.mxu0 %v152_v46  ;;  %578 = vmatprep.subr.mxu1 %v239_v47  ;;  %v219_v45 = vld [vmem:[%s12174_s0 + $0x448] sm:$0xff]  ;;  %v8335_v46 = vld [vmem:[%s12175_s1 + $0xb8] sm:$0xff]  ;;  %v8343_v47 = vld [vmem:[%s12175_s1 + $0x60] sm:$0xff] }
  0x5f   :  { %3899 = vperm.xlu0 %7331, %v8122_v49   ;;  %412 = vmatpush2.msra.mxu0 %v151_v50  ;;  %v2978_v50 = vld [vmem:[%s12177_s3 + $0x18] sm:$0xff] }
  0x60   :  { %579 = vmatpush2.msra.mxu1 %v238_v51  ;;  %413 = vmatprep.subr.mxu0 %v149_v52  ;;  %v8352_v51 = vld [vmem:[%s12175_s1 + $0x88] sm:$0xff]  ;;  %v216_v52 = vld [vmem:[%s12174_s0 + $0x430] sm:$0xff] }
  0x61   :  { %580 = vmatprep.subr.mxu1 %v236_v53  ;;  %414 = vmatpush2.msra.mxu0 %v148_v54  ;;  %v8369_v53 = vld [vmem:[%s12175_s1 + $0xd8] sm:$0xff]  ;;  %v8376_v54 = vld [vmem:[%s12175_s1 + $0x80] sm:$0xff] }
  0x62   :  { %581 = vmatpush2.msra.mxu1 %v235_v55  ;;  %415 = vmatprep.subr.mxu0 %v146_v57  ;;  %v177_v55 = vld [vmem:[%s12174_s0 + $0x2f8] sm:$0xff]  ;;  %v8385_v57 = vld [vmem:[%s12175_s1 + $0xa8] sm:$0xff] }
  0x63   :  { %582 = vmatprep.subr.mxu1 %v233_v58  ;;  %3907 = vperm.xlu0 %7331, %v8152_v59   ;;  %v213_v58 = vld [vmem:[%s12174_s0 + $0x418] sm:$0xff] }
  0x64   :  { %416 = vmatpush2.msra.mxu0 %v145_v60  ;;  %583 = vmatpush2.msra.mxu1 %v232_v61  ;;  %v8402_v60 = vld [vmem:[%s12175_s1 + $0xf8] sm:$0xff]  ;;  %v8409_v61 = vld [vmem:[%s12175_s1 + $0xa0] sm:$0xff] }
  0x65   :  { %417 = vmatprep.subr.mxu0 %v143_v62  ;;  %584 = vmatprep.subr.mxu1 %v230_v63  ;;  %v129_v62 = vld [vmem:[%s12174_s0 + $0x178] sm:$0xff]  ;;  %v8418_v63 = vld [vmem:[%s12175_s1 + $0xc8] sm:$0xff] }
  0x66   :  { %418 = vmatpush2.msra.mxu0 %v142_v0  ;;  %585 = vmatpush2.msra.mxu1 %v229_v4  ;;  %v210_v0 = vld [vmem:[%s12174_s0 + $0x400] sm:$0xff]  ;;  %v8435_v4 = vld [vmem:[%s12175_s1 + $0x118] sm:$0xff] }
  0x67   :  { %419 = vmatprep.subr.mxu0 %v140_v5  ;;  %586 = vmatprep.subr.mxu1 %v227_v7  ;;  %v2980_v5 = vld [vmem:[%s12177_s3 + $0x28] sm:$0xff]  ;;  %v8445_v7 = vld [vmem:[%s12175_s1 + $0xc0] sm:$0xff] }
  0x68   :  { %3915 = vperm.xlu0 %7331, %v8182_v10   ;;  %420 = vmatpush2.msra.mxu0 %v139_v11  ;;  %v174_v11 = vld [vmem:[%s12174_s0 + $0x2e0] sm:$0xff] }
  0x69   :  { %587 = vmatpush2.msra.mxu1 %v226_v12  ;;  %6825 = vmatprep.mubr.msk.f32.mxu1 %vm314_vm0, %v8193_v13  ;;  %v8454_v12 = vld [vmem:[%s12175_s1 + $0xe8] sm:$0xff] }
  0x6a   :  { %421 = vmatprep.subr.mxu0 %v137_v14  ;;  %589 = vmatmul.mubr.f32.vlgmr.msra.gmra.mxu1 %v8201_v16  ;;  %v8467_v14 = vld [vmem:[%s12175_s1 + $0x138] sm:$0xff] }
  0x6b   :  { %422 = vmatpush2.msra.mxu0 %v136_v17  ;;  %6826 = vmatprep.mubr.msk.f32.mxu1 %vm314_vm0, %v8210_v19  ;;  %v126_v17 = vld [vmem:[%s12174_s0 + $0x160] sm:$0xff] }
  0x6c   :  { %423 = vmatprep.subr.mxu0 %v134_v20  ;;  %7332 = vset.pattern.permute.xlu0 %v12190_v25  ;;  %v8477_v20 = vld [vmem:[%s12175_s1 + $0xe0] sm:$0xff] }
  0x6d   :  { %424 = vmatpush2.msra.mxu0 %v133_v21  ;;  %4019 = vperm.xlu0 %7332, %v7785_v3   ;;  %v8261_v3 = vld [vmem:[%s12175_s1 + $0x50] sm:$0xff]  ;;  %v171_v21 = vld [vmem:[%s12174_s0 + $0x2c8] sm:$0xff]  ;;  %v150_v25 = vld [vmem:[%s12174_s0 + $0x220] sm:$0xff] }
  0x6e   :  { %425 = vmatprep.subr.mxu0 %v131_v22  ;;  %595 = vmatmul.mubr.f32.gmra.mxu1 %v8229_v23  ;;  %v207_v22 = vld [vmem:[%s12174_s0 + $0x3e8] sm:$0xff] }
  0x6f   :  { %426 = vmatpush2.msra.mxu0 %v130_v26  ;;  %427 = vmatprep.mubr.f32.mxu0 %v8238_v27  ;;  %v8498_v26 = vld [vmem:[%s12175_s1 + $0x108] sm:$0xff] }
  0x70   :  { %428 = vmatmul.mubr.f32.vlgmr.msra.gmra.mxu0 %v8244_v29  ;;  %6827 = vmatprep.mubr.msk.f32.mxu1 %vm314_vm0, %v8249_v30 }
  0x71   :  { %4031 = vperm.xlu0 %7332, %v7803_v8   ;;  %433 = vmatprep.mubr.f32.mxu0 %v8255_v31  ;;  %v8293_v8 = vld [vmem:[%s12175_s1 + $0x70] sm:$0xff] }
  0x72   :  { %601 = vmatmul.mubr.f32.gmra.mxu1 %v8261_v3  ;;  %830 = vmatprep.subr.mxu0 %v12193_v37 }
  0x73   :  { %6828 = vmatprep.mubr.msk.f32.mxu1 %vm314_vm0, %v8269_v33  ;;  %831 = vmatpush1.msra.mxu0 %v225_v34  ;;  %v12189_v34 = vmov 4  }
  0x74   :  { %434 = vmatmul.mubr.f32.gmra.mxu0 %v8279_v35  ;;  %832 = vmatprep.subr.mxu0 %v12193_v37 }
  0x75   :  { %4039 = vperm.xlu0 %7332, %v7827_v15   ;;  %439 = vmatprep.mubr.f32.mxu0 %v8285_v36  ;;  %v8326_v15 = vld [vmem:[%s12175_s1 + $0x90] sm:$0xff] }
  0x76   :  { %607 = vmatmul.mubr.f32.gmra.mxu1 %v8293_v8  ;;  %833 = vmatpush1.msra.mxu0 %v222_v39  ;;  %v123_v39 = vld [vmem:[%s12174_s0 + $0x148] sm:$0xff] }
  0x77   :  { %6829 = vmatprep.mubr.msk.f32.mxu1 %vm314_vm0, %v8302_v41  ;;  %3003 = vperm.xlu1 %7327, %v2977_v42   ;;  %v204_v42 = vld [vmem:[%s12174_s0 + $0x3d0] sm:$0xff] }
  0x78   :  { %440 = vmatmul.mubr.f32.gmra.mxu0 %v8313_v43  ;;  %834 = vmatprep.subr.mxu0 %v12193_v37 }
  0x79   :  { %4047 = vperm.xlu0 %7332, %v7857_v24   ;;  %445 = vmatprep.mubr.f32.mxu0 %v8319_v44  ;;  %v8359_v24 = vld [vmem:[%s12175_s1 + $0xb0] sm:$0xff] }
  0x7a   :  { %613 = vmatmul.mubr.f32.gmra.mxu1 %v8326_v15  ;;  %835 = vmatpush1.msra.mxu0 %v219_v45  ;;  %v2982_v45 = vld [vmem:[%s12177_s3 + $0x38] sm:$0xff] }
  0x7b   :  { %6830 = vmatprep.mubr.msk.f32.mxu1 %vm314_vm0, %v8335_v46  ;;  %836 = vmatprep.subr.mxu0 %v12193_v37 }
  0x7c   :  { %446 = vmatmul.mubr.f32.gmra.mxu0 %v8343_v47  ;;  %3008 = vperm.xlu1 %7327, %v2978_v50   ;;  %v8515_v50 = vld [vmem:[%s12175_s1 + $0x100] sm:$0xff] }
  0x7d   :  { %4055 = vperm.xlu0 %7332, %v7884_v32   ;;  %451 = vmatprep.mubr.f32.mxu0 %v8352_v51  ;;  %v8392_v32 = vld [vmem:[%s12175_s1 + $0xd0] sm:$0xff] }
  0x7e   :  { %619 = vmatmul.mubr.f32.gmra.mxu1 %v8359_v24  ;;  %837 = vmatpush1.msra.mxu0 %v216_v52  ;;  %v168_v52 = vld [vmem:[%s12174_s0 + $0x2b0] sm:$0xff] }
  0x7f   :  { %6831 = vmatprep.mubr.msk.f32.mxu1 %vm314_vm0, %v8369_v53  ;;  %838 = vmatprep.subr.mxu0 %v12193_v37 }
  0x80   :  { %452 = vmatmul.mubr.f32.gmra.mxu0 %v8376_v54  ;;  %6922 = vmatprep.subr.mxu1 %v177_v55  ;;  %v8525_v55 = vld [vmem:[%s12175_s1 + $0x158] sm:$0xff] }
  0x81   :  { %4063 = vperm.xlu0 %7332, %v7911_v40   ;;  %457 = vmatprep.mubr.f32.mxu0 %v8385_v57  ;;  %v8425_v40 = vld [vmem:[%s12175_s1 + $0xf0] sm:$0xff]  ;;  %12236 = vst [vmem:[#allocation11_spill] sm:$0xff] %v8525_v55 }
  0x82   :  { %625 = vmatmul.mubr.f32.gmra.mxu1 %v8392_v32  ;;  %839 = vmatpush1.msra.mxu0 %v213_v58  ;;  %v120_v58 = vld [vmem:[%s12174_s0 + $0x130] sm:$0xff] }
  0x83   :  { %6832 = vmatprep.mubr.msk.f32.mxu1 %vm314_vm0, %v8402_v60  ;;  %840 = vmatprep.subr.mxu0 %v12193_v37 }
  0x84   :  { %458 = vmatmul.mubr.f32.gmra.mxu0 %v8409_v61  ;;  %6923 = vmatpush3.msra.mxu1 %v129_v62  ;;  %v201_v62 = vld [vmem:[%s12174_s0 + $0x3b8] sm:$0xff] }
  0x85   :  { %4071 = vperm.xlu0 %7332, %v7938_v48   ;;  %463 = vmatprep.mubr.f32.mxu0 %v8418_v63  ;;  %v8461_v48 = vld [vmem:[%s12175_s1 + $0x110] sm:$0xff] }
  0x86   :  { %631 = vmatmul.mubr.f32.gmra.mxu1 %v8425_v40  ;;  %841 = vmatpush1.msra.mxu0 %v210_v0  ;;  %v8537_v0 = vld [vmem:[%s12175_s1 + $0x150] sm:$0xff] }
  0x87   :  { %6833 = vmatprep.mubr.msk.f32.mxu1 %vm314_vm0, %v8435_v4  ;;  %3018 = vperm.xlu1 %7327, %v2980_v5   ;;  %12237 = vst [vmem:[#allocation12_spill] sm:$0xff] %v8537_v0  ;;  %v165_v5 = vld [vmem:[%s12174_s0 + $0x298] sm:$0xff] }
  0x88   :  { %464 = vmatmul.mubr.f32.gmra.mxu0 %v8445_v7  ;;  %6924 = vmatprep.subr.mxu1 %v174_v11  ;;  %v8548_v11 = vld [vmem:[%s12175_s1 + $0x128] sm:$0xff] }
  0x89   :  { %4079 = vperm.xlu0 %7332, %v7965_v56   ;;  %469 = vmatprep.mubr.f32.mxu0 %v8454_v12  ;;  %v8492_v56 = vld [vmem:[%s12175_s1 + $0x130] sm:$0xff] }
  0x8a   :  { %637 = vmatmul.mubr.f32.gmra.mxu1 %v8461_v48  ;;  %842 = vmatprep.subr.mxu0 %v12193_v37  ;;  %12235 = vst [vmem:[#allocation10_spill] sm:$0xff] %v8492_v56 }
  0x8b   :  { %6834 = vmatprep.mubr.msk.f32.mxu1 %vm314_vm0, %v8467_v14  ;;  %6925 = vmatpush3.msra.mxu1 %v126_v17  ;;  %v117_v17 = vld [vmem:[%s12174_s0 + $0x118] sm:$0xff] }
  0x8c   :  { %470 = vmatmul.mubr.f32.gmra.mxu0 %v8477_v20  ;;  %6926 = vmatprep.subr.mxu1 %v171_v21  ;;  %v198_v21 = vld [vmem:[%s12174_s0 + $0x3a0] sm:$0xff] }
  0x8d   :  { %843 = vmatpush1.msra.mxu0 %v207_v22  ;;  %7335 = vset.pattern.permute.xlu0 %v12189_v34  ;;  %v2984_v22 = vld [vmem:[%s12177_s3 + $0x48] sm:$0xff]  ;;  %v186_v34 = vld [vmem:[%s12174_s0 + $0x340] sm:$0xff] }
  0x8e   :  { %643 = vmatmul.mubr.f32.gmra.mxu1 %v8492_v56  ;;  %844 = vmatprep.subr.mxu0 %v12193_v37  ;;  %v8875_v56 = vld [vmem:[%s12178_s4 + $0x38] sm:$0xff] }
  0x8f   :  { %4183 = vperm.xlu0 %7335, %v8001_v6   ;;  %475 = vmatprep.mubr.f32.mxu0 %v8498_v26 }
  0x90   :  { %6927 = vmatpush3.msra.mxu1 %v123_v39  ;;  %845 = vmatpush1.msra.mxu0 %v204_v42  ;;  %v8564_v39 = vld [vmem:[%s12175_s1 + $0x120] sm:$0xff] }
  0x91   :  { %3028 = vperm.xlu1 %7327, %v2982_v45   ;;  %476 = vmatmul.mubr.f32.gmra.mxu0 %v8515_v50  ;;  %v162_v42 = vld [vmem:[%s12174_s0 + $0x280] sm:$0xff]  ;;  %v8574_v45 = vld [vmem:[%s12175_s1 + $0x178] sm:$0xff] }
  0x92   :  { %6928 = vmatprep.subr.mxu1 %v168_v52  ;;  %846 = vmatprep.subr.mxu0 %v12193_v37  ;;  %12238 = vst [vmem:[#allocation13_spill] sm:$0xff] %v8574_v45  ;;  %v114_v52 = vld [vmem:[%s12174_s0 + $0x100] sm:$0xff] }
  0x93   :  { %6835 = vmatprep.mubr.msk.f32.mxu1 %vm314_vm0, %v8525_v55  ;;  %6929 = vmatpush3.msra.mxu1 %v120_v58  ;;  %v8586_v58 = vld [vmem:[%s12175_s1 + $0x170] sm:$0xff] }
  0x94   :  { %847 = vmatpush1.msra.mxu0 %v201_v62  ;;  %649 = vmatmul.mubr.f32.gmra.mxu1 %v8537_v0  ;;  %12239 = vst [vmem:[#allocation14_spill] sm:$0xff] %v8586_v58  ;;  %v159_v62 = vld [vmem:[%s12174_s0 + $0x268] sm:$0xff]  ;;  %v240_v0 = vld [vmem:[%s12174_s0 + $0x4f0] sm:$0xff] }
  0x95   :  { %6930 = vmatprep.subr.mxu1 %v165_v5  ;;  %848 = vmatprep.subr.mxu0 %v12193_v37  ;;  %v8597_v5 = vld [vmem:[%s12175_s1 + $0x148] sm:$0xff] }
  0x96   :  { %4195 = vperm.xlu0 %7335, %v8032_v18   ;;  %481 = vmatprep.mubr.f32.mxu0 %v8548_v11  ;;  %v195_v18 = vld [vmem:[%s12174_s0 + $0x388] sm:$0xff] }
  0x97   :  { %6931 = vmatpush3.msra.mxu1 %v117_v17  ;;  %849 = vmatpush1.msra.mxu0 %v198_v21  ;;  %v111_v17 = vld [vmem:[%s12174_s0 + $0xe8] sm:$0xff]  ;;  %v192_v21 = vld [vmem:[%s12174_s0 + $0x370] sm:$0xff] }
  0x98   :  { %3038 = vperm.xlu1 %7327, %v2984_v22   ;;  %482 = vmatmul.mubr.f32.gmra.mxu0 %v8564_v39  ;;  %v2986_v22 = vld [vmem:[%s12177_s3 + $0x58] sm:$0xff] }
  0x99   :  { %6932 = vmatprep.subr.mxu1 %v162_v42  ;;  %850 = vmatprep.subr.mxu0 %v12193_v37  ;;  %v8613_v42 = vld [vmem:[%s12175_s1 + $0x140] sm:$0xff] }
  0x9a   :  { %6836 = vmatprep.mubr.msk.f32.mxu1 %vm314_vm0, %v8574_v45  ;;  %6933 = vmatpush3.msra.mxu1 %v114_v52  ;;  %v156_v52 = vld [vmem:[%s12174_s0 + $0x250] sm:$0xff]  ;;  %v8791_v45 = vld [vmem:[%s12175_s1 + $0x1c8] sm:$0xff] }
  0x9b   :  { %851 = vmatpush1.msra.mxu0 %v195_v18  ;;  %655 = vmatmul.mubr.f32.gmra.mxu1 %v8586_v58  ;;  %v8623_v18 = vld [vmem:[%s12175_s1 + $0x198] sm:$0xff]  ;;  %v246_v58 = vld [vmem:[%s12174_s0 + $0x520] sm:$0xff] }
  0x9c   :  { %6934 = vmatprep.subr.mxu1 %v159_v62  ;;  %852 = vmatprep.subr.mxu0 %v12193_v37  ;;  %12240 = vst [vmem:[#allocation15_spill] sm:$0xff] %v8623_v18  ;;  %v108_v62 = vld [vmem:[%s12174_s0 + $0xd0] sm:$0xff] }
  0x9d   :  { %4203 = vperm.xlu0 %7335, %v8062_v28   ;;  %487 = vmatprep.mubr.f32.mxu0 %v8597_v5 }
  0x9e   :  { %6935 = vmatpush3.msra.mxu1 %v111_v17  ;;  %853 = vmatpush1.msra.mxu0 %v192_v21  ;;  %v8635_v17 = vld [vmem:[%s12175_s1 + $0x190] sm:$0xff]  ;;  %v153_v21 = vld [vmem:[%s12174_s0 + $0x238] sm:$0xff] }
  0x9f   :  { %3048 = vperm.xlu1 %7327, %v2986_v22   ;;  %488 = vmatmul.mubr.f32.gmra.mxu0 %v8613_v42  ;;  %12241 = vst [vmem:[#allocation16_spill] sm:$0xff] %v8635_v17  ;;  %v8646_v22 = vld [vmem:[%s12175_s1 + $0x168] sm:$0xff] }
  0xa0   :  { %6936 = vmatprep.subr.mxu1 %v156_v52  ;;  %854 = vmatprep.subr.mxu0 %v12193_v37  ;;  %v105_v52 = vld [vmem:[%s12174_s0 + $0xb8] sm:$0xff] }
  0xa1   :  { %6837 = vmatprep.mubr.msk.f32.mxu1 %vm314_vm0, %v8623_v18  ;;  %6937 = vmatpush3.msra.mxu1 %v108_v62  ;;  %v2988_v62 = vld [vmem:[%s12177_s3 + $0x68] sm:$0xff]  ;;  %v249_v18 = vld [vmem:[%s12174_s0 + $0x538] sm:$0xff] }
  0xa2   :  { %855 = vmatpush1.msra.mxu0 %v189_v2  ;;  %661 = vmatmul.mubr.f32.gmra.mxu1 %v8635_v17  ;;  %v8662_v2 = vld [vmem:[%s12175_s1 + $0x160] sm:$0xff]  ;;  %v12244_v17 = vmov 0.0  }
  0xa3   :  { %6938 = vmatprep.subr.mxu1 %v153_v21  ;;  %856 = vmatprep.subr.mxu0 %v12193_v37  ;;  %v8672_v21 = vld [vmem:[%s12175_s1 + $0x1b8] sm:$0xff] }
  0xa4   :  { %4211 = vperm.xlu0 %7335, %v8092_v38   ;;  %493 = vmatprep.mubr.f32.mxu0 %v8646_v22  ;;  %12242 = vst [vmem:[#allocation17_spill] sm:$0xff] %v8672_v21 }
  0xa5   :  { %6939 = vmatpush3.msra.mxu1 %v105_v52  ;;  %857 = vmatpush1.msra.mxu0 %v186_v34  ;;  %v8684_v34 = vld [vmem:[%s12175_s1 + $0x1b0] sm:$0xff]  ;;  %v147_v52 = vld [vmem:[%s12174_s0 + $0x208] sm:$0xff] }
  0xa6   :  { %3058 = vperm.xlu1 %7327, %v2988_v62   ;;  %494 = vmatmul.mubr.f32.gmra.mxu0 %v8662_v2  ;;  %12243 = vst [vmem:[#allocation18_spill] sm:$0xff] %v8684_v34  ;;  %v8695_v62 = vld [vmem:[%s12175_s1 + $0x188] sm:$0xff] }
  0xa7   :  { %6940 = vmatprep.subr.mxu1 %v150_v25  ;;  %858 = vmatprep.subr.mxu0 %v12193_v37  ;;  %v99_v25 = vld [vmem:[%s12174_s0 + $0x88] sm:$0xff]  ;;  %v180_v37 = vld [vmem:[%s12174_s0 + $0x310] sm:$0xff]  ;;  %v8834_v55 = vpop.permute.xlu0 %3699 }
  0xa8   :  { %6838 = vmatprep.mubr.msk.f32.mxu1 %vm314_vm0, %v8672_v21  ;;  %6941 = vmatpush3.msra.mxu1 %v102_v9  ;;  %v2990_v9 = vld [vmem:[%s12177_s3 + $0x78] sm:$0xff]  ;;  %v96_v21 = vld [vmem:[%s12174_s0 + $0x70] sm:$0xff]  ;;  %12249 = vst [vmem:[#allocation23_spill] sm:$0xff] %v8834_v55 }
  0xa9   :  { %859 = vmatpush1.msra.mxu0 %v183_v1  ;;  %667 = vmatmul.mubr.f32.gmra.mxu1 %v8684_v34  ;;  %v8711_v1 = vld [vmem:[%s12175_s1 + $0x180] sm:$0xff]  ;;  %v144_v34 = vld [vmem:[%s12174_s0 + $0x1f0] sm:$0xff] }
  0xaa   :  { %6942 = vmatprep.subr.mxu1 %v147_v52  ;;  %860 = vmatprep.subr.mxu0 %v12244_v17  ;;  %v8721_v52 = vld [vmem:[%s12175_s1 + $0x1d8] sm:$0xff] }
  0xab   :  { %4219 = vperm.xlu0 %7335, %v8122_v49   ;;  %499 = vmatprep.mubr.f32.mxu0 %v8695_v62  ;;  %12245 = vst [vmem:[#allocation19_spill] sm:$0xff] %v8721_v52  ;;  %v1006_v55 = vld [vmem:[#allocation3 + $0xf8] sm:$0xff] }
  0xac   :  { %6943 = vmatpush3.msra.mxu1 %v99_v25  ;;  %861 = vmatpush1.msra.mxu0 %v180_v37  ;;  %v8733_v37 = vld [vmem:[%s12175_s1 + $0x1d0] sm:$0xff]  ;;  %v141_v25 = vld [vmem:[%s12174_s0 + $0x1d8] sm:$0xff] }
  0xad   :  { %3068 = vperm.xlu1 %7327, %v2990_v9   ;;  %500 = vmatmul.mubr.f32.gmra.mxu0 %v8711_v1  ;;  %12246 = vst [vmem:[#allocation20_spill] sm:$0xff] %v8733_v37  ;;  %v8744_v9 = vld [vmem:[%s12175_s1 + $0x1a8] sm:$0xff] }
  0xae   :  { %6944 = vmatprep.subr.mxu1 %v144_v34  ;;  %878 = vmatprep.subr.mxu0 %v12244_v17  ;;  %v93_v34 = vld [vmem:[%s12174_s0 + $0x58] sm:$0xff] }
  0xaf   :  { %6839 = vmatprep.mubr.msk.f32.mxu1 %vm314_vm0, %v8721_v52  ;;  %6945 = vmatpush3.msra.mxu1 %v96_v21  ;;  %v8757_v21 = vld [vmem:[%s12175_s1 + $0x1a0] sm:$0xff]  ;;  %v243_v52 = vld [vmem:[%s12174_s0 + $0x508] sm:$0xff] }
  0xb0   :  { %879 = vmatpush2.msra.mxu0 %v249_v18  ;;  %673 = vmatmul.mubr.f32.gmra.mxu1 %v8733_v37  ;;  %v138_v18 = vld [vmem:[%s12174_s0 + $0x1c0] sm:$0xff] }
  0xb1   :  { %6946 = vmatprep.subr.mxu1 %v141_v25  ;;  %880 = vmatprep.subr.mxu0 %v12244_v17  ;;  %v8767_v25 = vld [vmem:[%s12175_s1 + $0x1f8] sm:$0xff]  ;;  %v90_v37 = vld [vmem:[%s12174_s0 + $0x40] sm:$0xff] }
  0xb2   :  { %4227 = vperm.xlu0 %7335, %v8152_v59   ;;  %505 = vmatprep.mubr.f32.mxu0 %v8744_v9  ;;  %12247 = vst [vmem:[#allocation21_spill] sm:$0xff] %v8767_v25 }
  0xb3   :  { %6947 = vmatpush3.msra.mxu1 %v93_v34  ;;  %881 = vmatpush2.msra.mxu0 %v246_v58  ;;  %v8780_v58 = vld [vmem:[%s12175_s1 + $0x1f0] sm:$0xff]  ;;  %v135_v34 = vld [vmem:[%s12174_s0 + $0x1a8] sm:$0xff] }
  0xb4   :  { %3593 = vperm.xlu1 %7327, %v8001_v6   ;;  %506 = vmatmul.mubr.f32.gmra.mxu0 %v8757_v21  ;;  %12248 = vst [vmem:[#allocation22_spill] sm:$0xff] %v8780_v58 }
  0xb5   :  { %6948 = vmatprep.subr.mxu1 %v138_v18  ;;  %882 = vmatprep.subr.mxu0 %v12244_v17  ;;  %v87_v18 = vld [vmem:[%s12174_s0 + $0x28] sm:$0xff] }
  0xb6   :  { %6840 = vmatprep.mubr.msk.f32.mxu1 %vm314_vm0, %v8767_v25  ;;  %6949 = vmatpush3.msra.mxu1 %v90_v37  ;;  %v8804_v37 = vld [vmem:[%s12175_s1 + $0x1c0] sm:$0xff]  ;;  %v237_v25 = vld [vmem:[%s12174_s0 + $0x4d8] sm:$0xff] }
  0xb7   :  { %883 = vmatpush2.msra.mxu0 %v243_v52  ;;  %679 = vmatmul.mubr.f32.gmra.mxu1 %v8780_v58  ;;  %v132_v52 = vld [vmem:[%s12174_s0 + $0x190] sm:$0xff]  ;;  %v8817_v58 = vld [vmem:[%s12178_s4 + $0x18] sm:$0xff] }
  0xb8   :  { %6950 = vmatprep.subr.mxu1 %v135_v34  ;;  %884 = vmatprep.subr.mxu0 %v12244_v17  ;;  %v84_v34 = vld [vmem:[%s12174_s0 + $0x10] sm:$0xff] }
  0xb9   :  { %4235 = vperm.xlu0 %7335, %v8182_v10   ;;  %511 = vmatprep.mubr.f32.mxu0 %v8791_v45 }
  0xba   :  { %6951 = vmatpush3.msra.mxu1 %v87_v18  ;;  %885 = vmatpush2.msra.mxu0 %v240_v0  ;;  %v8829_v0 = vld [vmem:[%s12175_s1 + $0x1e8] sm:$0xff]  ;;  %v234_v18 = vld [vmem:[%s12174_s0 + $0x4c0] sm:$0xff] }
  0xbb   :  { %3603 = vperm.xlu1 %7327, %v8817_v58   ;;  %512 = vmatmul.mubr.f32.gmra.mxu0 %v8804_v37 }
  0xbc   :  { %6952 = vmatprep.subr.mxu1 %v132_v52  ;;  %886 = vmatprep.subr.mxu0 %v12244_v17  ;;  %v12207_v52 = vmov 5  }
  0xbd   :  { %6953 = vmatpush3.msra.mxu1 %v84_v34  ;;  %749 = vmatprep.mubr.f32.mxu1 %v8238_v27  ;;  %v8842_v27 = vld [vmem:[%s12175_s1 + $0x1e0] sm:$0xff]  ;;  %v231_v34 = vld [vmem:[%s12174_s0 + $0x4a8] sm:$0xff]  ;;  %s7689_s1 = smov 124  }
  0xbe   :  { %887 = vmatpush2.msra.mxu0 %v237_v25  ;;  %750 = vmatmul.mubr.f32.vlgmr.msra.gmra.mxu1 %v8244_v29  ;;  %v8851_v29 = vld [vmem:[%s12178_s4] sm:$0xff]  ;;  %v8857_v25 = vld [vmem:[%s12178_s4 + $0x28] sm:$0xff] }
  0xbf   :  { %888 = vmatprep.subr.mxu0 %v12244_v17  ;;  %7336 = vset.pattern.permute.xlu0 %v12207_v52  ;;  %v8866_v52 = vpop.permute.xlu0 %3711 }
  0xc0   :  { %517 = vmatprep.mubr.f32.mxu0 %v8829_v0  ;;  %889 = vmatpush2.msra.mxu0 %v234_v18  ;;  %v228_v18 = vld [vmem:[%s12174_s0 + $0x490] sm:$0xff]  ;;  %12250 = vst [vmem:[#allocation24_spill] sm:$0xff] %v8866_v52  ;;  %s7693_s0 = smov 120  }
  0xc1   :  { %4339 = vperm.xlu0 %7336, %v8851_v29   ;;  %3613 = vperm.xlu1 %7327, %v8857_v25  }
  0xc2   :  { %518 = vmatmul.mubr.f32.gmra.mxu0 %v8842_v27  ;;  %890 = vmatprep.subr.mxu0 %v12244_v17 }
  0xc3   :  { %891 = vmatpush2.msra.mxu0 %v231_v34  ;;  %754 = vmatprep.mubr.f32.mxu1 %v8255_v31  ;;  %v1005_v31 = vld [vmem:[#allocation3 + $0xf0] sm:$0xff]  ;;  %v1004_v34 = vld [vmem:[#allocation3 + $0xe8] sm:$0xff] }
  0xc4   :  { %892 = vmatprep.subr.mxu0 %v12244_v17  ;;  %6841 = vmatprep.mubr.msk.f32.mxu0 %vm314_vm0, %v8193_v13  ;;  %v8884_v13 = vpop.permute.xlu0 %3719 }
  0xc5   :  { %893 = vmatpush2.msra.mxu0 %v228_v18  ;;  %4351 = vperm.xlu0 %7336, %v8817_v58   ;;  %12251 = vst [vmem:[#allocation25_spill] sm:$0xff] %v8884_v13  ;;  %v8889_v18 = vld [vmem:[%s12178_s4 + $0x48] sm:$0xff] }
  0xc6   :  { %3623 = vperm.xlu1 %7327, %v8875_v56   ;;  %755 = vmatmul.mubr.f32.gmra.mxu1 %v8279_v35  ;;  %v8901_v35 = vld [vmem:[%s12178_s4 + $0x58] sm:$0xff] }
  0xc7   :  { %895 = vmatmul.mubr.f32.vlgmr.msra.gmra.mxu0 %v8201_v16  ;;  %759 = vmatprep.mubr.f32.mxu1 %v8285_v36  ;;  %v1003_v16 = vld [vmem:[#allocation3 + $0xe0] sm:$0xff] }
  0xc8   :  { %6842 = vmatprep.mubr.msk.f32.mxu0 %vm314_vm0, %v8210_v19  ;;  %1743 = vmatprep.subr.mxu1 %v1006_v55  ;;  %v1002_v19 = vld [vmem:[#allocation3 + $0xd8] sm:$0xff]  ;;  %v8905_v36 = vpop.permute.xlu0 %3727  ;;  %v993_v55 = vld [vmem:[#allocation3 + $0x90] sm:$0xff] }
  0xc9   :  { %4359 = vperm.xlu0 %7336, %v8857_v25   ;;  %1744 = vmatpush1.msra.mxu1 %v1005_v31  ;;  %12252 = vst [vmem:[#allocation26_spill] sm:$0xff] %v8905_v36 }
  0xca   :  { %3633 = vperm.xlu1 %7327, %v8889_v18   ;;  %760 = vmatmul.mubr.f32.gmra.mxu1 %v8313_v43  ;;  %v8915_v43 = vld [vmem:[%s12178_s4 + $0x68] sm:$0xff] }
  0xcb   :  { %900 = vmatmul.mubr.f32.gmra.mxu0 %v8229_v23  ;;  %764 = vmatprep.mubr.f32.mxu1 %v8319_v44  ;;  %v1001_v23 = vld [vmem:[#allocation3 + $0xd0] sm:$0xff] }
  0xcc   :  { %6843 = vmatprep.mubr.msk.f32.mxu0 %vm314_vm0, %v8249_v30  ;;  %1745 = vmatprep.subr.mxu1 %v1004_v34  ;;  %v1000_v30 = vld [vmem:[#allocation3 + $0xc8] sm:$0xff]  ;;  %v8924_v44 = vpop.permute.xlu0 %3735  ;;  %v990_v34 = vld [vmem:[#allocation3 + $0x78] sm:$0xff] }
  0xcd   :  { %4367 = vperm.xlu0 %7336, %v8875_v56   ;;  %1746 = vmatpush1.msra.mxu1 %v1003_v16  ;;  %12253 = vst [vmem:[#allocation27_spill] sm:$0xff] %v8924_v44  ;;  %v989_v16 = vld [vmem:[#allocation3 + $0x70] sm:$0xff]  ;;  %v1075_v44 = vld [vmem:[#allocation3 + $0x320] sm:$0xff] }
  0xce   :  { %3643 = vperm.xlu1 %7327, %v8901_v35   ;;  %765 = vmatmul.mubr.f32.gmra.mxu1 %v8343_v47  ;;  %v997_v47 = vld [vmem:[#allocation3 + $0xb0] sm:$0xff] }
  0xcf   :  { %905 = vmatmul.mubr.f32.gmra.mxu0 %v8261_v3  ;;  %769 = vmatprep.mubr.f32.mxu1 %v8352_v51  ;;  %v999_v3 = vld [vmem:[#allocation3 + $0xc0] sm:$0xff]  ;;  %v8929_v51 = vld [vmem:[%s12178_s4 + $0x78] sm:$0xff] }
  0xd0   :  { %6844 = vmatprep.mubr.msk.f32.mxu0 %vm314_vm0, %v8269_v33  ;;  %1747 = vmatprep.subr.mxu1 %v1002_v19  ;;  %v998_v33 = vld [vmem:[#allocation3 + $0xb8] sm:$0xff]  ;;  %v8938_v31 = vpop.permute.xlu0 %3743  ;;  %v12215_v19 = vmov 6  }
  0xd1   :  { %4375 = vperm.xlu0 %7336, %v8889_v18   ;;  %1748 = vmatpush1.msra.mxu1 %v1001_v23  ;;  %12255 = vst [vmem:[#allocation28_spill] sm:$0xff] %v8938_v31  ;;  %v986_v23 = vld [vmem:[#allocation3 + $0x58] sm:$0xff] }
  0xd2   :  { %3653 = vperm.xlu1 %7327, %v8915_v43   ;;  %770 = vmatmul.mubr.f32.gmra.mxu1 %v8376_v54  ;;  %v994_v54 = vld [vmem:[#allocation3 + $0x98] sm:$0xff] }
  0xd3   :  { %910 = vmatmul.mubr.f32.gmra.mxu0 %v8293_v8  ;;  %774 = vmatprep.mubr.f32.mxu1 %v8385_v57  ;;  %v996_v8 = vld [vmem:[#allocation3 + $0xa8] sm:$0xff]  ;;  %v12254_v57 = vmov 1  }
  0xd4   :  { %6845 = vmatprep.mubr.msk.f32.mxu0 %vm314_vm0, %v8302_v41  ;;  %1749 = vmatprep.subr.mxu1 %v1000_v30  ;;  %v995_v41 = vld [vmem:[#allocation3 + $0xa0] sm:$0xff] }
  0xd5   :  { %4383 = vperm.xlu0 %7336, %v8901_v35   ;;  %1750 = vmatpush1.msra.mxu1 %v999_v3  ;;  %v8958_v30 = vld [vmem:[%s12178_s4 + $0x8] sm:$0xff] }
  0xd6   :  { %3663 = vperm.xlu1 %7327, %v8929_v51   ;;  %775 = vmatmul.mubr.f32.gmra.mxu1 %v8409_v61  ;;  %v991_v61 = vld [vmem:[#allocation3 + $0x80] sm:$0xff]  ;;  %v984_v3 = vld [vmem:[#allocation3 + $0x48] sm:$0xff] }
  0xd7   :  { %915 = vmatmul.mubr.f32.gmra.mxu0 %v8326_v15  ;;  %1751 = vmatprep.subr.mxu1 %v998_v33  ;;  %v992_v15 = vld [vmem:[#allocation3 + $0x88] sm:$0xff]  ;;  %v983_v33 = vld [vmem:[#allocation3 + $0x40] sm:$0xff] }
  0xd8   :  { %6846 = vmatprep.mubr.msk.f32.mxu0 %vm314_vm0, %v8335_v46  ;;  %1752 = vmatpush1.msra.mxu1 %v997_v47  ;;  %v8945_v46 = vld [vmem:[%s12178_s4 + $0x10] sm:$0xff]  ;;  %v982_v47 = vld [vmem:[#allocation3 + $0x38] sm:$0xff] }
  0xd9   :  { %4391 = vperm.xlu0 %7336, %v8915_v43   ;;  %1753 = vmatprep.subr.mxu1 %v996_v8  ;;  %v981_v8 = vld [vmem:[#allocation3 + $0x30] sm:$0xff] }
  0xda   :  { %7329 = vset.pattern.permute.xlu1 %v12254_v57  ;;  %1754 = vmatpush1.msra.mxu1 %v995_v41  ;;  %v979_v57 = vld [vmem:[#allocation3 + $0x20] sm:$0xff] }
  0xdb   :  { %920 = vmatmul.mubr.f32.gmra.mxu0 %v8359_v24  ;;  %3703 = vperm.xlu1 %7329, %v8001_v6   ;;  %v988_v6 = vld [vmem:[#allocation3 + $0x68] sm:$0xff]  ;;  %v987_v24 = vld [vmem:[#allocation3 + $0x60] sm:$0xff] }
  0xdc   :  { %1755 = vmatprep.subr.mxu1 %v994_v54  ;;  %779 = vmatprep.mubr.f32.mxu1 %v8418_v63  ;;  %v8953_v63 = vpop.permute.xlu0 %3751  ;;  %v980_v54 = vld [vmem:[#allocation3 + $0x28] sm:$0xff] }
  0xdd   :  { %4399 = vperm.xlu0 %7336, %v8929_v51   ;;  %1756 = vmatpush1.msra.mxu1 %v993_v55  ;;  %12256 = vst [vmem:[#allocation29_spill] sm:$0xff] %v8953_v63  ;;  %v977_v55 = vld [vmem:[#allocation3 + $0x10] sm:$0xff]  ;;  %v1039_v63 = vld [vmem:[#allocation3 + $0x200] sm:$0xff] }
  0xde   :  { %1757 = vmatprep.subr.mxu1 %v992_v15  ;;  %780 = vmatmul.mubr.f32.gmra.mxu1 %v8445_v7  ;;  %v985_v7 = vld [vmem:[#allocation3 + $0x50] sm:$0xff]  ;;  %v975_v15 = vld [vmem:[#allocation3] sm:$0xff] }
  0xdf   :  { %3707 = vperm.xlu1 %7329, %v8945_v46   ;;  %1758 = vmatpush1.msra.mxu1 %v991_v61  ;;  %v8989_v61 = vld [vmem:[%s12178_s4 + $0x40] sm:$0xff] }
  0xe0   :  { %1759 = vmatprep.subr.mxu1 %v990_v34  ;;  %784 = vmatprep.mubr.f32.mxu1 %v8454_v12  ;;  %v8964_v12 = vld [vmem:[%s12178_s4 + $0x20] sm:$0xff]  ;;  %v8970_v41 = vpop.permute.xlu0 %3759  ;;  %v1036_v34 = vld [vmem:[#allocation3 + $0x1e8] sm:$0xff] }
  0xe1   :  { %7339 = vset.pattern.permute.xlu0 %v12215_v19  ;;  %1760 = vmatpush1.msra.mxu1 %v989_v16  ;;  %12257 = vst [vmem:[#allocation30_spill] sm:$0xff] %v8970_v41  ;;  %v1034_v16 = vld [vmem:[#allocation3 + $0x1d8] sm:$0xff] }
  0xe2   :  { %4503 = vperm.xlu0 %7339, %v8958_v30   ;;  %1761 = vmatprep.subr.mxu1 %v988_v6 }
  0xe3   :  { %3715 = vperm.xlu1 %7329, %v8964_v12   ;;  %1762 = vmatpush1.msra.mxu1 %v987_v24  ;;  %v1032_v24 = vld [vmem:[#allocation3 + $0x1c8] sm:$0xff] }
  0xe4   :  { %1763 = vmatprep.subr.mxu1 %v986_v23  ;;  %785 = vmatmul.mubr.f32.gmra.mxu1 %v8477_v20  ;;  %v978_v20 = vld [vmem:[#allocation3 + $0x18] sm:$0xff]  ;;  %v1031_v23 = vld [vmem:[#allocation3 + $0x1c0] sm:$0xff] }
  0xe5   :  { %1764 = vmatpush1.msra.mxu1 %v985_v7  ;;  %789 = vmatprep.mubr.f32.mxu1 %v8498_v26  ;;  %v8978_v26 = vld [vmem:[%s12178_s4 + $0x30] sm:$0xff]  ;;  %v1027_v7 = vld [vmem:[#allocation3 + $0x1a0] sm:$0xff] }
  0xe6   :  { %4515 = vperm.xlu0 %7339, %v8964_v12   ;;  %1765 = vmatprep.subr.mxu1 %v984_v3 }
  0xe7   :  { %3723 = vperm.xlu1 %7329, %v8062_v28   ;;  %1766 = vmatpush1.msra.mxu1 %v983_v33  ;;  %v976_v28 = vld [vmem:[#allocation3 + $0x8] sm:$0xff] }
  0xe8   :  { %1767 = vmatprep.subr.mxu1 %v982_v47  ;;  %790 = vmatmul.mubr.f32.gmra.mxu1 %v8515_v50  ;;  %v8983_v50 = vpop.permute.xlu0 %3863  ;;  %v1024_v33 = vld [vmem:[#allocation3 + $0x188] sm:$0xff]  ;;  %v1023_v47 = vld [vmem:[#allocation3 + $0x180] sm:$0xff] }
  0xe9   :  { %1768 = vmatpush1.msra.mxu1 %v981_v8  ;;  %794 = vmatprep.mubr.f32.mxu1 %v8548_v11  ;;  %12258 = vst [vmem:[#allocation31_spill] sm:$0xff] %v8983_v50  ;;  %v1038_v11 = vld [vmem:[#allocation3 + $0x1f8] sm:$0xff]  ;;  %v12213_v8 = vmov 7   ;;  %v1253_v50 = vld [vmem:[#allocation3 + $0x8b0] sm:$0xff] }
  0xea   :  { %4523 = vperm.xlu0 %7339, %v8978_v26   ;;  %1769 = vmatprep.subr.mxu1 %v980_v54 }
  0xeb   :  { %3731 = vperm.xlu1 %7329, %v8092_v38   ;;  %1770 = vmatpush1.msra.mxu1 %v979_v57  ;;  %v1037_v38 = vld [vmem:[#allocation3 + $0x1f0] sm:$0xff]  ;;  %v1020_v57 = vld [vmem:[#allocation3 + $0x168] sm:$0xff] }
  0xec   :  { %1771 = vmatprep.subr.mxu1 %v978_v20  ;;  %795 = vmatmul.mubr.f32.gmra.mxu1 %v8564_v39  ;;  %v1035_v39 = vld [vmem:[#allocation3 + $0x1e0] sm:$0xff]  ;;  %v8996_v6 = vpop.permute.xlu0 %3875 }
  0xed   :  { %1772 = vmatpush1.msra.mxu1 %v977_v55  ;;  %799 = vmatprep.mubr.f32.mxu1 %v8597_v5  ;;  %v1033_v5 = vld [vmem:[#allocation3 + $0x1d0] sm:$0xff]  ;;  %12259 = vst [vmem:[#allocation32_spill] sm:$0xff] %v8996_v6  ;;  %v1019_v20 = vld [vmem:[#allocation3 + $0x160] sm:$0xff]  ;;  %v1018_v55 = vld [vmem:[#allocation3 + $0x158] sm:$0xff] }
  0xee   :  { %4531 = vperm.xlu0 %7339, %v8989_v61   ;;  %1773 = vmatprep.subr.mxu1 %v976_v28  ;;  %v1016_v28 = vld [vmem:[#allocation3 + $0x148] sm:$0xff] }
  0xef   :  { %3739 = vperm.xlu1 %7329, %v8122_v49   ;;  %1774 = vmatpush1.msra.mxu1 %v975_v15  ;;  %v1015_v15 = vld [vmem:[#allocation3 + $0x140] sm:$0xff] }
  0xf0   :  { %1775 = vmatprep.subr.mxu1 %v1038_v11  ;;  %800 = vmatmul.mubr.f32.gmra.mxu1 %v8613_v42  ;;  %v1030_v42 = vld [vmem:[#allocation3 + $0x1b8] sm:$0xff]  ;;  %v9004_v3 = vpop.permute.xlu0 %3883 }
  0xf1   :  { %1776 = vmatpush2.msra.mxu1 %v1037_v38  ;;  %804 = vmatprep.mubr.f32.mxu1 %v8646_v22  ;;  %v1028_v22 = vld [vmem:[#allocation3 + $0x1a8] sm:$0xff]  ;;  %12260 = vst [vmem:[#allocation33_spill] sm:$0xff] %v9004_v3 }
  0xf2   :  { %4539 = vperm.xlu0 %7339, %v8122_v49   ;;  %1777 = vmatprep.subr.mxu1 %v1036_v34  ;;  %v1029_v49 = vld [vmem:[#allocation3 + $0x1b0] sm:$0xff]  ;;  %v9016_v54 = vpop.permute.xlu1 %3003  ;;  %v1012_v34 = vld [vmem:[#allocation3 + $0x128] sm:$0xff] }
  0xf3   :  { %3747 = vperm.xlu1 %7329, %v8152_v59   ;;  %1778 = vmatpush2.msra.mxu1 %v1035_v39  ;;  %v1011_v39 = vld [vmem:[#allocation3 + $0x120] sm:$0xff] }
  0xf4   :  { %1779 = vmatprep.subr.mxu1 %v1034_v16  ;;  %805 = vmatmul.mubr.f32.gmra.mxu1 %v8662_v2  ;;  %v1026_v2 = vld [vmem:[#allocation3 + $0x198] sm:$0xff] }
  0xf5   :  { %1780 = vmatpush2.msra.mxu1 %v1033_v5  ;;  %809 = vmatprep.mubr.f32.mxu1 %v8695_v62  ;;  %v12261_v62 = vmov 2   ;;  %v1009_v5 = vld [vmem:[#allocation3 + $0x110] sm:$0xff] }
  0xf6   :  { %4547 = vperm.xlu0 %7339, %v8152_v59   ;;  %1781 = vmatprep.subr.mxu1 %v1032_v24  ;;  %v1025_v59 = vld [vmem:[#allocation3 + $0x190] sm:$0xff] }
  0xf7   :  { %3755 = vperm.xlu1 %7329, %v8182_v10   ;;  %1782 = vmatpush2.msra.mxu1 %v1031_v23  ;;  %v9025_v38 = vpop.permute.xlu1 %3008 }
  0xf8   :  { %1783 = vmatprep.subr.mxu1 %v1030_v42  ;;  %810 = vmatmul.mubr.f32.gmra.mxu1 %v8711_v1  ;;  %v1022_v1 = vld [vmem:[#allocation3 + $0x178] sm:$0xff]  ;;  %v12269_v42 = vld [vmem:[#allocation11_spill] sm:$0xff] }
  0xf9   :  { %1784 = vmatpush2.msra.mxu1 %v1029_v49  ;;  %814 = vmatprep.mubr.f32.mxu1 %v8744_v9  ;;  %v9013_v9 = vpop.permute.xlu0 %3891  ;;  %v1068_v49 = vld [vmem:[#allocation3 + $0x2e8] sm:$0xff] }
  0xfa   :  { %4555 = vperm.xlu0 %7339, %v8182_v10   ;;  %1785 = vmatprep.subr.mxu1 %v1028_v22  ;;  %v1021_v10 = vld [vmem:[#allocation3 + $0x170] sm:$0xff]  ;;  %12262 = vst [vmem:[#allocation34_spill] sm:$0xff] %v9013_v9  ;;  %v12270_v22 = vld [vmem:[#allocation12_spill] sm:$0xff] }
  0xfb   :  { %7330 = vset.pattern.permute.xlu1 %v12261_v62  ;;  %1786 = vmatpush2.msra.mxu1 %v1027_v7  ;;  %v1067_v7 = vld [vmem:[#allocation3 + $0x2e0] sm:$0xff]  ;;  %v1073_v9 = vld [vmem:[#allocation3 + $0x310] sm:$0xff] }
  0xfc   :  { %3859 = vperm.xlu1 %7330, %v8851_v29   ;;  %1787 = vmatprep.subr.mxu1 %v1026_v2  ;;  %v12211_v2 = vmov 8   ;;  %v12273_v62 = vld [vmem:[#allocation13_spill] sm:$0xff] }
  0xfd   :  { %1788 = vmatpush2.msra.mxu1 %v1025_v59  ;;  %6847 = vmatprep.mubr.msk.f32.mxu0 %vm314_vm0, %v8369_v53  ;;  %v1017_v53 = vld [vmem:[#allocation3 + $0x150] sm:$0xff]  ;;  %v9023_v11 = vpop.permute.xlu0 %3899 }
  0xfe   :  { %7340 = vset.pattern.permute.xlu0 %v12213_v8  ;;  %1789 = vmatprep.subr.mxu1 %v1024_v33  ;;  %12263 = vst [vmem:[#allocation35_spill] sm:$0xff] %v9023_v11  ;;  %v1066_v33 = vld [vmem:[#allocation3 + $0x2d8] sm:$0xff] }
  0xff   :  { %4659 = vperm.xlu0 %7340, %v8851_v29   ;;  %1790 = vmatpush2.msra.mxu1 %v1023_v47  ;;  %v1065_v47 = vld [vmem:[#allocation3 + $0x2d0] sm:$0xff] }
 0x100   :  { %3867 = vperm.xlu1 %7330, %v8945_v46   ;;  %1791 = vmatprep.subr.mxu1 %v1022_v1  ;;  %v12274_v1 = vld [vmem:[#allocation14_spill] sm:$0xff] }
 0x101   :  { %1792 = vmatpush2.msra.mxu1 %v1021_v10  ;;  %925 = vmatmul.mubr.f32.gmra.mxu0 %v8392_v32  ;;  %v1014_v32 = vld [vmem:[#allocation3 + $0x138] sm:$0xff]  ;;  %v9035_v16 = vpop.permute.xlu0 %3907  ;;  %v1064_v10 = vld [vmem:[#allocation3 + $0x2c8] sm:$0xff] }
 0x102   :  { %1793 = vmatprep.subr.mxu1 %v1020_v57  ;;  %815 = vmatmul.mubr.f32.gmra.mxu1 %v8757_v21  ;;  %v1013_v21 = vld [vmem:[#allocation3 + $0x130] sm:$0xff]  ;;  %12264 = vst [vmem:[#allocation36_spill] sm:$0xff] %v9035_v16  ;;  %v1083_v16 = vld [vmem:[#allocation3 + $0x360] sm:$0xff] }
 0x103   :  { %4671 = vperm.xlu0 %7340, %v8817_v58   ;;  %1794 = vmatpush2.msra.mxu1 %v1019_v20  ;;  %v12275_v57 = vld [vmem:[#allocation15_spill] sm:$0xff]  ;;  %v1063_v20 = vld [vmem:[#allocation3 + $0x2c0] sm:$0xff] }
 0x104   :  { %3871 = vperm.xlu1 %7330, %v8817_v58   ;;  %1795 = vmatprep.subr.mxu1 %v1018_v55  ;;  %v1062_v55 = vld [vmem:[#allocation3 + $0x2b8] sm:$0xff] }
 0x105   :  { %1796 = vmatpush2.msra.mxu1 %v1017_v53  ;;  %819 = vmatprep.mubr.f32.mxu1 %v8791_v45  ;;  %v1010_v45 = vld [vmem:[#allocation3 + $0x118] sm:$0xff]  ;;  %v9047_v24 = vpop.permute.xlu0 %3915 }
 0x106   :  { %1797 = vmatprep.subr.mxu1 %v1016_v28  ;;  %6848 = vmatprep.mubr.msk.f32.mxu0 %vm314_vm0, %v8402_v60  ;;  %v9038_v60 = vpop.permute.xlu1 %3018  ;;  %12266 = vst [vmem:[#allocation38_spill] sm:$0xff] %v9047_v24  ;;  %v1088_v24 = vld [vmem:[#allocation3 + $0x388] sm:$0xff] }
 0x107   :  { %4679 = vperm.xlu0 %7340, %v8857_v25   ;;  %1798 = vmatpush2.msra.mxu1 %v1015_v15  ;;  %12265 = vst [vmem:[#allocation37_spill] sm:$0xff] %v9038_v60  ;;  %v1061_v15 = vld [vmem:[#allocation3 + $0x2b0] sm:$0xff] }
 0x108   :  { %3879 = vperm.xlu1 %7330, %v8857_v25   ;;  %1799 = vmatprep.subr.mxu1 %v1014_v32  ;;  %v12278_v32 = vld [vmem:[#allocation16_spill] sm:$0xff] }
 0x109   :  { %820 = vmatmul.mubr.f32.gmra.mxu1 %v8804_v37  ;;  %930 = vmatmul.mubr.f32.gmra.mxu0 %v8425_v40  ;;  %v1008_v40 = vld [vmem:[#allocation3 + $0x108] sm:$0xff]  ;;  %v1007_v37 = vld [vmem:[#allocation3 + $0x100] sm:$0xff] }
 0x10a   :  { %1800 = vmatpush2.msra.mxu1 %v1013_v21  ;;  %824 = vmatprep.mubr.f32.mxu1 %v8829_v0  ;;  %v1102_v0 = vld [vmem:[#allocation3 + $0x3f8] sm:$0xff]  ;;  %v1060_v21 = vld [vmem:[#allocation3 + $0x2a8] sm:$0xff] }
 0x10b   :  { %4719 = vperm.xlu0 %7340, %v8929_v51   ;;  %1801 = vmatprep.subr.mxu1 %v1012_v34  ;;  %v9081_v34 = vld [vmem:[%s12178_s4 + $0x50] sm:$0xff] }
 0x10c   :  { %3887 = vperm.xlu1 %7330, %v8875_v56   ;;  %1802 = vmatpush2.msra.mxu1 %v1011_v39  ;;  %v9049_v23 = vpop.permute.xlu1 %3028  ;;  %v12279_v39 = vmov 3  }
 0x10d   :  { %6849 = vmatprep.mubr.msk.f32.mxu0 %vm314_vm0, %v8435_v4  ;;  %1803 = vmatprep.subr.mxu1 %v1010_v45  ;;  %12267 = vst [vmem:[#allocation39_spill] sm:$0xff] %v9049_v23  ;;  %v1070_v4 = vld [vmem:[#allocation3 + $0x2f8] sm:$0xff]  ;;  %v1059_v45 = vld [vmem:[#allocation3 + $0x2a0] sm:$0xff] }
 0x10e   :  { %825 = vmatmul.mubr.f32.gmra.mxu1 %v8842_v27  ;;  %935 = vmatmul.mubr.f32.gmra.mxu0 %v8461_v48  ;;  %v12268_v27 = vld [vmem:[#allocation10_spill] sm:$0xff]  ;;  %v1069_v48 = vld [vmem:[#allocation3 + $0x2f0] sm:$0xff] }
 0x10f   :  { %4703 = vperm.xlu0 %7340, %v8901_v35   ;;  %1804 = vmatpush2.msra.mxu1 %v1009_v5  ;;  %v12280_v5 = vld [vmem:[#allocation17_spill] sm:$0xff] }
 0x110   :  { %3895 = vperm.xlu1 %7330, %v8889_v18   ;;  %1805 = vmatprep.subr.mxu1 %v1008_v40  ;;  %v1058_v40 = vld [vmem:[#allocation3 + $0x298] sm:$0xff] }
 0x111   :  { %1806 = vmatpush2.msra.mxu1 %v1007_v37  ;;  %6850 = vmatprep.mubr.msk.f32.mxu0 %vm314_vm0, %v8467_v14  ;;  %v9059_v14 = vpop.permute.xlu0 %4019 }
 0x112   :  { %1897 = vmatprep.subr.mxu1 %v1102_v0  ;;  %940 = vmatmul.mubr.f32.gmra.mxu0 %v12268_v27  ;;  %12271 = vst [vmem:[#allocation10_spill] sm:$0xff] %v9059_v14  ;;  %v12283_v27 = vld [vmem:[#allocation18_spill] sm:$0xff] }
 0x113   :  { %4691 = vperm.xlu0 %7340, %v8989_v61   ;;  %6851 = vmatprep.mubr.msk.f32.mxu0 %vm314_vm0, %v12269_v42  ;;  %v9062_v59 = vpop.permute.xlu1 %3038  ;;  %v1055_v42 = vld [vmem:[#allocation3 + $0x280] sm:$0xff] }
 0x114   :  { %3903 = vperm.xlu1 %7330, %v8901_v35   ;;  %1820 = vmatprep.subr.mxu0 %v1070_v4  ;;  %12272 = vst [vmem:[#allocation11_spill] sm:$0xff] %v9062_v59  ;;  %v1057_v4 = vld [vmem:[#allocation3 + $0x290] sm:$0xff] }
 0x115   :  { %1821 = vmatpush1.msra.mxu0 %v1069_v48  ;;  %v9073_v53 = vpop.permute.xlu0 %4031  ;;  %v1056_v48 = vld [vmem:[#allocation3 + $0x288] sm:$0xff] }
 0x116   :  { %945 = vmatmul.mubr.f32.gmra.mxu0 %v12270_v22  ;;  %1822 = vmatprep.subr.mxu0 %v1068_v49  ;;  %12276 = vst [vmem:[#allocation12_spill] sm:$0xff] %v9073_v53  ;;  %v12284_v49 = vld [vmem:[#allocation19_spill] sm:$0xff]  ;;  %v1054_v22 = vld [vmem:[#allocation3 + $0x278] sm:$0xff]  ;;  %v1120_v53 = vld [vmem:[#allocation3 + $0x488] sm:$0xff] }
 0x117   :  { %7358 = vset.pattern.permute.xlu0 %v12211_v2  ;;  %6852 = vmatprep.mubr.msk.f32.mxu0 %vm314_vm0, %v12273_v62 }
 0x118   :  { %4879 = vperm.xlu0 %7358, %v8929_v51   ;;  %3911 = vperm.xlu1 %7330, %v8915_v43  }
 0x119   :  { %1823 = vmatpush1.msra.mxu0 %v1067_v7  ;;  %v9088_v37 = vpop.permute.xlu0 %4039  ;;  %v1053_v7 = vld [vmem:[#allocation3 + $0x270] sm:$0xff] }
 0x11a   :  { %950 = vmatmul.mubr.f32.gmra.mxu0 %v12274_v1  ;;  %1824 = vmatprep.subr.mxu0 %v1066_v33  ;;  %v9075_v28 = vpop.permute.xlu1 %3048  ;;  %12281 = vst [vmem:[#allocation14_spill] sm:$0xff] %v9088_v37  ;;  %v1052_v1 = vld [vmem:[#allocation3 + $0x268] sm:$0xff]  ;;  %v1130_v37 = vld [vmem:[#allocation3 + $0x4d8] sm:$0xff] }
 0x11b   :  { %1825 = vmatpush1.msra.mxu0 %v1065_v47  ;;  %6853 = vmatprep.mubr.msk.f32.mxu0 %vm314_vm0, %v12275_v57  ;;  %12277 = vst [vmem:[#allocation13_spill] sm:$0xff] %v9075_v28  ;;  %v12287_v47 = vld [vmem:[#allocation20_spill] sm:$0xff]  ;;  %v12288_v57 = vld [vmem:[#allocation21_spill] sm:$0xff]  ;;  %v1144_v28 = vld [vmem:[#allocation3 + $0x548] sm:$0xff] }
 0x11c   :  { %4863 = vperm.xlu0 %7358, %v8901_v35   ;;  %3919 = vperm.xlu1 %7330, %v8929_v51  }
 0x11d   :  { %1826 = vmatprep.subr.mxu0 %v1064_v10  ;;  %v9098_v62 = vpop.permute.xlu0 %4047 }
 0x11e   :  { %1827 = vmatpush1.msra.mxu0 %v1063_v20  ;;  %12285 = vst [vmem:[#allocation16_spill] sm:$0xff] %v9098_v62  ;;  %v1051_v20 = vld [vmem:[#allocation3 + $0x260] sm:$0xff] }
 0x11f   :  { %955 = vmatmul.mubr.f32.gmra.mxu0 %v12278_v32  ;;  %1828 = vmatprep.subr.mxu0 %v1062_v55  ;;  %v1050_v55 = vld [vmem:[#allocation3 + $0x258] sm:$0xff]  ;;  %v1049_v32 = vld [vmem:[#allocation3 + $0x250] sm:$0xff] }
 0x120   :  { %4859 = vperm.xlu0 %7358, %v9081_v34   ;;  %7333 = vset.pattern.permute.xlu1 %v12279_v39  ;;  %v12289_v39 = vld [vmem:[#allocation22_spill] sm:$0xff] }
 0x121   :  { %4023 = vperm.xlu1 %7333, %v8958_v30   ;;  %1829 = vmatpush1.msra.mxu0 %v1061_v15  ;;  %v9090_v0 = vpop.permute.xlu1 %3058 }
 0x122   :  { %1830 = vmatprep.subr.mxu0 %v1060_v21  ;;  %6854 = vmatprep.mubr.msk.f32.mxu0 %vm314_vm0, %v12280_v5  ;;  %12282 = vst [vmem:[#allocation15_spill] sm:$0xff] %v9090_v0 }
 0x123   :  { %1831 = vmatpush1.msra.mxu0 %v1059_v45  ;;  %v9109_v45 = vpop.permute.xlu0 %4055 }
 0x124   :  { %4851 = vperm.xlu0 %7358, %v8989_v61   ;;  %960 = vmatmul.mubr.f32.gmra.mxu0 %v12283_v27  ;;  %12290 = vst [vmem:[#allocation18_spill] sm:$0xff] %v9109_v45  ;;  %v1078_v45 = vld [vmem:[#allocation3 + $0x338] sm:$0xff] }
 0x125   :  { %4027 = vperm.xlu1 %7333, %v8945_v46   ;;  %1832 = vmatprep.subr.mxu0 %v1058_v40  ;;  %v1047_v40 = vld [vmem:[#allocation3 + $0x240] sm:$0xff] }
 0x126   :  { %1833 = vmatpush1.msra.mxu0 %v1057_v4  ;;  %6855 = vmatprep.mubr.msk.f32.mxu0 %vm314_vm0, %v12284_v49  ;;  %v12209_v4 = vmov 11   ;;  %v1045_v49 = vld [vmem:[#allocation3 + $0x230] sm:$0xff] }
 0x127   :  { %1834 = vmatprep.subr.mxu0 %v1056_v48 }
 0x128   :  { %4839 = vperm.xlu0 %7358, %v8857_v25   ;;  %1835 = vmatpush1.msra.mxu0 %v1055_v42  ;;  %v9100_v33 = vpop.permute.xlu1 %3068  ;;  %v9118_v42 = vld [vmem:[%s12178_s4 + $0x70] sm:$0xff] }
 0x129   :  { %12286 = vst [vmem:[#allocation17_spill] sm:$0xff] %v9100_v33  ;;  %4035 = vperm.xlu1 %7333, %v8964_v12   ;;  %965 = vmatmul.mubr.f32.gmra.mxu0 %v12287_v47  ;;  %v1048_v12 = vld [vmem:[#allocation3 + $0x248] sm:$0xff] }
 0x12a   :  { %v590_v10 = vpop.f32.mrf.mxu1  ;;  %1836 = vmatprep.subr.mxu0 %v1054_v22  ;;  %6856 = vmatprep.mubr.msk.f32.mxu0 %vm314_vm0, %v12288_v57 }
 0x12b   :  { %1837 = vmatpush1.msra.mxu0 %v1053_v7 }
 0x12c   :  { %4827 = vperm.xlu0 %7358, %v8945_v46   ;;  %v592_v15 = vpop.f32.mrf.mxu1  ;;  %1838 = vmatprep.subr.mxu0 %v1052_v1 }
 0x12d   :  { %4043 = vperm.xlu1 %7333, %v8978_v26   ;;  %1839 = vmatpush1.msra.mxu0 %v1051_v20  ;;  %v1046_v26 = vld [vmem:[#allocation3 + $0x238] sm:$0xff]  ;;  %v1101_v20 = vld [vmem:[#allocation3 + $0x3f0] sm:$0xff] }
 0x12e   :  { %v596_v21 = vpop.f32.mrf.mxu1  ;;  %970 = vmatmul.mubr.f32.gmra.mxu0 %v12289_v39  ;;  %1840 = vmatprep.subr.mxu0 %v1050_v55  ;;  %v1044_v55 = vld [vmem:[#allocation3 + $0x228] sm:$0xff] }
 0x12f   :  { %v9111_v5 = vpop.permute.xlu1 %3593  ;;  %1841 = vmatpush1.msra.mxu0 %v1049_v32  ;;  %1884 = vmatprep.mubr.f32.mxu0 %v12244_v17  ;;  %v9124_v32 = vpop.permute.xlu0 %4063  ;;  %v1100_v39 = vld [vmem:[#allocation3 + $0x3e8] sm:$0xff] }
 0x130   :  { %12291 = vst [vmem:[#allocation19_spill] sm:$0xff] %v9111_v5  ;;  %7397 = vset.pattern.permute.xlu0 %v12209_v4  ;;  %v429_v27 = vpop.f32.mrf.mxu0  ;;  %v598_v48 = vpop.f32.mrf.mxu1  ;;  %1842 = vmatprep.subr.mxu0 %v1048_v12  ;;  %12292 = vst [vmem:[#allocation20_spill] sm:$0xff] %v9124_v32  ;;  %v1043_v4 = vld [vmem:[#allocation3 + $0x220] sm:$0xff] }
 0x131   :  { %5355 = vperm.xlu0 %7397, %v9118_v42   ;;  %4051 = vperm.xlu1 %7333, %v8989_v61   ;;  %v591_v1 = vadd.f32 %v590_v10, %v429_v27  ;;  %v1098_v27 = vld [vmem:[#allocation3 + $0x3d8] sm:$0xff]  ;;  %v1091_v5 = vld [vmem:[#allocation3 + $0x3a0] sm:$0xff] }
 0x132   :  { %v431_v22 = vpop.f32.mrf.mxu0  ;;  %v9122_v7 = vpop.f32.mrf.mxu1  ;;  %1843 = vmatpush1.msra.mxu0 %v1047_v40  ;;  %v1099_v40 = vld [vmem:[#allocation3 + $0x3e0] sm:$0xff] }
 0x133   :  { %v593_v47 = vadd.f32 %v592_v15, %v431_v22  ;;  %1844 = vmatprep.subr.mxu0 %v1046_v26 }
 0x134   :  { %v435_v57 = vpop.f32.mrf.mxu0  ;;  %1845 = vmatpush1.msra.mxu0 %v1045_v49  ;;  %v604_v12 = vpop.f32.mrf.mxu1 }
 0x135   :  { %5351 = vperm.xlu0 %7397, %v8915_v43   ;;  %1807 = vmatprep.mubr.f32.mxu1 %v593_v47  ;;  %v597_v49 = vadd.f32 %v596_v21, %v435_v57  ;;  %v1097_v47 = vld [vmem:[#allocation3 + $0x3d0] sm:$0xff]  ;;  %v9143_v21 = vpop.permute.xlu0 %4071 }
 0x136   :  { %v9127_v2 = vpop.permute.xlu1 %3603  ;;  %v437_v8 = vpop.f32.mrf.mxu0  ;;  %1808 = vmatmul.mubr.f32.vlgmr.msra.gmra.mxu1 %v591_v1  ;;  %4059 = vperm.xlu1 %7333, %v9081_v34   ;;  %v1042_v1 = vld [vmem:[#allocation3 + $0x218] sm:$0xff]  ;;  %12294 = vst [vmem:[#allocation22_spill] sm:$0xff] %v9143_v21  ;;  %v12298_v21 = vmov 4  }
 0x137   :  { %12293 = vst [vmem:[#allocation21_spill] sm:$0xff] %v9127_v2  ;;  %v599_v10 = vadd.f32 %v598_v48, %v437_v8  ;;  %v9130_v15 = vpop.f32.mrf.mxu1  ;;  %1898 = vmatpush1.msra.mxu1 %v1101_v20  ;;  %1846 = vmatprep.subr.mxu0 %v1044_v55  ;;  %v1096_v48 = vld [vmem:[#allocation3 + $0x3c8] sm:$0xff]  ;;  %v1095_v55 = vld [vmem:[#allocation3 + $0x3c0] sm:$0xff] }
 0x138   :  { %1899 = vmatprep.subr.mxu1 %v1100_v39  ;;  %v9132_v26 = vpop.f32.mrf.mxu0  ;;  %1847 = vmatpush1.msra.mxu0 %v1043_v4  ;;  %v9140_v4 = vld [vmem:[%s12178_s4 + $0x60] sm:$0xff] }
 0x139   :  { %5343 = vperm.xlu0 %7397, %v8901_v35   ;;  %v9135_v22 = vpop.f32.mrf.mxu1  ;;  %1900 = vmatpush1.msra.mxu1 %v1099_v40  ;;  %v1094_v39 = vld [vmem:[#allocation3 + $0x3b8] sm:$0xff] }
 0x13a   :  { %1813 = vmatprep.mubr.f32.mxu1 %v599_v10  ;;  %1901 = vmatprep.subr.mxu1 %v1098_v27  ;;  %v443_v8 = vpop.f32.mrf.mxu0  ;;  %v1093_v10 = vld [vmem:[#allocation3 + $0x3b0] sm:$0xff] }
 0x13b   :  { %v605_v19 = vadd.f32 %v604_v12, %v443_v8  ;;  %v614_v20 = vpop.f32.mrf.mxu1  ;;  %1814 = vmatmul.mubr.f32.gmra.mxu1 %v597_v49  ;;  %4067 = vperm.xlu1 %7333, %v9140_v4   ;;  %v1041_v27 = vld [vmem:[#allocation3 + $0x210] sm:$0xff]  ;;  %v1092_v49 = vld [vmem:[#allocation3 + $0x3a8] sm:$0xff] }
 0x13c   :  { %v9145_v57 = vpop.permute.xlu1 %3613  ;;  %1902 = vmatpush1.msra.mxu1 %v1097_v47  ;;  %1848 = vmatprep.subr.mxu0 %v1042_v1  ;;  %v9148_v12 = vpop.f32.mrf.mxu0  ;;  %v1040_v47 = vld [vmem:[#allocation3 + $0x208] sm:$0xff]  ;;  %v1090_v1 = vld [vmem:[#allocation3 + $0x398] sm:$0xff] }
 0x13d   :  { %12295 = vst [vmem:[#allocation40_spill] sm:$0xff] %v9145_v57  ;;  %5331 = vperm.xlu0 %7397, %v8989_v61   ;;  %1903 = vmatprep.subr.mxu1 %v1096_v48  ;;  %v9150_v40 = vpop.f32.mrf.mxu1 }
 0x13e   :  { %1904 = vmatpush1.msra.mxu1 %v1095_v55  ;;  %1961 = vmatprep.mubr.f32.mxu1 %v605_v19  ;;  %v9152_v8 = vpop.f32.mrf.mxu0  ;;  %v1089_v55 = vld [vmem:[#allocation3 + $0x390] sm:$0xff]  ;;  %v9158_v19 = vpop.permute.xlu0 %4079 }
 0x13f   :  { %1905 = vmatprep.subr.mxu1 %v1094_v39  ;;  %v620_v2 = vpop.f32.mrf.mxu1  ;;  %4075 = vperm.xlu1 %7333, %v9118_v42   ;;  %12297 = vst [vmem:[#allocation42_spill] sm:$0xff] %v9158_v19 }
 0x140   :  { %1906 = vmatpush1.msra.mxu1 %v1093_v10  ;;  %1849 = vmatpush1.msra.mxu0 %v1041_v27  ;;  %v453_v57 = vpop.f32.mrf.mxu0  ;;  %v1087_v27 = vld [vmem:[#allocation3 + $0x380] sm:$0xff] }
 0x141   :  { %v9155_v48 = vpop.permute.xlu1 %3623  ;;  %5319 = vperm.xlu0 %7397, %v8857_v25   ;;  %1907 = vmatprep.subr.mxu1 %v1092_v49  ;;  %v9160_v39 = vadd.f32 %v614_v20, %v453_v57  ;;  %v9162_v41 = vpop.f32.mrf.mxu1  ;;  %v1086_v49 = vld [vmem:[#allocation3 + $0x378] sm:$0xff]  ;;  %v12216_v20 = vmov 14   ;;  %v1085_v57 = vld [vmem:[#allocation3 + $0x370] sm:$0xff] }
 0x142   :  { %12296 = vst [vmem:[#allocation41_spill] sm:$0xff] %v9155_v48  ;;  %1908 = vmatpush1.msra.mxu1 %v1091_v5  ;;  %1850 = vmatprep.subr.mxu0 %v1040_v47  ;;  %v9164_v10 = vpop.f32.mrf.mxu0 }
 0x143   :  { %1909 = vmatprep.subr.mxu1 %v1090_v1  ;;  %7334 = vset.pattern.permute.xlu1 %v12298_v21  ;;  %v626_v48 = vpop.f32.mrf.mxu1  ;;  %v1084_v21 = vld [vmem:[#allocation3 + $0x368] sm:$0xff] }
 0x144   :  { %1910 = vmatpush1.msra.mxu1 %v1089_v55  ;;  %4179 = vperm.xlu1 %7334, %v8851_v29   ;;  %v459_v5 = vpop.f32.mrf.mxu0  ;;  %v1166_v55 = vld [vmem:[#allocation3 + $0x5f8] sm:$0xff] }
 0x145   :  { %v9168_v19 = vpop.permute.xlu1 %3633  ;;  %7400 = vset.pattern.permute.xlu0 %v12216_v20  ;;  %1911 = vmatprep.subr.mxu1 %v1088_v24  ;;  %v9172_v47 = vadd.f32 %v620_v2, %v459_v5  ;;  %v9174_v1 = vpop.f32.mrf.mxu1  ;;  %v1082_v24 = vld [vmem:[#allocation3 + $0x358] sm:$0xff]  ;;  %v1081_v5 = vld [vmem:[#allocation3 + $0x350] sm:$0xff] }
 0x146   :  { %12299 = vst [vmem:[#allocation43_spill] sm:$0xff] %v9168_v19  ;;  %5835 = vperm.xlu0 %7400, %v9118_v42   ;;  %1912 = vmatpush1.msra.mxu1 %v1087_v27  ;;  %v9176_v29 = vpop.f32.mrf.mxu0  ;;  %v9178_v19 = vpop.permute.xlu0 %4183 }
 0x147   :  { %1913 = vmatprep.subr.mxu1 %v1086_v49  ;;  %1851 = vmatpush1.msra.mxu0 %v1039_v63  ;;  %12300 = vst [vmem:[#allocation44_spill] sm:$0xff] %v9178_v19  ;;  %v632_v20 = vpop.f32.mrf.mxu1  ;;  %v1080_v63 = vld [vmem:[#allocation3 + $0x348] sm:$0xff] }
 0x148   :  { %1914 = vmatpush1.msra.mxu1 %v1085_v57  ;;  %4187 = vperm.xlu1 %7334, %v8945_v46   ;;  %v465_v2 = vpop.f32.mrf.mxu0  ;;  %v1079_v57 = vld [vmem:[#allocation3 + $0x340] sm:$0xff] }
 0x149   :  { %v9181_v32 = vpop.permute.xlu1 %3643  ;;  %1915 = vmatprep.subr.mxu1 %v1084_v21  ;;  %1974 = vmatprep.subr.mxu0 %v1166_v55  ;;  %v9184_v27 = vadd.f32 %v626_v48, %v465_v2  ;;  %v9186_v49 = vpop.f32.mrf.mxu1 }
 0x14a   :  { %12301 = vst [vmem:[#allocation45_spill] sm:$0xff] %v9181_v32  ;;  %5823 = vperm.xlu0 %7400, %v8901_v35   ;;  %1916 = vmatpush1.msra.mxu1 %v1083_v16  ;;  %v9188_v31 = vpop.f32.mrf.mxu0  ;;  %v1077_v32 = vld [vmem:[#allocation3 + $0x330] sm:$0xff]  ;;  %v9198_v2 = vpop.permute.xlu0 %4195 }
 0x14b   :  { %1917 = vmatprep.subr.mxu1 %v1082_v24  ;;  %v638_v11 = vpop.f32.mrf.mxu1  ;;  %v1076_v24 = vld [vmem:[#allocation3 + $0x328] sm:$0xff]  ;;  %12303 = vst [vmem:[#allocation47_spill] sm:$0xff] %v9198_v2 }
 0x14c   :  { %1918 = vmatpush1.msra.mxu1 %v1081_v5  ;;  %4191 = vperm.xlu1 %7334, %v8817_v58   ;;  %v471_v55 = vpop.f32.mrf.mxu0 }
 0x14d   :  { %v9191_v21 = vpop.permute.xlu1 %3653  ;;  %1919 = vmatprep.subr.mxu1 %v1080_v63  ;;  %v9194_v48 = vadd.f32 %v632_v20, %v471_v55  ;;  %v9196_v16 = vpop.f32.mrf.mxu1  ;;  %v12218_v55 = vmov 10  }
 0x14e   :  { %12302 = vst [vmem:[#allocation46_spill] sm:$0xff] %v9191_v21  ;;  %5811 = vperm.xlu0 %7400, %v8989_v61   ;;  %1920 = vmatpush1.msra.mxu1 %v1079_v57  ;;  %v9200_v5 = vpop.f32.mrf.mxu0  ;;  %v1074_v21 = vld [vmem:[#allocation3 + $0x318] sm:$0xff] }
 0x14f   :  { %1921 = vmatprep.subr.mxu1 %v1078_v45  ;;  %v644_v58 = vpop.f32.mrf.mxu1  ;;  %v1072_v45 = vld [vmem:[#allocation3 + $0x308] sm:$0xff] }
 0x150   :  { %1922 = vmatpush1.msra.mxu1 %v1077_v32  ;;  %4199 = vperm.xlu1 %7334, %v8857_v25   ;;  %v1071_v32 = vld [vmem:[#allocation3 + $0x300] sm:$0xff] }
 0x151   :  { %1923 = vmatprep.subr.mxu1 %v1076_v24  ;;  %v477_v63 = vpop.f32.mrf.mxu0  ;;  %v9203_v20 = vpop.permute.xlu1 %3663  ;;  %v1134_v24 = vld [vmem:[#allocation3 + $0x4f8] sm:$0xff] }
 0x152   :  { %12304 = vst [vmem:[#allocation48_spill] sm:$0xff] %v9203_v20  ;;  %7403 = vset.pattern.permute.xlu0 %v12218_v55  ;;  %v9206_v57 = vadd.f32 %v638_v11, %v477_v63  ;;  %v646_v62 = vpop.f32.mrf.mxu1  ;;  %1924 = vmatpush1.msra.mxu1 %v1075_v44  ;;  %v9212_v20 = vpop.permute.xlu0 %4203  ;;  %v1133_v55 = vld [vmem:[#allocation3 + $0x4f0] sm:$0xff]  ;;  %v1132_v11 = vld [vmem:[#allocation3 + $0x4e8] sm:$0xff] }
 0x153   :  { %5195 = vperm.xlu0 %7403, %v9118_v42   ;;  %1925 = vmatprep.subr.mxu1 %v1074_v21  ;;  %v9209_v36 = vpop.f32.mrf.mxu0  ;;  %12305 = vst [vmem:[#allocation49_spill] sm:$0xff] %v9212_v20  ;;  %v1131_v21 = vld [vmem:[#allocation3 + $0x4e0] sm:$0xff] }
 0x154   :  { %v650_v25 = vpop.f32.mrf.mxu1  ;;  %1926 = vmatpush1.msra.mxu1 %v1073_v9  ;;  %4207 = vperm.xlu1 %7334, %v8875_v56   ;;  %v1129_v56 = vld [vmem:[#allocation3 + $0x4d0] sm:$0xff] }
 0x155   :  { %1927 = vmatprep.subr.mxu1 %v1072_v45 }
 0x156   :  { %1928 = vmatpush1.msra.mxu1 %v1071_v32  ;;  %v9214_v63 = vpop.permute.xlu1 %3703  ;;  %v652_v44 = vpop.f32.mrf.mxu1  ;;  %v1128_v32 = vld [vmem:[#allocation3 + $0x4c8] sm:$0xff] }
 0x157   :  { %12306 = vst [vmem:[#allocation50_spill] sm:$0xff] %v9214_v63  ;;  %5183 = vperm.xlu0 %7403, %v8901_v35   ;;  %1929 = vmatprep.subr.mxu1 %v1134_v24  ;;  %v9222_v13 = vpop.permute.xlu0 %4211  ;;  %v1165_v63 = vld [vmem:[#allocation3 + $0x5f0] sm:$0xff] }
 0x158   :  { %v483_v3 = vpop.f32.mrf.mxu0  ;;  %1930 = vmatpush2.msra.mxu1 %v1133_v55  ;;  %4215 = vperm.xlu1 %7334, %v8889_v18   ;;  %12308 = vst [vmem:[#allocation52_spill] sm:$0xff] %v9222_v13  ;;  %v1127_v55 = vld [vmem:[#allocation3 + $0x4c0] sm:$0xff]  ;;  %v1126_v18 = vld [vmem:[#allocation3 + $0x4b8] sm:$0xff] }
 0x159   :  { %v9218_v9 = vadd.f32 %v644_v58, %v483_v3  ;;  %1931 = vmatprep.subr.mxu1 %v1132_v11  ;;  %v1125_v3 = vld [vmem:[#allocation3 + $0x4b0] sm:$0xff]  ;;  %v1124_v11 = vld [vmem:[#allocation3 + $0x4a8] sm:$0xff] }
 0x15a   :  { %v485_v45 = vpop.f32.mrf.mxu0  ;;  %1932 = vmatpush2.msra.mxu1 %v1131_v21  ;;  %v9220_v20 = vpop.permute.xlu1 %3707  ;;  %v9233_v13 = vld [vmem:[%s12178_s4 + $0x28] sm:$0xff] }
 0x15b   :  { %12307 = vst [vmem:[#allocation51_spill] sm:$0xff] %v9220_v20  ;;  %5171 = vperm.xlu0 %7403, %v8989_v61   ;;  %v9225_v24 = vadd.f32 %v646_v62, %v485_v45  ;;  %v656_v2 = vpop.f32.mrf.mxu1  ;;  %1933 = vmatprep.subr.mxu1 %v1130_v37  ;;  %v1123_v62 = vld [vmem:[#allocation3 + $0x4a0] sm:$0xff]  ;;  %v9239_v45 = vpop.permute.xlu0 %4219 }
 0x15c   :  { %1934 = vmatpush2.msra.mxu1 %v1129_v56  ;;  %4223 = vperm.xlu1 %7334, %v8901_v35   ;;  %v1122_v35 = vld [vmem:[#allocation3 + $0x498] sm:$0xff]  ;;  %12310 = vst [vmem:[#allocation54_spill] sm:$0xff] %v9239_v45  ;;  %v1103_v20 = vld [vmem:[#allocation3 + $0x400] sm:$0xff] }
 0x15d   :  { %1935 = vmatprep.subr.mxu1 %v1128_v32  ;;  %v658_v58 = vpop.f32.mrf.mxu1 }
 0x15e   :  { %1936 = vmatpush2.msra.mxu1 %v1127_v55  ;;  %v9228_v21 = vpop.permute.xlu1 %3715  ;;  %v1121_v55 = vld [vmem:[#allocation3 + $0x490] sm:$0xff] }
 0x15f   :  { %12309 = vst [vmem:[#allocation53_spill] sm:$0xff] %v9228_v21  ;;  %5159 = vperm.xlu0 %7403, %v9233_v13   ;;  %v489_v37 = vpop.f32.mrf.mxu0  ;;  %1937 = vmatprep.subr.mxu1 %v1126_v18  ;;  %v1118_v18 = vld [vmem:[#allocation3 + $0x478] sm:$0xff] }
 0x160   :  { %v9236_v56 = vadd.f32 %v650_v25, %v489_v37  ;;  %1938 = vmatpush2.msra.mxu1 %v1125_v3  ;;  %4231 = vperm.xlu1 %7334, %v8915_v43   ;;  %v1119_v25 = vld [vmem:[#allocation3 + $0x480] sm:$0xff]  ;;  %v1117_v3 = vld [vmem:[#allocation3 + $0x470] sm:$0xff] }
 0x161   :  { %v491_v32 = vpop.f32.mrf.mxu0  ;;  %1939 = vmatprep.subr.mxu1 %v1124_v11 }
 0x162   :  { %v9241_v6 = vadd.f32 %v652_v44, %v491_v32  ;;  %v662_v21 = vpop.f32.mrf.mxu1  ;;  %1940 = vmatpush2.msra.mxu1 %v1123_v62  ;;  %v9243_v52 = vpop.permute.xlu1 %3723  ;;  %v1116_v44 = vld [vmem:[#allocation3 + $0x468] sm:$0xff]  ;;  %v12220_v62 = vmov 9  }
 0x163   :  { %12311 = vst [vmem:[#allocation55_spill] sm:$0xff] %v9243_v52  ;;  %5147 = vperm.xlu0 %7403, %v8945_v46   ;;  %1941 = vmatprep.subr.mxu1 %v1122_v35  ;;  %v1115_v46 = vld [vmem:[#allocation3 + $0x460] sm:$0xff]  ;;  %v9252_v35 = vpop.permute.xlu0 %4227 }
 0x164   :  { %1942 = vmatpush2.msra.mxu1 %v1121_v55  ;;  %4239 = vperm.xlu1 %7334, %v8929_v51   ;;  %v664_v43 = vpop.f32.mrf.mxu1  ;;  %12313 = vst [vmem:[#allocation57_spill] sm:$0xff] %v9252_v35  ;;  %v9257_v51 = vld [vmem:[%s12178_s4 + $0x78] sm:$0xff]  ;;  %v1111_v35 = vld [vmem:[#allocation3 + $0x440] sm:$0xff] }
 0x165   :  { %1943 = vmatprep.subr.mxu1 %v1120_v53  ;;  %v1114_v55 = vld [vmem:[#allocation3 + $0x458] sm:$0xff] }
 0x166   :  { %v495_v11 = vpop.f32.mrf.mxu0  ;;  %1944 = vmatpush2.msra.mxu1 %v1119_v25  ;;  %v9247_v37 = vpop.permute.xlu1 %3731 }
 0x167   :  { %12312 = vst [vmem:[#allocation56_spill] sm:$0xff] %v9247_v37  ;;  %7412 = vset.pattern.permute.xlu0 %v12220_v62  ;;  %v9250_v32 = vadd.f32 %v656_v2, %v495_v11  ;;  %1945 = vmatprep.subr.mxu1 %v1118_v18  ;;  %v1113_v2 = vld [vmem:[#allocation3 + $0x450] sm:$0xff]  ;;  %v12314_v11 = vmov 5   ;;  %v1112_v18 = vld [vmem:[#allocation3 + $0x448] sm:$0xff] }
 0x168   :  { %5039 = vperm.xlu0 %7412, %v9257_v51   ;;  %v497_v53 = vpop.f32.mrf.mxu0  ;;  %1946 = vmatpush2.msra.mxu1 %v1117_v3  ;;  %v1110_v3 = vld [vmem:[#allocation3 + $0x438] sm:$0xff] }
 0x169   :  { %v9260_v25 = vadd.f32 %v658_v58, %v497_v53  ;;  %v668_v45 = vpop.f32.mrf.mxu1  ;;  %1947 = vmatprep.subr.mxu1 %v1116_v44  ;;  %7337 = vset.pattern.permute.xlu1 %v12314_v11  ;;  %v1109_v53 = vld [vmem:[#allocation3 + $0x430] sm:$0xff]  ;;  %v9267_v44 = vpop.permute.xlu0 %4235  ;;  %v1107_v11 = vld [vmem:[#allocation3 + $0x420] sm:$0xff] }
 0x16a   :  { %1948 = vmatpush2.msra.mxu1 %v1115_v46  ;;  %4343 = vperm.xlu1 %7337, %v8958_v30   ;;  %v9264_v62 = vpop.permute.xlu1 %3739  ;;  %12316 = vst [vmem:[#allocation59_spill] sm:$0xff] %v9267_v44  ;;  %v1108_v46 = vld [vmem:[#allocation3 + $0x428] sm:$0xff] }
 0x16b   :  { %12315 = vst [vmem:[#allocation58_spill] sm:$0xff] %v9264_v62  ;;  %1949 = vmatprep.subr.mxu1 %v1114_v55  ;;  %v670_v37 = vpop.f32.mrf.mxu1  ;;  %v9274_v30 = vld [vmem:[%s12178_s4 + $0x10] sm:$0xff]  ;;  %v7557_v62 = vld [vmem:[%s12178_s4 + $0x20] sm:$0xff] }
 0x16c   :  { %5035 = vperm.xlu0 %7412, %v9118_v42   ;;  %1950 = vmatpush2.msra.mxu1 %v1113_v2  ;;  %v1104_v44 = vld [vmem:[#allocation3 + $0x408] sm:$0xff] }
 0x16d   :  { %v501_v58 = vpop.f32.mrf.mxu0  ;;  %1951 = vmatprep.subr.mxu1 %v1112_v18 }
 0x16e   :  { %v9269_v52 = vadd.f32 %v662_v21, %v501_v58  ;;  %1952 = vmatpush2.msra.mxu1 %v1111_v35  ;;  %4347 = vperm.xlu1 %7337, %v9274_v30   ;;  %v9277_v55 = vpop.permute.xlu1 %3747  ;;  %v1106_v35 = vld [vmem:[#allocation3 + $0x418] sm:$0xff]  ;;  %v1105_v58 = vld [vmem:[#allocation3 + $0x410] sm:$0xff] }
 0x16f   :  { %12317 = vst [vmem:[#allocation60_spill] sm:$0xff] %v9277_v55  ;;  %v503_v2 = vpop.f32.mrf.mxu0  ;;  %1953 = vmatprep.subr.mxu1 %v1110_v3 }
 0x170   :  { %5011 = vperm.xlu0 %7412, %v8989_v61   ;;  %v9280_v18 = vadd.f32 %v664_v43, %v503_v2  ;;  %v674_v21 = vpop.f32.mrf.mxu1  ;;  %1954 = vmatpush2.msra.mxu1 %v1109_v53  ;;  %v9287_v61 = vpop.permute.xlu0 %4339  ;;  %v1262_v53 = vld [vmem:[#allocation3 + $0x8f8] sm:$0xff] }
 0x171   :  { %1955 = vmatprep.subr.mxu1 %v1108_v46  ;;  %12319 = vst [vmem:[#allocation62_spill] sm:$0xff] %v9287_v61  ;;  %v603_v46 = vadd.f32 %v9122_v7, %v9132_v26  ;;  %v1260_v7 = vld [vmem:[#allocation3 + $0x8e8] sm:$0xff]  ;;  %v1259_v26 = vld [vmem:[#allocation3 + $0x8e0] sm:$0xff] }
 0x172   :  { %1956 = vmatpush2.msra.mxu1 %v1107_v11  ;;  %4355 = vperm.xlu1 %7337, %v7557_v62   ;;  %v9285_v55 = vpop.permute.xlu1 %3755  ;;  %v676_v3 = vpop.f32.mrf.mxu1  ;;  %v611_v62 = vadd.f32 %v9135_v22, %v9152_v8 }
 0x173   :  { %12318 = vst [vmem:[#allocation61_spill] sm:$0xff] %v9285_v55  ;;  %1957 = vmatprep.subr.mxu1 %v1106_v35  ;;  %v1261_v35 = vld [vmem:[#allocation3 + $0x8f0] sm:$0xff] }
 0x174   :  { %4999 = vperm.xlu0 %7412, %v9233_v13   ;;  %v507_v43 = vpop.f32.mrf.mxu0  ;;  %1958 = vmatpush2.msra.mxu1 %v1105_v58  ;;  %v9299_v55 = vld [vmem:[%s12178_s4 + $0x30] sm:$0xff]  ;;  %v9307_v8 = vpop.permute.xlu0 %4351 }
 0x175   :  { %v9292_v2 = vadd.f32 %v668_v45, %v507_v43  ;;  %1959 = vmatprep.subr.mxu1 %v1104_v44  ;;  %12321 = vst [vmem:[#allocation64_spill] sm:$0xff] %v9307_v8  ;;  %v1258_v45 = vld [vmem:[#allocation3 + $0x8d8] sm:$0xff] }
 0x176   :  { %v509_v11 = vpop.f32.mrf.mxu0  ;;  %1960 = vmatpush2.msra.mxu1 %v1103_v20  ;;  %4363 = vperm.xlu1 %7337, %v9299_v55   ;;  %v609_v20 = vadd.f32 %v9130_v15, %v9148_v12  ;;  %v1256_v12 = vld [vmem:[#allocation3 + $0x8c8] sm:$0xff] }
 0x177   :  { %v9302_v58 = vadd.f32 %v670_v37, %v509_v11  ;;  %v680_v19 = vpop.f32.mrf.mxu1  ;;  %1962 = vmatmul.mubr.f32.vlgmr.msra.gmra.mxu1 %v603_v46  ;;  %2128 = vmatprep.subr.mxu1 %v1262_v53  ;;  %v9305_v22 = vpop.permute.xlu1 %3859  ;;  %v9314_v37 = vld [vmem:[%s12178_s4 + $0x40] sm:$0xff]  ;;  %v1257_v53 = vld [vmem:[#allocation3 + $0x8d0] sm:$0xff] }
 0x178   :  { %4987 = vperm.xlu0 %7412, %v9274_v30   ;;  %1967 = vmatprep.mubr.f32.mxu1 %v611_v62  ;;  %12320 = vst [vmem:[#allocation63_spill] sm:$0xff] %v9305_v22  ;;  %v9320_v46 = vld [vmem:[%s12178_s4] sm:$0xff] }
 0x179   :  { %2129 = vmatpush1.msra.mxu1 %v1261_v35  ;;  %v682_v43 = vpop.f32.mrf.mxu1  ;;  %v1255_v11 = vld [vmem:[#allocation3 + $0x8c0] sm:$0xff] }
 0x17a   :  { %2130 = vmatprep.subr.mxu1 %v1260_v7  ;;  %4371 = vperm.xlu1 %7337, %v9314_v37   ;;  %v1254_v7 = vld [vmem:[#allocation3 + $0x8b8] sm:$0xff] }
 0x17b   :  { %v513_v44 = vpop.f32.mrf.mxu0  ;;  %2131 = vmatpush1.msra.mxu1 %v1259_v26  ;;  %v9329_v26 = vpop.permute.xlu1 %3867 }
 0x17c   :  { %4979 = vperm.xlu0 %7412, %v9320_v46   ;;  %v9323_v15 = vadd.f32 %v674_v21, %v513_v44  ;;  %1968 = vmatmul.mubr.f32.gmra.mxu1 %v609_v20  ;;  %12322 = vst [vmem:[#allocation65_spill] sm:$0xff] %v9329_v26  ;;  %v9331_v21 = vpop.permute.xlu0 %4359  ;;  %v12222_v20 = vmov 13   ;;  %v1248_v26 = vld [vmem:[#allocation3 + $0x888] sm:$0xff] }
 0x17d   :  { %v515_v62 = vpop.f32.mrf.mxu0  ;;  %2132 = vmatprep.subr.mxu1 %v1258_v45  ;;  %2192 = vmatprep.mubr.f32.mxu1 %v12244_v17  ;;  %12323 = vst [vmem:[#allocation66_spill] sm:$0xff] %v9331_v21  ;;  %v1252_v45 = vld [vmem:[#allocation3 + $0x8a8] sm:$0xff] }
 0x17e   :  { %v9326_v35 = vadd.f32 %v676_v3, %v515_v62  ;;  %2133 = vmatpush1.msra.mxu1 %v1257_v53  ;;  %4379 = vperm.xlu1 %7337, %v9081_v34   ;;  %v6954_v8 = vpop.f32.mrf.mxu1  ;;  %v1251_v3 = vld [vmem:[#allocation3 + $0x8a0] sm:$0xff]  ;;  %v1250_v53 = vld [vmem:[#allocation3 + $0x898] sm:$0xff]  ;;  %v1249_v62 = vld [vmem:[#allocation3 + $0x890] sm:$0xff] }
 0x17f   :  { %2134 = vmatprep.subr.mxu1 %v1256_v12 }
 0x180   :  { %7417 = vset.pattern.permute.xlu0 %v12222_v20  ;;  %2135 = vmatpush1.msra.mxu1 %v1255_v11  ;;  %v6955_v12 = vpop.f32.mrf.mxu1  ;;  %v9338_v20 = vpop.permute.xlu1 %3871 }
 0x181   :  { %5675 = vperm.xlu0 %7417, %v9118_v42   ;;  %2136 = vmatprep.subr.mxu1 %v1254_v7  ;;  %12324 = vst [vmem:[#allocation67_spill] sm:$0xff] %v9338_v20  ;;  %v9345_v7 = vld [vmem:[%s12178_s4 + $0x58] sm:$0xff] }
 0x182   :  { %v519_v44 = vpop.f32.mrf.mxu0  ;;  %2137 = vmatpush1.msra.mxu1 %v1253_v50  ;;  %4387 = vperm.xlu1 %7337, %v9140_v4   ;;  %v1247_v50 = vld [vmem:[#allocation3 + $0x880] sm:$0xff]  ;;  %v9348_v4 = vpop.permute.xlu0 %4367 }
 0x183   :  { %v9336_v34 = vadd.f32 %v680_v19, %v519_v44  ;;  %2138 = vmatprep.subr.mxu1 %v1252_v45  ;;  %12325 = vst [vmem:[#allocation68_spill] sm:$0xff] %v9348_v4  ;;  %v6956_v19 = vadd.f32 %v6955_v12, %v6954_v8  ;;  %v1244_v4 = vld [vmem:[#allocation3 + $0x868] sm:$0xff]  ;;  %v1163_v8 = vld [vmem:[#allocation3 + $0x5e0] sm:$0xff] }
 0x184   :  { %v521_v21 = vpop.f32.mrf.mxu0  ;;  %2139 = vmatpush1.msra.mxu1 %v1251_v3  ;;  %v1246_v3 = vld [vmem:[#allocation3 + $0x878] sm:$0xff] }
 0x185   :  { %v9340_v11 = vadd.f32 %v682_v43, %v521_v21  ;;  %5663 = vperm.xlu0 %7417, %v9345_v7   ;;  %2140 = vmatprep.subr.mxu1 %v1250_v53  ;;  %v1245_v43 = vld [vmem:[#allocation3 + $0x870] sm:$0xff]  ;;  %v1164_v53 = vld [vmem:[#allocation3 + $0x5e8] sm:$0xff] }
 0x186   :  { %v6957_v45 = vpop.f32.mrf.mxu1  ;;  %2141 = vmatpush1.msra.mxu1 %v1249_v62  ;;  %4395 = vperm.xlu1 %7337, %v9118_v42   ;;  %v9354_v42 = vpop.permute.xlu1 %3879  ;;  %v1162_v62 = vld [vmem:[#allocation3 + $0x5d8] sm:$0xff] }
 0x187   :  { %v896_v44 = vpop.f32.mrf.mxu0  ;;  %2142 = vmatprep.subr.mxu1 %v1248_v26  ;;  %12326 = vst [vmem:[#allocation69_spill] sm:$0xff] %v9354_v42  ;;  %v1153_v42 = vld [vmem:[#allocation3 + $0x590] sm:$0xff] }
 0x188   :  { %v897_v21 = vadd.f32 %v6956_v19, %v896_v44  ;;  %v6958_v20 = vpop.f32.mrf.mxu1  ;;  %2143 = vmatpush1.msra.mxu1 %v1247_v50  ;;  %v9357_v50 = vpop.permute.xlu0 %4375 }
 0x189   :  { %v6959_v61 = vadd.f32 %v6958_v20, %v6957_v45  ;;  %v898_v14 = vpop.f32.mrf.mxu0  ;;  %5651 = vperm.xlu0 %7417, %v9314_v37   ;;  %2144 = vmatprep.subr.mxu1 %v1246_v3  ;;  %12327 = vst [vmem:[#allocation70_spill] sm:$0xff] %v9357_v50  ;;  %v1161_v20 = vld [vmem:[#allocation3 + $0x5d0] sm:$0xff]  ;;  %v1243_v45 = vld [vmem:[#allocation3 + $0x860] sm:$0xff]  ;;  %v1160_v3 = vld [vmem:[#allocation3 + $0x5c8] sm:$0xff] }
 0x18a   :  { %1885 = vmatmul.mubr.f32.vlgmr.msra.gmra.mxu0 %v897_v21  ;;  %v9352_v12 = vpop.f32.mrf.mxu1  ;;  %2145 = vmatpush1.msra.mxu1 %v1245_v43  ;;  %v1242_v43 = vld [vmem:[#allocation3 + $0x858] sm:$0xff] }
 0x18b   :  { %1975 = vmatpush1.msra.mxu0 %v1165_v63  ;;  %v901_v26 = vpop.f32.mrf.mxu0  ;;  %1890 = vmatprep.mubr.f32.mxu0 %v12244_v17  ;;  %v1159_v63 = vld [vmem:[#allocation3 + $0x5c0] sm:$0xff]  ;;  %v1158_v21 = vld [vmem:[#allocation3 + $0x5b8] sm:$0xff] }
 0x18c   :  { %v902_v14 = vadd.f32 %v6959_v61, %v901_v26  ;;  %1976 = vmatprep.subr.mxu0 %v1164_v53  ;;  %2146 = vmatprep.subr.mxu1 %v1244_v4  ;;  %v9359_v19 = vpop.f32.mrf.mxu1  ;;  %v1241_v61 = vld [vmem:[#allocation3 + $0x850] sm:$0xff]  ;;  %v9366_v26 = vpop.permute.xlu1 %3887 }
 0x18d   :  { %1977 = vmatpush1.msra.mxu0 %v1163_v8  ;;  %5639 = vperm.xlu0 %7417, %v9233_v13   ;;  %v903_v44 = vpop.f32.mrf.mxu0  ;;  %v1157_v4 = vld [vmem:[#allocation3 + $0x5b0] sm:$0xff]  ;;  %v1240_v8 = vld [vmem:[#allocation3 + $0x848] sm:$0xff]  ;;  %12328 = vst [vmem:[#allocation71_spill] sm:$0xff] %v9366_v26  ;;  %v1238_v26 = vld [vmem:[#allocation3 + $0x838] sm:$0xff] }
 0x18e   :  { %1978 = vmatprep.subr.mxu0 %v1162_v62  ;;  %1891 = vmatmul.mubr.f32.gmra.mxu0 %v902_v14  ;;  %v9364_v53 = vpop.f32.mrf.mxu1  ;;  %v1156_v62 = vld [vmem:[#allocation3 + $0x5a8] sm:$0xff]  ;;  %v1239_v44 = vld [vmem:[#allocation3 + $0x840] sm:$0xff] }
 0x18f   :  { %1979 = vmatpush1.msra.mxu0 %v1161_v20  ;;  %2147 = vmatpush1.msra.mxu1 %v1243_v45  ;;  %v9362_v50 = vpop.f32.mrf.mxu0  ;;  %v9369_v20 = vpop.permute.xlu0 %4383  ;;  %v1155_v45 = vld [vmem:[#allocation3 + $0x5a0] sm:$0xff] }
 0x190   :  { %1980 = vmatprep.subr.mxu0 %v1160_v3  ;;  %2148 = vmatprep.subr.mxu1 %v1242_v43  ;;  %12329 = vst [vmem:[#allocation72_spill] sm:$0xff] %v9369_v20  ;;  %v1154_v3 = vld [vmem:[#allocation3 + $0x598] sm:$0xff]  ;;  %v9373_v22 = vpop.f32.mrf.mxu1 }
 0x191   :  { %1981 = vmatpush1.msra.mxu0 %v1159_v63  ;;  %5627 = vperm.xlu0 %7417, %v9274_v30   ;;  %v908_v14 = vpop.f32.mrf.mxu0  ;;  %v12225_v63 = vmov 12   ;;  %v6965_v60 = vadd.f32 %v9373_v22, %v9364_v53  ;;  %v1195_v53 = vld [vmem:[#allocation3 + $0x6e0] sm:$0xff] }
 0x192   :  { %1982 = vmatprep.subr.mxu0 %v1158_v21  ;;  %2149 = vmatpush1.msra.mxu1 %v1241_v61  ;;  %v1152_v14 = vld [vmem:[#allocation3 + $0x588] sm:$0xff]  ;;  %v1151_v21 = vld [vmem:[#allocation3 + $0x580] sm:$0xff]  ;;  %v9377_v61 = vpop.permute.xlu1 %3895 }
 0x193   :  { %1983 = vmatpush1.msra.mxu0 %v1157_v4  ;;  %2150 = vmatprep.subr.mxu1 %v1240_v8  ;;  %v9371_v43 = vpop.f32.mrf.mxu0  ;;  %12330 = vst [vmem:[#allocation73_spill] sm:$0xff] %v9377_v61  ;;  %v1150_v4 = vld [vmem:[#allocation3 + $0x578] sm:$0xff]  ;;  %v12331_v8 = vmov 6   ;;  %v9380_v33 = vpop.permute.xlu0 %4391  ;;  %v1235_v61 = vld [vmem:[#allocation3 + $0x820] sm:$0xff] }
 0x194   :  { %1984 = vmatprep.subr.mxu0 %v1156_v62  ;;  %2151 = vmatpush1.msra.mxu1 %v1239_v44  ;;  %12332 = vst [vmem:[#allocation74_spill] sm:$0xff] %v9380_v33  ;;  %v1149_v44 = vld [vmem:[#allocation3 + $0x570] sm:$0xff]  ;;  %v912_v22 = vadd.f32 %v6965_v60, %v9371_v43  ;;  %v1292_v60 = vld [vmem:[#allocation3 + $0x9e8] sm:$0xff] }
 0x195   :  { %1985 = vmatpush1.msra.mxu0 %v1155_v45  ;;  %7428 = vset.pattern.permute.xlu0 %v12225_v63  ;;  %v913_v20 = vpop.f32.mrf.mxu0  ;;  %v6966_v45 = vpop.f32.mrf.mxu1  ;;  %v1237_v63 = vld [vmem:[#allocation3 + $0x830] sm:$0xff]  ;;  %v1192_v43 = vld [vmem:[#allocation3 + $0x6c8] sm:$0xff] }
 0x196   :  { %1986 = vmatprep.subr.mxu0 %v1154_v3  ;;  %5503 = vperm.xlu0 %7428, %v9345_v7   ;;  %v1148_v20 = vld [vmem:[#allocation3 + $0x568] sm:$0xff] }
 0x197   :  { %1987 = vmatpush1.msra.mxu0 %v1153_v42  ;;  %7338 = vset.pattern.permute.xlu1 %v12331_v8  ;;  %v916_v62 = vpop.f32.mrf.mxu0  ;;  %v1236_v3 = vld [vmem:[#allocation3 + $0x828] sm:$0xff]  ;;  %v1147_v42 = vld [vmem:[#allocation3 + $0x560] sm:$0xff]  ;;  %v1146_v8 = vld [vmem:[#allocation3 + $0x558] sm:$0xff]  ;;  %v9388_v59 = vpop.permute.xlu0 %4399 }
 0x198   :  { %1988 = vmatprep.subr.mxu0 %v1152_v14  ;;  %2152 = vmatprep.subr.mxu1 %v1238_v26  ;;  %v1145_v26 = vld [vmem:[#allocation3 + $0x550] sm:$0xff]  ;;  %v6967_v14 = vpop.f32.mrf.mxu1  ;;  %12334 = vst [vmem:[#allocation76_spill] sm:$0xff] %v9388_v59  ;;  %v1294_v59 = vld [vmem:[#allocation3 + $0x9f8] sm:$0xff] }
 0x199   :  { %1989 = vmatpush1.msra.mxu0 %v1151_v21  ;;  %4499 = vperm.xlu1 %7338, %v9320_v46   ;;  %v918_v0 = vpop.f32.mrf.mxu0  ;;  %v9386_v21 = vpop.permute.xlu1 %3903  ;;  %v6968_v23 = vadd.f32 %v6967_v14, %v6966_v45  ;;  %v1231_v45 = vld [vmem:[#allocation3 + $0x800] sm:$0xff] }
 0x19a   :  { %1990 = vmatprep.subr.mxu0 %v1150_v4  ;;  %5491 = vperm.xlu0 %7428, %v9314_v37   ;;  %12333 = vst [vmem:[#allocation75_spill] sm:$0xff] %v9386_v21  ;;  %v1234_v0 = vld [vmem:[#allocation3 + $0x818] sm:$0xff] }
 0x19b   :  { %1991 = vmatpush1.msra.mxu0 %v1149_v44  ;;  %2153 = vmatpush1.msra.mxu1 %v1237_v63  ;;  %v9384_v33 = vpop.f32.mrf.mxu0  ;;  %v1143_v44 = vld [vmem:[#allocation3 + $0x540] sm:$0xff]  ;;  %v1142_v63 = vld [vmem:[#allocation3 + $0x538] sm:$0xff] }
 0x19c   :  { %1992 = vmatprep.subr.mxu0 %v1148_v20  ;;  %2154 = vmatprep.subr.mxu1 %v1236_v3  ;;  %v1141_v20 = vld [vmem:[#allocation3 + $0x530] sm:$0xff] }
 0x19d   :  { %1993 = vmatpush1.msra.mxu0 %v1147_v42  ;;  %2155 = vmatpush1.msra.mxu1 %v1235_v61  ;;  %v923_v4 = vpop.f32.mrf.mxu0  ;;  %v1233_v3 = vld [vmem:[#allocation3 + $0x810] sm:$0xff]  ;;  %v1140_v42 = vld [vmem:[#allocation3 + $0x528] sm:$0xff]  ;;  %v9401_v14 = vpop.permute.xlu1 %3911 }
 0x19e   :  { %1994 = vmatprep.subr.mxu0 %v1146_v8  ;;  %5479 = vperm.xlu0 %7428, %v9233_v13   ;;  %v1232_v61 = vld [vmem:[#allocation3 + $0x808] sm:$0xff]  ;;  %v6962_v8 = vadd.f32 %v9359_v19, %v9352_v12  ;;  %12335 = vst [vmem:[#allocation77_spill] sm:$0xff] %v9401_v14  ;;  %v917_v4 = vadd.f32 %v6968_v23, %v916_v62  ;;  %v1137_v12 = vld [vmem:[#allocation3 + $0x510] sm:$0xff]  ;;  %v6969_v19 = vpop.f32.mrf.mxu1  ;;  %v1135_v23 = vld [vmem:[#allocation3 + $0x500] sm:$0xff] }
 0x19f   :  { %1995 = vmatpush1.msra.mxu0 %v1145_v26  ;;  %2038 = vmatprep.mubr.f32.mxu0 %v12244_v17  ;;  %v9398_v26 = vld [vmem:[%s12178_s4 + $0x18] sm:$0xff] }
 0x1a0   :  { %1996 = vmatprep.subr.mxu0 %v1144_v28  ;;  %2156 = vmatprep.subr.mxu1 %v1234_v0  ;;  %v1139_v28 = vld [vmem:[#allocation3 + $0x520] sm:$0xff]  ;;  %v1138_v0 = vld [vmem:[#allocation3 + $0x518] sm:$0xff]  ;;  %v907_v21 = vadd.f32 %v6962_v8, %v9362_v50  ;;  %v1293_v8 = vld [vmem:[#allocation3 + $0x9f0] sm:$0xff] }
 0x1a1   :  { %1997 = vmatpush1.msra.mxu0 %v1143_v44  ;;  %4507 = vperm.xlu1 %7338, %v9274_v30   ;;  %v9403_v44 = vpop.permute.xlu0 %4503  ;;  %v1198_v62 = vld [vmem:[#allocation3 + $0x6f8] sm:$0xff] }
 0x1a2   :  { %1998 = vmatprep.subr.mxu0 %v1142_v63  ;;  %5471 = vperm.xlu0 %7428, %v9398_v26   ;;  %v1136_v63 = vld [vmem:[#allocation3 + $0x508] sm:$0xff] }
 0x1a3   :  { %1999 = vmatpush1.msra.mxu0 %v1141_v20  ;;  %2157 = vmatpush1.msra.mxu1 %v1233_v3  ;;  %v1197_v20 = vld [vmem:[#allocation3 + $0x6f0] sm:$0xff]  ;;  %v6970_v3 = vpop.f32.mrf.mxu1 }
 0x1a4   :  { %2000 = vmatprep.subr.mxu0 %v1140_v42  ;;  %2158 = vmatprep.subr.mxu1 %v1232_v61  ;;  %v9409_v42 = vpop.permute.xlu1 %3919  ;;  %v1196_v61 = vld [vmem:[#allocation3 + $0x6e8] sm:$0xff] }
 0x1a5   :  { %2001 = vmatpush1.msra.mxu0 %v1139_v28  ;;  %2159 = vmatpush1.msra.mxu1 %v1231_v45  ;;  %12336 = vst [vmem:[#allocation78_spill] sm:$0xff] %v9409_v42  ;;  %v9412_v50 = vpop.permute.xlu0 %4515  ;;  %v6971_v28 = vadd.f32 %v6970_v3, %v6969_v19  ;;  %v1194_v45 = vld [vmem:[#allocation3 + $0x6d8] sm:$0xff]  ;;  %v9433_v3 = vld [vmem:[%s12178_s4 + $0x70] sm:$0xff] }
 0x1a6   :  { %2002 = vmatprep.subr.mxu0 %v1138_v0  ;;  %5467 = vperm.xlu0 %7428, %v9274_v30   ;;  %12337 = vst [vmem:[#allocation79_spill] sm:$0xff] %v9412_v50 }
 0x1a7   :  { %2003 = vmatpush1.msra.mxu0 %v1137_v12  ;;  %2193 = vmatmul.mubr.f32.vlgmr.msra.gmra.mxu1 %v917_v4  ;;  %v617_v4 = vadd.f32 %v9150_v40, %v9164_v10  ;;  %v922_v12 = vadd.f32 %v6971_v28, %v9384_v33  ;;  %v12232_v40 = vmov 15   ;;  %v1190_v10 = vld [vmem:[#allocation3 + $0x6b8] sm:$0xff]  ;;  %v1189_v33 = vld [vmem:[#allocation3 + $0x6b0] sm:$0xff] }
 0x1a8   :  { %2004 = vmatprep.subr.mxu0 %v1136_v63  ;;  %2205 = vmatprep.subr.mxu1 %v1294_v59  ;;  %v1193_v59 = vld [vmem:[#allocation3 + $0x6d0] sm:$0xff]  ;;  %v9417_v0 = vpop.permute.xlu1 %4023  ;;  %v1290_v63 = vld [vmem:[#allocation3 + $0x9d8] sm:$0xff] }
 0x1a9   :  { %2005 = vmatpush1.msra.mxu0 %v1135_v23  ;;  %4511 = vperm.xlu1 %7338, %v9398_v26   ;;  %v9422_v19 = vpop.permute.xlu0 %4523  ;;  %v1289_v23 = vld [vmem:[#allocation3 + $0x9d0] sm:$0xff] }
 0x1aa   :  { %2039 = vmatmul.mubr.f32.vlgmr.msra.gmra.mxu0 %v907_v21  ;;  %2051 = vmatprep.subr.mxu0 %v1198_v62  ;;  %v1291_v21 = vld [vmem:[#allocation3 + $0x9e0] sm:$0xff]  ;;  %12338 = vst [vmem:[#allocation80_spill] sm:$0xff] %v9422_v19  ;;  %v1214_v19 = vld [vmem:[#allocation3 + $0x778] sm:$0xff] }
 0x1ab   :  { %2052 = vmatpush1.msra.mxu0 %v1197_v20  ;;  %5459 = vperm.xlu0 %7428, %v9320_v46   ;;  %v1191_v46 = vld [vmem:[#allocation3 + $0x6c0] sm:$0xff]  ;;  %v629_v20 = vadd.f32 %v9174_v1, %v9188_v31  ;;  %v1286_v31 = vld [vmem:[#allocation3 + $0x9b8] sm:$0xff] }
 0x1ac   :  { %2053 = vmatprep.subr.mxu0 %v1196_v61  ;;  %2044 = vmatprep.mubr.f32.mxu0 %v12244_v17  ;;  %v9426_v62 = vpop.permute.xlu1 %4027  ;;  %v1288_v61 = vld [vmem:[#allocation3 + $0x9c8] sm:$0xff]  ;;  %v1186_v1 = vld [vmem:[#allocation3 + $0x698] sm:$0xff] }
 0x1ad   :  { %2054 = vmatpush1.msra.mxu0 %v1195_v53  ;;  %2206 = vmatpush1.msra.mxu1 %v1293_v8  ;;  %v1287_v53 = vld [vmem:[#allocation3 + $0x9c0] sm:$0xff]  ;;  %v9437_v28 = vpop.permute.xlu0 %4531 }
 0x1ae   :  { %2045 = vmatmul.mubr.f32.gmra.mxu0 %v912_v22  ;;  %2055 = vmatprep.subr.mxu0 %v1194_v45  ;;  %v1188_v22 = vld [vmem:[#allocation3 + $0x6a8] sm:$0xff]  ;;  %v1187_v8 = vld [vmem:[#allocation3 + $0x6a0] sm:$0xff]  ;;  %12339 = vst [vmem:[#allocation81_spill] sm:$0xff] %v9437_v28  ;;  %v1285_v45 = vld [vmem:[#allocation3 + $0x9b0] sm:$0xff]  ;;  %v12353_v28 = vmov 7  }
 0x1af   :  { %2056 = vmatpush1.msra.mxu0 %v1193_v59  ;;  %2115 = vmatprep.mubr.f32.mxu0 %v617_v4  ;;  %v1185_v59 = vld [vmem:[#allocation3 + $0x690] sm:$0xff] }
 0x1b0   :  { %2207 = vmatprep.subr.mxu1 %v1292_v60  ;;  %2057 = vmatprep.subr.mxu0 %v1192_v43  ;;  %v9439_v4 = vpop.permute.xlu1 %4035  ;;  %v1284_v60 = vld [vmem:[#allocation3 + $0x9a8] sm:$0xff] }
 0x1b1   :  { %2198 = vmatprep.mubr.f32.mxu1 %v12244_v17  ;;  %2208 = vmatpush1.msra.mxu1 %v1291_v21  ;;  %12340 = vst [vmem:[#allocation82_spill] sm:$0xff] %v9439_v4  ;;  %v1184_v43 = vld [vmem:[#allocation3 + $0x688] sm:$0xff]  ;;  %v7564_v21 = vld [vmem:[%s12178_s4 + $0x38] sm:$0xff] }
 0x1b2   :  { %7431 = vset.pattern.permute.xlu0 %v12232_v40  ;;  %2058 = vmatpush1.msra.mxu0 %v1191_v46  ;;  %v1183_v46 = vld [vmem:[#allocation3 + $0x680] sm:$0xff] }
 0x1b3   :  { %2199 = vmatmul.mubr.f32.gmra.mxu1 %v922_v12  ;;  %2209 = vmatprep.subr.mxu1 %v1290_v63  ;;  %v1283_v12 = vld [vmem:[#allocation3 + $0x9a0] sm:$0xff]  ;;  %v1282_v63 = vld [vmem:[#allocation3 + $0x998] sm:$0xff] }
 0x1b4   :  { %5995 = vperm.xlu0 %7431, %v9433_v3   ;;  %4519 = vperm.xlu1 %7338, %v9233_v13   ;;  %v1167_v40 = vld [vmem:[#allocation3 + $0x600] sm:$0xff] }
 0x1b5   :  { %2059 = vmatprep.subr.mxu0 %v1190_v10  ;;  %2210 = vmatpush1.msra.mxu1 %v1289_v23  ;;  %v9445_v10 = vpop.permute.xlu0 %4539  ;;  %v1182_v23 = vld [vmem:[#allocation3 + $0x678] sm:$0xff] }
 0x1b6   :  { %2269 = vmatprep.mubr.f32.mxu1 %v629_v20  ;;  %2060 = vmatpush1.msra.mxu0 %v1189_v33  ;;  %12341 = vst [vmem:[#allocation83_spill] sm:$0xff] %v9445_v10  ;;  %v1281_v33 = vld [vmem:[#allocation3 + $0x990] sm:$0xff]  ;;  %v1218_v10 = vld [vmem:[#allocation3 + $0x798] sm:$0xff] }
 0x1b7   :  { %2211 = vmatprep.subr.mxu1 %v1288_v61  ;;  %2061 = vmatprep.subr.mxu0 %v1188_v22  ;;  %v1181_v20 = vld [vmem:[#allocation3 + $0x670] sm:$0xff]  ;;  %v1280_v61 = vld [vmem:[#allocation3 + $0x988] sm:$0xff] }
 0x1b8   :  { %2212 = vmatpush1.msra.mxu1 %v1287_v53  ;;  %2062 = vmatpush1.msra.mxu0 %v1187_v8  ;;  %v1180_v22 = vld [vmem:[#allocation3 + $0x668] sm:$0xff]  ;;  %v9448_v53 = vpop.permute.xlu1 %4043 }
 0x1b9   :  { %2213 = vmatprep.subr.mxu1 %v1286_v31  ;;  %5983 = vperm.xlu0 %7431, %v9345_v7   ;;  %12342 = vst [vmem:[#allocation84_spill] sm:$0xff] %v9448_v53  ;;  %v7565_v8 = vld [vmem:[%s12178_s4 + $0x48] sm:$0xff] }
 0x1ba   :  { %4527 = vperm.xlu1 %7338, %v7564_v21   ;;  %2063 = vmatprep.subr.mxu0 %v1186_v1  ;;  %v1279_v31 = vld [vmem:[#allocation3 + $0x980] sm:$0xff]  ;;  %v1177_v21 = vld [vmem:[#allocation3 + $0x650] sm:$0xff] }
 0x1bb   :  { %2214 = vmatpush1.msra.mxu1 %v1285_v45  ;;  %2064 = vmatpush1.msra.mxu0 %v1185_v59  ;;  %v1179_v1 = vld [vmem:[#allocation3 + $0x660] sm:$0xff]  ;;  %v1278_v45 = vld [vmem:[#allocation3 + $0x978] sm:$0xff] }
 0x1bc   :  { %2215 = vmatprep.subr.mxu1 %v1284_v60  ;;  %2065 = vmatprep.subr.mxu0 %v1184_v43  ;;  %v1178_v59 = vld [vmem:[#allocation3 + $0x658] sm:$0xff]  ;;  %v1277_v43 = vld [vmem:[#allocation3 + $0x970] sm:$0xff] }
 0x1bd   :  { %2216 = vmatpush1.msra.mxu1 %v1283_v12  ;;  %2066 = vmatpush1.msra.mxu0 %v1183_v46  ;;  %v1276_v12 = vld [vmem:[#allocation3 + $0x968] sm:$0xff] }
 0x1be   :  { %2217 = vmatprep.subr.mxu1 %v1282_v63  ;;  %5971 = vperm.xlu0 %7431, %v9314_v37   ;;  %v9455_v37 = vpop.permute.xlu0 %4547  ;;  %v1176_v46 = vld [vmem:[#allocation3 + $0x648] sm:$0xff] }
 0x1bf   :  { %4535 = vperm.xlu1 %7338, %v7565_v8   ;;  %2067 = vmatprep.subr.mxu0 %v1182_v23  ;;  %12343 = vst [vmem:[#allocation85_spill] sm:$0xff] %v9455_v37  ;;  %v1275_v23 = vld [vmem:[#allocation3 + $0x960] sm:$0xff]  ;;  %v1273_v8 = vld [vmem:[#allocation3 + $0x950] sm:$0xff]  ;;  %v12351_v37 = vmov 0  }
 0x1c0   :  { %2218 = vmatpush1.msra.mxu1 %v1281_v33  ;;  %2068 = vmatpush1.msra.mxu0 %v1181_v20  ;;  %v1175_v33 = vld [vmem:[#allocation3 + $0x640] sm:$0xff]  ;;  %v9459_v20 = vpop.permute.xlu1 %4051 }
 0x1c1   :  { %2219 = vmatprep.subr.mxu1 %v1280_v61  ;;  %2069 = vmatprep.subr.mxu0 %v1180_v22  ;;  %v9453_v60 = vpop.f32.mrf.mxu0  ;;  %12344 = vst [vmem:[#allocation86_spill] sm:$0xff] %v9459_v20  ;;  %v1274_v61 = vld [vmem:[#allocation3 + $0x958] sm:$0xff] }
 0x1c2   :  { %2220 = vmatpush1.msra.mxu1 %v1279_v31  ;;  %2070 = vmatpush1.msra.mxu0 %v1179_v1  ;;  %v1174_v22 = vld [vmem:[#allocation3 + $0x638] sm:$0xff]  ;;  %v9461_v31 = vpop.permute.xlu0 %4555  ;;  %v1172_v1 = vld [vmem:[#allocation3 + $0x628] sm:$0xff] }
 0x1c3   :  { %2221 = vmatprep.subr.mxu1 %v1278_v45  ;;  %5963 = vperm.xlu0 %7431, %v9299_v55   ;;  %v928_v63 = vpop.f32.mrf.mxu0  ;;  %v1173_v55 = vld [vmem:[#allocation3 + $0x630] sm:$0xff]  ;;  %12345 = vst [vmem:[#allocation87_spill] sm:$0xff] %v9461_v31  ;;  %v9467_v45 = vld [vmem:[%s12178_s4 + $0x68] sm:$0xff] }
 0x1c4   :  { %4543 = vperm.xlu1 %7338, %v9345_v7   ;;  %2071 = vmatprep.subr.mxu0 %v1178_v59  ;;  %v1272_v7 = vld [vmem:[#allocation3 + $0x948] sm:$0xff]  ;;  %v1271_v59 = vld [vmem:[#allocation3 + $0x940] sm:$0xff]  ;;  %v1269_v63 = vld [vmem:[#allocation3 + $0x930] sm:$0xff] }
 0x1c5   :  { %2222 = vmatpush1.msra.mxu1 %v1277_v43  ;;  %2072 = vmatpush1.msra.mxu0 %v1177_v21  ;;  %v1171_v43 = vld [vmem:[#allocation3 + $0x620] sm:$0xff]  ;;  %v1270_v21 = vld [vmem:[#allocation3 + $0x938] sm:$0xff]  ;;  %v1224_v31 = vld [vmem:[#allocation3 + $0x7c8] sm:$0xff] }
 0x1c6   :  { %2223 = vmatprep.subr.mxu1 %v1276_v12  ;;  %2073 = vmatprep.subr.mxu0 %v1176_v46  ;;  %v9470_v12 = vpop.permute.xlu1 %4059 }
 0x1c7   :  { %2224 = vmatpush1.msra.mxu1 %v1275_v23  ;;  %2074 = vmatpush1.msra.mxu0 %v1175_v33  ;;  %12346 = vst [vmem:[#allocation88_spill] sm:$0xff] %v9470_v12  ;;  %v1169_v23 = vld [vmem:[#allocation3 + $0x610] sm:$0xff]  ;;  %v2976_v12 = vld [vmem:[%s12177_s3 + $0x8] sm:$0xff] }
 0x1c8   :  { %2225 = vmatprep.subr.mxu1 %v1274_v61  ;;  %5959 = vperm.xlu0 %7431, %v9233_v13   ;;  %v1170_v13 = vld [vmem:[#allocation3 + $0x618] sm:$0xff]  ;;  %v1268_v61 = vld [vmem:[#allocation3 + $0x928] sm:$0xff] }
 0x1c9   :  { %4551 = vperm.xlu1 %7338, %v9467_v45   ;;  %2075 = vmatprep.subr.mxu0 %v1174_v22  ;;  %v9472_v46 = vpop.f32.mrf.mxu0  ;;  %v1168_v22 = vld [vmem:[#allocation3 + $0x608] sm:$0xff] }
 0x1ca   :  { %2226 = vmatpush1.msra.mxu1 %v1273_v8  ;;  %2076 = vmatpush1.msra.mxu0 %v1173_v55  ;;  %v9475_v8 = vpop.permute.xlu0 %4659  ;;  %v1267_v55 = vld [vmem:[#allocation3 + $0x920] sm:$0xff] }
 0x1cb   :  { %2227 = vmatprep.subr.mxu1 %v1272_v7  ;;  %2077 = vmatprep.subr.mxu0 %v1172_v1  ;;  %v933_v33 = vpop.f32.mrf.mxu0  ;;  %v1266_v7 = vld [vmem:[#allocation3 + $0x918] sm:$0xff] }
 0x1cc   :  { %2228 = vmatpush1.msra.mxu1 %v1271_v59  ;;  %2078 = vmatpush1.msra.mxu0 %v1171_v43  ;;  %v1230_v59 = vld [vmem:[#allocation3 + $0x7f8] sm:$0xff]  ;;  %v1265_v43 = vld [vmem:[#allocation3 + $0x910] sm:$0xff]  ;;  %v1264_v33 = vld [vmem:[#allocation3 + $0x908] sm:$0xff] }
 0x1cd   :  { %2229 = vmatprep.subr.mxu1 %v1270_v21  ;;  %5951 = vperm.xlu0 %7431, %v9398_v26   ;;  %v9480_v21 = vpop.permute.xlu1 %4067  ;;  %v1229_v26 = vld [vmem:[#allocation3 + $0x7f0] sm:$0xff] }
 0x1ce   :  { %4559 = vperm.xlu1 %7338, %v9257_v51   ;;  %2079 = vmatprep.subr.mxu0 %v1170_v13  ;;  %v9478_v1 = vpop.f32.mrf.mxu0  ;;  %12347 = vst [vmem:[#allocation89_spill] sm:$0xff] %v9480_v21  ;;  %v1228_v51 = vld [vmem:[#allocation3 + $0x7e8] sm:$0xff]  ;;  %v1263_v13 = vld [vmem:[#allocation3 + $0x900] sm:$0xff] }
 0x1cf   :  { %2230 = vmatpush1.msra.mxu1 %v1269_v63  ;;  %2080 = vmatpush1.msra.mxu0 %v1169_v23  ;;  %v1227_v63 = vld [vmem:[#allocation3 + $0x7e0] sm:$0xff]  ;;  %v1326_v23 = vld [vmem:[#allocation3 + $0xaf8] sm:$0xff] }
 0x1d0   :  { %2231 = vmatprep.subr.mxu1 %v1268_v61  ;;  %2081 = vmatprep.subr.mxu0 %v1168_v22  ;;  %v938_v42 = vpop.f32.mrf.mxu0  ;;  %v9485_v22 = vpop.permute.xlu0 %4671 }
 0x1d1   :  { %2232 = vmatpush1.msra.mxu1 %v1267_v55  ;;  %2082 = vmatpush1.msra.mxu0 %v1167_v40  ;;  %12348 = vst [vmem:[#allocation90_spill] sm:$0xff] %v9485_v22  ;;  %v1226_v55 = vld [vmem:[#allocation3 + $0x7d8] sm:$0xff]  ;;  %v1325_v40 = vld [vmem:[#allocation3 + $0xaf0] sm:$0xff] }
 0x1d2   :  { %2233 = vmatprep.subr.mxu1 %v1266_v7  ;;  %5947 = vperm.xlu0 %7431, %v9274_v30   ;;  %v9483_v61 = vpop.f32.mrf.mxu0  ;;  %v1225_v42 = vld [vmem:[#allocation3 + $0x7d0] sm:$0xff]  ;;  %v1324_v30 = vld [vmem:[#allocation3 + $0xae8] sm:$0xff] }
 0x1d3   :  { %2083 = vmatprep.subr.mxu0 %v1230_v59  ;;  %2234 = vmatpush1.msra.mxu1 %v1265_v43  ;;  %v9487_v59 = vpop.permute.xlu1 %4075  ;;  %v7567_v43 = vld [vmem:[%s12178_s4 + $0x8] sm:$0xff] }
 0x1d4   :  { %2084 = vmatpush2.msra.mxu0 %v1229_v26  ;;  %2235 = vmatprep.subr.mxu1 %v1264_v33  ;;  %v943_v7 = vpop.f32.mrf.mxu0  ;;  %12349 = vst [vmem:[#allocation91_spill] sm:$0xff] %v9487_v59  ;;  %v1323_v26 = vld [vmem:[#allocation3 + $0xae0] sm:$0xff]  ;;  %v1221_v59 = vld [vmem:[#allocation3 + $0x7b0] sm:$0xff] }
 0x1d5   :  { %2085 = vmatprep.subr.mxu0 %v1228_v51  ;;  %2236 = vmatpush1.msra.mxu1 %v1263_v13  ;;  %v1223_v33 = vld [vmem:[#allocation3 + $0x7c0] sm:$0xff]  ;;  %v1322_v51 = vld [vmem:[#allocation3 + $0xad8] sm:$0xff]  ;;  %v9494_v7 = vpop.permute.xlu0 %4679 }
 0x1d6   :  { %2086 = vmatpush2.msra.mxu0 %v1227_v63  ;;  %2237 = vmatprep.subr.mxu1 %v1326_v23  ;;  %v9492_v14 = vpop.f32.mrf.mxu0  ;;  %v1222_v13 = vld [vmem:[#allocation3 + $0x7b8] sm:$0xff]  ;;  %v1321_v63 = vld [vmem:[#allocation3 + $0xad0] sm:$0xff]  ;;  %12350 = vst [vmem:[#allocation92_spill] sm:$0xff] %v9494_v7 }
 0x1d7   :  { %5943 = vperm.xlu0 %7431, %v7567_v43   ;;  %2087 = vmatprep.subr.mxu0 %v1226_v55  ;;  %v2975_v55 = vld [vmem:[%s12177_s3] sm:$0xff] }
 0x1d8   :  { %2238 = vmatpush2.msra.mxu1 %v1325_v40  ;;  %2088 = vmatpush2.msra.mxu0 %v1225_v42  ;;  %v948_v23 = vpop.f32.mrf.mxu0  ;;  %v1320_v40 = vld [vmem:[#allocation3 + $0xac8] sm:$0xff] }
 0x1d9   :  { %2239 = vmatprep.subr.mxu1 %v1324_v30  ;;  %2089 = vmatprep.subr.mxu0 %v1224_v31  ;;  %v1220_v42 = vld [vmem:[#allocation3 + $0x7a8] sm:$0xff]  ;;  %v1319_v31 = vld [vmem:[#allocation3 + $0xac0] sm:$0xff]  ;;  %v9502_v23 = vpop.permute.xlu1 %4179 }
 0x1da   :  { %2240 = vmatpush2.msra.mxu1 %v1323_v26  ;;  %2090 = vmatpush2.msra.mxu0 %v1223_v33  ;;  %v9500_v21 = vpop.f32.mrf.mxu0  ;;  %v1219_v30 = vld [vmem:[#allocation3 + $0x7a0] sm:$0xff]  ;;  %v1318_v26 = vld [vmem:[#allocation3 + $0xab8] sm:$0xff] }
 0x1db   :  { %2241 = vmatprep.subr.mxu1 %v1322_v51  ;;  %7436 = vset.pattern.permute.xlu0 %v12351_v37  ;;  %v1317_v51 = vld [vmem:[#allocation3 + $0xab0] sm:$0xff] }
 0x1dc   :  { %2091 = vmatprep.subr.mxu0 %v1222_v13  ;;  %2242 = vmatpush2.msra.mxu1 %v1321_v63  ;;  %v953_v33 = vpop.f32.mrf.mxu0  ;;  %v9509_v63 = vpop.permute.xlu0 %4719 }
 0x1dd   :  { %2993 = vperm.xlu0 %7436, %v2975_v55   ;;  %2092 = vmatpush2.msra.mxu0 %v1221_v59  ;;  %12352 = vst [vmem:[#allocation93_spill] sm:$0xff] %v9509_v63  ;;  %v1217_v59 = vld [vmem:[#allocation3 + $0x790] sm:$0xff]  ;;  %v1316_v55 = vld [vmem:[#allocation3 + $0xaa8] sm:$0xff]  ;;  %v9512_v20 = vpop.permute.xlu1 %4187 }
 0x1de   :  { %2243 = vmatprep.subr.mxu1 %v1320_v40  ;;  %2093 = vmatprep.subr.mxu0 %v1220_v42  ;;  %v1216_v40 = vld [vmem:[#allocation3 + $0x788] sm:$0xff]  ;;  %v1315_v42 = vld [vmem:[#allocation3 + $0xaa0] sm:$0xff]  ;;  %v1313_v63 = vld [vmem:[#allocation3 + $0xa90] sm:$0xff] }
 0x1df   :  { %2244 = vmatpush2.msra.mxu1 %v1319_v31  ;;  %2094 = vmatpush2.msra.mxu0 %v1219_v30  ;;  %v9507_v13 = vpop.f32.mrf.mxu0  ;;  %v1215_v31 = vld [vmem:[#allocation3 + $0x780] sm:$0xff]  ;;  %v1314_v30 = vld [vmem:[#allocation3 + $0xa98] sm:$0xff] }
 0x1e0   :  { %2245 = vmatprep.subr.mxu1 %v1318_v26  ;;  %7341 = vset.pattern.permute.xlu1 %v12353_v28  ;;  %v1213_v26 = vld [vmem:[#allocation3 + $0x770] sm:$0xff] }
 0x1e1   :  { %2095 = vmatprep.subr.mxu0 %v1218_v10  ;;  %2246 = vmatpush2.msra.mxu1 %v1317_v51  ;;  %v958_v33 = vpop.f32.mrf.mxu0  ;;  %v1312_v10 = vld [vmem:[#allocation3 + $0xa88] sm:$0xff] }
 0x1e2   :  { %4663 = vperm.xlu1 %7341, %v7567_v43   ;;  %2998 = vperm.xlu0 %7436, %v2976_v12   ;;  %v1212_v51 = vld [vmem:[#allocation3 + $0x768] sm:$0xff]  ;;  %v9516_v33 = vpop.permute.xlu0 %4703  ;;  %v1311_v12 = vld [vmem:[#allocation3 + $0xa80] sm:$0xff] }
 0x1e3   :  { %2096 = vmatpush2.msra.mxu0 %v1217_v59  ;;  %2247 = vmatprep.subr.mxu1 %v1316_v55  ;;  %12354 = vst [vmem:[#allocation94_spill] sm:$0xff] %v9516_v33  ;;  %v1211_v43 = vld [vmem:[#allocation3 + $0x760] sm:$0xff]  ;;  %v7568_v59 = vld [vmem:[%s12178_s4 + $0x10] sm:$0xff]  ;;  %v1310_v55 = vld [vmem:[#allocation3 + $0xa78] sm:$0xff] }
 0x1e4   :  { %2097 = vmatprep.subr.mxu0 %v1216_v40  ;;  %2248 = vmatpush2.msra.mxu1 %v1315_v42  ;;  %v9514_v53 = vpop.f32.mrf.mxu0  ;;  %v1210_v40 = vld [vmem:[#allocation3 + $0x758] sm:$0xff]  ;;  %v1309_v42 = vld [vmem:[#allocation3 + $0xa70] sm:$0xff]  ;;  %v1307_v33 = vld [vmem:[#allocation3 + $0xa60] sm:$0xff] }
 0x1e5   :  { %2098 = vmatpush2.msra.mxu0 %v1215_v31  ;;  %2249 = vmatprep.subr.mxu1 %v1314_v30  ;;  %v9521_v31 = vpop.permute.xlu1 %4191 }
 0x1e6   :  { %2099 = vmatprep.subr.mxu0 %v1214_v19  ;;  %2250 = vmatpush2.msra.mxu1 %v1313_v63  ;;  %v963_v7 = vpop.f32.mrf.mxu0  ;;  %12355 = vst [vmem:[#allocation95_spill] sm:$0xff] %v9521_v31  ;;  %v1209_v19 = vld [vmem:[#allocation3 + $0x750] sm:$0xff]  ;;  %v1308_v63 = vld [vmem:[#allocation3 + $0xa68] sm:$0xff]  ;;  %v9528_v50 = vpop.permute.xlu0 %4691 }
 0x1e7   :  { %4667 = vperm.xlu1 %7341, %v7568_v59   ;;  %2100 = vmatpush2.msra.mxu0 %v1213_v26  ;;  %v1208_v7 = vld [vmem:[#allocation3 + $0x748] sm:$0xff]  ;;  %v7569_v26 = vld [vmem:[%s12178_s4 + $0x20] sm:$0xff]  ;;  %12356 = vst [vmem:[#allocation96_spill] sm:$0xff] %v9528_v50 }
 0x1e8   :  { %2251 = vmatprep.subr.mxu1 %v1312_v10  ;;  %2101 = vmatprep.subr.mxu0 %v1212_v51  ;;  %v1207_v10 = vld [vmem:[#allocation3 + $0x740] sm:$0xff]  ;;  %v1306_v51 = vld [vmem:[#allocation3 + $0xa58] sm:$0xff]  ;;  %v1200_v50 = vld [vmem:[#allocation3 + $0x708] sm:$0xff] }
 0x1e9   :  { %2252 = vmatpush2.msra.mxu1 %v1311_v12  ;;  %2102 = vmatpush2.msra.mxu0 %v1211_v43  ;;  %v9523_v30 = vpop.f32.mrf.mxu0  ;;  %v1206_v12 = vld [vmem:[#allocation3 + $0x738] sm:$0xff]  ;;  %v1305_v43 = vld [vmem:[#allocation3 + $0xa50] sm:$0xff]  ;;  %v9530_v4 = vpop.permute.xlu1 %4199 }
 0x1ea   :  { %2253 = vmatprep.subr.mxu1 %v1310_v55  ;;  %2103 = vmatprep.subr.mxu0 %v1210_v40  ;;  %v1205_v55 = vld [vmem:[#allocation3 + $0x730] sm:$0xff]  ;;  %v1304_v40 = vld [vmem:[#allocation3 + $0xa48] sm:$0xff]  ;;  %12357 = vst [vmem:[#allocation97_spill] sm:$0xff] %v9530_v4  ;;  %v1299_v4 = vld [vmem:[#allocation3 + $0xa20] sm:$0xff] }
 0x1eb   :  { %2254 = vmatpush2.msra.mxu1 %v1309_v42  ;;  %4675 = vperm.xlu1 %7341, %v7569_v26   ;;  %v968_v59 = vpop.f32.mrf.mxu0  ;;  %v1204_v42 = vld [vmem:[#allocation3 + $0x728] sm:$0xff]  ;;  %v1303_v26 = vld [vmem:[#allocation3 + $0xa40] sm:$0xff] }
 0x1ec   :  { %2104 = vmatpush2.msra.mxu0 %v1209_v19  ;;  %2255 = vmatprep.subr.mxu1 %v1308_v63  ;;  %v1203_v59 = vld [vmem:[#allocation3 + $0x720] sm:$0xff]  ;;  %v7570_v19 = vld [vmem:[%s12178_s4 + $0x30] sm:$0xff]  ;;  %v1202_v63 = vld [vmem:[#allocation3 + $0x718] sm:$0xff] }
 0x1ed   :  { %2105 = vmatprep.subr.mxu0 %v1208_v7  ;;  %2256 = vmatpush2.msra.mxu1 %v1307_v33  ;;  %v1302_v33 = vld [vmem:[#allocation3 + $0xa38] sm:$0xff]  ;;  %v9540_v31 = vpop.permute.xlu1 %4207 }
 0x1ee   :  { %2106 = vmatpush2.msra.mxu0 %v1207_v10  ;;  %2257 = vmatprep.subr.mxu1 %v1306_v51  ;;  %v9532_v22 = vpop.f32.mrf.mxu0  ;;  %v1301_v10 = vld [vmem:[#allocation3 + $0xa30] sm:$0xff]  ;;  %v9537_v51 = vpop.permute.xlu0 %4879  ;;  %12359 = vst [vmem:[#allocation99_spill] sm:$0xff] %v9540_v31 }
 0x1ef   :  { %2107 = vmatprep.subr.mxu0 %v1206_v12  ;;  %2258 = vmatpush2.msra.mxu1 %v1305_v43  ;;  %12358 = vst [vmem:[#allocation98_spill] sm:$0xff] %v9537_v51  ;;  %v1201_v12 = vld [vmem:[#allocation3 + $0x710] sm:$0xff]  ;;  %v1300_v43 = vld [vmem:[#allocation3 + $0xa28] sm:$0xff]  ;;  %v1338_v51 = vld [vmem:[#allocation3 + $0xb58] sm:$0xff] }
 0x1f0   :  { %4683 = vperm.xlu1 %7341, %v7570_v19   ;;  %2108 = vmatpush2.msra.mxu0 %v1205_v55  ;;  %v973_v7 = vpop.f32.mrf.mxu0  ;;  %v1199_v55 = vld [vmem:[#allocation3 + $0x700] sm:$0xff]  ;;  %v1298_v19 = vld [vmem:[#allocation3 + $0xa18] sm:$0xff] }
 0x1f1   :  { %2259 = vmatprep.subr.mxu1 %v1304_v40  ;;  %2109 = vmatprep.subr.mxu0 %v1204_v42  ;;  %v1297_v40 = vld [vmem:[#allocation3 + $0xa10] sm:$0xff]  ;;  %v1358_v42 = vld [vmem:[#allocation3 + $0xbf8] sm:$0xff]  ;;  %v1295_v7 = vld [vmem:[#allocation3 + $0xa00] sm:$0xff] }
 0x1f2   :  { %2260 = vmatpush2.msra.mxu1 %v1303_v26  ;;  %2110 = vmatpush2.msra.mxu0 %v1203_v59  ;;  %v1296_v26 = vld [vmem:[#allocation3 + $0xa08] sm:$0xff]  ;;  %v623_v59 = vadd.f32 %v9162_v41, %v9176_v29  ;;  %v635_v41 = vadd.f32 %v9186_v49, %v9200_v5  ;;  %v1453_v29 = vld [vmem:[#allocation3 + $0xef0] sm:$0xff]  ;;  %v1450_v49 = vld [vmem:[#allocation3 + $0xed8] sm:$0xff] }
 0x1f3   :  { %2261 = vmatprep.subr.mxu1 %v1302_v33  ;;  %2111 = vmatprep.subr.mxu0 %v1202_v63  ;;  %v9544_v33 = vpop.permute.xlu0 %4863  ;;  %v1357_v63 = vld [vmem:[#allocation3 + $0xbf0] sm:$0xff] }
 0x1f4   :  { %2262 = vmatpush2.msra.mxu1 %v1301_v10  ;;  %4715 = vperm.xlu1 %7341, %v9433_v3   ;;  %12360 = vst [vmem:[#allocation100_spill] sm:$0xff] %v9544_v33  ;;  %v1356_v10 = vld [vmem:[#allocation3 + $0xbe8] sm:$0xff]  ;;  %v1433_v33 = vld [vmem:[#allocation3 + $0xe50] sm:$0xff] }
 0x1f5   :  { %2112 = vmatpush2.msra.mxu0 %v1201_v12  ;;  %2263 = vmatprep.subr.mxu1 %v1300_v43  ;;  %v9548_v12 = vpop.permute.xlu1 %4215  ;;  %v1353_v43 = vld [vmem:[#allocation3 + $0xbd0] sm:$0xff] }
 0x1f6   :  { %2113 = vmatprep.subr.mxu0 %v1200_v50  ;;  %2264 = vmatpush2.msra.mxu1 %v1299_v4  ;;  %v1355_v50 = vld [vmem:[#allocation3 + $0xbe0] sm:$0xff]  ;;  %v1454_v4 = vld [vmem:[#allocation3 + $0xef8] sm:$0xff]  ;;  %12361 = vst [vmem:[#allocation101_spill] sm:$0xff] %v9548_v12  ;;  %v1432_v12 = vld [vmem:[#allocation3 + $0xe48] sm:$0xff] }
 0x1f7   :  { %2114 = vmatpush2.msra.mxu0 %v1199_v55  ;;  %2265 = vmatprep.subr.mxu1 %v1298_v19  ;;  %v1452_v55 = vld [vmem:[#allocation3 + $0xee8] sm:$0xff]  ;;  %v9553_v19 = vpop.permute.xlu0 %4859 }
 0x1f8   :  { %2116 = vmatmul.mubr.f32.vlgmr.msra.gmra.mxu0 %v9160_v39  ;;  %2266 = vmatpush2.msra.mxu1 %v1297_v40  ;;  %v1354_v39 = vld [vmem:[#allocation3 + $0xbd8] sm:$0xff]  ;;  %12362 = vst [vmem:[#allocation102_spill] sm:$0xff] %v9553_v19  ;;  %v1352_v40 = vld [vmem:[#allocation3 + $0xbc8] sm:$0xff]  ;;  %v1333_v19 = vld [vmem:[#allocation3 + $0xb30] sm:$0xff] }
 0x1f9   :  { %2282 = vmatprep.subr.mxu0 %v1358_v42  ;;  %4711 = vperm.xlu1 %7341, %v9467_v45   ;;  %v1451_v42 = vld [vmem:[#allocation3 + $0xee0] sm:$0xff]  ;;  %v9556_v5 = vpop.permute.xlu1 %4223 }
 0x1fa   :  { %2121 = vmatprep.mubr.f32.mxu0 %v623_v59  ;;  %2267 = vmatprep.subr.mxu1 %v1296_v26  ;;  %v1351_v26 = vld [vmem:[#allocation3 + $0xbc0] sm:$0xff]  ;;  %12363 = vst [vmem:[#allocation103_spill] sm:$0xff] %v9556_v5  ;;  %v1449_v59 = vld [vmem:[#allocation3 + $0xed0] sm:$0xff] }
 0x1fb   :  { %2283 = vmatpush1.msra.mxu0 %v1357_v63  ;;  %2268 = vmatpush2.msra.mxu1 %v1295_v7  ;;  %v1349_v63 = vld [vmem:[#allocation3 + $0xbb0] sm:$0xff]  ;;  %v1348_v7 = vld [vmem:[#allocation3 + $0xba8] sm:$0xff] }
 0x1fc   :  { %2284 = vmatprep.subr.mxu0 %v1356_v10  ;;  %2270 = vmatmul.mubr.f32.vlgmr.msra.gmra.mxu1 %v9184_v27  ;;  %v1350_v27 = vld [vmem:[#allocation3 + $0xbb8] sm:$0xff]  ;;  %v9559_v10 = vpop.permute.xlu0 %4851 }
 0x1fd   :  { %2285 = vmatpush1.msra.mxu0 %v1355_v50  ;;  %2436 = vmatprep.subr.mxu1 %v1454_v4  ;;  %12364 = vst [vmem:[#allocation104_spill] sm:$0xff] %v9559_v10  ;;  %v12365_v50 = vmov 8   ;;  %v1447_v4 = vld [vmem:[#allocation3 + $0xec0] sm:$0xff] }
 0x1fe   :  { %2122 = vmatmul.mubr.f32.gmra.mxu0 %v9172_v47  ;;  %2275 = vmatprep.mubr.f32.mxu1 %v635_v41  ;;  %v1448_v47 = vld [vmem:[#allocation3 + $0xec8] sm:$0xff]  ;;  %v1347_v41 = vld [vmem:[#allocation3 + $0xba0] sm:$0xff] }
 0x1ff   :  { %2286 = vmatprep.subr.mxu0 %v1354_v39  ;;  %2437 = vmatpush1.msra.mxu1 %v1453_v29  ;;  %v1446_v39 = vld [vmem:[#allocation3 + $0xeb8] sm:$0xff] }
 0x200   :  { %2287 = vmatpush1.msra.mxu0 %v1353_v43  ;;  %2438 = vmatprep.subr.mxu1 %v1452_v55  ;;  %v1346_v29 = vld [vmem:[#allocation3 + $0xb98] sm:$0xff]  ;;  %v9563_v43 = vpop.permute.xlu1 %4231  ;;  %v1345_v55 = vld [vmem:[#allocation3 + $0xb90] sm:$0xff] }
 0x201   :  { %2288 = vmatprep.subr.mxu0 %v1352_v40  ;;  %2439 = vmatpush1.msra.mxu1 %v1451_v42  ;;  %12366 = vst [vmem:[#allocation105_spill] sm:$0xff] %v9563_v43  ;;  %v9565_v40 = vpop.f32.mrf.mxu1  ;;  %v1444_v42 = vld [vmem:[#allocation3 + $0xea8] sm:$0xff] }
 0x202   :  { %2276 = vmatmul.mubr.f32.gmra.mxu1 %v9194_v48  ;;  %2289 = vmatpush1.msra.mxu0 %v1351_v26  ;;  %v1445_v48 = vld [vmem:[#allocation3 + $0xeb0] sm:$0xff]  ;;  %v1344_v26 = vld [vmem:[#allocation3 + $0xb88] sm:$0xff] }
 0x203   :  { %2440 = vmatprep.subr.mxu1 %v1450_v49  ;;  %2290 = vmatprep.subr.mxu0 %v1350_v27  ;;  %v1443_v49 = vld [vmem:[#allocation3 + $0xea0] sm:$0xff] }
 0x204   :  { %2441 = vmatpush1.msra.mxu1 %v1449_v59  ;;  %7342 = vset.pattern.permute.xlu1 %v12365_v50  ;;  %v1343_v27 = vld [vmem:[#allocation3 + $0xb80] sm:$0xff]  ;;  %v9567_v59 = vpop.permute.xlu0 %4839 }
 0x205   :  { %2291 = vmatpush1.msra.mxu0 %v1349_v63  ;;  %2442 = vmatprep.subr.mxu1 %v1448_v47  ;;  %12367 = vst [vmem:[#allocation106_spill] sm:$0xff] %v9567_v59  ;;  %v1342_v63 = vld [vmem:[#allocation3 + $0xb78] sm:$0xff]  ;;  %v9570_v47 = vpop.f32.mrf.mxu1  ;;  %v1328_v59 = vld [vmem:[#allocation3 + $0xb08] sm:$0xff] }
 0x206   :  { %4875 = vperm.xlu1 %7342, %v9433_v3   ;;  %2292 = vmatprep.subr.mxu0 %v1348_v7  ;;  %v1442_v3 = vld [vmem:[#allocation3 + $0xe98] sm:$0xff]  ;;  %v1441_v7 = vld [vmem:[#allocation3 + $0xe90] sm:$0xff] }
 0x207   :  { %2443 = vmatpush1.msra.mxu1 %v1447_v4  ;;  %2293 = vmatpush1.msra.mxu0 %v1347_v41  ;;  %v1341_v4 = vld [vmem:[#allocation3 + $0xb70] sm:$0xff]  ;;  %v9575_v41 = vld [vmem:[%s12178_s4 + $0x60] sm:$0xff] }
 0x208   :  { %2444 = vmatprep.subr.mxu1 %v1446_v39  ;;  %2294 = vmatprep.subr.mxu0 %v1346_v29  ;;  %v9578_v39 = vpop.permute.xlu1 %4239  ;;  %v1440_v29 = vld [vmem:[#allocation3 + $0xe88] sm:$0xff]  ;;  %v9582_v43 = vpop.permute.xlu0 %4827 }
 0x209   :  { %2445 = vmatpush1.msra.mxu1 %v1445_v48  ;;  %2295 = vmatpush1.msra.mxu0 %v1345_v55  ;;  %12368 = vst [vmem:[#allocation107_spill] sm:$0xff] %v9578_v39  ;;  %v1340_v48 = vld [vmem:[#allocation3 + $0xb68] sm:$0xff]  ;;  %v1439_v55 = vld [vmem:[#allocation3 + $0xe80] sm:$0xff]  ;;  %12369 = vst [vmem:[#allocation108_spill] sm:$0xff] %v9582_v43 }
 0x20a   :  { %2446 = vmatprep.subr.mxu1 %v1444_v42  ;;  %7343 = vset.pattern.permute.xlu1 %v12353_v28  ;;  %v1339_v42 = vld [vmem:[#allocation3 + $0xb60] sm:$0xff]  ;;  %v1337_v39 = vld [vmem:[#allocation3 + $0xb50] sm:$0xff] }
 0x20b   :  { %2296 = vmatprep.subr.mxu0 %v1344_v26  ;;  %2447 = vmatpush1.msra.mxu1 %v1443_v49  ;;  %v1438_v26 = vld [vmem:[#allocation3 + $0xe78] sm:$0xff]  ;;  %v9580_v49 = vpop.f32.mrf.mxu1 }
 0x20c   :  { %4707 = vperm.xlu1 %7343, %v9575_v41   ;;  %2297 = vmatpush1.msra.mxu0 %v1343_v27  ;;  %v1437_v27 = vld [vmem:[#allocation3 + $0xe70] sm:$0xff]  ;;  %v9585_v5 = vpop.permute.xlu1 %4343 }
 0x20d   :  { %2448 = vmatprep.subr.mxu1 %v1442_v3  ;;  %2298 = vmatprep.subr.mxu0 %v1342_v63  ;;  %v1436_v3 = vld [vmem:[#allocation3 + $0xe68] sm:$0xff] }
 0x20e   :  { %2449 = vmatpush1.msra.mxu1 %v1441_v7  ;;  %2299 = vmatpush1.msra.mxu0 %v1341_v4  ;;  %v1336_v63 = vld [vmem:[#allocation3 + $0xb48] sm:$0xff]  ;;  %v1435_v7 = vld [vmem:[#allocation3 + $0xe60] sm:$0xff] }
 0x20f   :  { %2450 = vmatprep.subr.mxu1 %v1440_v29  ;;  %2300 = vmatprep.subr.mxu0 %v1340_v48  ;;  %v1335_v4 = vld [vmem:[#allocation3 + $0xb40] sm:$0xff]  ;;  %v6976_v29 = vpop.f32.mrf.mxu1  ;;  %v1434_v48 = vld [vmem:[#allocation3 + $0xe58] sm:$0xff] }
 0x210   :  { %2451 = vmatpush1.msra.mxu1 %v1439_v55  ;;  %7344 = vset.pattern.permute.xlu1 %v12365_v50  ;;  %v1334_v55 = vld [vmem:[#allocation3 + $0xb38] sm:$0xff]  ;;  %v9591_v10 = vpop.permute.xlu1 %4347 }
 0x211   :  { %2301 = vmatpush1.msra.mxu0 %v1339_v42  ;;  %2452 = vmatprep.subr.mxu1 %v1438_v26  ;;  %v9588_v42 = vpop.permute.xlu0 %5355  ;;  %v12371_v26 = vmov 10   ;;  %12372 = vst [vmem:[#allocation110_spill] sm:$0xff] %v9591_v10  ;;  %v6978_v31 = vpop.f32.mrf.mxu1 }
 0x212   :  { %4871 = vperm.xlu1 %7344, %v9467_v45   ;;  %2302 = vmatprep.subr.mxu0 %v1338_v51  ;;  %12370 = vst [vmem:[#allocation109_spill] sm:$0xff] %v9588_v42  ;;  %v1332_v51 = vld [vmem:[#allocation3 + $0xb28] sm:$0xff] }
 0x213   :  { %2453 = vmatpush1.msra.mxu1 %v1437_v27  ;;  %2303 = vmatpush1.msra.mxu0 %v1337_v39  ;;  %v1431_v39 = vld [vmem:[#allocation3 + $0xe40] sm:$0xff]  ;;  %v6979_v42 = vpop.f32.mrf.mxu1 }
 0x214   :  { %2454 = vmatprep.subr.mxu1 %v1436_v3  ;;  %2304 = vmatprep.subr.mxu0 %v1336_v63  ;;  %v1331_v27 = vld [vmem:[#allocation3 + $0xb20] sm:$0xff]  ;;  %v9596_v3 = vld [vmem:[%s12178_s4 + $0x78] sm:$0xff]  ;;  %v9604_v10 = vpop.permute.xlu1 %4355 }
 0x215   :  { %2455 = vmatpush1.msra.mxu1 %v1435_v7  ;;  %2305 = vmatpush1.msra.mxu0 %v1335_v4  ;;  %v1430_v63 = vld [vmem:[#allocation3 + $0xe38] sm:$0xff]  ;;  %v6974_v4 = vadd.f32 %v9570_v47, %v9565_v40  ;;  %v9601_v43 = vpop.permute.xlu0 %5351  ;;  %12374 = vst [vmem:[#allocation112_spill] sm:$0xff] %v9604_v10  ;;  %v1327_v40 = vld [vmem:[#allocation3 + $0xb00] sm:$0xff] }
 0x216   :  { %2456 = vmatprep.subr.mxu1 %v1434_v48  ;;  %7345 = vset.pattern.permute.xlu1 %v12371_v26  ;;  %v1330_v7 = vld [vmem:[#allocation3 + $0xb18] sm:$0xff]  ;;  %v1429_v48 = vld [vmem:[#allocation3 + $0xe30] sm:$0xff]  ;;  %12373 = vst [vmem:[#allocation111_spill] sm:$0xff] %v9601_v43  ;;  %v1424_v43 = vld [vmem:[#allocation3 + $0xe08] sm:$0xff] }
 0x217   :  { %2306 = vmatprep.subr.mxu0 %v1334_v55  ;;  %2457 = vmatpush1.msra.mxu1 %v1433_v33  ;;  %v1329_v33 = vld [vmem:[#allocation3 + $0xb10] sm:$0xff]  ;;  %v1428_v55 = vld [vmem:[#allocation3 + $0xe28] sm:$0xff]  ;;  %v1426_v47 = vld [vmem:[#allocation3 + $0xe18] sm:$0xff] }
 0x218   :  { %5199 = vperm.xlu1 %7345, %v9596_v3   ;;  %2307 = vmatpush1.msra.mxu0 %v1333_v19  ;;  %v1427_v19 = vld [vmem:[#allocation3 + $0xe20] sm:$0xff] }
 0x219   :  { %2458 = vmatprep.subr.mxu1 %v1432_v12  ;;  %2308 = vmatprep.subr.mxu0 %v1332_v51  ;;  %v927_v12 = vadd.f32 %v6974_v4, %v9453_v60  ;;  %v1390_v51 = vld [vmem:[#allocation3 + $0xcf8] sm:$0xff]  ;;  %v1388_v60 = vld [vmem:[#allocation3 + $0xce8] sm:$0xff]  ;;  %v1423_v4 = vld [vmem:[#allocation3 + $0xe00] sm:$0xff] }
 0x21a   :  { %2459 = vmatpush1.msra.mxu1 %v1431_v39  ;;  %2309 = vmatpush1.msra.mxu0 %v1331_v27  ;;  %v6980_v39 = vadd.f32 %v6979_v42, %v6978_v31  ;;  %v1425_v27 = vld [vmem:[#allocation3 + $0xe10] sm:$0xff]  ;;  %v9612_v31 = vpop.permute.xlu1 %4363  ;;  %v12377_v42 = vmov 9  }
 0x21b   :  { %2460 = vmatprep.subr.mxu1 %v1430_v63  ;;  %2310 = vmatprep.subr.mxu0 %v1330_v7  ;;  %v1389_v63 = vld [vmem:[#allocation3 + $0xcf0] sm:$0xff]  ;;  %v6977_v7 = vadd.f32 %v6976_v29, %v9580_v49  ;;  %12376 = vst [vmem:[#allocation114_spill] sm:$0xff] %v9612_v31  ;;  %v1387_v49 = vld [vmem:[#allocation3 + $0xce0] sm:$0xff] }
 0x21c   :  { %2461 = vmatpush1.msra.mxu1 %v1429_v48  ;;  %7346 = vset.pattern.permute.xlu1 %v12365_v50  ;;  %v6981_v48 = vpop.f32.mrf.mxu1  ;;  %v1401_v31 = vld [vmem:[#allocation3 + $0xd50] sm:$0xff] }
 0x21d   :  { %2311 = vmatpush1.msra.mxu0 %v1329_v33  ;;  %2462 = vmatprep.subr.mxu1 %v1428_v55  ;;  %v9610_v33 = vpop.permute.xlu0 %5343  ;;  %v932_v55 = vadd.f32 %v6977_v7, %v9472_v46  ;;  %v641_v46 = vadd.f32 %v9196_v16, %v9209_v36  ;;  %v1483_v7 = vld [vmem:[#allocation3 + $0xfe0] sm:$0xff]  ;;  %v12380_v36 = vmov 11   ;;  %v1382_v16 = vld [vmem:[#allocation3 + $0xcb8] sm:$0xff] }
 0x21e   :  { %4867 = vperm.xlu1 %7346, %v9575_v41   ;;  %2312 = vmatprep.subr.mxu0 %v1328_v59  ;;  %12375 = vst [vmem:[#allocation113_spill] sm:$0xff] %v9610_v33  ;;  %v937_v59 = vadd.f32 %v6980_v39, %v9478_v1  ;;  %v6982_v29 = vpop.f32.mrf.mxu1  ;;  %v1485_v1 = vld [vmem:[#allocation3 + $0xff0] sm:$0xff]  ;;  %v1384_v39 = vld [vmem:[#allocation3 + $0xcc8] sm:$0xff] }
 0x21f   :  { %2463 = vmatpush1.msra.mxu1 %v1427_v19  ;;  %2313 = vmatpush1.msra.mxu0 %v1327_v40  ;;  %v1486_v19 = vld [vmem:[#allocation3 + $0xff8] sm:$0xff]  ;;  %v6983_v40 = vadd.f32 %v6982_v29, %v6981_v48  ;;  %v1383_v48 = vld [vmem:[#allocation3 + $0xcc0] sm:$0xff]  ;;  %v1380_v29 = vld [vmem:[#allocation3 + $0xca8] sm:$0xff] }
 0x220   :  { %2346 = vmatprep.mubr.f32.mxu0 %v12244_v17  ;;  %2464 = vmatprep.subr.mxu1 %v1426_v47  ;;  %v1484_v47 = vld [vmem:[#allocation3 + $0xfe8] sm:$0xff] }
 0x221   :  { %2347 = vmatmul.mubr.f32.vlgmr.msra.gmra.mxu0 %v927_v12  ;;  %2359 = vmatprep.subr.mxu0 %v1390_v51  ;;  %v1386_v12 = vld [vmem:[#allocation3 + $0xcd8] sm:$0xff]  ;;  %v9622_v51 = vpop.permute.xlu0 %5331 }
 0x222   :  { %2465 = vmatpush1.msra.mxu1 %v1425_v27  ;;  %2360 = vmatpush1.msra.mxu0 %v1389_v63  ;;  %12378 = vst [vmem:[#allocation115_spill] sm:$0xff] %v9622_v51  ;;  %v9624_v27 = vpop.permute.xlu1 %4371  ;;  %v942_v63 = vadd.f32 %v6983_v40, %v9483_v61  ;;  %v1480_v61 = vld [vmem:[#allocation3 + $0xfc8] sm:$0xff]  ;;  %v1379_v40 = vld [vmem:[#allocation3 + $0xca0] sm:$0xff] }
 0x223   :  { %2466 = vmatprep.subr.mxu1 %v1424_v43  ;;  %7347 = vset.pattern.permute.xlu1 %v12377_v42  ;;  %v1385_v43 = vld [vmem:[#allocation3 + $0xcd0] sm:$0xff]  ;;  %12379 = vst [vmem:[#allocation116_spill] sm:$0xff] %v9624_v27  ;;  %v1511_v51 = vld [vmem:[#allocation3 + $0x10c0] sm:$0xff]  ;;  %v1506_v27 = vld [vmem:[#allocation3 + $0x1098] sm:$0xff] }
 0x224   :  { %2361 = vmatprep.subr.mxu0 %v1388_v60  ;;  %2467 = vmatpush1.msra.mxu1 %v1423_v4  ;;  %v1482_v60 = vld [vmem:[#allocation3 + $0xfd8] sm:$0xff]  ;;  %v1481_v4 = vld [vmem:[#allocation3 + $0xfd0] sm:$0xff] }
 0x225   :  { %2500 = vmatprep.mubr.f32.mxu1 %v12244_v17  ;;  %5031 = vperm.xlu1 %7347, %v9467_v45  }
 0x226   :  { %2352 = vmatprep.mubr.f32.mxu0 %v12244_v17  ;;  %2362 = vmatpush1.msra.mxu0 %v1387_v49  ;;  %v9629_v49 = vpop.permute.xlu0 %5319 }
 0x227   :  { %2501 = vmatmul.mubr.f32.vlgmr.msra.gmra.mxu1 %v937_v59  ;;  %2513 = vmatprep.subr.mxu1 %v1486_v19  ;;  %v1381_v59 = vld [vmem:[#allocation3 + $0xcb0] sm:$0xff]  ;;  %12381 = vst [vmem:[#allocation117_spill] sm:$0xff] %v9629_v49  ;;  %v1479_v19 = vld [vmem:[#allocation3 + $0xfc0] sm:$0xff] }
 0x228   :  { %2353 = vmatmul.mubr.f32.gmra.mxu0 %v932_v55  ;;  %2363 = vmatprep.subr.mxu0 %v1386_v12  ;;  %v9632_v55 = vpop.permute.xlu1 %4379  ;;  %v1478_v12 = vld [vmem:[#allocation3 + $0xfb8] sm:$0xff] }
 0x229   :  { %2514 = vmatpush1.msra.mxu1 %v1485_v1  ;;  %2364 = vmatpush1.msra.mxu0 %v1385_v43  ;;  %12382 = vst [vmem:[#allocation118_spill] sm:$0xff] %v9632_v55  ;;  %v1378_v1 = vld [vmem:[#allocation3 + $0xc98] sm:$0xff]  ;;  %v1477_v43 = vld [vmem:[#allocation3 + $0xfb0] sm:$0xff]  ;;  %v1415_v55 = vld [vmem:[#allocation3 + $0xdc0] sm:$0xff] }
 0x22a   :  { %2423 = vmatprep.mubr.f32.mxu0 %v641_v46  ;;  %2515 = vmatprep.subr.mxu1 %v1484_v47  ;;  %v1377_v47 = vld [vmem:[#allocation3 + $0xc90] sm:$0xff]  ;;  %v1476_v46 = vld [vmem:[#allocation3 + $0xfa8] sm:$0xff] }
 0x22b   :  { %2365 = vmatprep.subr.mxu0 %v1384_v39  ;;  %2506 = vmatprep.mubr.f32.mxu1 %v12244_v17  ;;  %v1376_v39 = vld [vmem:[#allocation3 + $0xc88] sm:$0xff] }
 0x22c   :  { %2516 = vmatpush1.msra.mxu1 %v1483_v7  ;;  %7348 = vset.pattern.permute.xlu1 %v12380_v36  ;;  %v1475_v7 = vld [vmem:[#allocation3 + $0xfa0] sm:$0xff] }
 0x22d   :  { %2366 = vmatpush1.msra.mxu0 %v1383_v48  ;;  %2507 = vmatmul.mubr.f32.gmra.mxu1 %v942_v63  ;;  %v9636_v63 = vpop.permute.xlu0 %5835  ;;  %v1375_v48 = vld [vmem:[#allocation3 + $0xc80] sm:$0xff] }
 0x22e   :  { %2517 = vmatprep.subr.mxu1 %v1482_v60  ;;  %5359 = vperm.xlu1 %7348, %v9596_v3   ;;  %12383 = vst [vmem:[#allocation119_spill] sm:$0xff] %v9636_v63  ;;  %v9643_v60 = vld [vmem:[%s12178_s4 + $0x50] sm:$0xff]  ;;  %v1363_v63 = vld [vmem:[#allocation3 + $0xc20] sm:$0xff] }
 0x22f   :  { %2367 = vmatprep.subr.mxu0 %v1382_v16  ;;  %2518 = vmatpush1.msra.mxu1 %v1481_v4  ;;  %v1474_v16 = vld [vmem:[#allocation3 + $0xf98] sm:$0xff] }
 0x230   :  { %2577 = vmatprep.mubr.f32.mxu1 %v9241_v6  ;;  %2368 = vmatpush1.msra.mxu0 %v1381_v59  ;;  %v9638_v6 = vpop.permute.xlu1 %4387  ;;  %v1374_v4 = vld [vmem:[#allocation3 + $0xc78] sm:$0xff]  ;;  %v1473_v59 = vld [vmem:[#allocation3 + $0xf90] sm:$0xff] }
 0x231   :  { %2519 = vmatprep.subr.mxu1 %v1480_v61  ;;  %2369 = vmatprep.subr.mxu0 %v1380_v29  ;;  %12384 = vst [vmem:[#allocation120_spill] sm:$0xff] %v9638_v6  ;;  %v1373_v61 = vld [vmem:[#allocation3 + $0xc70] sm:$0xff]  ;;  %v1472_v29 = vld [vmem:[#allocation3 + $0xf88] sm:$0xff] }
 0x232   :  { %2520 = vmatpush1.msra.mxu1 %v1479_v19  ;;  %2370 = vmatpush1.msra.mxu0 %v1379_v40  ;;  %v1372_v19 = vld [vmem:[#allocation3 + $0xc68] sm:$0xff]  ;;  %v1471_v40 = vld [vmem:[#allocation3 + $0xf80] sm:$0xff] }
 0x233   :  { %2521 = vmatprep.subr.mxu1 %v1478_v12  ;;  %7349 = vset.pattern.permute.xlu1 %v12353_v28  ;;  %v1371_v12 = vld [vmem:[#allocation3 + $0xc60] sm:$0xff] }
 0x234   :  { %2371 = vmatprep.subr.mxu0 %v1378_v1  ;;  %2522 = vmatpush1.msra.mxu1 %v1477_v43  ;;  %v9647_v1 = vpop.permute.xlu0 %5823  ;;  %v9649_v43 = vpop.permute.xlu1 %4395 }
 0x235   :  { %4699 = vperm.xlu1 %7349, %v9643_v60   ;;  %2372 = vmatpush1.msra.mxu0 %v1377_v47  ;;  %12385 = vst [vmem:[#allocation121_spill] sm:$0xff] %v9647_v1  ;;  %12386 = vst [vmem:[#allocation122_spill] sm:$0xff] %v9649_v43  ;;  %v1470_v47 = vld [vmem:[#allocation3 + $0xf78] sm:$0xff]  ;;  %v12389_v43 = vmov 12  }
 0x236   :  { %2523 = vmatprep.subr.mxu1 %v1476_v46  ;;  %2373 = vmatprep.subr.mxu0 %v1376_v39  ;;  %v1370_v46 = vld [vmem:[#allocation3 + $0xc58] sm:$0xff]  ;;  %v1469_v39 = vld [vmem:[#allocation3 + $0xf70] sm:$0xff] }
 0x237   :  { %2524 = vmatpush1.msra.mxu1 %v1475_v7  ;;  %2374 = vmatpush1.msra.mxu0 %v1375_v48  ;;  %v1369_v7 = vld [vmem:[#allocation3 + $0xc50] sm:$0xff]  ;;  %v1468_v48 = vld [vmem:[#allocation3 + $0xf68] sm:$0xff] }
 0x238   :  { %2525 = vmatprep.subr.mxu1 %v1474_v16  ;;  %2375 = vmatprep.subr.mxu0 %v1374_v4  ;;  %v1368_v16 = vld [vmem:[#allocation3 + $0xc48] sm:$0xff]  ;;  %v1467_v4 = vld [vmem:[#allocation3 + $0xf60] sm:$0xff] }
 0x239   :  { %2526 = vmatpush1.msra.mxu1 %v1473_v59  ;;  %7350 = vset.pattern.permute.xlu1 %v12377_v42  ;;  %v1367_v59 = vld [vmem:[#allocation3 + $0xc40] sm:$0xff] }
 0x23a   :  { %2376 = vmatpush1.msra.mxu0 %v1373_v61  ;;  %2527 = vmatprep.subr.mxu1 %v1472_v29  ;;  %v1466_v61 = vld [vmem:[#allocation3 + $0xf58] sm:$0xff] }
 0x23b   :  { %5027 = vperm.xlu1 %7350, %v9575_v41   ;;  %2377 = vmatprep.subr.mxu0 %v1372_v19  ;;  %v2979_v29 = vld [vmem:[%s12177_s3 + $0x20] sm:$0xff]  ;;  %v9656_v19 = vpop.permute.xlu0 %5811 }
 0x23c   :  { %2528 = vmatpush1.msra.mxu1 %v1471_v40  ;;  %2378 = vmatpush1.msra.mxu0 %v1371_v12  ;;  %12387 = vst [vmem:[#allocation123_spill] sm:$0xff] %v9656_v19  ;;  %v9658_v40 = vpop.permute.xlu1 %4499  ;;  %v1366_v12 = vld [vmem:[#allocation3 + $0xc38] sm:$0xff] }
 0x23d   :  { %2529 = vmatprep.subr.mxu1 %v1470_v47  ;;  %2379 = vmatprep.subr.mxu0 %v1370_v46  ;;  %v1465_v47 = vld [vmem:[#allocation3 + $0xf50] sm:$0xff] }
 0x23e   :  { %2530 = vmatpush1.msra.mxu1 %v1469_v39  ;;  %2380 = vmatpush1.msra.mxu0 %v1369_v7  ;;  %v1365_v46 = vld [vmem:[#allocation3 + $0xc30] sm:$0xff]  ;;  %v1464_v39 = vld [vmem:[#allocation3 + $0xf48] sm:$0xff] }
 0x23f   :  { %2531 = vmatprep.subr.mxu1 %v1468_v48  ;;  %7351 = vset.pattern.permute.xlu1 %v12371_v26  ;;  %v1364_v7 = vld [vmem:[#allocation3 + $0xc28] sm:$0xff]  ;;  %v1463_v48 = vld [vmem:[#allocation3 + $0xf40] sm:$0xff] }
 0x240   :  { %2381 = vmatprep.subr.mxu0 %v1368_v16  ;;  %2532 = vmatpush1.msra.mxu1 %v1467_v4  ;;  %v1462_v16 = vld [vmem:[#allocation3 + $0xf38] sm:$0xff]  ;;  %v2981_v4 = vld [vmem:[%s12177_s3 + $0x30] sm:$0xff] }
 0x241   :  { %5191 = vperm.xlu1 %7351, %v9467_v45   ;;  %2382 = vmatpush1.msra.mxu0 %v1367_v59  ;;  %v1362_v45 = vld [vmem:[#allocation3 + $0xc18] sm:$0xff]  ;;  %v9664_v59 = vpop.permute.xlu0 %5195 }
 0x242   :  { %2533 = vmatprep.subr.mxu1 %v1466_v61  ;;  %3013 = vperm.xlu0 %7436, %v2979_v29   ;;  %12388 = vst [vmem:[#allocation124_spill] sm:$0xff] %v9664_v59  ;;  %v9667_v61 = vpop.permute.xlu1 %4507  ;;  %v1461_v29 = vld [vmem:[#allocation3 + $0xf30] sm:$0xff]  ;;  %v1422_v59 = vld [vmem:[#allocation3 + $0xdf8] sm:$0xff] }
 0x243   :  { %2383 = vmatprep.subr.mxu0 %v1366_v12  ;;  %2534 = vmatpush1.msra.mxu1 %v1465_v47  ;;  %v1361_v12 = vld [vmem:[#allocation3 + $0xc10] sm:$0xff]  ;;  %v1460_v47 = vld [vmem:[#allocation3 + $0xf28] sm:$0xff] }
 0x244   :  { %2384 = vmatpush1.msra.mxu0 %v1365_v46  ;;  %2535 = vmatprep.subr.mxu1 %v1464_v39  ;;  %v1360_v46 = vld [vmem:[#allocation3 + $0xc08] sm:$0xff]  ;;  %v1459_v39 = vld [vmem:[#allocation3 + $0xf20] sm:$0xff] }
 0x245   :  { %2385 = vmatprep.subr.mxu0 %v1364_v7  ;;  %2536 = vmatpush1.msra.mxu1 %v1463_v48  ;;  %v1359_v7 = vld [vmem:[#allocation3 + $0xc00] sm:$0xff]  ;;  %v1458_v48 = vld [vmem:[#allocation3 + $0xf18] sm:$0xff]  ;;  %v9673_v6 = vpop.permute.xlu0 %5183 }
 0x246   :  { %7352 = vset.pattern.permute.xlu1 %v12389_v43  ;;  %2386 = vmatpush1.msra.mxu0 %v1363_v63  ;;  %v2983_v63 = vld [vmem:[%s12177_s3 + $0x40] sm:$0xff]  ;;  %12390 = vst [vmem:[#allocation125_spill] sm:$0xff] %v9673_v6  ;;  %v9675_v1 = vpop.permute.xlu1 %4511 }
 0x247   :  { %2537 = vmatprep.subr.mxu1 %v1462_v16  ;;  %5519 = vperm.xlu1 %7352, %v9596_v3   ;;  %v1457_v16 = vld [vmem:[#allocation3 + $0xf10] sm:$0xff]  ;;  %12391 = vst [vmem:[#allocation126_spill] sm:$0xff] %v9675_v1 }
 0x248   :  { %3023 = vperm.xlu0 %7436, %v2981_v4   ;;  %2387 = vmatprep.subr.mxu0 %v1362_v45  ;;  %v1421_v4 = vld [vmem:[#allocation3 + $0xdf0] sm:$0xff]  ;;  %v1456_v45 = vld [vmem:[#allocation3 + $0xf08] sm:$0xff] }
 0x249   :  { %2538 = vmatpush1.msra.mxu1 %v1461_v29  ;;  %2388 = vmatpush1.msra.mxu0 %v1361_v12  ;;  %v1420_v29 = vld [vmem:[#allocation3 + $0xde8] sm:$0xff]  ;;  %v1455_v12 = vld [vmem:[#allocation3 + $0xf00] sm:$0xff]  ;;  %v9687_v6 = vpop.permute.xlu0 %5171 }
 0x24a   :  { %2539 = vmatprep.subr.mxu1 %v1460_v47  ;;  %2389 = vmatprep.subr.mxu0 %v1360_v46  ;;  %v9681_v47 = vld [vmem:[%s12178_s4 + $0x48] sm:$0xff]  ;;  %12392 = vst [vmem:[#allocation127_spill] sm:$0xff] %v9687_v6  ;;  %v9689_v33 = vpop.permute.xlu1 %4519 }
 0x24b   :  { %2540 = vmatpush1.msra.mxu1 %v1459_v39  ;;  %2390 = vmatpush1.msra.mxu0 %v1359_v7  ;;  %v1419_v46 = vld [vmem:[#allocation3 + $0xde0] sm:$0xff]  ;;  %v1518_v39 = vld [vmem:[#allocation3 + $0x10f8] sm:$0xff]  ;;  %v2985_v7 = vld [vmem:[%s12177_s3 + $0x50] sm:$0xff]  ;;  %12393 = vst [vmem:[#allocation128_spill] sm:$0xff] %v9689_v33 }
 0x24c   :  { %2541 = vmatprep.subr.mxu1 %v1458_v48  ;;  %7353 = vset.pattern.permute.xlu1 %v12353_v28  ;;  %v1418_v48 = vld [vmem:[#allocation3 + $0xdd8] sm:$0xff]  ;;  %v1407_v6 = vld [vmem:[#allocation3 + $0xd80] sm:$0xff]  ;;  %v1525_v33 = vld [vmem:[#allocation3 + $0x1130] sm:$0xff] }
 0x24d   :  { %3033 = vperm.xlu0 %7436, %v2983_v63   ;;  %2391 = vmatprep.subr.mxu0 %v1422_v59  ;;  %v1517_v59 = vld [vmem:[#allocation3 + $0x10f0] sm:$0xff] }
 0x24e   :  { %2542 = vmatpush1.msra.mxu1 %v1457_v16  ;;  %4695 = vperm.xlu1 %7353, %v9681_v47   ;;  %v1417_v63 = vld [vmem:[#allocation3 + $0xdd0] sm:$0xff]  ;;  %v1516_v16 = vld [vmem:[#allocation3 + $0x10e8] sm:$0xff]  ;;  %v9700_v19 = vpop.permute.xlu1 %4527 }
 0x24f   :  { %2392 = vmatpush2.msra.mxu0 %v1421_v4  ;;  %2543 = vmatprep.subr.mxu1 %v1456_v45  ;;  %v1416_v4 = vld [vmem:[#allocation3 + $0xdc8] sm:$0xff]  ;;  %v1515_v45 = vld [vmem:[#allocation3 + $0x10e0] sm:$0xff]  ;;  %12395 = vst [vmem:[#allocation130_spill] sm:$0xff] %v9700_v19  ;;  %v1501_v19 = vld [vmem:[#allocation3 + $0x1070] sm:$0xff] }
 0x250   :  { %2393 = vmatprep.subr.mxu0 %v1420_v29  ;;  %2544 = vmatpush1.msra.mxu1 %v1455_v12  ;;  %v1514_v29 = vld [vmem:[#allocation3 + $0x10d8] sm:$0xff] }
 0x251   :  { %2394 = vmatpush2.msra.mxu0 %v1419_v46  ;;  %2545 = vmatprep.subr.mxu1 %v1518_v39  ;;  %v2987_v12 = vld [vmem:[%s12177_s3 + $0x60] sm:$0xff]  ;;  %v7575_v46 = vld [vmem:[%s12178_s4 + $0x58] sm:$0xff] }
 0x252   :  { %3043 = vperm.xlu0 %7436, %v2985_v7   ;;  %2395 = vmatprep.subr.mxu0 %v1418_v48  ;;  %v1414_v39 = vld [vmem:[#allocation3 + $0xdb8] sm:$0xff]  ;;  %v1513_v7 = vld [vmem:[#allocation3 + $0x10d0] sm:$0xff] }
 0x253   :  { %2546 = vmatpush2.msra.mxu1 %v1517_v59  ;;  %7354 = vset.pattern.permute.xlu1 %v12377_v42  ;;  %v1413_v48 = vld [vmem:[#allocation3 + $0xdb0] sm:$0xff]  ;;  %v1512_v59 = vld [vmem:[#allocation3 + $0x10c8] sm:$0xff] }
 0x254   :  { %2396 = vmatpush2.msra.mxu0 %v1417_v63  ;;  %2547 = vmatprep.subr.mxu1 %v1516_v16  ;;  %v1412_v63 = vld [vmem:[#allocation3 + $0xda8] sm:$0xff]  ;;  %v9698_v16 = vpop.permute.xlu0 %5159 }
 0x255   :  { %5023 = vperm.xlu1 %7354, %v7575_v46   ;;  %2397 = vmatprep.subr.mxu0 %v1416_v4  ;;  %12394 = vst [vmem:[#allocation129_spill] sm:$0xff] %v9698_v16  ;;  %v1411_v46 = vld [vmem:[#allocation3 + $0xda0] sm:$0xff]  ;;  %v1510_v4 = vld [vmem:[#allocation3 + $0x10b8] sm:$0xff]  ;;  %v12409_v16 = vmov 14  }
 0x256   :  { %2548 = vmatpush2.msra.mxu1 %v1515_v45  ;;  %2398 = vmatpush2.msra.mxu0 %v1415_v55  ;;  %v2989_v55 = vld [vmem:[%s12177_s3 + $0x70] sm:$0xff]  ;;  %v1410_v45 = vld [vmem:[#allocation3 + $0xd98] sm:$0xff] }
 0x257   :  { %2549 = vmatprep.subr.mxu1 %v1514_v29  ;;  %3053 = vperm.xlu0 %7436, %v2987_v12   ;;  %v1509_v29 = vld [vmem:[#allocation3 + $0x10b0] sm:$0xff] }
 0x258   :  { %2399 = vmatprep.subr.mxu0 %v1414_v39  ;;  %2550 = vmatpush2.msra.mxu1 %v1513_v7  ;;  %v1409_v12 = vld [vmem:[#allocation3 + $0xd90] sm:$0xff]  ;;  %v1508_v39 = vld [vmem:[#allocation3 + $0x10a8] sm:$0xff] }
 0x259   :  { %2400 = vmatpush2.msra.mxu0 %v1413_v48  ;;  %2551 = vmatprep.subr.mxu1 %v1512_v59  ;;  %v1408_v7 = vld [vmem:[#allocation3 + $0xd88] sm:$0xff]  ;;  %v1507_v48 = vld [vmem:[#allocation3 + $0x10a0] sm:$0xff]  ;;  %v9707_v59 = vpop.permute.xlu0 %5147 }
 0x25a   :  { %7355 = vset.pattern.permute.xlu1 %v12371_v26  ;;  %2401 = vmatprep.subr.mxu0 %v1412_v63  ;;  %v9709_v63 = vpop.permute.xlu1 %4535 }
 0x25b   :  { %2552 = vmatpush2.msra.mxu1 %v1511_v51  ;;  %5187 = vperm.xlu1 %7355, %v9575_v41   ;;  %12396 = vst [vmem:[#allocation131_spill] sm:$0xff] %v9709_v63  ;;  %v1406_v51 = vld [vmem:[#allocation3 + $0xd78] sm:$0xff] }
 0x25c   :  { %2402 = vmatpush2.msra.mxu0 %v1411_v46  ;;  %2553 = vmatprep.subr.mxu1 %v1510_v4  ;;  %v1505_v46 = vld [vmem:[#allocation3 + $0x1090] sm:$0xff]  ;;  %v1402_v63 = vld [vmem:[#allocation3 + $0xd58] sm:$0xff] }
 0x25d   :  { %3063 = vperm.xlu0 %7436, %v2989_v55   ;;  %2403 = vmatprep.subr.mxu0 %v1410_v45  ;;  %v1405_v4 = vld [vmem:[#allocation3 + $0xd70] sm:$0xff]  ;;  %v1504_v55 = vld [vmem:[#allocation3 + $0x1088] sm:$0xff] }
 0x25e   :  { %2554 = vmatpush2.msra.mxu1 %v1509_v29  ;;  %2404 = vmatpush2.msra.mxu0 %v1409_v12  ;;  %v9715_v45 = vld [vmem:[%s12178_s4 + $0x70] sm:$0xff]  ;;  %v7577_v29 = vld [vmem:[%s12178_s4] sm:$0xff] }
 0x25f   :  { %2555 = vmatprep.subr.mxu1 %v1508_v39  ;;  %2405 = vmatprep.subr.mxu0 %v1408_v7  ;;  %v1404_v12 = vld [vmem:[#allocation3 + $0xd68] sm:$0xff]  ;;  %v1503_v39 = vld [vmem:[#allocation3 + $0x1080] sm:$0xff]  ;;  %v9721_v7 = vpop.permute.xlu0 %5039 }
 0x260   :  { %2556 = vmatpush2.msra.mxu1 %v1507_v48  ;;  %7356 = vset.pattern.permute.xlu1 %v12389_v43  ;;  %12397 = vst [vmem:[#allocation132_spill] sm:$0xff] %v9721_v7  ;;  %v9723_v48 = vpop.permute.xlu1 %4543  ;;  %v1400_v7 = vld [vmem:[#allocation3 + $0xd48] sm:$0xff] }
 0x261   :  { %2406 = vmatpush2.msra.mxu0 %v1407_v6  ;;  %2557 = vmatprep.subr.mxu1 %v1506_v27  ;;  %v1403_v6 = vld [vmem:[#allocation3 + $0xd60] sm:$0xff]  ;;  %v1502_v27 = vld [vmem:[#allocation3 + $0x1078] sm:$0xff]  ;;  %12398 = vst [vmem:[#allocation133_spill] sm:$0xff] %v9723_v48  ;;  %v1497_v48 = vld [vmem:[#allocation3 + $0x1050] sm:$0xff] }
 0x262   :  { %5515 = vperm.xlu1 %7356, %v9715_v45   ;;  %3588 = vperm.xlu0 %7436, %v7577_v29   ;;  %v12399_v29 = vmov 13  }
 0x263   :  { %2407 = vmatprep.subr.mxu0 %v1406_v51  ;;  %2558 = vmatpush2.msra.mxu1 %v1505_v46  ;;  %v7578_v51 = vld [vmem:[%s12178_s4 + $0x10] sm:$0xff] }
 0x264   :  { %2408 = vmatpush2.msra.mxu0 %v1405_v4  ;;  %2559 = vmatprep.subr.mxu1 %v1504_v55  ;;  %v1500_v46 = vld [vmem:[#allocation3 + $0x1068] sm:$0xff]  ;;  %v1499_v4 = vld [vmem:[#allocation3 + $0x1060] sm:$0xff] }
 0x265   :  { %2409 = vmatprep.subr.mxu0 %v1404_v12  ;;  %2560 = vmatpush2.msra.mxu1 %v1503_v39  ;;  %v1399_v55 = vld [vmem:[#allocation3 + $0xd40] sm:$0xff]  ;;  %v1498_v12 = vld [vmem:[#allocation3 + $0x1058] sm:$0xff]  ;;  %v9730_v39 = vpop.permute.xlu0 %5035 }
 0x266   :  { %2410 = vmatpush2.msra.mxu0 %v1403_v6  ;;  %2561 = vmatprep.subr.mxu1 %v1502_v27  ;;  %12400 = vst [vmem:[#allocation134_spill] sm:$0xff] %v9730_v39  ;;  %v9732_v6 = vpop.permute.xlu1 %4551  ;;  %v1398_v27 = vld [vmem:[#allocation3 + $0xd38] sm:$0xff]  ;;  %v1495_v39 = vld [vmem:[#allocation3 + $0x1040] sm:$0xff] }
 0x267   :  { %7357 = vset.pattern.permute.xlu1 %v12399_v29  ;;  %3598 = vperm.xlu0 %7436, %v7578_v51   ;;  %12401 = vst [vmem:[#allocation135_spill] sm:$0xff] %v9732_v6  ;;  %v1397_v51 = vld [vmem:[#allocation3 + $0xd30] sm:$0xff]  ;;  %v1491_v6 = vld [vmem:[#allocation3 + $0x1020] sm:$0xff] }
 0x268   :  { %2411 = vmatprep.subr.mxu0 %v1402_v63  ;;  %2562 = vmatpush2.msra.mxu1 %v1501_v19  ;;  %v7579_v19 = vld [vmem:[%s12178_s4 + $0x20] sm:$0xff]  ;;  %v1496_v63 = vld [vmem:[#allocation3 + $0x1048] sm:$0xff] }
 0x269   :  { %5679 = vperm.xlu1 %7357, %v9596_v3   ;;  %2412 = vmatpush2.msra.mxu0 %v1401_v31  ;;  %v1396_v31 = vld [vmem:[#allocation3 + $0xd28] sm:$0xff] }
 0x26a   :  { %2563 = vmatprep.subr.mxu1 %v1500_v46  ;;  %2413 = vmatprep.subr.mxu0 %v1400_v7  ;;  %v1395_v7 = vld [vmem:[#allocation3 + $0xd20] sm:$0xff]  ;;  %v1494_v46 = vld [vmem:[#allocation3 + $0x1038] sm:$0xff] }
 0x26b   :  { %2564 = vmatpush2.msra.mxu1 %v1499_v4  ;;  %2414 = vmatpush2.msra.mxu0 %v1399_v55  ;;  %v1394_v4 = vld [vmem:[#allocation3 + $0xd18] sm:$0xff]  ;;  %v9739_v55 = vpop.permute.xlu0 %5011 }
 0x26c   :  { %2565 = vmatprep.subr.mxu1 %v1498_v12  ;;  %3608 = vperm.xlu0 %7436, %v7579_v19   ;;  %12402 = vst [vmem:[#allocation136_spill] sm:$0xff] %v9739_v55  ;;  %v9741_v12 = vpop.permute.xlu1 %4559  ;;  %v1493_v19 = vld [vmem:[#allocation3 + $0x1030] sm:$0xff]  ;;  %v1646_v55 = vld [vmem:[#allocation3 + $0x14f8] sm:$0xff] }
 0x26d   :  { %2415 = vmatprep.subr.mxu0 %v1398_v27  ;;  %2566 = vmatpush2.msra.mxu1 %v1497_v48  ;;  %12403 = vst [vmem:[#allocation137_spill] sm:$0xff] %v9741_v12  ;;  %v1393_v27 = vld [vmem:[#allocation3 + $0xd10] sm:$0xff]  ;;  %v1492_v48 = vld [vmem:[#allocation3 + $0x1028] sm:$0xff]  ;;  %v1391_v12 = vld [vmem:[#allocation3 + $0xd00] sm:$0xff] }
 0x26e   :  { %7359 = vset.pattern.permute.xlu1 %v12365_v50  ;;  %2416 = vmatpush2.msra.mxu0 %v1397_v51  ;;  %v9746_v51 = vld [vmem:[%s12178_s4 + $0x30] sm:$0xff] }
 0x26f   :  { %2567 = vmatprep.subr.mxu1 %v1496_v63  ;;  %4855 = vperm.xlu1 %7359, %v9681_v47   ;;  %v1392_v63 = vld [vmem:[#allocation3 + $0xd08] sm:$0xff] }
 0x270   :  { %2417 = vmatprep.subr.mxu0 %v1396_v31  ;;  %2568 = vmatpush2.msra.mxu1 %v1495_v39  ;;  %v1490_v39 = vld [vmem:[#allocation3 + $0x1018] sm:$0xff]  ;;  %v9750_v31 = vpop.permute.xlu1 %4663 }
 0x271   :  { %2418 = vmatpush2.msra.mxu0 %v1395_v7  ;;  %2569 = vmatprep.subr.mxu1 %v1494_v46  ;;  %v1489_v7 = vld [vmem:[#allocation3 + $0x1010] sm:$0xff]  ;;  %v9752_v46 = vpop.permute.xlu0 %4999 }
 0x272   :  { %3618 = vperm.xlu0 %7436, %v9746_v51   ;;  %2419 = vmatprep.subr.mxu0 %v1394_v4  ;;  %12404 = vst [vmem:[#allocation138_spill] sm:$0xff] %v9752_v46  ;;  %v1550_v4 = vld [vmem:[#allocation3 + $0x11f8] sm:$0xff]  ;;  %v1629_v46 = vld [vmem:[#allocation3 + $0x1470] sm:$0xff] }
 0x273   :  { %2570 = vmatpush2.msra.mxu1 %v1493_v19  ;;  %2420 = vmatpush2.msra.mxu0 %v1393_v27  ;;  %v7581_v19 = vld [vmem:[%s12178_s4 + $0x40] sm:$0xff]  ;;  %v1488_v27 = vld [vmem:[#allocation3 + $0x1008] sm:$0xff] }
 0x274   :  { %2571 = vmatprep.subr.mxu1 %v1492_v48  ;;  %7360 = vset.pattern.permute.xlu1 %v12377_v42  ;;  %v1549_v48 = vld [vmem:[#allocation3 + $0x11f0] sm:$0xff] }
 0x275   :  { %2421 = vmatprep.subr.mxu0 %v1392_v63  ;;  %2572 = vmatpush2.msra.mxu1 %v1491_v6  ;;  %v1487_v63 = vld [vmem:[#allocation3 + $0x1000] sm:$0xff]  ;;  %v1548_v6 = vld [vmem:[#allocation3 + $0x11e8] sm:$0xff]  ;;  %v9762_v49 = vpop.permute.xlu0 %4987 }
 0x276   :  { %5019 = vperm.xlu1 %7360, %v9643_v60   ;;  %2422 = vmatpush2.msra.mxu0 %v1391_v12  ;;  %v1547_v12 = vld [vmem:[#allocation3 + $0x11e0] sm:$0xff]  ;;  %12405 = vst [vmem:[#allocation139_spill] sm:$0xff] %v9762_v49 }
 0x277   :  { %2573 = vmatprep.subr.mxu1 %v1490_v39  ;;  %3628 = vperm.xlu0 %7436, %v7581_v19   ;;  %v9760_v39 = vpop.permute.xlu1 %4667  ;;  %v1544_v19 = vld [vmem:[#allocation3 + $0x11c8] sm:$0xff] }
 0x278   :  { %2424 = vmatmul.mubr.f32.vlgmr.msra.gmra.mxu0 %v9206_v57  ;;  %2574 = vmatpush2.msra.mxu1 %v1489_v7  ;;  %v1546_v57 = vld [vmem:[#allocation3 + $0x11d8] sm:$0xff]  ;;  %v1645_v7 = vld [vmem:[#allocation3 + $0x14f0] sm:$0xff] }
 0x279   :  { %2590 = vmatprep.subr.mxu0 %v1550_v4  ;;  %2429 = vmatprep.mubr.f32.mxu0 %v9225_v24  ;;  %v1545_v24 = vld [vmem:[#allocation3 + $0x11d0] sm:$0xff]  ;;  %v1644_v4 = vld [vmem:[#allocation3 + $0x14e8] sm:$0xff] }
 0x27a   :  { %2575 = vmatprep.subr.mxu1 %v1488_v27  ;;  %2591 = vmatpush1.msra.mxu0 %v1549_v48  ;;  %v1643_v27 = vld [vmem:[#allocation3 + $0x14e0] sm:$0xff] }
 0x27b   :  { %2576 = vmatpush2.msra.mxu1 %v1487_v63  ;;  %2592 = vmatprep.subr.mxu0 %v1548_v6  ;;  %v1543_v48 = vld [vmem:[#allocation3 + $0x11c0] sm:$0xff]  ;;  %v9772_v63 = vpop.permute.xlu0 %4979  ;;  %v1542_v6 = vld [vmem:[#allocation3 + $0x11b8] sm:$0xff] }
 0x27c   :  { %7361 = vset.pattern.permute.xlu1 %v12380_v36  ;;  %2578 = vmatmul.mubr.f32.vlgmr.msra.gmra.mxu1 %v9236_v56  ;;  %v9770_v56 = vpop.permute.xlu1 %4675 }
 0x27d   :  { %2593 = vmatpush1.msra.mxu0 %v1547_v12  ;;  %2744 = vmatprep.subr.mxu1 %v1646_v55  ;;  %12406 = vst [vmem:[#allocation140_spill] sm:$0xff] %v9770_v56  ;;  %v1642_v55 = vld [vmem:[#allocation3 + $0x14d8] sm:$0xff]  ;;  %v1640_v12 = vld [vmem:[#allocation3 + $0x14c8] sm:$0xff] }
 0x27e   :  { %5347 = vperm.xlu1 %7361, %v9575_v41   ;;  %3638 = vperm.xlu0 %7436, %v9643_v60  }
 0x27f   :  { %2430 = vmatmul.mubr.f32.gmra.mxu0 %v9218_v9  ;;  %2583 = vmatprep.mubr.f32.mxu1 %v9260_v25  ;;  %v1641_v9 = vld [vmem:[#allocation3 + $0x14d0] sm:$0xff] }
 0x280   :  { %2594 = vmatprep.subr.mxu0 %v1546_v57  ;;  %2745 = vmatpush1.msra.mxu1 %v1645_v7  ;;  %v1541_v25 = vld [vmem:[#allocation3 + $0x11b0] sm:$0xff]  ;;  %v1540_v57 = vld [vmem:[#allocation3 + $0x11a8] sm:$0xff]  ;;  %v1639_v7 = vld [vmem:[#allocation3 + $0x14c0] sm:$0xff] }
 0x281   :  { %2595 = vmatpush1.msra.mxu0 %v1545_v24  ;;  %2746 = vmatprep.subr.mxu1 %v1644_v4  ;;  %v9780_v24 = vld [vmem:[%s12178_s4 + $0x68] sm:$0xff]  ;;  %v1638_v4 = vld [vmem:[#allocation3 + $0x14b8] sm:$0xff] }
 0x282   :  { %2596 = vmatprep.subr.mxu0 %v1544_v19  ;;  %2747 = vmatpush1.msra.mxu1 %v1643_v27  ;;  %v9783_v19 = vpop.permute.xlu1 %4683  ;;  %v1538_v27 = vld [vmem:[#allocation3 + $0x1198] sm:$0xff] }
 0x283   :  { %2584 = vmatmul.mubr.f32.gmra.mxu1 %v9250_v32  ;;  %2597 = vmatpush1.msra.mxu0 %v1543_v48  ;;  %v1539_v32 = vld [vmem:[#allocation3 + $0x11a0] sm:$0xff]  ;;  %12407 = vst [vmem:[#allocation141_spill] sm:$0xff] %v9783_v19  ;;  %v9785_v48 = vpop.permute.xlu0 %5675 }
 0x284   :  { %2748 = vmatprep.subr.mxu1 %v1642_v55  ;;  %7362 = vset.pattern.permute.xlu1 %v12389_v43  ;;  %12408 = vst [vmem:[#allocation142_spill] sm:$0xff] %v9785_v48  ;;  %v1537_v55 = vld [vmem:[#allocation3 + $0x1190] sm:$0xff]  ;;  %v1635_v19 = vld [vmem:[#allocation3 + $0x14a0] sm:$0xff]  ;;  %v1534_v48 = vld [vmem:[#allocation3 + $0x1178] sm:$0xff] }
 0x285   :  { %3648 = vperm.xlu0 %7436, %v9575_v41   ;;  %2598 = vmatprep.subr.mxu0 %v1542_v6  ;;  %v1637_v41 = vld [vmem:[#allocation3 + $0x14b0] sm:$0xff]  ;;  %v1636_v6 = vld [vmem:[#allocation3 + $0x14a8] sm:$0xff] }
 0x286   :  { %2749 = vmatpush1.msra.mxu1 %v1641_v9  ;;  %5511 = vperm.xlu1 %7362, %v9780_v24   ;;  %v1536_v9 = vld [vmem:[#allocation3 + $0x1188] sm:$0xff] }
 0x287   :  { %2599 = vmatpush1.msra.mxu0 %v1541_v25  ;;  %2750 = vmatprep.subr.mxu1 %v1640_v12  ;;  %v1535_v25 = vld [vmem:[#allocation3 + $0x1180] sm:$0xff]  ;;  %v1634_v12 = vld [vmem:[#allocation3 + $0x1498] sm:$0xff] }
 0x288   :  { %2600 = vmatprep.subr.mxu0 %v1540_v57  ;;  %2751 = vmatpush1.msra.mxu1 %v1639_v7  ;;  %v9789_v57 = vpop.permute.xlu1 %4715  ;;  %v9791_v7 = vpop.f32.mrf.mxu1 }
 0x289   :  { %2601 = vmatpush1.msra.mxu0 %v1539_v32  ;;  %2752 = vmatprep.subr.mxu1 %v1638_v4  ;;  %12410 = vst [vmem:[#allocation143_spill] sm:$0xff] %v9789_v57  ;;  %v1633_v32 = vld [vmem:[#allocation3 + $0x1490] sm:$0xff]  ;;  %v9794_v4 = vpop.permute.xlu0 %5663 }
 0x28a   :  { %3658 = vperm.xlu0 %7436, %v9715_v45   ;;  %2602 = vmatprep.subr.mxu0 %v1538_v27  ;;  %v1533_v45 = vld [vmem:[#allocation3 + $0x1170] sm:$0xff]  ;;  %12411 = vst [vmem:[#allocation144_spill] sm:$0xff] %v9794_v4  ;;  %v1632_v27 = vld [vmem:[#allocation3 + $0x1488] sm:$0xff]  ;;  %v6985_v57 = vpop.f32.mrf.mxu1 }
 0x28b   :  { %2753 = vmatpush1.msra.mxu1 %v1637_v41  ;;  %7363 = vset.pattern.permute.xlu1 %v12409_v16  ;;  %v1532_v41 = vld [vmem:[#allocation3 + $0x1168] sm:$0xff]  ;;  %v1529_v4 = vld [vmem:[#allocation3 + $0x1150] sm:$0xff]  ;;  %v6986_v56 = vadd.f32 %v6985_v57, %v9791_v7 }
 0x28c   :  { %2603 = vmatpush1.msra.mxu0 %v1537_v55  ;;  %2754 = vmatprep.subr.mxu1 %v1636_v6  ;;  %v1631_v55 = vld [vmem:[#allocation3 + $0x1480] sm:$0xff] }
 0x28d   :  { %5839 = vperm.xlu1 %7363, %v9596_v3   ;;  %2604 = vmatprep.subr.mxu0 %v1536_v9  ;;  %v1531_v6 = vld [vmem:[#allocation3 + $0x1160] sm:$0xff]  ;;  %v1630_v3 = vld [vmem:[#allocation3 + $0x1478] sm:$0xff]  ;;  %v947_v7 = vadd.f32 %v6986_v56, %v9492_v14 }
 0x28e   :  { %2755 = vmatpush1.msra.mxu1 %v1635_v19  ;;  %2605 = vmatpush1.msra.mxu0 %v1535_v25  ;;  %v1530_v9 = vld [vmem:[#allocation3 + $0x1158] sm:$0xff]  ;;  %v9797_v19 = vpop.permute.xlu1 %4711  ;;  %v1628_v25 = vld [vmem:[#allocation3 + $0x1468] sm:$0xff]  ;;  %v1615_v14 = vld [vmem:[#allocation3 + $0x1400] sm:$0xff] }
 0x28f   :  { %2756 = vmatprep.subr.mxu1 %v1634_v12  ;;  %2606 = vmatprep.subr.mxu0 %v1534_v48  ;;  %12412 = vst [vmem:[#allocation145_spill] sm:$0xff] %v9797_v19  ;;  %v9802_v48 = vld [vmem:[%s12178_s4 + $0x38] sm:$0xff]  ;;  %v1528_v12 = vld [vmem:[#allocation3 + $0x1148] sm:$0xff] }
 0x290   :  { %2757 = vmatpush1.msra.mxu1 %v1633_v32  ;;  %2607 = vmatpush1.msra.mxu0 %v1533_v45  ;;  %v9805_v32 = vpop.permute.xlu0 %5651  ;;  %v9807_v45 = vpop.f32.mrf.mxu1 }
 0x291   :  { %2758 = vmatprep.subr.mxu1 %v1632_v27  ;;  %7364 = vset.pattern.permute.xlu1 %v12353_v28  ;;  %12413 = vst [vmem:[#allocation146_spill] sm:$0xff] %v9805_v32  ;;  %v1627_v28 = vld [vmem:[#allocation3 + $0x1460] sm:$0xff] }
 0x292   :  { %2608 = vmatprep.subr.mxu0 %v1532_v41  ;;  %2759 = vmatpush1.msra.mxu1 %v1631_v55  ;;  %v1527_v27 = vld [vmem:[#allocation3 + $0x1140] sm:$0xff]  ;;  %v1626_v41 = vld [vmem:[#allocation3 + $0x1458] sm:$0xff]  ;;  %v9809_v19 = vpop.permute.xlu1 %4875  ;;  %v6988_v32 = vpop.f32.mrf.mxu1 }
 0x293   :  { %4687 = vperm.xlu1 %7364, %v9802_v48   ;;  %2609 = vmatpush1.msra.mxu0 %v1531_v6  ;;  %v1526_v55 = vld [vmem:[#allocation3 + $0x1138] sm:$0xff]  ;;  %12414 = vst [vmem:[#allocation147_spill] sm:$0xff] %v9809_v19  ;;  %v1625_v6 = vld [vmem:[#allocation3 + $0x1450] sm:$0xff] }
 0x294   :  { %2760 = vmatprep.subr.mxu1 %v1630_v3  ;;  %2610 = vmatprep.subr.mxu0 %v1530_v9  ;;  %v1624_v3 = vld [vmem:[#allocation3 + $0x1448] sm:$0xff]  ;;  %v1621_v19 = vld [vmem:[#allocation3 + $0x1430] sm:$0xff]  ;;  %v6990_v10 = vpop.f32.mrf.mxu1 }
 0x295   :  { %2761 = vmatpush1.msra.mxu1 %v1629_v46  ;;  %2611 = vmatpush1.msra.mxu0 %v1529_v4  ;;  %v1524_v9 = vld [vmem:[#allocation3 + $0x1128] sm:$0xff]  ;;  %v1623_v46 = vld [vmem:[#allocation3 + $0x1440] sm:$0xff] }
 0x296   :  { %2762 = vmatprep.subr.mxu1 %v1628_v25  ;;  %2612 = vmatprep.subr.mxu0 %v1528_v12  ;;  %v1523_v4 = vld [vmem:[#allocation3 + $0x1120] sm:$0xff]  ;;  %v9813_v25 = vpop.permute.xlu0 %5639  ;;  %v1622_v12 = vld [vmem:[#allocation3 + $0x1438] sm:$0xff]  ;;  %v6991_v57 = vpop.f32.mrf.mxu1 }
 0x297   :  { %2763 = vmatpush1.msra.mxu1 %v1627_v28  ;;  %7365 = vset.pattern.permute.xlu1 %v12377_v42  ;;  %12415 = vst [vmem:[#allocation148_spill] sm:$0xff] %v9813_v25  ;;  %v1522_v28 = vld [vmem:[#allocation3 + $0x1118] sm:$0xff]  ;;  %v1520_v25 = vld [vmem:[#allocation3 + $0x1108] sm:$0xff] }
 0x298   :  { %2613 = vmatpush1.msra.mxu0 %v1527_v27  ;;  %2764 = vmatprep.subr.mxu1 %v1626_v41  ;;  %v1521_v27 = vld [vmem:[#allocation3 + $0x1110] sm:$0xff]  ;;  %v9815_v41 = vpop.permute.xlu1 %4707  ;;  %v6993_v56 = vpop.f32.mrf.mxu1 }
 0x299   :  { %5015 = vperm.xlu1 %7365, %v9681_v47   ;;  %2614 = vmatprep.subr.mxu0 %v1526_v55  ;;  %12416 = vst [vmem:[#allocation149_spill] sm:$0xff] %v9815_v41  ;;  %v1620_v55 = vld [vmem:[#allocation3 + $0x1428] sm:$0xff]  ;;  %v1699_v41 = vld [vmem:[#allocation3 + $0x16a0] sm:$0xff] }
 0x29a   :  { %2765 = vmatpush1.msra.mxu1 %v1625_v6  ;;  %2615 = vmatpush1.msra.mxu0 %v1525_v33  ;;  %v1619_v33 = vld [vmem:[#allocation3 + $0x1420] sm:$0xff] }
 0x29b   :  { %2766 = vmatprep.subr.mxu1 %v1624_v3  ;;  %2616 = vmatprep.subr.mxu0 %v1524_v9  ;;  %v1519_v6 = vld [vmem:[#allocation3 + $0x1100] sm:$0xff]  ;;  %v1618_v3 = vld [vmem:[#allocation3 + $0x1418] sm:$0xff]  ;;  %v9820_v9 = vpop.permute.xlu0 %5627 }
 0x29c   :  { %2767 = vmatpush1.msra.mxu1 %v1623_v46  ;;  %2617 = vmatpush1.msra.mxu0 %v1523_v4  ;;  %12417 = vst [vmem:[#allocation150_spill] sm:$0xff] %v9820_v9  ;;  %v1582_v46 = vld [vmem:[#allocation3 + $0x12f8] sm:$0xff]  ;;  %v1617_v4 = vld [vmem:[#allocation3 + $0x1410] sm:$0xff]  ;;  %v1559_v9 = vld [vmem:[#allocation3 + $0x1240] sm:$0xff] }
 0x29d   :  { %2768 = vmatprep.subr.mxu1 %v1622_v12  ;;  %7366 = vset.pattern.permute.xlu1 %v12371_v26  ;;  %v1616_v12 = vld [vmem:[#allocation3 + $0x1408] sm:$0xff] }
 0x29e   :  { %2618 = vmatprep.subr.mxu0 %v1522_v28  ;;  %2769 = vmatpush1.msra.mxu1 %v1621_v19  ;;  %v1581_v19 = vld [vmem:[#allocation3 + $0x12f0] sm:$0xff]  ;;  %v9824_v28 = vpop.permute.xlu1 %4871 }
 0x29f   :  { %5179 = vperm.xlu1 %7366, %v9643_v60   ;;  %2619 = vmatpush1.msra.mxu0 %v1521_v27  ;;  %12418 = vst [vmem:[#allocation151_spill] sm:$0xff] %v9824_v28  ;;  %v6992_v60 = vadd.f32 %v6991_v57, %v6990_v10  ;;  %v1580_v27 = vld [vmem:[#allocation3 + $0x12e8] sm:$0xff]  ;;  %v1678_v10 = vld [vmem:[#allocation3 + $0x15f8] sm:$0xff]  ;;  %v1577_v57 = vld [vmem:[#allocation3 + $0x12d0] sm:$0xff] }
 0x2a0   :  { %2770 = vmatprep.subr.mxu1 %v1620_v55  ;;  %2620 = vmatprep.subr.mxu0 %v1520_v25  ;;  %v6989_v25 = vadd.f32 %v6988_v32, %v9807_v45  ;;  %v1579_v55 = vld [vmem:[#allocation3 + $0x12e0] sm:$0xff]  ;;  %v1578_v45 = vld [vmem:[#allocation3 + $0x12d8] sm:$0xff]  ;;  %v1613_v28 = vld [vmem:[#allocation3 + $0x13f0] sm:$0xff] }
 0x2a1   :  { %2771 = vmatpush1.msra.mxu1 %v1619_v33  ;;  %2621 = vmatpush1.msra.mxu0 %v1519_v6  ;;  %v9828_v33 = vpop.permute.xlu0 %5503  ;;  %v9833_v6 = vld [vmem:[%s12178_s4 + $0x60] sm:$0xff]  ;;  %v957_v32 = vadd.f32 %v6992_v60, %v9507_v13  ;;  %v1576_v13 = vld [vmem:[#allocation3 + $0x12c8] sm:$0xff] }
 0x2a2   :  { %2654 = vmatprep.mubr.f32.mxu0 %v12244_v17  ;;  %2772 = vmatprep.subr.mxu1 %v1618_v3  ;;  %12419 = vst [vmem:[#allocation152_spill] sm:$0xff] %v9828_v33  ;;  %v952_v3 = vadd.f32 %v6989_v25, %v9500_v21  ;;  %v1675_v60 = vld [vmem:[#allocation3 + $0x15e0] sm:$0xff]  ;;  %v1674_v25 = vld [vmem:[#allocation3 + $0x15d8] sm:$0xff] }
 0x2a3   :  { %2655 = vmatmul.mubr.f32.vlgmr.msra.gmra.mxu0 %v947_v7  ;;  %2667 = vmatprep.subr.mxu0 %v1582_v46  ;;  %v1677_v46 = vld [vmem:[#allocation3 + $0x15f0] sm:$0xff]  ;;  %v9840_v7 = vpop.permute.xlu1 %5199  ;;  %v1575_v21 = vld [vmem:[#allocation3 + $0x12c0] sm:$0xff] }
 0x2a4   :  { %2773 = vmatpush1.msra.mxu1 %v1617_v4  ;;  %7367 = vset.pattern.permute.xlu1 %v12389_v43  ;;  %12420 = vst [vmem:[#allocation153_spill] sm:$0xff] %v9840_v7  ;;  %v6994_v4 = vpop.f32.mrf.mxu1  ;;  %v1655_v7 = vld [vmem:[#allocation3 + $0x1540] sm:$0xff] }
 0x2a5   :  { %2668 = vmatpush1.msra.mxu0 %v1581_v19  ;;  %2774 = vmatprep.subr.mxu1 %v1616_v12  ;;  %v1676_v19 = vld [vmem:[#allocation3 + $0x15e8] sm:$0xff]  ;;  %v6995_v12 = vadd.f32 %v6994_v4, %v6993_v56  ;;  %v1574_v56 = vld [vmem:[#allocation3 + $0x12b8] sm:$0xff] }
 0x2a6   :  { %5507 = vperm.xlu1 %7367, %v9833_v6   ;;  %2669 = vmatprep.subr.mxu0 %v1580_v27  ;;  %v9842_v27 = vpop.permute.xlu0 %5491  ;;  %v1570_v4 = vld [vmem:[#allocation3 + $0x1298] sm:$0xff] }
 0x2a7   :  { %2775 = vmatpush1.msra.mxu1 %v1615_v14  ;;  %2808 = vmatprep.mubr.f32.mxu1 %v12244_v17  ;;  %12421 = vst [vmem:[#allocation154_spill] sm:$0xff] %v9842_v27  ;;  %v962_v14 = vadd.f32 %v6995_v12, %v9514_v53  ;;  %v1571_v53 = vld [vmem:[#allocation3 + $0x12a0] sm:$0xff]  ;;  %v1669_v12 = vld [vmem:[#allocation3 + $0x15b0] sm:$0xff] }
 0x2a8   :  { %2660 = vmatprep.mubr.f32.mxu0 %v12244_v17  ;;  %2670 = vmatpush1.msra.mxu0 %v1579_v55  ;;  %v1673_v55 = vld [vmem:[#allocation3 + $0x15d0] sm:$0xff]  ;;  %v1723_v27 = vld [vmem:[#allocation3 + $0x1760] sm:$0xff] }
 0x2a9   :  { %2809 = vmatmul.mubr.f32.vlgmr.msra.gmra.mxu1 %v957_v32  ;;  %2821 = vmatprep.subr.mxu1 %v1678_v10  ;;  %v9848_v10 = vpop.permute.xlu1 %4867  ;;  %v1573_v32 = vld [vmem:[#allocation3 + $0x12b0] sm:$0xff] }
 0x2aa   :  { %2661 = vmatmul.mubr.f32.gmra.mxu0 %v952_v3  ;;  %2671 = vmatprep.subr.mxu0 %v1578_v45  ;;  %12422 = vst [vmem:[#allocation155_spill] sm:$0xff] %v9848_v10  ;;  %v1572_v45 = vld [vmem:[#allocation3 + $0x12a8] sm:$0xff]  ;;  %v1671_v3 = vld [vmem:[#allocation3 + $0x15c0] sm:$0xff]  ;;  %v1593_v10 = vld [vmem:[#allocation3 + $0x1350] sm:$0xff] }
 0x2ab   :  { %2822 = vmatpush1.msra.mxu1 %v1677_v46  ;;  %2672 = vmatpush1.msra.mxu0 %v1577_v57  ;;  %v9851_v46 = vpop.permute.xlu0 %5479  ;;  %v1670_v57 = vld [vmem:[#allocation3 + $0x15b8] sm:$0xff] }
 0x2ac   :  { %2731 = vmatprep.mubr.f32.mxu0 %v9280_v18  ;;  %2823 = vmatprep.subr.mxu1 %v1676_v19  ;;  %v1672_v18 = vld [vmem:[#allocation3 + $0x15c8] sm:$0xff]  ;;  %12423 = vst [vmem:[#allocation156_spill] sm:$0xff] %v9851_v46  ;;  %v12424_v19 = vmov 15  }
 0x2ad   :  { %7368 = vset.pattern.permute.xlu1 %v12399_v29  ;;  %2673 = vmatprep.subr.mxu0 %v1576_v13  ;;  %v1569_v13 = vld [vmem:[#allocation3 + $0x1290] sm:$0xff] }
 0x2ae   :  { %2814 = vmatprep.mubr.f32.mxu1 %v12244_v17  ;;  %2824 = vmatpush1.msra.mxu1 %v1675_v60  ;;  %v9855_v60 = vpop.permute.xlu1 %5031 }
 0x2af   :  { %5671 = vperm.xlu1 %7368, %v9780_v24   ;;  %2674 = vmatpush1.msra.mxu0 %v1575_v21  ;;  %12425 = vst [vmem:[#allocation157_spill] sm:$0xff] %v9855_v60  ;;  %v1668_v21 = vld [vmem:[#allocation3 + $0x15a8] sm:$0xff] }
 0x2b0   :  { %2815 = vmatmul.mubr.f32.gmra.mxu1 %v962_v14  ;;  %2825 = vmatprep.subr.mxu1 %v1674_v25  ;;  %v1568_v25 = vld [vmem:[#allocation3 + $0x1288] sm:$0xff]  ;;  %v1667_v14 = vld [vmem:[#allocation3 + $0x15a0] sm:$0xff] }
 0x2b1   :  { %2675 = vmatprep.subr.mxu0 %v1574_v56  ;;  %2826 = vmatpush1.msra.mxu1 %v1673_v55  ;;  %v1567_v56 = vld [vmem:[#allocation3 + $0x1280] sm:$0xff]  ;;  %v1666_v55 = vld [vmem:[#allocation3 + $0x1598] sm:$0xff]  ;;  %v1704_v60 = vld [vmem:[#allocation3 + $0x16c8] sm:$0xff] }
 0x2b2   :  { %2885 = vmatprep.mubr.f32.mxu1 %v9326_v35  ;;  %2676 = vmatpush1.msra.mxu0 %v1573_v32  ;;  %v7585_v35 = vld [vmem:[%s12178_s4 + $0x78] sm:$0xff]  ;;  %v9860_v32 = vpop.permute.xlu0 %5471 }
 0x2b3   :  { %2827 = vmatprep.subr.mxu1 %v1672_v18  ;;  %2677 = vmatprep.subr.mxu0 %v1572_v45  ;;  %12426 = vst [vmem:[#allocation158_spill] sm:$0xff] %v9860_v32  ;;  %v1566_v18 = vld [vmem:[#allocation3 + $0x1278] sm:$0xff]  ;;  %v1665_v45 = vld [vmem:[#allocation3 + $0x1590] sm:$0xff] }
 0x2b4   :  { %2828 = vmatpush1.msra.mxu1 %v1671_v3  ;;  %7369 = vset.pattern.permute.xlu1 %v12424_v19  ;;  %v1565_v3 = vld [vmem:[#allocation3 + $0x1270] sm:$0xff]  ;;  %v1714_v32 = vld [vmem:[#allocation3 + $0x1718] sm:$0xff] }
 0x2b5   :  { %2678 = vmatpush1.msra.mxu0 %v1571_v53  ;;  %2829 = vmatprep.subr.mxu1 %v1670_v57  ;;  %v1664_v53 = vld [vmem:[#allocation3 + $0x1588] sm:$0xff] }
 0x2b6   :  { %5999 = vperm.xlu1 %7369, %v7585_v35   ;;  %2679 = vmatprep.subr.mxu0 %v1570_v4  ;;  %v1564_v57 = vld [vmem:[#allocation3 + $0x1268] sm:$0xff]  ;;  %v9863_v4 = vpop.permute.xlu1 %5359  ;;  %v1661_v35 = vld [vmem:[#allocation3 + $0x1570] sm:$0xff] }
 0x2b7   :  { %2830 = vmatpush1.msra.mxu1 %v1669_v12  ;;  %2680 = vmatpush1.msra.mxu0 %v1569_v13  ;;  %12427 = vst [vmem:[#allocation159_spill] sm:$0xff] %v9863_v4  ;;  %v1663_v12 = vld [vmem:[#allocation3 + $0x1580] sm:$0xff]  ;;  %v1649_v4 = vld [vmem:[#allocation3 + $0x1510] sm:$0xff] }
 0x2b8   :  { %2831 = vmatprep.subr.mxu1 %v1668_v21  ;;  %2681 = vmatprep.subr.mxu0 %v1568_v25  ;;  %v1563_v13 = vld [vmem:[#allocation3 + $0x1260] sm:$0xff]  ;;  %v1662_v21 = vld [vmem:[#allocation3 + $0x1578] sm:$0xff] }
 0x2b9   :  { %2832 = vmatpush1.msra.mxu1 %v1667_v14  ;;  %2682 = vmatpush1.msra.mxu0 %v1567_v56  ;;  %v1562_v25 = vld [vmem:[#allocation3 + $0x1258] sm:$0xff]  ;;  %v9866_v14 = vpop.permute.xlu0 %5467  ;;  %v1561_v56 = vld [vmem:[#allocation3 + $0x1250] sm:$0xff] }
 0x2ba   :  { %2833 = vmatprep.subr.mxu1 %v1666_v55  ;;  %7370 = vset.pattern.permute.xlu1 %v12365_v50  ;;  %12428 = vst [vmem:[#allocation160_spill] sm:$0xff] %v9866_v14  ;;  %v1660_v55 = vld [vmem:[#allocation3 + $0x1568] sm:$0xff] }
 0x2bb   :  { %2683 = vmatprep.subr.mxu0 %v1566_v18  ;;  %2834 = vmatpush1.msra.mxu1 %v1665_v45  ;;  %v1560_v18 = vld [vmem:[#allocation3 + $0x1248] sm:$0xff]  ;;  %v1659_v45 = vld [vmem:[#allocation3 + $0x1560] sm:$0xff] }
 0x2bc   :  { %4847 = vperm.xlu1 %7370, %v9802_v48   ;;  %2684 = vmatpush1.msra.mxu0 %v1565_v3  ;;  %v9869_v3 = vpop.permute.xlu1 %4699 }
 0x2bd   :  { %2835 = vmatprep.subr.mxu1 %v1664_v53  ;;  %2685 = vmatprep.subr.mxu0 %v1564_v57  ;;  %12429 = vst [vmem:[#allocation161_spill] sm:$0xff] %v9869_v3  ;;  %v1658_v53 = vld [vmem:[#allocation3 + $0x1558] sm:$0xff] }
 0x2be   :  { %2836 = vmatpush1.msra.mxu1 %v1663_v12  ;;  %2686 = vmatpush1.msra.mxu0 %v1563_v13  ;;  %v1558_v57 = vld [vmem:[#allocation3 + $0x1238] sm:$0xff]  ;;  %v1657_v12 = vld [vmem:[#allocation3 + $0x1550] sm:$0xff] }
 0x2bf   :  { %2837 = vmatprep.subr.mxu1 %v1662_v21  ;;  %2687 = vmatprep.subr.mxu0 %v1562_v25  ;;  %v1557_v13 = vld [vmem:[#allocation3 + $0x1230] sm:$0xff]  ;;  %v1656_v21 = vld [vmem:[#allocation3 + $0x1548] sm:$0xff]  ;;  %v9872_v25 = vpop.permute.xlu0 %5459 }
 0x2c0   :  { %2838 = vmatpush1.msra.mxu1 %v1661_v35  ;;  %7371 = vset.pattern.permute.xlu1 %v12371_v26  ;;  %12430 = vst [vmem:[#allocation162_spill] sm:$0xff] %v9872_v25  ;;  %v1556_v35 = vld [vmem:[#allocation3 + $0x1228] sm:$0xff]  ;;  %v1614_v25 = vld [vmem:[#allocation3 + $0x13f8] sm:$0xff] }
 0x2c1   :  { %2688 = vmatpush1.msra.mxu0 %v1561_v56  ;;  %2839 = vmatprep.subr.mxu1 %v1660_v55  ;;  %v1555_v56 = vld [vmem:[#allocation3 + $0x1220] sm:$0xff]  ;;  %v1654_v55 = vld [vmem:[#allocation3 + $0x1538] sm:$0xff] }
 0x2c2   :  { %5175 = vperm.xlu1 %7371, %v9681_v47   ;;  %2689 = vmatprep.subr.mxu0 %v1560_v18  ;;  %v1554_v47 = vld [vmem:[#allocation3 + $0x1218] sm:$0xff]  ;;  %v9875_v18 = vpop.permute.xlu1 %5027 }
 0x2c3   :  { %2840 = vmatpush1.msra.mxu1 %v1659_v45  ;;  %2690 = vmatpush1.msra.mxu0 %v1559_v9  ;;  %12431 = vst [vmem:[#allocation163_spill] sm:$0xff] %v9875_v18  ;;  %v1653_v9 = vld [vmem:[#allocation3 + $0x1530] sm:$0xff]  ;;  %v1694_v18 = vld [vmem:[#allocation3 + $0x1678] sm:$0xff] }
 0x2c4   :  { %2841 = vmatprep.subr.mxu1 %v1658_v53  ;;  %2691 = vmatprep.subr.mxu0 %v1558_v57  ;;  %v1553_v45 = vld [vmem:[#allocation3 + $0x1210] sm:$0xff]  ;;  %v1652_v57 = vld [vmem:[#allocation3 + $0x1528] sm:$0xff] }
 0x2c5   :  { %2842 = vmatpush1.msra.mxu1 %v1657_v12  ;;  %2692 = vmatpush1.msra.mxu0 %v1557_v13  ;;  %v9880_v53 = vld [vmem:[%s12178_s4 + $0x50] sm:$0xff]  ;;  %v1651_v13 = vld [vmem:[#allocation3 + $0x1520] sm:$0xff] }
 0x2c6   :  { %2843 = vmatprep.subr.mxu1 %v1656_v21  ;;  %7372 = vset.pattern.permute.xlu1 %v12380_v36  ;;  %v1552_v12 = vld [vmem:[#allocation3 + $0x1208] sm:$0xff]  ;;  %v9883_v21 = vpop.permute.xlu0 %5995 }
 0x2c7   :  { %2693 = vmatprep.subr.mxu0 %v1556_v35  ;;  %2844 = vmatpush1.msra.mxu1 %v1655_v7  ;;  %12432 = vst [vmem:[#allocation164_spill] sm:$0xff] %v9883_v21  ;;  %v1551_v7 = vld [vmem:[#allocation3 + $0x1200] sm:$0xff]  ;;  %v1650_v35 = vld [vmem:[#allocation3 + $0x1518] sm:$0xff]  ;;  %v1709_v21 = vld [vmem:[#allocation3 + $0x16f0] sm:$0xff] }
 0x2c8   :  { %5339 = vperm.xlu1 %7372, %v9880_v53   ;;  %2694 = vmatpush1.msra.mxu0 %v1555_v56  ;;  %v9886_v56 = vpop.permute.xlu1 %5191 }
 0x2c9   :  { %2845 = vmatprep.subr.mxu1 %v1654_v55  ;;  %2695 = vmatprep.subr.mxu0 %v1554_v47  ;;  %12433 = vst [vmem:[#allocation165_spill] sm:$0xff] %v9886_v56  ;;  %v1648_v55 = vld [vmem:[#allocation3 + $0x1508] sm:$0xff] }
 0x2ca   :  { %2846 = vmatpush1.msra.mxu1 %v1653_v9  ;;  %2696 = vmatpush1.msra.mxu0 %v1553_v45  ;;  %v1612_v47 = vld [vmem:[#allocation3 + $0x13e8] sm:$0xff]  ;;  %v1647_v9 = vld [vmem:[#allocation3 + $0x1500] sm:$0xff] }
 0x2cb   :  { %2847 = vmatprep.subr.mxu1 %v1652_v57  ;;  %2697 = vmatprep.subr.mxu0 %v1552_v12  ;;  %v1611_v45 = vld [vmem:[#allocation3 + $0x13e0] sm:$0xff]  ;;  %v1710_v57 = vld [vmem:[#allocation3 + $0x16f8] sm:$0xff]  ;;  %v9889_v12 = vpop.permute.xlu0 %5983  ;;  %v1608_v56 = vld [vmem:[#allocation3 + $0x13c8] sm:$0xff] }
 0x2cc   :  { %2848 = vmatpush1.msra.mxu1 %v1651_v13  ;;  %7373 = vset.pattern.permute.xlu1 %v12399_v29  ;;  %12434 = vst [vmem:[#allocation166_spill] sm:$0xff] %v9889_v12  ;;  %v1610_v13 = vld [vmem:[#allocation3 + $0x13d8] sm:$0xff] }
 0x2cd   :  { %2698 = vmatpush1.msra.mxu0 %v1551_v7  ;;  %2849 = vmatprep.subr.mxu1 %v1650_v35  ;;  %v1609_v7 = vld [vmem:[#allocation3 + $0x13d0] sm:$0xff]  ;;  %v1708_v35 = vld [vmem:[#allocation3 + $0x16e8] sm:$0xff] }
 0x2ce   :  { %5667 = vperm.xlu1 %7373, %v9833_v6   ;;  %2699 = vmatprep.subr.mxu0 %v1614_v25  ;;  %v9892_v25 = vpop.permute.xlu1 %5519 }
 0x2cf   :  { %2850 = vmatpush1.msra.mxu1 %v1649_v4  ;;  %2700 = vmatpush2.msra.mxu0 %v1613_v28  ;;  %12435 = vst [vmem:[#allocation167_spill] sm:$0xff] %v9892_v25  ;;  %v1707_v28 = vld [vmem:[#allocation3 + $0x16e0] sm:$0xff] }
 0x2d0   :  { %2851 = vmatprep.subr.mxu1 %v1648_v55  ;;  %2701 = vmatprep.subr.mxu0 %v1612_v47  ;;  %v1607_v4 = vld [vmem:[#allocation3 + $0x13c0] sm:$0xff]  ;;  %v1706_v55 = vld [vmem:[#allocation3 + $0x16d8] sm:$0xff] }
 0x2d1   :  { %2852 = vmatpush1.msra.mxu1 %v1647_v9  ;;  %2702 = vmatpush2.msra.mxu0 %v1611_v45  ;;  %v1606_v47 = vld [vmem:[#allocation3 + $0x13b8] sm:$0xff]  ;;  %v1705_v9 = vld [vmem:[#allocation3 + $0x16d0] sm:$0xff]  ;;  %v9895_v45 = vpop.permute.xlu0 %5971  ;;  %v1603_v25 = vld [vmem:[#allocation3 + $0x13a0] sm:$0xff] }
 0x2d2   :  { %2853 = vmatprep.subr.mxu1 %v1710_v57  ;;  %7374 = vset.pattern.permute.xlu1 %v12409_v16  ;;  %12436 = vst [vmem:[#allocation168_spill] sm:$0xff] %v9895_v45  ;;  %v1605_v57 = vld [vmem:[#allocation3 + $0x13b0] sm:$0xff] }
 0x2d3   :  { %2703 = vmatprep.subr.mxu0 %v1610_v13  ;;  %2854 = vmatpush2.msra.mxu1 %v1709_v21  ;;  %v1604_v13 = vld [vmem:[#allocation3 + $0x13a8] sm:$0xff]  ;;  %v1703_v21 = vld [vmem:[#allocation3 + $0x16c0] sm:$0xff] }
 0x2d4   :  { %5831 = vperm.xlu1 %7374, %v9780_v24   ;;  %2704 = vmatpush2.msra.mxu0 %v1609_v7  ;;  %v9898_v7 = vpop.permute.xlu1 %4695 }
 0x2d5   :  { %2855 = vmatprep.subr.mxu1 %v1708_v35  ;;  %2705 = vmatprep.subr.mxu0 %v1608_v56  ;;  %12437 = vst [vmem:[#allocation169_spill] sm:$0xff] %v9898_v7  ;;  %v1702_v56 = vld [vmem:[#allocation3 + $0x16b8] sm:$0xff] }
 0x2d6   :  { %2856 = vmatpush2.msra.mxu1 %v1707_v28  ;;  %2706 = vmatpush2.msra.mxu0 %v1607_v4  ;;  %v1602_v35 = vld [vmem:[#allocation3 + $0x1398] sm:$0xff]  ;;  %v1701_v28 = vld [vmem:[#allocation3 + $0x16b0] sm:$0xff] }
 0x2d7   :  { %2857 = vmatprep.subr.mxu1 %v1706_v55  ;;  %2707 = vmatprep.subr.mxu0 %v1606_v47  ;;  %v1601_v4 = vld [vmem:[#allocation3 + $0x1390] sm:$0xff]  ;;  %v1700_v55 = vld [vmem:[#allocation3 + $0x16a8] sm:$0xff]  ;;  %v9901_v47 = vpop.permute.xlu0 %5963 }
 0x2d8   :  { %2858 = vmatpush2.msra.mxu1 %v1705_v9  ;;  %7375 = vset.pattern.permute.xlu1 %v12365_v50  ;;  %12438 = vst [vmem:[#allocation170_spill] sm:$0xff] %v9901_v47  ;;  %v1600_v9 = vld [vmem:[#allocation3 + $0x1388] sm:$0xff] }
 0x2d9   :  { %2708 = vmatpush2.msra.mxu0 %v1605_v57  ;;  %2859 = vmatprep.subr.mxu1 %v1704_v60  ;;  %v1599_v57 = vld [vmem:[#allocation3 + $0x1380] sm:$0xff]  ;;  %v1698_v60 = vld [vmem:[#allocation3 + $0x1698] sm:$0xff] }
 0x2da   :  { %4843 = vperm.xlu1 %7375, %v9746_v51   ;;  %2709 = vmatprep.subr.mxu0 %v1604_v13  ;;  %v1598_v51 = vld [vmem:[#allocation3 + $0x1378] sm:$0xff]  ;;  %v9904_v13 = vpop.permute.xlu1 %5023 }
 0x2db   :  { %2860 = vmatpush2.msra.mxu1 %v1703_v21  ;;  %2710 = vmatpush2.msra.mxu0 %v1603_v25  ;;  %12439 = vst [vmem:[#allocation171_spill] sm:$0xff] %v9904_v13  ;;  %v1697_v25 = vld [vmem:[#allocation3 + $0x1690] sm:$0xff]  ;;  %v1588_v13 = vld [vmem:[#allocation3 + $0x1328] sm:$0xff] }
 0x2dc   :  { %2861 = vmatprep.subr.mxu1 %v1702_v56  ;;  %2711 = vmatprep.subr.mxu0 %v1602_v35  ;;  %v1597_v21 = vld [vmem:[#allocation3 + $0x1370] sm:$0xff]  ;;  %v1696_v56 = vld [vmem:[#allocation3 + $0x1688] sm:$0xff] }
 0x2dd   :  { %2862 = vmatpush2.msra.mxu1 %v1701_v28  ;;  %2712 = vmatpush2.msra.mxu0 %v1601_v4  ;;  %v1596_v35 = vld [vmem:[#allocation3 + $0x1368] sm:$0xff]  ;;  %v1695_v28 = vld [vmem:[#allocation3 + $0x1680] sm:$0xff]  ;;  %v9907_v4 = vpop.permute.xlu0 %5959 }
 0x2de   :  { %2863 = vmatprep.subr.mxu1 %v1700_v55  ;;  %7376 = vset.pattern.permute.xlu1 %v12377_v42  ;;  %12440 = vst [vmem:[#allocation172_spill] sm:$0xff] %v9907_v4  ;;  %v1595_v55 = vld [vmem:[#allocation3 + $0x1360] sm:$0xff]  ;;  %v9912_v12 = vpop.permute.xlu1 %5187 }
 0x2df   :  { %2713 = vmatprep.subr.mxu0 %v1600_v9  ;;  %2864 = vmatpush2.msra.mxu1 %v1699_v41  ;;  %v1594_v9 = vld [vmem:[#allocation3 + $0x1358] sm:$0xff]  ;;  %v9909_v41 = vpop.f32.mrf.mxu1  ;;  %12441 = vst [vmem:[#allocation173_spill] sm:$0xff] %v9912_v12  ;;  %v1589_v12 = vld [vmem:[#allocation3 + $0x1330] sm:$0xff] }
 0x2e0   :  { %5007 = vperm.xlu1 %7376, %v9802_v48   ;;  %2714 = vmatpush2.msra.mxu0 %v1599_v57  ;;  %v1693_v57 = vld [vmem:[#allocation3 + $0x1670] sm:$0xff] }
 0x2e1   :  { %2865 = vmatprep.subr.mxu1 %v1698_v60  ;;  %2715 = vmatprep.subr.mxu0 %v1598_v51  ;;  %v1692_v60 = vld [vmem:[#allocation3 + $0x1668] sm:$0xff]  ;;  %v9922_v4 = vpop.permute.xlu0 %5951 }
 0x2e2   :  { %2866 = vmatpush2.msra.mxu1 %v1697_v25  ;;  %2716 = vmatpush2.msra.mxu0 %v1597_v21  ;;  %v1592_v51 = vld [vmem:[#allocation3 + $0x1348] sm:$0xff]  ;;  %v1691_v21 = vld [vmem:[#allocation3 + $0x1660] sm:$0xff]  ;;  %12442 = vst [vmem:[#allocation174_spill] sm:$0xff] %v9922_v4  ;;  %v9925_v33 = vpop.permute.xlu1 %5515 }
 0x2e3   :  { %2867 = vmatprep.subr.mxu1 %v1696_v56  ;;  %2717 = vmatprep.subr.mxu0 %v1596_v35  ;;  %v9917_v25 = vld [vmem:[%s12178_s4 + $0x48] sm:$0xff]  ;;  %v1690_v35 = vld [vmem:[#allocation3 + $0x1658] sm:$0xff]  ;;  %12443 = vst [vmem:[#allocation175_spill] sm:$0xff] %v9925_v33 }
 0x2e4   :  { %2868 = vmatpush2.msra.mxu1 %v1695_v28  ;;  %7377 = vset.pattern.permute.xlu1 %v12380_v36  ;;  %v1591_v56 = vld [vmem:[#allocation3 + $0x1340] sm:$0xff]  ;;  %v9920_v28 = vpop.f32.mrf.mxu1  ;;  %v1684_v4 = vld [vmem:[#allocation3 + $0x1628] sm:$0xff] }
 0x2e5   :  { %2718 = vmatpush2.msra.mxu0 %v1595_v55  ;;  %2869 = vmatprep.subr.mxu1 %v1694_v18  ;;  %v1590_v18 = vld [vmem:[#allocation3 + $0x1338] sm:$0xff]  ;;  %v1689_v55 = vld [vmem:[#allocation3 + $0x1650] sm:$0xff]  ;;  %v1583_v33 = vld [vmem:[#allocation3 + $0x1300] sm:$0xff] }
 0x2e6   :  { %5335 = vperm.xlu1 %7377, %v9917_v25   ;;  %2719 = vmatprep.subr.mxu0 %v1594_v9  ;;  %v1688_v9 = vld [vmem:[#allocation3 + $0x1648] sm:$0xff]  ;;  %v9927_v3 = vpop.f32.mrf.mxu1  ;;  %v9935_v7 = vpop.permute.xlu1 %5679 }
 0x2e7   :  { %2870 = vmatpush2.msra.mxu1 %v1693_v57  ;;  %2720 = vmatpush2.msra.mxu0 %v1593_v10  ;;  %v1687_v10 = vld [vmem:[#allocation3 + $0x1640] sm:$0xff]  ;;  %12445 = vst [vmem:[#allocation177_spill] sm:$0xff] %v9935_v7 }
 0x2e8   :  { %2871 = vmatprep.subr.mxu1 %v1692_v60  ;;  %2721 = vmatprep.subr.mxu0 %v1592_v51  ;;  %v1587_v57 = vld [vmem:[#allocation3 + $0x1320] sm:$0xff]  ;;  %v1686_v60 = vld [vmem:[#allocation3 + $0x1638] sm:$0xff] }
 0x2e9   :  { %2872 = vmatpush2.msra.mxu1 %v1691_v21  ;;  %2722 = vmatpush2.msra.mxu0 %v1591_v56  ;;  %v1586_v51 = vld [vmem:[#allocation3 + $0x1318] sm:$0xff]  ;;  %v1685_v21 = vld [vmem:[#allocation3 + $0x1630] sm:$0xff]  ;;  %v9930_v56 = vpop.permute.xlu0 %5947 }
 0x2ea   :  { %2873 = vmatprep.subr.mxu1 %v1690_v35  ;;  %7378 = vset.pattern.permute.xlu1 %v12389_v43  ;;  %12444 = vst [vmem:[#allocation176_spill] sm:$0xff] %v9930_v56  ;;  %v1585_v35 = vld [vmem:[#allocation3 + $0x1310] sm:$0xff]  ;;  %v1740_v56 = vld [vmem:[#allocation3 + $0x17e8] sm:$0xff] }
 0x2eb   :  { %2723 = vmatprep.subr.mxu0 %v1590_v18  ;;  %2874 = vmatpush2.msra.mxu1 %v1689_v55  ;;  %v1584_v18 = vld [vmem:[#allocation3 + $0x1308] sm:$0xff]  ;;  %v9932_v55 = vpop.f32.mrf.mxu1 }
 0x2ec   :  { %5499 = vperm.xlu1 %7378, %v9880_v53   ;;  %2724 = vmatpush2.msra.mxu0 %v1589_v12  ;;  %v1683_v12 = vld [vmem:[#allocation3 + $0x1620] sm:$0xff] }
 0x2ed   :  { %2875 = vmatprep.subr.mxu1 %v1688_v9  ;;  %2725 = vmatprep.subr.mxu0 %v1588_v13  ;;  %v1682_v13 = vld [vmem:[#allocation3 + $0x1618] sm:$0xff]  ;;  %v9937_v9 = vpop.f32.mrf.mxu0 }
 0x2ee   :  { %2876 = vmatpush2.msra.mxu1 %v1687_v10  ;;  %2726 = vmatpush2.msra.mxu0 %v1587_v57  ;;  %v1681_v10 = vld [vmem:[#allocation3 + $0x1610] sm:$0xff]  ;;  %v1742_v57 = vld [vmem:[#allocation3 + $0x17f8] sm:$0xff] }
 0x2ef   :  { %2877 = vmatprep.subr.mxu1 %v1686_v60  ;;  %2727 = vmatprep.subr.mxu0 %v1586_v51  ;;  %v1680_v60 = vld [vmem:[#allocation3 + $0x1608] sm:$0xff]  ;;  %v9940_v51 = vpop.f32.mrf.mxu1  ;;  %v1888_v7 = vpop.f32.mrf.mxu0 }
 0x2f0   :  { %2878 = vmatpush2.msra.mxu1 %v1685_v21  ;;  %7379 = vset.pattern.permute.xlu1 %v12409_v16  ;;  %v9942_v21 = vpop.permute.xlu0 %5943 }
 0x2f1   :  { %2728 = vmatpush2.msra.mxu0 %v1585_v35  ;;  %2879 = vmatprep.subr.mxu1 %v1684_v4  ;;  %12446 = vst [vmem:[#allocation178_spill] sm:$0xff] %v9942_v21  ;;  %v1741_v35 = vld [vmem:[#allocation3 + $0x17f0] sm:$0xff]  ;;  %v1679_v4 = vld [vmem:[#allocation3 + $0x1600] sm:$0xff] }
 0x2f2   :  { %5827 = vperm.xlu1 %7379, %v9833_v6   ;;  %2729 = vmatprep.subr.mxu0 %v1584_v18  ;;  %v9946_v18 = vpop.permute.xlu1 %4855 }
 0x2f3   :  { %2880 = vmatpush2.msra.mxu1 %v1683_v12  ;;  %2730 = vmatpush2.msra.mxu0 %v1583_v33  ;;  %12447 = vst [vmem:[#allocation179_spill] sm:$0xff] %v9946_v18  ;;  %v1739_v33 = vld [vmem:[#allocation3 + $0x17e0] sm:$0xff]  ;;  %v1811_v12 = vpop.f32.mrf.mxu1 }
 0x2f4   :  { %2881 = vmatprep.subr.mxu1 %v1682_v13  ;;  %2732 = vmatmul.mubr.f32.vlgmr.msra.gmra.mxu0 %v9269_v52  ;;  %v1738_v13 = vld [vmem:[#allocation3 + $0x17d8] sm:$0xff]  ;;  %v1889_v52 = vadd.f32 %v1888_v7, %v1811_v12 }
 0x2f5   :  { %2882 = vmatpush2.msra.mxu1 %v1681_v10  ;;  %2898 = vmatprep.subr.mxu0 %v1742_v57  ;;  %v1737_v10 = vld [vmem:[#allocation3 + $0x17d0] sm:$0xff]  ;;  %v9951_v57 = vpop.permute.xlu0 %2993 }
 0x2f6   :  { %2737 = vmatprep.mubr.f32.mxu0 %v9302_v58  ;;  %2883 = vmatprep.subr.mxu1 %v1680_v60  ;;  %v1736_v58 = vld [vmem:[#allocation3 + $0x17c8] sm:$0xff]  ;;  %v1735_v60 = vld [vmem:[#allocation3 + $0x17c0] sm:$0xff]  ;;  %v9963_v7 = vadd.f32 %v9951_v57, %v1889_v52 }
 0x2f7   :  { %2899 = vmatpush1.msra.mxu0 %v1741_v35  ;;  %7380 = vset.pattern.permute.xlu1 %v12424_v19  ;;  %v9955_v35 = vpop.f32.mrf.mxu0 }
 0x2f8   :  { %2884 = vmatpush2.msra.mxu1 %v1679_v4  ;;  %2900 = vmatprep.subr.mxu0 %v1740_v56  ;;  %v1734_v56 = vld [vmem:[#allocation3 + $0x17b8] sm:$0xff]  ;;  %v9970_v4 = vld [vmem:[%s12178_s4 + $0x30] sm:$0xff]  ;;  %vm3104_vm1 = vcmp.gt.f32.partialorder %v9963_v7, 0.0 }
 0x2f9   :  { %5991 = vperm.xlu1 %7380, %v9780_v24   ;;  %2886 = vmatmul.mubr.f32.vlgmr.msra.gmra.mxu1 %v9323_v15  ;;  %v9958_v24 = vpop.permute.xlu1 %5019  ;;  %v9960_v15 = vpop.f32.mrf.mxu1 }
 0x2fa   :  { %2901 = vmatpush1.msra.mxu0 %v1739_v33  ;;  %2891 = vmatprep.mubr.f32.mxu1 %v9340_v11  ;;  %12448 = vst [vmem:[#allocation180_spill] sm:$0xff] %v9958_v24  ;;  %v1733_v11 = vld [vmem:[#allocation3 + $0x17b0] sm:$0xff]  ;;  %v1731_v33 = vld [vmem:[#allocation3 + $0x17a0] sm:$0xff]  ;;  %v9973_v12 = vpop.f32.mrf.mxu0 }
 0x2fb   :  { %2738 = vmatmul.mubr.f32.gmra.mxu0 %v9292_v2  ;;  %2902 = vmatprep.subr.mxu0 %v1738_v13  ;;  %v1732_v2 = vld [vmem:[#allocation3 + $0x17a8] sm:$0xff]  ;;  %v1730_v13 = vld [vmem:[#allocation3 + $0x1798] sm:$0xff]  ;;  %v9975_v52 = vpop.f32.mrf.mxu1 }
 0x2fc   :  { %2903 = vmatpush1.msra.mxu0 %v1737_v10  ;;  %2962 = vmatprep.mubr.f32.mxu0 %v12244_v17  ;;  %v3136_v10 = vmin.f32 %v9963_v7, 0.0 }
 0x2fd   :  { %2904 = vmatprep.subr.mxu0 %v1736_v58  ;;  %7381 = vset.pattern.permute.xlu1 %v12377_v42  ;;  %v9978_v58 = vpop.f32.mrf.mxu0  ;;  %v9980_v21 = vpop.permute.xlu1 %5347 }
 0x2fe   :  { %2892 = vmatmul.mubr.f32.gmra.mxu1 %v9336_v34  ;;  %2905 = vmatpush1.msra.mxu0 %v1735_v60  ;;  %v1729_v34 = vld [vmem:[#allocation3 + $0x1790] sm:$0xff]  ;;  %v1728_v60 = vld [vmem:[#allocation3 + $0x1788] sm:$0xff]  ;;  %12449 = vst [vmem:[#allocation181_spill] sm:$0xff] %v9980_v21  ;;  %v9983_v24 = vpop.f32.mrf.mxu1  ;;  %v3169_v18 = vmul.f32 1.442695, %v3136_v10 }
 0x2ff   :  { %5003 = vperm.xlu1 %7381, %v9970_v4   ;;  %2906 = vmatprep.subr.mxu0 %v1734_v56  ;;  %v1727_v56 = vld [vmem:[#allocation3 + $0x1780] sm:$0xff]  ;;  %v9986_v45 = vpop.f32.mrf.mxu0 }
 0x300   :  { %2907 = vmatpush1.msra.mxu0 %v1733_v11  ;;  %v1726_v11 = vld [vmem:[#allocation3 + $0x1778] sm:$0xff]  ;;  %v1965_v21 = vpop.f32.mrf.mxu1  ;;  %7439 = vpow2.f32 %v3169_v18  ;;  %v1716_v18 = vld [vmem:[#allocation3 + $0x1728] sm:$0xff] }
 0x301   :  { %2908 = vmatprep.subr.mxu0 %v1732_v2  ;;  %v1725_v2 = vld [vmem:[#allocation3 + $0x1770] sm:$0xff]  ;;  %v9989_v47 = vpop.permute.xlu1 %5511  ;;  %v9992_v10 = vpop.f32.mrf.mxu0 }
 0x302   :  { %2909 = vmatpush1.msra.mxu0 %v1731_v33  ;;  %v1724_v33 = vld [vmem:[#allocation3 + $0x1768] sm:$0xff]  ;;  %12450 = vst [vmem:[#allocation182_spill] sm:$0xff] %v9989_v47 }
 0x303   :  { %7382 = vset.pattern.permute.xlu1 %v12371_v26  ;;  %2910 = vmatprep.subr.mxu0 %v1730_v13  ;;  %v1722_v13 = vld [vmem:[#allocation3 + $0x1758] sm:$0xff]  ;;  %v2048_v47 = vpop.f32.mrf.mxu0 }
 0x304   :  { %5167 = vperm.xlu1 %7382, %v9802_v48   ;;  %2911 = vmatpush1.msra.mxu0 %v1729_v34  ;;  %v1721_v48 = vld [vmem:[#allocation3 + $0x1750] sm:$0xff]  ;;  %v1720_v34 = vld [vmem:[#allocation3 + $0x1748] sm:$0xff] }
 0x305   :  { %2912 = vmatprep.subr.mxu0 %v1728_v60  ;;  %v1719_v60 = vld [vmem:[#allocation3 + $0x1740] sm:$0xff] }
 0x306   :  { %2913 = vmatpush1.msra.mxu0 %v1727_v56  ;;  %v9994_v56 = vpop.f32.mrf.mxu1 }
 0x307   :  { %2914 = vmatprep.subr.mxu0 %v1726_v11  ;;  %v1718_v11 = vld [vmem:[#allocation3 + $0x1738] sm:$0xff] }
 0x308   :  { %7383 = vset.pattern.permute.xlu1 %v12389_v43  ;;  %2915 = vmatpush1.msra.mxu0 %v1725_v2  ;;  %v1717_v2 = vld [vmem:[#allocation3 + $0x1730] sm:$0xff]  ;;  %v1971_v46 = vpop.f32.mrf.mxu1 }
 0x309   :  { %5495 = vperm.xlu1 %7383, %v9917_v25   ;;  %2916 = vmatprep.subr.mxu0 %v1724_v33  ;;  %v9998_v33 = vpop.permute.xlu1 %5839 }
 0x30a   :  { %2917 = vmatpush1.msra.mxu0 %v1723_v27  ;;  %12451 = vst [vmem:[#allocation183_spill] sm:$0xff] %v9998_v33  ;;  %v1715_v27 = vld [vmem:[#allocation3 + $0x1720] sm:$0xff]  ;;  %v10004_v1 = vpop.f32.mrf.mxu1 }
 0x30b   :  { %2918 = vmatprep.subr.mxu0 %v1722_v13  ;;  %v10000_v13 = vpop.f32.mrf.mxu0  ;;  %v1711_v33 = vld [vmem:[#allocation3 + $0x1700] sm:$0xff] }
 0x30c   :  { %2919 = vmatpush1.msra.mxu0 %v1721_v48  ;;  %v6998_v48 = vadd.f32 %v9920_v28, %v9909_v41  ;;  %v1895_v28 = vadd.f32 %v9973_v12, %v9975_v52  ;;  %v1893_v12 = vadd.f32 %v9955_v35, %v9960_v15  ;;  %v3309_v35 = vld [vmem:[%s12179_s5 + $0x70] sm:$0xff] }
 0x30d   :  { %7384 = vset.pattern.permute.xlu1 %v12399_v29  ;;  %2920 = vmatprep.subr.mxu0 %v1720_v34  ;;  %v1713_v34 = vld [vmem:[#allocation3 + $0x1710] sm:$0xff] }
 0x30e   :  { %5659 = vperm.xlu1 %7384, %v9880_v53   ;;  %2921 = vmatpush1.msra.mxu0 %v1719_v60  ;;  %v1712_v60 = vld [vmem:[#allocation3 + $0x1708] sm:$0xff]  ;;  %v10012_v14 = vpop.permute.xlu1 %4687  ;;  %v967_v41 = vadd.f32 %v6998_v48, %v9523_v30 }
 0x30f   :  { %2922 = vmatprep.subr.mxu0 %v1718_v11  ;;  %v1887_v11 = vadd.f32 %v9937_v9, %v9940_v51  ;;  %12452 = vst [vmem:[#allocation184_spill] sm:$0xff] %v10012_v14  ;;  %v7440_v9 = vpop.eup %7439  ;;  %v2196_v51 = vpop.f32.mrf.mxu1 }
 0x310   :  { %2923 = vmatpush1.msra.mxu0 %v1717_v2  ;;  %v10010_v2 = vpop.f32.mrf.mxu0 }
 0x311   :  { %2924 = vmatprep.subr.mxu0 %v1716_v18  ;;  %v3326_v18 = vld [vmem:[%s12179_s5 + $0xf8] sm:$0xff]  ;;  %v10026_v30 = vadd.f32 %v9951_v57, %v1887_v11  ;;  %v10035_v52 = vpop.f32.mrf.mxu1  ;;  %v10042_v57 = vld [vmem:[%s12178_s4 + $0x20] sm:$0xff] }
 0x312   :  { %7385 = vset.pattern.permute.xlu1 %v12424_v19  ;;  %2925 = vmatpush1.msra.mxu0 %v1715_v27  ;;  %v3310_v27 = vld [vmem:[%s12179_s5 + $0x78] sm:$0xff] }
 0x313   :  { %5987 = vperm.xlu1 %7385, %v9833_v6   ;;  %2926 = vmatprep.subr.mxu0 %v1714_v32  ;;  %v7001_v6 = vadd.f32 %v9932_v55, %v9927_v3  ;;  %v2999_v32 = vpop.permute.xlu0 %2998  ;;  %v3325_v3 = vld [vmem:[%s12179_s5 + $0xf0] sm:$0xff]  ;;  %v2043_v55 = vadd.f32 %v9986_v45, %v1965_v21  ;;  %v3324_v45 = vld [vmem:[%s12179_s5 + $0xe8] sm:$0xff]  ;;  %v6858_v21 = vadd.f32 -1.0, %v7440_v9  ;;  %v3135_v11 = vmin.f32 %v10026_v30, 0.0 }
 0x314   :  { %2927 = vmatpush1.msra.mxu0 %v1713_v34  ;;  %v10048_v15 = vadd.f32 %v2999_v32, %v1895_v28  ;;  %v3308_v34 = vld [vmem:[%s12179_s5 + $0x68] sm:$0xff]  ;;  %v2041_v28 = vadd.f32 %v9978_v58, %v9983_v24  ;;  %v2049_v9 = vadd.f32 %v2048_v47, %v1971_v46  ;;  %v3307_v46 = vld [vmem:[%s12179_s5 + $0x60] sm:$0xff]  ;;  %v3322_v58 = vld [vmem:[%s12179_s5 + $0xd8] sm:$0xff]  ;;  %vm3103_vm2 = vcmp.gt.f32.partialorder %v10026_v30, 0.0 }
 0x315   :  { %2928 = vmatprep.subr.mxu0 %v1712_v60  ;;  %v972_v48 = vadd.f32 %v7001_v6, %v9532_v22  ;;  %v10058_v60 = vpop.permute.xlu1 %5015  ;;  %v2202_v22 = vpop.f32.mrf.mxu1  ;;  %v3264_v24 = vsel %vm3104_vm1, %v9963_v7, %v6858_v21  ;;  %v2047_v7 = vadd.f32 %v9992_v10, %v9994_v56  ;;  %v2197_v56 = vadd.f32 %v2196_v51, %v10010_v2  ;;  %v10119_v2 = vld [vmem:[%s12178_s4 + $0x38] sm:$0xff]  ;;  %v3304_v51 = vld [vmem:[%s12179_s5 + $0x48] sm:$0xff] }
 0x316   :  { %2929 = vmatpush1.msra.mxu0 %v1711_v33  ;;  %v10037_v33 = vpop.f32.mrf.mxu0  ;;  %12453 = vst [vmem:[#allocation185_spill] sm:$0xff] %v10058_v60  ;;  %v10095_v21 = vadd.f32 %v9025_v38, %v2049_v9  ;;  %v3320_v9 = vld [vmem:[%s12179_s5 + $0xc8] sm:$0xff]  ;;  %vm3106_vm3 = vcmp.gt.f32.partialorder %v10048_v15, 0.0 }
 0x317   :  { %7386 = vset.pattern.permute.xlu1 %v12365_v50  ;;  %2963 = vmatmul.mubr.f32.vlgmr.msra.gmra.mxu0 %v967_v41  ;;  %v10061_v41 = vadd.f32 %v2999_v32, %v1893_v12  ;;  %v3138_v32 = vmin.f32 %v10048_v15, 0.0  ;;  %v3167_v12 = vmul.f32 1.442695, %v3135_v11  ;;  %v3305_v11 = vld [vmem:[%s12179_s5 + $0x50] sm:$0xff] }
 0x318   :  { %7002 = vmatprep.subr.mxu0 %v3326_v18  ;;  %4835 = vperm.xlu1 %7386, %v10042_v57   ;;  %v10066_v18 = vadd.f32 %v9016_v54, %v2043_v55  ;;  %v2125_v6 = vpop.f32.mrf.mxu0  ;;  %v10086_v55 = vadd.f32 %v9016_v54, %v2041_v28  ;;  %v3321_v54 = vld [vmem:[%s12179_s5 + $0xd0] sm:$0xff]  ;;  %vm3110_vm7 = vcmp.gt.f32.partialorder %v10095_v21, 0.0 }
 0x319   :  { %7003 = vmatpush3.msra.mxu0 %v3310_v27  ;;  %2968 = vmatprep.mubr.f32.mxu0 %v12244_v17  ;;  %v3323_v27 = vld [vmem:[%s12179_s5 + $0xe0] sm:$0xff]  ;;  %v3173_v10 = vmul.f32 1.442695, %v3138_v32  ;;  %7441 = vpow2.f32 %v3167_v12  ;;  %v10114_v32 = vadd.f32 %v9025_v38, %v2047_v7  ;;  %v3014_v12 = vpop.permute.xlu0 %3013  ;;  %v2195_v38 = vadd.f32 %v10004_v1, %v10000_v13  ;;  %v3318_v1 = vld [vmem:[%s12179_s5 + $0xb8] sm:$0xff] }
 0x31a   :  { %7004 = vmatprep.subr.mxu0 %v3325_v3  ;;  %v10078_v47 = vpop.f32.mrf.mxu0  ;;  %v3137_v3 = vmin.f32 %v10061_v41, 0.0  ;;  %v3319_v7 = vld [vmem:[%s12179_s5 + $0xc0] sm:$0xff]  ;;  %vm3105_vm4 = vcmp.gt.f32.partialorder %v10061_v41, 0.0  ;;  %vm3108_vm5 = vcmp.gt.f32.partialorder %v10066_v18, 0.0  ;;  %vm3107_vm6 = vcmp.gt.f32.partialorder %v10086_v55, 0.0 }
 0x31b   :  { %7005 = vmatpush3.msra.mxu0 %v3309_v35  ;;  %v3306_v35 = vld [vmem:[%s12179_s5 + $0x58] sm:$0xff]  ;;  %7443 = vpow2.f32 %v3173_v10  ;;  %v3141_v10 = vmin.f32 %v10114_v32, 0.0  ;;  %vm3109_vm8 = vcmp.gt.f32.partialorder %v10114_v32, 0.0 }
 0x31c   :  { %2969 = vmatmul.mubr.f32.gmra.mxu0 %v972_v48  ;;  %7006 = vmatprep.subr.mxu0 %v3324_v45  ;;  %v3140_v45 = vmin.f32 %v10066_v18, 0.0  ;;  %v10097_v48 = vpop.f32.mrf.mxu1  ;;  %v2350_v28 = vpop.f32.mrf.mxu0 }
 0x31d   :  { %7387 = vset.pattern.permute.xlu1 %v12371_v26  ;;  %7007 = vmatpush3.msra.mxu0 %v3308_v34  ;;  %v10102_v34 = vpop.permute.xlu1 %5179 }
 0x31e   :  { %3391 = vmatprep.mubr.f32.mxu0 %v3264_v24  ;;  %5163 = vperm.xlu1 %7387, %v9970_v4   ;;  %12454 = vst [vmem:[#allocation186_spill] sm:$0xff] %v10102_v34  ;;  %v3139_v24 = vmin.f32 %v10086_v55, 0.0  ;;  %v2354_v34 = vpop.f32.mrf.mxu0 }
 0x31f   :  { %7008 = vmatprep.subr.mxu0 %v3323_v27  ;;  %v3171_v27 = vmul.f32 1.442695, %v3137_v3  ;;  %v2273_v3 = vpop.f32.mrf.mxu1 }
 0x320   :  { %7009 = vmatpush3.msra.mxu0 %v3307_v46  ;;  %v3177_v46 = vmul.f32 1.442695, %v3140_v45  ;;  %v3303_v45 = vld [vmem:[%s12179_s5 + $0x40] sm:$0xff] }
 0x321   :  { %7010 = vmatprep.subr.mxu0 %v3322_v58  ;;  %v3142_v58 = vmin.f32 %v10095_v21, 0.0  ;;  %v10139_v13 = vpop.permute.xlu1 %5507  ;;  %7445 = vpow2.f32 %v3171_v27  ;;  %v3317_v27 = vld [vmem:[%s12179_s5 + $0xb0] sm:$0xff] }
 0x322   :  { %7011 = vmatpush3.msra.mxu0 %v3306_v35  ;;  %7388 = vset.pattern.permute.xlu1 %v12380_v36  ;;  %v10131_v35 = vadd.f32 %v3014_v12, %v2197_v56  ;;  %12455 = vst [vmem:[#allocation187_spill] sm:$0xff] %v10139_v13  ;;  %7447 = vpow2.f32 %v3177_v46  ;;  %v10146_v56 = vadd.f32 %v3014_v12, %v2195_v38  ;;  %v3179_v12 = vmul.f32 1.442695, %v3141_v10  ;;  %v3024_v38 = vpop.permute.xlu0 %3023 }
 0x323   :  { %7012 = vmatprep.subr.mxu0 %v3321_v54  ;;  %5327 = vperm.xlu1 %7388, %v10119_v2   ;;  %v2203_v54 = vadd.f32 %v2202_v22, %v2125_v6  ;;  %v3302_v22 = vld [vmem:[%s12179_s5 + $0x38] sm:$0xff]  ;;  %v3181_v6 = vmul.f32 1.442695, %v3142_v58  ;;  %v2351_v46 = vadd.f32 %v2350_v28, %v2273_v3  ;;  %v3301_v58 = vld [vmem:[%s12179_s5 + $0x30] sm:$0xff] }
 0x324   :  { %7013 = vmatpush3.msra.mxu0 %v3305_v11  ;;  %v3175_v11 = vmul.f32 1.442695, %v3139_v24  ;;  %v3144_v24 = vmin.f32 %v10131_v35, 0.0  ;;  %v3143_v28 = vmin.f32 %v10146_v56, 0.0  ;;  %vm3112_vm9 = vcmp.gt.f32.partialorder %v10131_v35, 0.0 }
 0x325   :  { %7014 = vmatprep.subr.mxu0 %v3320_v9  ;;  %v2201_v9 = vadd.f32 %v10035_v52, %v10037_v33  ;;  %v2356_v52 = vpop.f32.mrf.mxu0  ;;  %v3316_v33 = vld [vmem:[%s12179_s5 + $0xa8] sm:$0xff]  ;;  %vm3111_vm10 = vcmp.gt.f32.partialorder %v10146_v56, 0.0 }
 0x326   :  { %7015 = vmatpush3.msra.mxu0 %v3304_v51  ;;  %v2277_v51 = vpop.f32.mrf.mxu1  ;;  %7449 = vpow2.f32 %v3175_v11  ;;  %v3315_v11 = vld [vmem:[%s12179_s5 + $0xa0] sm:$0xff] }
 0x327   :  { %7016 = vmatprep.subr.mxu0 %v3319_v7  ;;  %7389 = vset.pattern.permute.xlu1 %v12399_v29  ;;  %v12456_v7 = vld [vmem:[#allocation37_spill] sm:$0xff]  ;;  %7451 = vpow2.f32 %v3181_v6 }
 0x328   :  { %7017 = vmatpush3.msra.mxu0 %v3303_v45  ;;  %5655 = vperm.xlu1 %7389, %v9917_v25   ;;  %v10156_v13 = vadd.f32 %v12456_v7, %v2203_v54  ;;  %v3300_v54 = vld [vmem:[%s12179_s5 + $0x28] sm:$0xff]  ;;  %v10169_v3 = vadd.f32 %v12456_v7, %v2201_v9  ;;  %v2279_v45 = vpop.f32.mrf.mxu1  ;;  %7453 = vpow2.f32 %v3179_v12  ;;  %v7442_v7 = vpop.eup %7441 }
 0x329   :  { %7018 = vmatprep.subr.mxu0 %v3318_v1  ;;  %v2349_v1 = vadd.f32 %v10078_v47, %v10097_v48  ;;  %v2357_v9 = vadd.f32 %v2356_v52, %v2279_v45  ;;  %v3299_v47 = vld [vmem:[%s12179_s5 + $0x20] sm:$0xff]  ;;  %v3314_v48 = vld [vmem:[%s12179_s5 + $0x98] sm:$0xff]  ;;  %v2355_v52 = vadd.f32 %v2354_v34, %v2277_v51  ;;  %v7444_v34 = vpop.eup %7443 }
 0x32a   :  { %7019 = vmatpush3.msra.mxu0 %v3302_v22  ;;  %v10177_v10 = vpop.permute.xlu1 %5671  ;;  %v3185_v22 = vmul.f32 1.442695, %v3144_v24  ;;  %v3146_v6 = vmin.f32 %v10156_v13, 0.0  ;;  %v3298_v24 = vld [vmem:[%s12179_s5 + $0x18] sm:$0xff]  ;;  %v2502_v14 = vpop.f32.mrf.mxu1  ;;  %vm3114_vm11 = vcmp.gt.f32.partialorder %v10156_v13, 0.0  ;;  %vm3113_vm12 = vcmp.gt.f32.partialorder %v10169_v3, 0.0 }
 0x32b   :  { %7020 = vmatprep.subr.mxu0 %v3317_v27  ;;  %12457 = vst [vmem:[#allocation37_spill] sm:$0xff] %v10177_v10  ;;  %v10180_v27 = vadd.f32 %v3024_v38, %v2351_v46  ;;  %v3183_v46 = vmul.f32 1.442695, %v3143_v28  ;;  %v12458_v45 = vld [vmem:[#allocation39_spill] sm:$0xff]  ;;  %v3312_v28 = vld [vmem:[%s12179_s5 + $0x88] sm:$0xff]  ;;  %v3311_v10 = vld [vmem:[%s12179_s5 + $0x80] sm:$0xff] }
 0x32c   :  { %7021 = vmatpush3.msra.mxu0 %v3301_v58  ;;  %7390 = vset.pattern.permute.xlu1 %v12409_v16  ;;  %v3145_v58 = vmin.f32 %v10169_v3, 0.0  ;;  %7455 = vpow2.f32 %v3185_v22  ;;  %v10209_v51 = vld [vmem:[%s12178_s4 + $0x18] sm:$0xff]  ;;  %v3296_v22 = vld [vmem:[%s12179_s5 + $0x8] sm:$0xff]  ;;  %v2504_v49 = vpop.f32.mrf.mxu1 }
 0x32d   :  { %7022 = vmatprep.subr.mxu0 %v3316_v33  ;;  %5819 = vperm.xlu1 %7390, %v9880_v53   ;;  %v10193_v53 = vadd.f32 %v3024_v38, %v2349_v1  ;;  %v3313_v33 = vld [vmem:[%s12179_s5 + $0x90] sm:$0xff]  ;;  %v3148_v12 = vmin.f32 %v10180_v27, 0.0  ;;  %7457 = vpow2.f32 %v3183_v46  ;;  %v6860_v46 = vadd.f32 -1.0, %v7444_v34 }
 0x32e   :  { %7023 = vmatpush3.msra.mxu0 %v3300_v54  ;;  %v3189_v54 = vmul.f32 1.442695, %v3146_v6  ;;  %v3297_v38 = vld [vmem:[%s12179_s5 + $0x10] sm:$0xff]  ;;  %v6857_v6 = vadd.f32 -1.0, %v7442_v7  ;;  %v3295_v7 = vld [vmem:[%s12179_s5] sm:$0xff]  ;;  %vm3116_vm13 = vcmp.gt.f32.partialorder %v10180_v27, 0.0 }
 0x32f   :  { %7024 = vmatprep.subr.mxu0 %v3315_v11  ;;  %v10200_v11 = vadd.f32 %v12458_v45, %v2357_v9  ;;  %v7446_v9 = vpop.eup %7445  ;;  %vm3115_vm14 = vcmp.gt.f32.partialorder %v10193_v53, 0.0  ;;  %s7701_s5 = smov 113  }
 0x330   :  { %7025 = vmatpush3.msra.mxu0 %v3299_v47  ;;  %v3187_v47 = vmul.f32 1.442695, %v3145_v58  ;;  %7459 = vpow2.f32 %v3189_v54  ;;  %v3263_v58 = vsel %vm3103_vm2, %v10026_v30, %v6857_v6  ;;  %v3266_v30 = vsel %vm3106_vm3, %v10048_v15, %v6860_v46  ;;  %v2508_v46 = vpop.f32.mrf.mxu1 }
 0x331   :  { %7026 = vmatprep.subr.mxu0 %v3314_v48  ;;  %7391 = vset.pattern.permute.xlu1 %v12365_v50  ;;  %v10215_v1 = vpop.permute.xlu1 %5999  ;;  %v3147_v48 = vmin.f32 %v10193_v53, 0.0  ;;  %v3150_v60 = vmin.f32 %v10200_v11, 0.0  ;;  %vm3118_vm15 = vcmp.gt.f32.partialorder %v10200_v11, 0.0 }
 0x332   :  { %7027 = vmatpush3.msra.mxu0 %v3298_v24  ;;  %4831 = vperm.xlu1 %7391, %v10209_v51   ;;  %12459 = vst [vmem:[#allocation39_spill] sm:$0xff] %v10215_v1  ;;  %v10222_v24 = vadd.f32 %v12458_v45, %v2355_v52  ;;  %v7448_v1 = vpop.eup %7447  ;;  %v6859_v52 = vadd.f32 -1.0, %v7446_v9  ;;  %7461 = vpow2.f32 %v3187_v47  ;;  %v3034_v9 = vpop.permute.xlu0 %3033 }
 0x333   :  { %7028 = vmatprep.subr.mxu0 %v3313_v33  ;;  %v3193_v33 = vmul.f32 1.442695, %v3148_v12  ;;  %v7450_v54 = vpop.eup %7449  ;;  %v3191_v12 = vmul.f32 1.442695, %v3147_v48 }
 0x334   :  { %7029 = vmatpush3.msra.mxu0 %v3297_v38  ;;  %v3149_v45 = vmin.f32 %v10222_v24, 0.0  ;;  %v6862_v38 = vadd.f32 -1.0, %v7448_v1  ;;  %v3265_v1 = vsel %vm3105_vm4, %v10061_v41, %v6859_v52  ;;  %vm3117_vm2 = vcmp.gt.f32.partialorder %v10222_v24, 0.0 }
 0x335   :  { %7030 = vmatprep.subr.mxu0 %v3312_v28  ;;  %7463 = vpow2.f32 %v3193_v33 }
 0x336   :  { %7031 = vmatpush3.msra.mxu0 %v3296_v22  ;;  %7392 = vset.pattern.permute.xlu1 %v12377_v42  ;;  %v7452_v22 = vpop.eup %7451  ;;  %7465 = vpow2.f32 %v3191_v12  ;;  %v3195_v15 = vmul.f32 1.442695, %v3149_v45 }
 0x337   :  { %7032 = vmatprep.subr.mxu0 %v3311_v10  ;;  %4995 = vperm.xlu1 %7392, %v10042_v57   ;;  %v10237_v34 = vpop.permute.xlu1 %4847  ;;  %v3197_v10 = vmul.f32 1.442695, %v3150_v60  ;;  %v7454_v33 = vpop.eup %7453 }
 0x338   :  { %7033 = vmatpush3.msra.mxu0 %v3295_v7  ;;  %v2425_v28 = vpop.f32.mrf.mxu0  ;;  %v6861_v7 = vadd.f32 -1.0, %v7450_v54 }
 0x339   :  { %3392 = vmatmul.mubr.f32.vlgmr.msra.gmra.mxu0 %v3263_v58  ;;  %v2503_v6 = vadd.f32 %v2502_v14, %v2425_v28  ;;  %7251 = vmatprep.subr.mxu0 %v12244_v17  ;;  %v3268_v14 = vsel %vm3108_vm5, %v10066_v18, %v6862_v38  ;;  %7467 = vpow2.f32 %v3197_v10  ;;  %v6864_v58 = vadd.f32 -1.0, %v7452_v22  ;;  %v7456_v52 = vpop.eup %7455  ;;  %v2510_v10 = vpop.f32.mrf.mxu1 }
 0x33a   :  { %3396 = vmatprep.mubr.f32.mxu0 %v3266_v30  ;;  %v2427_v47 = vpop.f32.mrf.mxu0  ;;  %7469 = vpow2.f32 %v3195_v15  ;;  %v3267_v12 = vsel %vm3107_vm6, %v10086_v55, %v6861_v7  ;;  %v7458_v22 = vpop.eup %7457 }
 0x33b   :  { %7393 = vset.pattern.permute.xlu1 %v12380_v36  ;;  %v10245_v48 = vadd.f32 %v3034_v9, %v2503_v6  ;;  %v2505_v60 = vadd.f32 %v2504_v49, %v2427_v47  ;;  %v6863_v49 = vadd.f32 -1.0, %v7454_v33  ;;  %v3270_v6 = vsel %vm3110_vm7, %v10095_v21, %v6864_v58  ;;  %v12460_v33 = vld [vmem:[#allocation11_spill] sm:$0xff] }
 0x33c   :  { %5323 = vperm.xlu1 %7393, %v9970_v4   ;;  %v6865_v7 = vadd.f32 -1.0, %v7458_v22 }
 0x33d   :  { %3397 = vmatmul.mubr.f32.gmra.mxu0 %v3265_v1  ;;  %v3151_v28 = vmin.f32 %v10245_v48, 0.0  ;;  %v10250_v41 = vadd.f32 %v3034_v9, %v2505_v60  ;;  %v10252_v30 = vpop.permute.xlu1 %5175  ;;  %v6866_v9 = vadd.f32 -1.0, %v7456_v52  ;;  %v7460_v60 = vpop.eup %7459  ;;  %vm3119_vm3 = vcmp.gt.f32.partialorder %v10245_v48, 0.0 }
 0x33e   :  { %3401 = vmatprep.mubr.f32.mxu0 %v3268_v14  ;;  %v3269_v14 = vsel %vm3109_vm8, %v10114_v32, %v6863_v49 }
 0x33f   :  { %v3152_v18 = vmin.f32 %v10250_v41, 0.0  ;;  %v2431_v54 = vpop.f32.mrf.mxu0  ;;  %v3199_v45 = vmul.f32 1.442695, %v3151_v28  ;;  %v7462_v28 = vpop.eup %7461  ;;  %v3272_v52 = vsel %vm3112_vm9, %v10131_v35, %v6866_v9  ;;  %v7592_v9 = vld [vmem:[%s12178_s4 + $0x50] sm:$0xff]  ;;  %vm3120_vm1 = vcmp.gt.f32.partialorder %v10250_v41, 0.0 }
 0x340   :  { %7394 = vset.pattern.permute.xlu1 %v12389_v43  ;;  %v2509_v38 = vadd.f32 %v2508_v46, %v2431_v54 }
 0x341   :  { %3402 = vmatmul.mubr.f32.gmra.mxu0 %v3267_v12  ;;  %5487 = vperm.xlu1 %7394, %v10119_v2   ;;  %v3201_v47 = vmul.f32 1.442695, %v3152_v18  ;;  %v2433_v1 = vpop.f32.mrf.mxu0  ;;  %v6868_v18 = vadd.f32 -1.0, %v7460_v60  ;;  %v3271_v12 = vsel %vm3111_vm10, %v10146_v56, %v6865_v7 }
 0x342   :  { %3406 = vmatprep.mubr.f32.mxu0 %v3270_v6  ;;  %v10263_v15 = vadd.f32 %v12460_v33, %v2509_v38  ;;  %v2511_v55 = vadd.f32 %v2510_v10, %v2433_v1  ;;  %v7464_v32 = vpop.eup %7463 }
 0x343   :  { %7471 = vpow2.f32 %v3201_v47  ;;  %v10268_v46 = vpop.permute.xlu1 %5339  ;;  %v7466_v22 = vpop.eup %7465  ;;  %v3274_v35 = vsel %vm3114_vm11, %v10156_v13, %v6868_v18  ;;  %v6870_v10 = vadd.f32 -1.0, %v7464_v32 }
 0x344   :  { %7473 = vpow2.f32 %v3199_v45  ;;  %v3153_v21 = vmin.f32 %v10263_v15, 0.0  ;;  %12461 = vst [vmem:[#allocation11_spill] sm:$0xff] %v10268_v46  ;;  %v10271_v58 = vadd.f32 %v12460_v33, %v2511_v55  ;;  %v6867_v45 = vadd.f32 -1.0, %v7462_v28 }
 0x345   :  { %3407 = vmatmul.mubr.f32.gmra.mxu0 %v3269_v14  ;;  %7395 = vset.pattern.permute.xlu1 %v12409_v16  ;;  %v6869_v13 = vadd.f32 -1.0, %v7466_v22  ;;  %v3276_v1 = vsel %vm3116_vm13, %v10180_v27, %v6870_v10  ;;  %vm3121_vm5 = vcmp.gt.f32.partialorder %v10263_v15, 0.0 }
 0x346   :  { %3411 = vmatprep.mubr.f32.mxu0 %v3272_v52  ;;  %5815 = vperm.xlu1 %7395, %v9917_v25   ;;  %v3203_v49 = vmul.f32 1.442695, %v3153_v21  ;;  %v3154_v54 = vmin.f32 %v10271_v58, 0.0  ;;  %v7468_v6 = vpop.eup %7467  ;;  %v3273_v56 = vsel %vm3113_vm12, %v10169_v3, %v6867_v45  ;;  %vm3122_vm4 = vcmp.gt.f32.partialorder %v10271_v58, 0.0 }
 0x347   :  { %v7470_v47 = vpop.eup %7469  ;;  %v6872_v60 = vadd.f32 -1.0, %v7468_v6  ;;  %v3275_v55 = vsel %vm3115_vm14, %v10193_v53, %v6869_v13  ;;  %v3044_v6 = vpop.permute.xlu0 %3043 }
 0x348   :  { %7475 = vpow2.f32 %v3203_v49  ;;  %v3205_v38 = vmul.f32 1.442695, %v3154_v54  ;;  %v6871_v3 = vadd.f32 -1.0, %v7470_v47 }
 0x349   :  { %3412 = vmatmul.mubr.f32.gmra.mxu0 %v3271_v12  ;;  %v10282_v25 = vpop.permute.xlu1 %5667  ;;  %v3278_v27 = vsel %vm3118_vm15, %v10200_v11, %v6872_v60 }
 0x34a   :  { %3416 = vmatprep.mubr.f32.mxu0 %v3274_v35  ;;  %7396 = vset.pattern.permute.xlu1 %v12424_v19  ;;  %7477 = vpow2.f32 %v3205_v38  ;;  %12462 = vst [vmem:[#allocation188_spill] sm:$0xff] %v10282_v25  ;;  %v3277_v53 = vsel %vm3117_vm2, %v10222_v24, %v6871_v3 }
 0x34b   :  { %5979 = vperm.xlu1 %7396, %v7592_v9  }
 0x34d   :  { %3417 = vmatmul.mubr.f32.gmra.mxu0 %v3273_v56 }
 0x34e   :  { %3421 = vmatprep.mubr.f32.mxu0 %v3276_v1 }
 0x34f   :  { %7398 = vset.pattern.permute.xlu1 %v12377_v42  ;;  %v10296_v14 = vpop.permute.xlu1 %5831 }
 0x350   :  { %v7472_v33 = vpop.eup %7471  ;;  %4991 = vperm.xlu1 %7398, %v10209_v51   ;;  %12463 = vst [vmem:[#allocation189_spill] sm:$0xff] %v10296_v14 }
 0x351   :  { %v7474_v7 = vpop.eup %7473  ;;  %3422 = vmatmul.mubr.f32.gmra.mxu0 %v3275_v55  ;;  %v6874_v21 = vadd.f32 -1.0, %v7472_v33  ;;  %v10331_v33 = vld [vmem:[%s12178_s4 + $0x8] sm:$0xff] }
 0x352   :  { %3426 = vmatprep.mubr.f32.mxu0 %v3278_v27  ;;  %v6873_v52 = vadd.f32 -1.0, %v7474_v7 }
 0x353   :  { %v3280_v28 = vsel %vm3120_vm1, %v10250_v41, %v6874_v21 }
 0x354   :  { %7399 = vset.pattern.permute.xlu1 %v12371_v26  ;;  %v3279_v49 = vsel %vm3119_vm3, %v10245_v48, %v6873_v52  ;;  %v2579_v48 = vpop.f32.mrf.mxu1  ;;  %v12465_v52 = vld [vmem:[#allocation13_spill] sm:$0xff]  ;;  %vm3536_vm3 = vcmask 56320  }
 0x355   :  { %v7476_v18 = vpop.eup %7475  ;;  %3427 = vmatmul.mubr.f32.gmra.mxu0 %v3277_v53  ;;  %5155 = vperm.xlu1 %7399, %v10042_v57   ;;  %v10305_v32 = vpop.permute.xlu1 %4843 }
 0x356   :  { %3431 = vmatprep.mubr.f32.mxu0 %v3280_v28  ;;  %v6875_v12 = vadd.f32 -1.0, %v7476_v18  ;;  %v2581_v35 = vpop.f32.mrf.mxu1 }
 0x357   :  { %v7478_v11 = vpop.eup %7477 }
 0x358   :  { %v6876_v54 = vadd.f32 -1.0, %v7478_v11  ;;  %v3281_v45 = vsel %vm3121_vm5, %v10263_v15, %v6875_v12  ;;  %v2585_v13 = vpop.f32.mrf.mxu1 }
 0x359   :  { %7401 = vset.pattern.permute.xlu1 %v12389_v43  ;;  %3432 = vmatmul.mubr.f32.gmra.mxu0 %v3279_v49 }
 0x35a   :  { %5483 = vperm.xlu1 %7401, %v9970_v4   ;;  %v3282_v24 = vsel %vm3122_vm4, %v10271_v58, %v6876_v54  ;;  %v7593_v58 = vld [vmem:[%s12178_s4 + $0x48] sm:$0xff]  ;;  %v2587_v21 = vpop.f32.mrf.mxu1  ;;  %vm3553_vm4 = vcmask 580608  }
 0x35b   :  { %3436 = vmatprep.mubr.f32.mxu0 %v3282_v24  ;;  %v10314_v41 = vpop.permute.xlu1 %5007 }
 0x35d   :  { %3437 = vmatmul.mubr.f32.gmra.mxu0 %v3281_v45 }
 0x35e   :  { %7402 = vset.pattern.permute.xlu1 %v12399_v29 }
 0x35f   :  { %5647 = vperm.xlu1 %7402, %v10119_v2  }
 0x361   :  { %v10319_v38 = vpop.permute.xlu1 %5335 }
 0x363   :  { %7404 = vset.pattern.permute.xlu1 %v12424_v19  ;;  %v2656_v22 = vpop.f32.mrf.mxu0 }
 0x364   :  { %5975 = vperm.xlu1 %7404, %v7593_v58   ;;  %v2657_v10 = vadd.f32 %v2656_v22, %v2579_v48 }
 0x365   :  { %v2658_v15 = vpop.f32.mrf.mxu0 }
 0x366   :  { %v3091_v9 = vadd.f32 %v3044_v6, %v2657_v10  ;;  %v2659_v56 = vadd.f32 %v2658_v15, %v2581_v35 }
 0x367   :  { %v10326_v60 = vpop.permute.xlu1 %5499 }
 0x368   :  { %7405 = vset.pattern.permute.xlu1 %v12365_v50  ;;  %v3155_v47 = vmin.f32 %v3091_v9, 0.0  ;;  %v3092_v1 = vadd.f32 %v3044_v6, %v2659_v56  ;;  %12464 = vst [vmem:[#allocation190_spill] sm:$0xff] %v10326_v60  ;;  %vm3123_vm7 = vcmp.gt.f32.partialorder %v3091_v9, 0.0 }
 0x369   :  { %4823 = vperm.xlu1 %7405, %v10331_v33  }
 0x36a   :  { %v3207_v55 = vmul.f32 1.442695, %v3155_v47  ;;  %v3156_v3 = vmin.f32 %v3092_v1, 0.0  ;;  %v2662_v7 = vpop.f32.mrf.mxu0  ;;  %vm3124_vm6 = vcmp.gt.f32.partialorder %v3092_v1, 0.0 }
 0x36b   :  { %v2663_v27 = vadd.f32 %v2662_v7, %v2585_v13  ;;  %v10356_v7 = vld [vmem:[%s12178_s4] sm:$0xff] }
 0x36c   :  { %7479 = vpow2.f32 %v3207_v55  ;;  %v3209_v28 = vmul.f32 1.442695, %v3156_v3  ;;  %v2664_v53 = vpop.f32.mrf.mxu0 }
 0x36d   :  { %7406 = vset.pattern.permute.xlu1 %v12371_v26  ;;  %v3093_v18 = vadd.f32 %v12465_v52, %v2663_v27  ;;  %v2665_v11 = vadd.f32 %v2664_v53, %v2587_v21  ;;  %v10337_v49 = vpop.permute.xlu1 %5827 }
 0x36e   :  { %5151 = vperm.xlu1 %7406, %v10209_v51   ;;  %7481 = vpow2.f32 %v3209_v28  ;;  %12466 = vst [vmem:[#allocation13_spill] sm:$0xff] %v10337_v49 }
 0x36f   :  { %v3157_v54 = vmin.f32 %v3093_v18, 0.0  ;;  %v3094_v12 = vadd.f32 %v12465_v52, %v2665_v11  ;;  %vm3125_vm9 = vcmp.gt.f32.partialorder %v3093_v18, 0.0 }
 0x371   :  { %v3211_v24 = vmul.f32 1.442695, %v3157_v54  ;;  %v3158_v45 = vmin.f32 %v3094_v12, 0.0  ;;  %vm3126_vm8 = vcmp.gt.f32.partialorder %v3094_v12, 0.0 }
 0x372   :  { %7407 = vset.pattern.permute.xlu1 %v12380_v36 }
 0x373   :  { %5315 = vperm.xlu1 %7407, %v10042_v57   ;;  %7483 = vpow2.f32 %v3211_v24  ;;  %v3213_v48 = vmul.f32 1.442695, %v3158_v45  ;;  %v2810_v24 = vpop.f32.mrf.mxu1 }
 0x374   :  { %v10342_v22 = vpop.permute.xlu1 %5991 }
 0x375   :  { %12467 = vst [vmem:[#allocation191_spill] sm:$0xff] %v10342_v22  ;;  %7485 = vpow2.f32 %v3213_v48 }
 0x377   :  { %7408 = vset.pattern.permute.xlu1 %v12399_v29 }
 0x378   :  { %5643 = vperm.xlu1 %7408, %v9970_v4  }
 0x379   :  { %v7480_v35 = vpop.eup %7479 }
 0x37a   :  { %v10346_v58 = vpop.permute.xlu1 %5003  ;;  %v6877_v6 = vadd.f32 -1.0, %v7480_v35  ;;  %v2812_v35 = vpop.f32.mrf.mxu1 }
 0x37b   :  { %v7482_v10 = vpop.eup %7481 }
 0x37c   :  { %7409 = vset.pattern.permute.xlu1 %v12409_v16  ;;  %v6878_v15 = vadd.f32 -1.0, %v7482_v10  ;;  %v3283_v47 = vsel %vm3123_vm7, %v3091_v9, %v6877_v6  ;;  %v3054_v6 = vpop.permute.xlu0 %3053 }
 0x37d   :  { %5807 = vperm.xlu1 %7409, %v10119_v2  }
 0x37e   :  { %v3284_v56 = vsel %vm3124_vm6, %v3092_v1, %v6878_v15 }
 0x37f   :  { %v10350_v13 = vpop.permute.xlu1 %5167  ;;  %3441 = vmatprep.mubr.f32.mxu0 %v3284_v56 }
 0x380   :  { %v7484_v55 = vpop.eup %7483  ;;  %3442 = vmatmul.mubr.f32.gmra.mxu0 %v3283_v47 }
 0x381   :  { %7410 = vset.pattern.permute.xlu1 %v12365_v50  ;;  %v6879_v27 = vadd.f32 -1.0, %v7484_v55 }
 0x382   :  { %v7486_v3 = vpop.eup %7485  ;;  %4819 = vperm.xlu1 %7410, %v10356_v7  }
 0x383   :  { %v6880_v21 = vadd.f32 -1.0, %v7486_v3  ;;  %v3285_v9 = vsel %vm3125_vm9, %v3093_v18, %v6879_v27  ;;  %v2816_v3 = vpop.f32.mrf.mxu1 }
 0x384   :  { %v10359_v1 = vpop.permute.xlu1 %5495 }
 0x385   :  { %v3286_v28 = vsel %vm3126_vm8, %v3094_v12, %v6880_v21  ;;  %v7597_v12 = vld [vmem:[%s12178_s4 + $0x28] sm:$0xff] }
 0x386   :  { %7411 = vset.pattern.permute.xlu1 %v12377_v42  ;;  %3446 = vmatprep.mubr.f32.mxu0 %v3286_v28 }
 0x387   :  { %4983 = vperm.xlu1 %7411, %v10331_v33   ;;  %3447 = vmatmul.mubr.f32.gmra.mxu0 %v3285_v9 }
 0x389   :  { %v10363_v50 = vpop.permute.xlu1 %5659 }
 0x38a   :  { %12468 = vst [vmem:[#allocation192_spill] sm:$0xff] %v10363_v50 }
 0x38b   :  { %7413 = vset.pattern.permute.xlu1 %v12380_v36 }
 0x38c   :  { %5311 = vperm.xlu1 %7413, %v10209_v51  }
 0x38e   :  { %v10367_v53 = vpop.permute.xlu1 %5987 }
 0x38f   :  { %12469 = vst [vmem:[#allocation193_spill] sm:$0xff] %v10367_v53 }
 0x390   :  { %7414 = vset.pattern.permute.xlu1 %v12389_v43 }
 0x391   :  { %5475 = vperm.xlu1 %7414, %v10042_v57  }
 0x393   :  { %v10371_v52 = vpop.permute.xlu1 %4835 }
 0x395   :  { %7415 = vset.pattern.permute.xlu1 %v12409_v16 }
 0x396   :  { %5803 = vperm.xlu1 %7415, %v9970_v4   ;;  %v10389_v4 = vld [vmem:[%s12178_s4 + $0x10] sm:$0xff]  ;;  %s7686_s4 = smov 7  }
 0x399   :  { %v10375_v42 = vpop.permute.xlu1 %5163 }
 0x39a   :  { %7416 = vset.pattern.permute.xlu1 %v12424_v19 }
 0x39b   :  { %5967 = vperm.xlu1 %7416, %v10119_v2  }
 0x39e   :  { %v10379_v18 = vpop.permute.xlu1 %5327 }
 0x39f   :  { %7418 = vset.pattern.permute.xlu1 %v12371_v26 }
 0x3a0   :  { %5143 = vperm.xlu1 %7418, %v10331_v33  }
 0x3a3   :  { %v10383_v11 = vpop.permute.xlu1 %5655 }
 0x3a4   :  { %12470 = vst [vmem:[#allocation194_spill] sm:$0xff] %v10383_v11  ;;  %7419 = vset.pattern.permute.xlu1 %v12380_v36 }
 0x3a5   :  { %5307 = vperm.xlu1 %7419, %v10389_v4  }
 0x3a8   :  { %v10392_v54 = vpop.permute.xlu1 %5819 }
 0x3a9   :  { %12471 = vst [vmem:[#allocation195_spill] sm:$0xff] %v10392_v54  ;;  %7420 = vset.pattern.permute.xlu1 %v12399_v29 }
 0x3aa   :  { %5635 = vperm.xlu1 %7420, %v10042_v57  }
 0x3ad   :  { %v10396_v2 = vpop.permute.xlu1 %4831 }
 0x3ae   :  { %7421 = vset.pattern.permute.xlu1 %v12409_v16 }
 0x3af   :  { %5799 = vperm.xlu1 %7421, %v7597_v12  }
 0x3b2   :  { %v10402_v45 = vpop.permute.xlu1 %4995 }
 0x3b3   :  { %7422 = vset.pattern.permute.xlu1 %v12371_v26 }
 0x3b4   :  { %5139 = vperm.xlu1 %7422, %v10356_v7   ;;  %v2733_v48 = vpop.f32.mrf.mxu0 }
 0x3b5   :  { %v2811_v10 = vadd.f32 %v2810_v24, %v2733_v48  ;;  %v2818_v24 = vpop.f32.mrf.mxu1 }
 0x3b6   :  { %v2735_v15 = vpop.f32.mrf.mxu0 }
 0x3b7   :  { %v3095_v56 = vadd.f32 %v3054_v6, %v2811_v10  ;;  %v2813_v47 = vadd.f32 %v2812_v35, %v2735_v15  ;;  %v10406_v55 = vpop.permute.xlu1 %5323  ;;  %v12472_v10 = vld [vmem:[#allocation15_spill] sm:$0xff] }
 0x3b8   :  { %7423 = vset.pattern.permute.xlu1 %v12380_v36 }
 0x3b9   :  { %v3159_v27 = vmin.f32 %v3095_v56, 0.0  ;;  %5303 = vperm.xlu1 %7423, %v10331_v33   ;;  %v3096_v21 = vadd.f32 %v3054_v6, %v2813_v47  ;;  %vm3127_vm11 = vcmp.gt.f32.partialorder %v3095_v56, 0.0 }
 0x3bb   :  { %v3215_v28 = vmul.f32 1.442695, %v3159_v27  ;;  %v3160_v26 = vmin.f32 %v3096_v21, 0.0  ;;  %v2739_v9 = vpop.f32.mrf.mxu0  ;;  %vm3128_vm10 = vcmp.gt.f32.partialorder %v3096_v21, 0.0 }
 0x3bc   :  { %v2817_v12 = vadd.f32 %v2816_v3, %v2739_v9  ;;  %v10410_v17 = vpop.permute.xlu1 %5487 }
 0x3bd   :  { %7487 = vpow2.f32 %v3215_v28  ;;  %v3217_v48 = vmul.f32 1.442695, %v3160_v26  ;;  %7424 = vset.pattern.permute.xlu1 %v12399_v29  ;;  %v2741_v35 = vpop.f32.mrf.mxu0 }
 0x3be   :  { %v3097_v15 = vadd.f32 %v12472_v10, %v2817_v12  ;;  %5631 = vperm.xlu1 %7424, %v10209_v51   ;;  %v2819_v22 = vadd.f32 %v2818_v24, %v2741_v35 }
 0x3bf   :  { %7489 = vpow2.f32 %v3217_v48 }
 0x3c0   :  { %v3161_v14 = vmin.f32 %v3097_v15, 0.0  ;;  %v3098_v6 = vadd.f32 %v12472_v10, %v2819_v22  ;;  %vm3129_vm13 = vcmp.gt.f32.partialorder %v3097_v15, 0.0 }
 0x3c1   :  { %v10416_v47 = vpop.permute.xlu1 %5815 }
 0x3c2   :  { %12473 = vst [vmem:[#allocation15_spill] sm:$0xff] %v10416_v47  ;;  %v3219_v3 = vmul.f32 1.442695, %v3161_v14  ;;  %v3162_v27 = vmin.f32 %v3098_v6, 0.0  ;;  %7425 = vset.pattern.permute.xlu1 %v12409_v16  ;;  %vm3130_vm12 = vcmp.gt.f32.partialorder %v3098_v6, 0.0 }
 0x3c3   :  { %5795 = vperm.xlu1 %7425, %v10042_v57  }
 0x3c4   :  { %7491 = vpow2.f32 %v3219_v3  ;;  %v3221_v28 = vmul.f32 1.442695, %v3162_v27  ;;  %v2887_v3 = vpop.f32.mrf.mxu1 }
 0x3c6   :  { %7493 = vpow2.f32 %v3221_v28  ;;  %v10420_v26 = vpop.permute.xlu1 %5979 }
 0x3c7   :  { %12474 = vst [vmem:[#allocation196_spill] sm:$0xff] %v10420_v26  ;;  %7426 = vset.pattern.permute.xlu1 %v12380_v36 }
 0x3c8   :  { %5299 = vperm.xlu1 %7426, %v10356_v7  }
 0x3ca   :  { %v7488_v9 = vpop.eup %7487 }
 0x3cb   :  { %v10424_v12 = vpop.permute.xlu1 %4991  ;;  %v6881_v14 = vadd.f32 -1.0, %v7488_v9 }
 0x3cc   :  { %v7490_v22 = vpop.eup %7489  ;;  %7427 = vset.pattern.permute.xlu1 %v12389_v43 }
 0x3cd   :  { %5463 = vperm.xlu1 %7427, %v10331_v33   ;;  %v6882_v24 = vadd.f32 -1.0, %v7490_v22  ;;  %v3287_v35 = vsel %vm3127_vm11, %v3095_v56, %v6881_v14  ;;  %v2889_v22 = vpop.f32.mrf.mxu1 }
 0x3cf   :  { %v3288_v48 = vsel %vm3128_vm10, %v3096_v21, %v6882_v24 }
 0x3d0   :  { %3451 = vmatprep.mubr.f32.mxu0 %v3288_v48  ;;  %v10428_v10 = vpop.permute.xlu1 %5155  ;;  %v3064_v48 = vpop.permute.xlu0 %3063 }
 0x3d1   :  { %v7492_v36 = vpop.eup %7491  ;;  %7429 = vset.pattern.permute.xlu1 %v12409_v16  ;;  %3452 = vmatmul.mubr.f32.gmra.mxu0 %v3287_v35  ;;  %v2893_v35 = vpop.f32.mrf.mxu1 }
 0x3d2   :  { %5791 = vperm.xlu1 %7429, %v10209_v51   ;;  %v6883_v43 = vadd.f32 -1.0, %v7492_v36 }
 0x3d3   :  { %v7494_v27 = vpop.eup %7493 }
 0x3d4   :  { %v6884_v28 = vadd.f32 -1.0, %v7494_v27  ;;  %v3289_v14 = vsel %vm3129_vm13, %v3097_v15, %v6883_v43  ;;  %v12475_v43 = vld [vmem:[#allocation17_spill] sm:$0xff] }
 0x3d5   :  { %v10432_v9 = vpop.permute.xlu1 %5483 }
 0x3d6   :  { %7430 = vset.pattern.permute.xlu1 %v12424_v19  ;;  %v3290_v21 = vsel %vm3130_vm12, %v3098_v6, %v6884_v28  ;;  %v2895_v28 = vpop.f32.mrf.mxu1 }
 0x3d7   :  { %5955 = vperm.xlu1 %7430, %v10042_v57   ;;  %v2964_v56 = vpop.f32.mrf.mxu0  ;;  %3456 = vmatprep.mubr.f32.mxu0 %v3290_v21 }
 0x3d8   :  { %v2965_v24 = vadd.f32 %v2964_v56, %v2887_v3  ;;  %3457 = vmatmul.mubr.f32.gmra.mxu0 %v3289_v14 }
 0x3d9   :  { %v2966_v51 = vpop.f32.mrf.mxu0 }
 0x3da   :  { %v3099_v36 = vadd.f32 %v3064_v48, %v2965_v24  ;;  %v2967_v27 = vadd.f32 %v2966_v51, %v2889_v22  ;;  %v10436_v53 = vpop.permute.xlu1 %5647 }
 0x3db   :  { %7432 = vset.pattern.permute.xlu1 %v12399_v29 }
 0x3dc   :  { %v3163_v49 = vmin.f32 %v3099_v36, 0.0  ;;  %v3100_v25 = vadd.f32 %v3064_v48, %v2967_v27  ;;  %5623 = vperm.xlu1 %7432, %v10331_v33   ;;  %v2970_v6 = vpop.f32.mrf.mxu0  ;;  %vm3131_vm15 = vcmp.gt.f32.partialorder %v3099_v36, 0.0 }
 0x3dd   :  { %v2971_v57 = vadd.f32 %v2970_v6, %v2893_v35 }
 0x3de   :  { %v3223_v21 = vmul.f32 1.442695, %v3163_v49  ;;  %v3164_v15 = vmin.f32 %v3100_v25, 0.0  ;;  %v2972_v3 = vpop.f32.mrf.mxu0  ;;  %vm3132_vm14 = vcmp.gt.f32.partialorder %v3100_v25, 0.0 }
 0x3df   :  { %v3101_v56 = vadd.f32 %v12475_v43, %v2971_v57  ;;  %v2973_v14 = vadd.f32 %v2972_v3, %v2895_v28  ;;  %v10441_v26 = vpop.permute.xlu1 %5975 }
 0x3e0   :  { %12476 = vst [vmem:[#allocation17_spill] sm:$0xff] %v10441_v26  ;;  %7495 = vpow2.f32 %v3223_v21  ;;  %v3225_v22 = vmul.f32 1.442695, %v3164_v15  ;;  %7433 = vset.pattern.permute.xlu1 %v12409_v16 }
 0x3e1   :  { %v3165_v24 = vmin.f32 %v3101_v56, 0.0  ;;  %v3102_v48 = vadd.f32 %v12475_v43, %v2973_v14  ;;  %5787 = vperm.xlu1 %7433, %v10389_v4   ;;  %vm3133_vm2 = vcmp.gt.f32.partialorder %v3101_v56, 0.0 }
 0x3e2   :  { %7497 = vpow2.f32 %v3225_v22 }
 0x3e3   :  { %v3227_v51 = vmul.f32 1.442695, %v3165_v24  ;;  %v3166_v35 = vmin.f32 %v3102_v48, 0.0  ;;  %vm3134_vm1 = vcmp.gt.f32.partialorder %v3102_v48, 0.0 }
 0x3e4   :  { %v10446_v49 = vpop.permute.xlu1 %4823 }
 0x3e5   :  { %7499 = vpow2.f32 %v3227_v51  ;;  %v3229_v27 = vmul.f32 1.442695, %v3166_v35  ;;  %7434 = vset.pattern.permute.xlu1 %v12399_v29 }
 0x3e6   :  { %5619 = vperm.xlu1 %7434, %v10356_v7  }
 0x3e7   :  { %7501 = vpow2.f32 %v3229_v27 }
 0x3e9   :  { %v10450_v6 = vpop.permute.xlu1 %5151 }
 0x3ea   :  { %7435 = vset.pattern.permute.xlu1 %v12409_v16 }
 0x3eb   :  { %5783 = vperm.xlu1 %7435, %v10331_v33  }
 0x3ed   :  { %v7496_v57 = vpop.eup %7495 }
 0x3ee   :  { %v10454_v4 = vpop.permute.xlu1 %5315  ;;  %v6885_v21 = vadd.f32 -1.0, %v7496_v57 }
 0x3ef   :  { %v7498_v28 = vpop.eup %7497  ;;  %5779 = vperm.xlu1 %7435, %v10356_v7  }
 0x3f0   :  { %v6886_v15 = vadd.f32 -1.0, %v7498_v28  ;;  %v3291_v43 = vsel %vm3131_vm15, %v3099_v36, %v6885_v21 }
 0x3f2   :  { %v7500_v3 = vpop.eup %7499  ;;  %v3292_v29 = vsel %vm3132_vm14, %v3100_v25, %v6886_v15 }
 0x3f3   :  { %7437 = vset.pattern.permute.xlu1 %v12424_v19  ;;  %3461 = vmatprep.mubr.f32.mxu0 %v3292_v29  ;;  %v10458_v14 = vpop.permute.xlu1 %5643  ;;  %v6887_v33 = vadd.f32 -1.0, %v7500_v3 }
 0x3f4   :  { %v7502_v16 = vpop.eup %7501  ;;  %5939 = vperm.xlu1 %7437, %v10356_v7   ;;  %3462 = vmatmul.mubr.f32.gmra.mxu0 %v3291_v43 }
 0x3f5   :  { %v6888_v22 = vadd.f32 -1.0, %v7502_v16  ;;  %v3293_v51 = vsel %vm3133_vm2, %v3101_v56, %v6887_v33 }
 0x3f7   :  { %v3294_v24 = vsel %vm3134_vm1, %v3102_v48, %v6888_v22 }
 0x3f8   :  { %3466 = vmatprep.mubr.f32.mxu0 %v3294_v24  ;;  %v10461_v35 = vpop.permute.xlu1 %5807  ;;  %7438 = vset.pattern.permute.xlu1 %v12351_v37 }
 0x3f9   :  { %v7034_v19 = vpop.f32.mrf.mxu0  ;;  %3467 = vmatmul.mubr.f32.gmra.mxu0 %v3293_v51 }
 0x3fb   :  { %v7035_v25 = vpop.f32.mrf.mxu0 }
 0x3fc   :  { %v7036_v36 = vadd.f32 %v7035_v25, %v7034_v19 }
 0x3fd   :  { %v7037_v27 = vpop.f32.mrf.mxu0  ;;  %v10464_v57 = vpop.permute.xlu1 %4819 }
 0x3fe   :  { %3488 = vrot.lane.b32.xlu0 %v7036_v36, %s7686_s4 }
 0x3ff   :  { %v7038_v7 = vpop.f32.mrf.mxu0 }
 0x400   :  { %v7039_v28 = vadd.f32 %v7038_v7, %v7037_v27 }
 0x401   :  { %v7040_v48 = vpop.f32.mrf.mxu0 }
 0x402   :  { %3490 = vrot.lane.b32.xlu1 %v7039_v28, %s7686_s4  ;;  %v10468_v56 = vpop.permute.xlu1 %4983 }
 0x403   :  { %v7041_v21 = vpop.f32.mrf.mxu0 }
 0x404   :  { %v7042_v15 = vadd.f32 %v7041_v21, %v7040_v48 }
 0x405   :  { %v7043_v37 = vpop.f32.mrf.mxu0 }
 0x406   :  { %3492 = vrot.lane.b32.xlu0 %v7042_v15, %s7686_s4 }
 0x407   :  { %v7044_v3 = vpop.f32.mrf.mxu0  ;;  %v10471_v29 = vpop.permute.xlu1 %5311 }
 0x408   :  { %v7045_v43 = vadd.f32 %v7044_v3, %v7043_v37 }
 0x409   :  { %v7046_v16 = vpop.f32.mrf.mxu0 }
 0x40a   :  { %3494 = vrot.lane.b32.xlu1 %v7045_v43, %s7686_s4 }
 0x40b   :  { %v7047_v33 = vpop.f32.mrf.mxu0 }
 0x40c   :  { %v7048_v22 = vadd.f32 %v7047_v33, %v7046_v16  ;;  %v10474_v24 = vpop.permute.xlu1 %5475 }
 0x40d   :  { %v7049_v51 = vpop.f32.mrf.mxu0 }
 0x40e   :  { %3496 = vrot.lane.b32.xlu0 %v7048_v22, %s7686_s4 }
 0x40f   :  { %v7050_v19 = vpop.f32.mrf.mxu0 }
 0x410   :  { %v7051_v25 = vadd.f32 %v7050_v19, %v7049_v51 }
 0x411   :  { %v7052_v36 = vpop.f32.mrf.mxu0  ;;  %v10477_v27 = vpop.permute.xlu1 %5803 }
 0x412   :  { %3498 = vrot.lane.b32.xlu1 %v7051_v25, %s7686_s4 }
 0x413   :  { %v7053_v7 = vpop.f32.mrf.mxu0 }
 0x414   :  { %v7054_v28 = vadd.f32 %v7053_v7, %v7052_v36 }
 0x415   :  { %v7055_v48 = vpop.f32.mrf.mxu0 }
 0x416   :  { %3500 = vrot.lane.b32.xlu0 %v7054_v28, %s7686_s4  ;;  %v10481_v21 = vpop.permute.xlu1 %5967 }
 0x417   :  { %v7056_v15 = vpop.f32.mrf.mxu0 }
 0x418   :  { %v7057_v37 = vadd.f32 %v7056_v15, %v7055_v48 }
 0x419   :  { %v7058_v3 = vpop.f32.mrf.mxu0 }
 0x41a   :  { %3502 = vrot.lane.b32.xlu1 %v7057_v37, %s7686_s4 }
 0x41b   :  { %v10484_v43 = vpop.permute.xlu1 %5143  ;;  %v7059_v16 = vpop.f32.mrf.mxu0 }
 0x41c   :  { %v7060_v33 = vadd.f32 %v7059_v16, %v7058_v3  ;;  %v10500_v16 = vpop.permute.xlu0 %3588 }
 0x41d   :  { %v7061_v22 = vpop.f32.mrf.mxu0  ;;  %12477 = vst [vmem:[#allocation197_spill] sm:$0xff] %v10500_v16 }
 0x41e   :  { %3504 = vrot.lane.b32.xlu0 %v7060_v33, %s7686_s4 }
 0x41f   :  { %v7062_v51 = vpop.f32.mrf.mxu0 }
 0x420   :  { %v10487_v19 = vpop.permute.xlu1 %5307  ;;  %v7063_v25 = vadd.f32 %v7062_v51, %v7061_v22 }
 0x422   :  { %3506 = vrot.lane.b32.xlu1 %v7063_v25, %s7686_s4  ;;  %v10505_v25 = vpop.permute.xlu0 %3598 }
 0x423   :  { %12478 = vst [vmem:[#allocation198_spill] sm:$0xff] %v10505_v25 }
 0x425   :  { %v10490_v36 = vpop.permute.xlu1 %5635 }
 0x426   :  { %v10510_v26 = vpop.permute.xlu0 %3608 }
 0x427   :  { %12480 = vst [vmem:[#allocation200_spill] sm:$0xff] %v10510_v26 }
 0x42a   :  { %v10492_v7 = vpop.permute.xlu1 %5799  ;;  %v10514_v16 = vpop.permute.xlu0 %3618 }
 0x42b   :  { %12481 = vst [vmem:[#allocation201_spill] sm:$0xff] %v10514_v16 }
 0x42f   :  { %v5140_v28 = vpop.permute.xlu1 %5139 }
 0x434   :  { %v10494_v48 = vpop.permute.xlu1 %5303 }
 0x439   :  { %v10496_v15 = vpop.permute.xlu1 %5631 }
 0x43e   :  { %v10498_v37 = vpop.permute.xlu1 %5795 }
 0x440   :  { %v7064_v3 = vpop.f32.mrf.mxu0 }
 0x442   :  { %v7065_v33 = vpop.f32.mrf.mxu0 }
 0x443   :  { %v10502_v54 = vpop.permute.xlu1 %5299  ;;  %v7066_v22 = vadd.f32 %v7065_v33, %v7064_v3  ;;  %v10518_v3 = vpop.permute.xlu0 %3628 }
 0x444   :  { %12483 = vst [vmem:[#allocation203_spill] sm:$0xff] %v10518_v3 }
 0x445   :  { %3508 = vrot.lane.b32.xlu0 %v7066_v22, %s7686_s4 }
 0x447   :  { %v7067_v51 = vpop.f32.mrf.mxu0  ;;  %v10522_v22 = vpop.permute.xlu0 %3638 }
 0x448   :  { %v10507_v50 = vpop.permute.xlu1 %5463  ;;  %12485 = vst [vmem:[#allocation205_spill] sm:$0xff] %v10522_v22  ;;  %v12490_v22 = vld [vmem:[#allocation63_spill] sm:$0xff] }
 0x449   :  { %12479 = vst [vmem:[#allocation199_spill] sm:$0xff] %v10507_v50  ;;  %v7068_v60 = vpop.f32.mrf.mxu0 }
 0x44a   :  { %v7069_v46 = vadd.f32 %v7068_v60, %v7067_v51 }
 0x44b   :  { %v10526_v50 = vpop.permute.xlu0 %3648 }
 0x44c   :  { %3510 = vrot.lane.b32.xlu1 %v7069_v46, %s7686_s4 }
 0x44d   :  { %v10512_v47 = vpop.permute.xlu1 %5791 }
 0x44f   :  { %v10530_v46 = vpop.permute.xlu0 %3658 }
 0x450   :  { %12488 = vst [vmem:[#allocation208_spill] sm:$0xff] %v10530_v46  ;;  %v12492_v46 = vld [vmem:[#allocation10_spill] sm:$0xff] }
 0x452   :  { %v10516_v11 = vpop.permute.xlu1 %5955 }
 0x453   :  { %12482 = vst [vmem:[#allocation202_spill] sm:$0xff] %v10516_v11  ;;  %v12491_v11 = vld [vmem:[#allocation23_spill] sm:$0xff] }
 0x457   :  { %v10520_v33 = vpop.permute.xlu1 %5623 }
 0x458   :  { %12484 = vst [vmem:[#allocation204_spill] sm:$0xff] %v10520_v33 }
 0x45c   :  { %v10524_v25 = vpop.permute.xlu1 %5787 }
 0x45d   :  { %12486 = vst [vmem:[#allocation206_spill] sm:$0xff] %v10524_v25 }
 0x461   :  { %v10528_v60 = vpop.permute.xlu1 %5619 }
 0x462   :  { %12487 = vst [vmem:[#allocation207_spill] sm:$0xff] %v10528_v60 }
 0x466   :  { %v10532_v51 = vpop.permute.xlu1 %5783 }
 0x46a   :  { %v10535_v3 = vpop.permute.xlu1 %5779 }
 0x46b   :  { %12489 = vst [vmem:[#allocation209_spill] sm:$0xff] %v10535_v3 }
 0x470   :  { %v3489_v26 = vpop.permute.xlu0 %3488 }
 0x471   :  { %v3537_v16 = vsel %vm3536_vm3, 0.0, %v3489_v26 }
 0x472   :  { %v10538_v33 = vsel %vm3553_vm4, %v3537_v16, 0.0  ;;  %v10550_v16 = vpop.permute.xlu1 %5939 }
 0x473   :  { %v3922_v25 = vmul.f32 %v12490_v22, %v10538_v33  ;;  %v3762_v60 = vmul.f32 %v12491_v11, %v10538_v33  ;;  %v4242_v26 = vmul.f32 %v9502_v23, %v10538_v33  ;;  %v4082_v3 = vmul.f32 %v12492_v46, %v10538_v33 }
 0x474   :  { %v4562_v11 = vmul.f32 %v9658_v40, %v10538_v33  ;;  %v4722_v46 = vmul.f32 %v9475_v8, %v10538_v33  ;;  %v5042_v40 = vmul.f32 %v9772_v63, %v10538_v33  ;;  %v12494_v8 = vld [vmem:[#allocation50_spill] sm:$0xff] }
 0x475   :  { %3954 = vrot.lane.b32.xlu0 %v3922_v25, %s7687_s26  ;;  %3794 = vrot.lane.b32.xlu1 %v3762_v60, %s7688_s27  ;;  %v12493_v25 = vld [vmem:[#allocation62_spill] sm:$0xff]  ;;  %v4882_v60 = vmul.f32 %v10464_v57, %v10538_v33 }
 0x476   :  { %v4402_v22 = vmul.f32 %v12493_v25, %v10538_v33  ;;  %v3491_v23 = vpop.permute.xlu1 %3490  ;;  %v12495_v25 = vld [vmem:[#allocation31_spill] sm:$0xff] }
 0x479   :  { %4274 = vrot.lane.b32.xlu0 %v4242_v26, %s7689_s1  ;;  %4114 = vrot.lane.b32.xlu1 %v4082_v3, %s7690_s28  ;;  %v3538_v3 = vsel %vm3536_vm3, 0.0, %v3491_v23  ;;  %v5202_v26 = vmul.f32 %v5140_v28, %v10538_v33  ;;  %v12496_v28 = vld [vmem:[#allocation44_spill] sm:$0xff] }
 0x47d   :  { %4594 = vrot.lane.b32.xlu0 %v4562_v11, %s7691_s29  ;;  %4434 = vrot.lane.b32.xlu1 %v4402_v22, %s7692_s11  ;;  %v10571_v11 = vsel %vm3553_vm4, %v3538_v3, 0.0  ;;  %v3493_v3 = vpop.permute.xlu0 %3492 }
 0x47e   :  { %v3763_v57 = vmul.f32 %v12494_v8, %v10571_v11  ;;  %v3923_v22 = vmul.f32 %v12495_v25, %v10571_v11  ;;  %v4083_v63 = vmul.f32 %v9417_v0, %v10571_v11  ;;  %v4243_v23 = vmul.f32 %v12496_v28, %v10571_v11 }
 0x47f   :  { %v4723_v0 = vmul.f32 %v9750_v31, %v10571_v11  ;;  %v5363_v31 = vmul.f32 %v10494_v48, %v10571_v11 }
 0x481   :  { %4914 = vrot.lane.b32.xlu0 %v4882_v60, %s7693_s0  ;;  %4754 = vrot.lane.b32.xlu1 %v4722_v46, %s7694_s30  ;;  %v4403_v60 = vmul.f32 %v9585_v5, %v10571_v11  ;;  %v4563_v46 = vmul.f32 %v9403_v44, %v10571_v11  ;;  %v4883_v44 = vmul.f32 %v10446_v49, %v10571_v11  ;;  %v12498_v49 = vld [vmem:[#allocation65_spill] sm:$0xff] }
 0x482   :  { %v5203_v5 = vmul.f32 %v10484_v43, %v10571_v11 }
 0x485   :  { %5074 = vrot.lane.b32.xlu0 %v5042_v40, %s7695_s13  ;;  %5234 = vrot.lane.b32.xlu1 %v5202_v26, %s7696_s14  ;;  %v5043_v40 = vmul.f32 %v10468_v56, %v10571_v11  ;;  %v3539_v26 = vsel %vm3536_vm3, 0.0, %v3493_v3  ;;  %v12497_v56 = vld [vmem:[#allocation51_spill] sm:$0xff] }
 0x486   :  { %v10605_v8 = vsel %vm3553_vm4, %v3539_v26, 0.0 }
 0x487   :  { %v3924_v43 = vmul.f32 %v12498_v49, %v10605_v8  ;;  %v4084_v25 = vmul.f32 %v9426_v62, %v10605_v8  ;;  %v4244_v48 = vmul.f32 %v9512_v20, %v10605_v8  ;;  %v4564_v28 = vmul.f32 %v9667_v61, %v10605_v8  ;;  %v12506_v49 = vld [vmem:[#allocation64_spill] sm:$0xff] }
 0x488   :  { %v4724_v62 = vmul.f32 %v9760_v39, %v10605_v8  ;;  %v5204_v20 = vmul.f32 %v9707_v59, %v10605_v8  ;;  %v5364_v61 = vmul.f32 %v10487_v19, %v10605_v8  ;;  %v12501_v39 = vld [vmem:[#allocation139_spill] sm:$0xff]  ;;  %v12502_v59 = vld [vmem:[#allocation24_spill] sm:$0xff] }
 0x489   :  { %3796 = vrot.lane.b32.xlu0 %v3763_v57, %s7688_s27  ;;  %3956 = vrot.lane.b32.xlu1 %v3923_v22, %s7687_s26  ;;  %v3764_v57 = vmul.f32 %v12497_v56, %v10605_v8  ;;  %v12499_v22 = vld [vmem:[#allocation110_spill] sm:$0xff]  ;;  %v12504_v19 = vld [vmem:[#allocation12_spill] sm:$0xff]  ;;  %v12505_v56 = vld [vmem:[#allocation67_spill] sm:$0xff] }
 0x48d   :  { %4116 = vrot.lane.b32.xlu0 %v4083_v63, %s7690_s28  ;;  %4276 = vrot.lane.b32.xlu1 %v4243_v23, %s7689_s1  ;;  %v4404_v63 = vmul.f32 %v12499_v22, %v10605_v8  ;;  %v3495_v23 = vpop.permute.xlu1 %3494  ;;  %v12508_v22 = vld [vmem:[#allocation90_spill] sm:$0xff] }
 0x48e   :  { %v3540_v3 = vsel %vm3536_vm3, 0.0, %v3495_v23  ;;  %v3497_v23 = vpop.permute.xlu0 %3496 }
 0x491   :  { %4436 = vrot.lane.b32.xlu0 %v4403_v60, %s7692_s11  ;;  %4596 = vrot.lane.b32.xlu1 %v4563_v46, %s7691_s29  ;;  %v12500_v60 = vld [vmem:[#allocation108_spill] sm:$0xff] }
 0x492   :  { %v4884_v46 = vmul.f32 %v12500_v60, %v10605_v8 }
 0x495   :  { %4756 = vrot.lane.b32.xlu0 %v4723_v0, %s7694_s30  ;;  %5076 = vrot.lane.b32.xlu1 %v5043_v40, %s7695_s13  ;;  %v5044_v0 = vmul.f32 %v12501_v39, %v10605_v8  ;;  %v10645_v40 = vsel %vm3553_vm4, %v3540_v3, 0.0 }
 0x496   :  { %v3765_v26 = vmul.f32 %v12502_v59, %v10645_v40  ;;  %v5365_v60 = vmul.f32 %v10471_v29, %v10645_v40  ;;  %v5045_v3 = vmul.f32 %v10424_v12, %v10645_v40  ;;  %v12511_v29 = vld [vmem:[#allocation53_spill] sm:$0xff]  ;;  %v5685_v12 = vmul.f32 %v10496_v15, %v10645_v40  ;;  %v12515_v15 = vld [vmem:[#allocation47_spill] sm:$0xff] }
 0x499   :  { %4916 = vrot.lane.b32.xlu0 %v4883_v44, %s7693_s0  ;;  %5236 = vrot.lane.b32.xlu1 %v5203_v5, %s7696_s14  ;;  %v12503_v44 = vld [vmem:[#allocation160_spill] sm:$0xff] }
 0x49a   :  { %v5524_v5 = vmul.f32 %v12503_v44, %v10605_v8 }
 0x49d   :  { %5396 = vrot.lane.b32.xlu0 %v5363_v31, %s7697_s15  ;;  %3798 = vrot.lane.b32.xlu1 %v3764_v57, %s7688_s27  ;;  %v4085_v31 = vmul.f32 %v12504_v19, %v10645_v40  ;;  %v3925_v57 = vmul.f32 %v12505_v56, %v10645_v40  ;;  %v12514_v19 = vld [vmem:[#allocation112_spill] sm:$0xff]  ;;  %v3499_v56 = vpop.permute.xlu1 %3498 }
 0x4a1   :  { %3958 = vrot.lane.b32.xlu0 %v3924_v43, %s7687_s26  ;;  %4118 = vrot.lane.b32.xlu1 %v4084_v25, %s7690_s28  ;;  %v4405_v43 = vmul.f32 %v12506_v49, %v10645_v40  ;;  %v12507_v25 = vld [vmem:[#allocation95_spill] sm:$0xff]  ;;  %v12516_v49 = vld [vmem:[#allocation140_spill] sm:$0xff] }
 0x4a5   :  { %4278 = vrot.lane.b32.xlu0 %v4244_v48, %s7689_s1  ;;  %4438 = vrot.lane.b32.xlu1 %v4404_v63, %s7692_s11  ;;  %v4245_v48 = vmul.f32 %v12507_v25, %v10645_v40  ;;  %v4725_v63 = vmul.f32 %v12508_v22, %v10645_v40  ;;  %v3501_v25 = vpop.permute.xlu0 %3500  ;;  %v12517_v22 = vld [vmem:[#allocation79_spill] sm:$0xff] }
 0x4a9   :  { %4598 = vrot.lane.b32.xlu0 %v4564_v28, %s7691_s29  ;;  %4758 = vrot.lane.b32.xlu1 %v4724_v62, %s7694_s30  ;;  %v12509_v28 = vld [vmem:[#allocation126_spill] sm:$0xff] }
 0x4aa   :  { %v4565_v62 = vmul.f32 %v12509_v28, %v10645_v40 }
 0x4ad   :  { %5238 = vrot.lane.b32.xlu0 %v5204_v20, %s7696_s14  ;;  %4918 = vrot.lane.b32.xlu1 %v4884_v46, %s7693_s0  ;;  %v4885_v20 = vmul.f32 %v10396_v2, %v10645_v40  ;;  %v3541_v46 = vsel %vm3536_vm3, 0.0, %v3497_v23  ;;  %v5205_v2 = vmul.f32 %v10450_v6, %v10645_v40  ;;  %v12513_v6 = vld [vmem:[#allocation32_spill] sm:$0xff] }
 0x4b1   :  { %5398 = vrot.lane.b32.xlu0 %v5364_v61, %s7697_s15  ;;  %5078 = vrot.lane.b32.xlu1 %v5044_v0, %s7695_s13  ;;  %v12510_v61 = vld [vmem:[#allocation158_spill] sm:$0xff]  ;;  %v10685_v0 = vsel %vm3553_vm4, %v3541_v46, 0.0  ;;  %v3542_v46 = vsel %vm3536_vm3, 0.0, %v3499_v56  ;;  %v12527_v56 = vld [vmem:[#allocation69_spill] sm:$0xff] }
 0x4b2   :  { %v5525_v39 = vmul.f32 %v12510_v61, %v10645_v40  ;;  %v3766_v59 = vmul.f32 %v12511_v29, %v10685_v0  ;;  %v4886_v28 = vmul.f32 %v10371_v52, %v10685_v0  ;;  %v5686_v61 = vmul.f32 %v10490_v36, %v10685_v0  ;;  %v12520_v29 = vld [vmem:[#allocation25_spill] sm:$0xff] }
 0x4b3   :  { %v5366_v36 = vmul.f32 %v10454_v4, %v10685_v0 }
 0x4b5   :  { %3800 = vrot.lane.b32.xlu0 %v3765_v26, %s7688_s27  ;;  %5558 = vrot.lane.b32.xlu1 %v5524_v5, %s7698_s16  ;;  %v12512_v26 = vld [vmem:[#allocation82_spill] sm:$0xff]  ;;  %v3926_v5 = vmul.f32 %v12513_v6, %v10685_v0  ;;  %v5846_v6 = vmul.f32 %v10498_v37, %v10685_v0 }
 0x4b6   :  { %v4086_v44 = vmul.f32 %v12512_v26, %v10685_v0  ;;  %v12523_v26 = vld [vmem:[#allocation14_spill] sm:$0xff] }
 0x4b9   :  { %4120 = vrot.lane.b32.xlu0 %v4085_v31, %s7690_s28  ;;  %3960 = vrot.lane.b32.xlu1 %v3925_v57, %s7687_s26  ;;  %v4406_v31 = vmul.f32 %v12514_v19, %v10685_v0  ;;  %v4246_v57 = vmul.f32 %v12515_v15, %v10685_v0  ;;  %v12526_v19 = vld [vmem:[#allocation66_spill] sm:$0xff] }
 0x4bd   :  { %4440 = vrot.lane.b32.xlu0 %v4405_v43, %s7692_s11  ;;  %4280 = vrot.lane.b32.xlu1 %v4245_v48, %s7689_s1  ;;  %v4726_v43 = vmul.f32 %v12516_v49, %v10685_v0  ;;  %v10713_v48 = vpop.permute.xlu1 %3502  ;;  %v12530_v49 = vld [vmem:[#allocation92_spill] sm:$0xff] }
 0x4c1   :  { %4760 = vrot.lane.b32.xlu0 %v4725_v63, %s7694_s30  ;;  %4600 = vrot.lane.b32.xlu1 %v4565_v62, %s7691_s29  ;;  %v4566_v63 = vmul.f32 %v12517_v22, %v10685_v0  ;;  %v10721_v62 = vpop.permute.xlu0 %3504  ;;  %v10723_v23 = vpop.permute.xlu1 %3506  ;;  %v12531_v22 = vld [vmem:[#allocation97_spill] sm:$0xff] }
 0x4c5   :  { %4920 = vrot.lane.b32.xlu0 %v4885_v20, %s7693_s0  ;;  %5400 = vrot.lane.b32.xlu1 %v5365_v60, %s7697_s15  ;;  %v5526_v20 = vmul.f32 %v10474_v24, %v10685_v0  ;;  %v5046_v60 = vmul.f32 %v10402_v45, %v10685_v0  ;;  %v10732_v52 = vpop.permute.xlu0 %3508  ;;  %v10741_v24 = vsel %vm3553_vm4, %v3542_v46, 0.0 }
 0x4c6   :  { %v3927_v15 = vmul.f32 %v12527_v56, %v10741_v24 }
 0x4c9   :  { %5080 = vrot.lane.b32.xlu0 %v5045_v3, %s7695_s13  ;;  %5560 = vrot.lane.b32.xlu1 %v5525_v39, %s7698_s16  ;;  %v10734_v3 = vpop.permute.xlu1 %3510  ;;  %v5206_v39 = vmul.f32 %v10428_v10, %v10685_v0 }
 0x4cd   :  { %5240 = vrot.lane.b32.xlu0 %v5205_v2, %s7696_s14  ;;  %3802 = vrot.lane.b32.xlu1 %v3766_v59, %s7688_s27  ;;  %v3767_v59 = vmul.f32 %v12520_v29, %v10741_v24 }
 0x4d1   :  { %5720 = vrot.lane.b32.xlu0 %v5685_v12, %s7699_s17  ;;  %4122 = vrot.lane.b32.xlu1 %v4086_v44, %s7690_s28  ;;  %v4087_v44 = vmul.f32 %v12523_v26, %v10741_v24 }
 0x4d5   :  { %3962 = vrot.lane.b32.xlu0 %v3926_v5, %s7687_s26  ;;  %4442 = vrot.lane.b32.xlu1 %v4406_v31, %s7692_s11  ;;  %v4407_v31 = vmul.f32 %v12526_v19, %v10741_v24  ;;  %v3543_v19 = vsel %vm3536_vm3, 0.0, %v3501_v25 }
 0x4d9   :  { %4282 = vrot.lane.b32.xlu0 %v4246_v57, %s7689_s1  ;;  %4762 = vrot.lane.b32.xlu1 %v4726_v43, %s7694_s30  ;;  %v4727_v43 = vmul.f32 %v12530_v49, %v10741_v24 }
 0x4dd   :  { %4602 = vrot.lane.b32.xlu0 %v4566_v63, %s7691_s29  ;;  %4922 = vrot.lane.b32.xlu1 %v4886_v28, %s7693_s0  ;;  %v4247_v63 = vmul.f32 %v12531_v22, %v10741_v24  ;;  %v10815_v22 = vsel %vm3553_vm4, %v3543_v19, 0.0 }
 0x4e1   :  { %5562 = vrot.lane.b32.xlu0 %v5526_v20, %s7698_s16  ;;  %5082 = vrot.lane.b32.xlu1 %v5046_v60, %s7695_s13  ;;  %v12534_v60 = vld [vmem:[#allocation106_spill] sm:$0xff] }
 0x4e2   :  { %v4887_v46 = vmul.f32 %v12534_v60, %v10741_v24  ;;  %v12545_v60 = vld [vmem:[#allocation117_spill] sm:$0xff] }
 0x4e5   :  { %5722 = vrot.lane.b32.xlu0 %v5686_v61, %s7699_s17  ;;  %5242 = vrot.lane.b32.xlu1 %v5206_v39, %s7696_s14  ;;  %v12535_v61 = vld [vmem:[#allocation128_spill] sm:$0xff] }
 0x4e6   :  { %v4567_v39 = vmul.f32 %v12535_v61, %v10741_v24  ;;  %v12546_v61 = vld [vmem:[#allocation55_spill] sm:$0xff] }
 0x4e7   :  { %v10745_v45 = vpop.permute.xlu1 %3794  ;;  %v10747_v2 = vpop.permute.xlu0 %3954 }
 0x4e8   :  { %12518 = vst [vmem:[#allocation63_spill] sm:$0xff] %v10745_v45  ;;  %12519 = vst [vmem:[#allocation23_spill] sm:$0xff] %v10747_v2 }
 0x4e9   :  { %3804 = vrot.lane.b32.xlu0 %v3767_v59, %s7688_s27  ;;  %5402 = vrot.lane.b32.xlu1 %v5366_v36, %s7697_s15  ;;  %v12538_v36 = vld [vmem:[#allocation138_spill] sm:$0xff] }
 0x4ea   :  { %v5047_v26 = vmul.f32 %v12538_v36, %v10741_v24 }
 0x4eb   :  { %v10755_v10 = vpop.permute.xlu1 %4114  ;;  %v10757_v12 = vpop.permute.xlu0 %4274 }
 0x4ec   :  { %12521 = vst [vmem:[#allocation10_spill] sm:$0xff] %v10755_v10  ;;  %12522 = vst [vmem:[#allocation62_spill] sm:$0xff] %v10757_v12 }
 0x4ed   :  { %4124 = vrot.lane.b32.xlu0 %v4087_v44, %s7690_s28  ;;  %5882 = vrot.lane.b32.xlu1 %v5846_v6, %s7700_s18  ;;  %v12539_v44 = vld [vmem:[#allocation148_spill] sm:$0xff] }
 0x4ee   :  { %v5687_v6 = vmul.f32 %v12539_v44, %v10741_v24 }
 0x4ef   :  { %v10765_v4 = vpop.permute.xlu1 %4434  ;;  %v10767_v5 = vpop.permute.xlu0 %4594 }
 0x4f0   :  { %12524 = vst [vmem:[#allocation50_spill] sm:$0xff] %v10765_v4  ;;  %12525 = vst [vmem:[#allocation31_spill] sm:$0xff] %v10767_v5 }
 0x4f1   :  { %4444 = vrot.lane.b32.xlu0 %v4407_v31, %s7692_s11  ;;  %3964 = vrot.lane.b32.xlu1 %v3927_v15, %s7687_s26  ;;  %v12542_v15 = vld [vmem:[#allocation129_spill] sm:$0xff] }
 0x4f2   :  { %v5207_v49 = vmul.f32 %v12542_v15, %v10741_v24 }
 0x4f3   :  { %v10775_v37 = vpop.permute.xlu1 %4754  ;;  %v10777_v57 = vpop.permute.xlu0 %4914 }
 0x4f4   :  { %12528 = vst [vmem:[#allocation44_spill] sm:$0xff] %v10775_v37  ;;  %12529 = vst [vmem:[#allocation51_spill] sm:$0xff] %v10777_v57  ;;  %v7070_v57 = vpop.f32.mrf.mxu0 }
 0x4f5   :  { %4764 = vrot.lane.b32.xlu0 %v4727_v43, %s7694_s30  ;;  %4284 = vrot.lane.b32.xlu1 %v4247_v63, %s7689_s1  ;;  %v5847_v43 = vmul.f32 %v10492_v7, %v10741_v24 }
 0x4f7   :  { %v10785_v28 = vpop.permute.xlu1 %5234  ;;  %v10787_v20 = vpop.permute.xlu0 %5074 }
 0x4f8   :  { %12532 = vst [vmem:[#allocation65_spill] sm:$0xff] %v10785_v28  ;;  %12533 = vst [vmem:[#allocation110_spill] sm:$0xff] %v10787_v20 }
 0x4f9   :  { %4924 = vrot.lane.b32.xlu0 %v4887_v46, %s7693_s0  ;;  %4604 = vrot.lane.b32.xlu1 %v4567_v39, %s7691_s29  ;;  %v5367_v46 = vmul.f32 %v12545_v60, %v10741_v24  ;;  %v3768_v39 = vmul.f32 %v12546_v61, %v10815_v22 }
 0x4fb   :  { %v10795_v29 = vpop.permute.xlu1 %3956  ;;  %v10797_v59 = vpop.permute.xlu0 %3796 }
 0x4fc   :  { %12536 = vst [vmem:[#allocation108_spill] sm:$0xff] %v10795_v29  ;;  %12537 = vst [vmem:[#allocation139_spill] sm:$0xff] %v10797_v59 }
 0x4fd   :  { %5084 = vrot.lane.b32.xlu0 %v5047_v26, %s7695_s13  ;;  %5724 = vrot.lane.b32.xlu1 %v5687_v6, %s7699_s17  ;;  %v12549_v26 = vld [vmem:[#allocation156_spill] sm:$0xff] }
 0x4fe   :  { %v5527_v44 = vmul.f32 %v12549_v26, %v10741_v24  ;;  %v12550_v6 = vld [vmem:[#allocation84_spill] sm:$0xff] }
 0x4ff   :  { %v10806_v31 = vpop.permute.xlu1 %4276  ;;  %v10808_v56 = vpop.permute.xlu0 %4116  ;;  %v4088_v19 = vmul.f32 %v12550_v6, %v10815_v22 }
 0x500   :  { %12540 = vst [vmem:[#allocation24_spill] sm:$0xff] %v10806_v31  ;;  %12541 = vst [vmem:[#allocation160_spill] sm:$0xff] %v10808_v56  ;;  %v12673_v31 = vld [vmem:[#allocation195_spill] sm:$0xff] }
 0x501   :  { %5244 = vrot.lane.b32.xlu0 %v5207_v49, %s7696_s14  ;;  %5884 = vrot.lane.b32.xlu1 %v5847_v43, %s7700_s18  ;;  %v12553_v43 = vld [vmem:[#allocation33_spill] sm:$0xff] }
 0x502   :  { %v3928_v60 = vmul.f32 %v12553_v43, %v10815_v22 }
 0x503   :  { %v10819_v25 = vpop.permute.xlu1 %4596  ;;  %v10821_v63 = vpop.permute.xlu0 %4436 }
 0x504   :  { %12543 = vst [vmem:[#allocation12_spill] sm:$0xff] %v10819_v25  ;;  %12544 = vst [vmem:[#allocation67_spill] sm:$0xff] %v10821_v63  ;;  %v12625_v25 = vld [vmem:[#allocation70_spill] sm:$0xff] }
 0x505   :  { %5404 = vrot.lane.b32.xlu0 %v5367_v46, %s7697_s15  ;;  %3806 = vrot.lane.b32.xlu1 %v3768_v39, %s7688_s27  ;;  %v12554_v46 = vld [vmem:[#allocation114_spill] sm:$0xff] }
 0x506   :  { %v4408_v61 = vmul.f32 %v12554_v46, %v10815_v22 }
 0x507   :  { %v10829_v7 = vpop.permute.xlu1 %5076  ;;  %v10831_v36 = vpop.permute.xlu0 %4756 }
 0x508   :  { %12547 = vst [vmem:[#allocation64_spill] sm:$0xff] %v10829_v7  ;;  %12548 = vst [vmem:[#allocation95_spill] sm:$0xff] %v10831_v36 }
 0x509   :  { %5564 = vrot.lane.b32.xlu0 %v5527_v44, %s7698_s16  ;;  %4126 = vrot.lane.b32.xlu1 %v4088_v19, %s7690_s28  ;;  %v12557_v44 = vld [vmem:[#allocation49_spill] sm:$0xff] }
 0x50a   :  { %v4248_v6 = vmul.f32 %v12557_v44, %v10815_v22  ;;  %v12558_v19 = vld [vmem:[#allocation141_spill] sm:$0xff] }
 0x50b   :  { %v10839_v15 = vpop.permute.xlu1 %5236  ;;  %v10841_v49 = vpop.permute.xlu0 %4916  ;;  %v4728_v28 = vmul.f32 %v12558_v19, %v10815_v22 }
 0x50c   :  { %12551 = vst [vmem:[#allocation90_spill] sm:$0xff] %v10839_v15  ;;  %12552 = vst [vmem:[#allocation126_spill] sm:$0xff] %v10841_v49  ;;  %v7071_v49 = vpop.f32.mrf.mxu0 }
 0x50d   :  { %3966 = vrot.lane.b32.xlu0 %v3928_v60, %s7687_s26  ;;  %4446 = vrot.lane.b32.xlu1 %v4408_v61, %s7692_s11  ;;  %v12561_v60 = vld [vmem:[#allocation80_spill] sm:$0xff] }
 0x50e   :  { %v4568_v61 = vmul.f32 %v12561_v60, %v10815_v22  ;;  %v3544_v60 = vsel %vm3536_vm3, 0.0, %v10713_v48  ;;  %v7073_v36 = vpop.f32.mrf.mxu0 }
 0x50f   :  { %v10849_v39 = vpop.permute.xlu1 %3798  ;;  %v10851_v26 = vpop.permute.xlu0 %5396  ;;  %v10890_v20 = vsel %vm3553_vm4, %v3544_v60, 0.0 }
 0x510   :  { %12555 = vst [vmem:[#allocation158_spill] sm:$0xff] %v10849_v39  ;;  %12556 = vst [vmem:[#allocation53_spill] sm:$0xff] %v10851_v26  ;;  %v4888_v26 = vmul.f32 %v10305_v32, %v10815_v22  ;;  %v7074_v37 = vpop.f32.mrf.mxu0 }
 0x511   :  { %4286 = vrot.lane.b32.xlu0 %v4248_v6, %s7689_s1  ;;  %4766 = vrot.lane.b32.xlu1 %v4728_v28, %s7694_s30  ;;  %v5848_v28 = vmul.f32 %v10477_v27, %v10815_v22  ;;  %v5048_v6 = vmul.f32 %v10346_v58, %v10815_v22  ;;  %v5208_v27 = vmul.f32 %v10375_v42, %v10815_v22 }
 0x513   :  { %v10859_v43 = vpop.permute.xlu1 %4118  ;;  %v10861_v46 = vpop.permute.xlu0 %3958 }
 0x514   :  { %12559 = vst [vmem:[#allocation82_spill] sm:$0xff] %v10859_v43  ;;  %12560 = vst [vmem:[#allocation32_spill] sm:$0xff] %v10861_v46 }
 0x515   :  { %4606 = vrot.lane.b32.xlu0 %v4568_v61, %s7691_s29  ;;  %4926 = vrot.lane.b32.xlu1 %v4888_v26, %s7693_s0  ;;  %v12566_v61 = vld [vmem:[#allocation170_spill] sm:$0xff] }
 0x516   :  { %v6008_v15 = vmul.f32 %v12566_v61, %v10815_v22  ;;  %v5368_v61 = vmul.f32 %v10406_v55, %v10815_v22 }
 0x517   :  { %v10869_v44 = vpop.permute.xlu1 %4438  ;;  %v10871_v19 = vpop.permute.xlu0 %4278 }
 0x518   :  { %12562 = vst [vmem:[#allocation112_spill] sm:$0xff] %v10869_v44  ;;  %12563 = vst [vmem:[#allocation47_spill] sm:$0xff] %v10871_v19  ;;  %v12687_v19 = vld [vmem:[#allocation133_spill] sm:$0xff] }
 0x519   :  { %5886 = vrot.lane.b32.xlu0 %v5848_v28, %s7700_s18  ;;  %5086 = vrot.lane.b32.xlu1 %v5048_v6, %s7695_s13  ;;  %v12569_v28 = vld [vmem:[#allocation26_spill] sm:$0xff] }
 0x51a   :  { %v3769_v6 = vmul.f32 %v12569_v28, %v10890_v20 }
 0x51b   :  { %v10881_v32 = vpop.permute.xlu1 %4758  ;;  %v10883_v26 = vpop.permute.xlu0 %4598 }
 0x51c   :  { %12564 = vst [vmem:[#allocation140_spill] sm:$0xff] %v10881_v32  ;;  %12565 = vst [vmem:[#allocation79_spill] sm:$0xff] %v10883_v26 }
 0x51d   :  { %6046 = vrot.lane.b32.xlu0 %v6008_v15, %s7701_s5  ;;  %5246 = vrot.lane.b32.xlu1 %v5208_v27, %s7696_s14  ;;  %v12572_v15 = vld [vmem:[#allocation16_spill] sm:$0xff] }
 0x51e   :  { %v4089_v27 = vmul.f32 %v12572_v15, %v10890_v20 }
 0x51f   :  { %v10894_v58 = vpop.permute.xlu1 %4918  ;;  %v10896_v48 = vpop.permute.xlu0 %5238 }
 0x520   :  { %12567 = vst [vmem:[#allocation25_spill] sm:$0xff] %v10894_v58  ;;  %12568 = vst [vmem:[#allocation14_spill] sm:$0xff] %v10896_v48  ;;  %v5528_v48 = vmul.f32 %v10432_v9, %v10815_v22  ;;  %v5049_v58 = vmul.f32 %v10314_v41, %v10890_v20  ;;  %v7075_v41 = vadd.f32 %v7074_v37, %v7073_v36  ;;  %v12591_v37 = vld [vmem:[#allocation56_spill] sm:$0xff] }
 0x521   :  { %3808 = vrot.lane.b32.xlu0 %v3769_v6, %s7688_s27  ;;  %5406 = vrot.lane.b32.xlu1 %v5368_v61, %s7697_s15  ;;  %v12575_v6 = vld [vmem:[#allocation68_spill] sm:$0xff] }
 0x522   :  { %v4409_v61 = vmul.f32 %v12575_v6, %v10890_v20 }
 0x523   :  { %v10904_v42 = vpop.permute.xlu1 %5078  ;;  %v10906_v60 = vpop.permute.xlu0 %5398 }
 0x524   :  { %12570 = vst [vmem:[#allocation66_spill] sm:$0xff] %v10904_v42  ;;  %12571 = vst [vmem:[#allocation69_spill] sm:$0xff] %v10906_v60  ;;  %v5688_v60 = vmul.f32 %v10458_v14, %v10815_v22  ;;  %v4889_v42 = vmul.f32 %v10237_v34, %v10890_v20 }
 0x525   :  { %4128 = vrot.lane.b32.xlu0 %v4089_v27, %s7690_s28  ;;  %5566 = vrot.lane.b32.xlu1 %v5528_v48, %s7698_s16  ;;  %v12578_v48 = vld [vmem:[#allocation184_spill] sm:$0xff] }
 0x526   :  { %v4729_v27 = vmul.f32 %v12578_v48, %v10890_v20 }
 0x527   :  { %v10914_v28 = vpop.permute.xlu1 %5558  ;;  %v10916_v55 = vpop.permute.xlu0 %3800 }
 0x528   :  { %12573 = vst [vmem:[#allocation92_spill] sm:$0xff] %v10914_v28  ;;  %12574 = vst [vmem:[#allocation97_spill] sm:$0xff] %v10916_v55  ;;  %v12579_v28 = vld [vmem:[#allocation71_spill] sm:$0xff] }
 0x529   :  { %4448 = vrot.lane.b32.xlu0 %v4409_v61, %s7692_s11  ;;  %5726 = vrot.lane.b32.xlu1 %v5688_v60, %s7699_s17  ;;  %v3929_v7 = vmul.f32 %v12579_v28, %v10890_v20  ;;  %v12582_v60 = vld [vmem:[#allocation99_spill] sm:$0xff] }
 0x52a   :  { %v4249_v61 = vmul.f32 %v12582_v60, %v10890_v20 }
 0x52b   :  { %v10924_v15 = vpop.permute.xlu1 %3960  ;;  %v10926_v9 = vpop.permute.xlu0 %4120 }
 0x52c   :  { %12576 = vst [vmem:[#allocation106_spill] sm:$0xff] %v10924_v15  ;;  %12577 = vst [vmem:[#allocation128_spill] sm:$0xff] %v10926_v9 }
 0x52d   :  { %4768 = vrot.lane.b32.xlu0 %v4729_v27, %s7694_s30  ;;  %3968 = vrot.lane.b32.xlu1 %v3929_v7, %s7687_s26  ;;  %v12585_v7 = vld [vmem:[#allocation130_spill] sm:$0xff] }
 0x52e   :  { %v4569_v27 = vmul.f32 %v12585_v7, %v10890_v20  ;;  %v3545_v7 = vsel %vm3536_vm3, 0.0, %v10721_v62 }
 0x52f   :  { %v10934_v14 = vpop.permute.xlu1 %4280  ;;  %v10936_v6 = vpop.permute.xlu0 %4440 }
 0x530   :  { %12580 = vst [vmem:[#allocation138_spill] sm:$0xff] %v10934_v14  ;;  %12581 = vst [vmem:[#allocation148_spill] sm:$0xff] %v10936_v6 }
 0x531   :  { %4288 = vrot.lane.b32.xlu1 %v4249_v61, %s7689_s1  ;;  %4928 = vrot.lane.b32.xlu0 %v4889_v42, %s7693_s0  ;;  %v6009_v42 = vmul.f32 %v10481_v21, %v10890_v20  ;;  %v5209_v61 = vmul.f32 %v10350_v13, %v10890_v20  ;;  %v10973_v21 = vsel %vm3553_vm4, %v3545_v7, 0.0 }
 0x532   :  { %v3770_v36 = vmul.f32 %v12591_v37, %v10973_v21 }
 0x533   :  { %v10944_v28 = vpop.permute.xlu1 %4600  ;;  %v10946_v48 = vpop.permute.xlu0 %4760 }
 0x534   :  { %12583 = vst [vmem:[#allocation129_spill] sm:$0xff] %v10944_v28  ;;  %12584 = vst [vmem:[#allocation117_spill] sm:$0xff] %v10946_v48  ;;  %v7076_v28 = vpop.f32.mrf.mxu0 }
 0x535   :  { %4608 = vrot.lane.b32.xlu1 %v4569_v27, %s7691_s29  ;;  %5088 = vrot.lane.b32.xlu0 %v5049_v58, %s7695_s13 }
 0x537   :  { %v10954_v34 = vpop.permute.xlu1 %5400  ;;  %v10956_v60 = vpop.permute.xlu0 %4920 }
 0x538   :  { %12586 = vst [vmem:[#allocation55_spill] sm:$0xff] %v10954_v34  ;;  %12587 = vst [vmem:[#allocation156_spill] sm:$0xff] %v10956_v60  ;;  %v5369_v34 = vmul.f32 %v10379_v18, %v10890_v20 }
 0x539   :  { %6048 = vrot.lane.b32.xlu1 %v6009_v42, %s7701_s5  ;;  %5248 = vrot.lane.b32.xlu0 %v5209_v61, %s7696_s14  ;;  %v5529_v42 = vmul.f32 %v10410_v17, %v10890_v20 }
 0x53b   :  { %v10966_v58 = vpop.permute.xlu1 %5560  ;;  %v10968_v27 = vpop.permute.xlu0 %5080 }
 0x53c   :  { %12588 = vst [vmem:[#allocation84_spill] sm:$0xff] %v10966_v58  ;;  %12589 = vst [vmem:[#allocation33_spill] sm:$0xff] %v10968_v27  ;;  %v12607_v27 = vld [vmem:[#allocation52_spill] sm:$0xff] }
 0x53d   :  { %3514 = vrot.lane.b32.xlu1 %v7075_v41, %s7686_s4  ;;  %5408 = vrot.lane.b32.xlu0 %v5369_v34, %s7697_s15  ;;  %v12594_v34 = vld [vmem:[#allocation86_spill] sm:$0xff]  ;;  %v5689_v41 = vmul.f32 %v10436_v53, %v10890_v20  ;;  %v4250_v60 = vmul.f32 %v12607_v27, %v10973_v21 }
 0x53e   :  { %v4090_v7 = vmul.f32 %v12594_v34, %v10973_v21  ;;  %v7072_v34 = vadd.f32 %v7071_v49, %v7070_v57  ;;  %v12603_v57 = vld [vmem:[#allocation34_spill] sm:$0xff] }
 0x53f   :  { %v10977_v13 = vpop.permute.xlu1 %3802  ;;  %v10979_v62 = vpop.permute.xlu0 %5240  ;;  %v3930_v49 = vmul.f32 %v12603_v57, %v10973_v21 }
 0x540   :  { %12590 = vst [vmem:[#allocation114_spill] sm:$0xff] %v10979_v62 }
 0x541   :  { %3810 = vrot.lane.b32.xlu1 %v3770_v36, %s7688_s27  ;;  %5568 = vrot.lane.b32.xlu0 %v5529_v42, %s7698_s16  ;;  %v12596_v36 = vld [vmem:[#allocation116_spill] sm:$0xff] }
 0x542   :  { %v4410_v42 = vmul.f32 %v12596_v36, %v10973_v21 }
 0x543   :  { %v10987_v18 = vpop.permute.xlu1 %4122  ;;  %v10989_v61 = vpop.permute.xlu0 %5720 }
 0x544   :  { %12592 = vst [vmem:[#allocation49_spill] sm:$0xff] %v10987_v18  ;;  %12593 = vst [vmem:[#allocation141_spill] sm:$0xff] %v10989_v61  ;;  %v5849_v61 = vmul.f32 %v10461_v35, %v10890_v20  ;;  %v12602_v35 = vld [vmem:[#allocation136_spill] sm:$0xff] }
 0x545   :  { %4130 = vrot.lane.b32.xlu1 %v4090_v7, %s7690_s28  ;;  %5728 = vrot.lane.b32.xlu0 %v5689_v41, %s7699_s17  ;;  %v12599_v41 = vld [vmem:[#allocation104_spill] sm:$0xff] }
 0x546   :  { %v4890_v58 = vmul.f32 %v12599_v41, %v10973_v21 }
 0x547   :  { %v10997_v37 = vpop.permute.xlu1 %4442  ;;  %v10999_v17 = vpop.permute.xlu0 %3962 }
 0x548   :  { %12595 = vst [vmem:[#allocation80_spill] sm:$0xff] %v10997_v37 }
 0x549   :  { %4450 = vrot.lane.b32.xlu1 %v4410_v42, %s7692_s11  ;;  %5888 = vrot.lane.b32.xlu0 %v5849_v61, %s7700_s18  ;;  %v5050_v42 = vmul.f32 %v12602_v35, %v10973_v21 }
 0x54b   :  { %v11007_v53 = vpop.permute.xlu1 %4762  ;;  %v11009_v7 = vpop.permute.xlu0 %4282 }
 0x54c   :  { %12597 = vst [vmem:[#allocation170_spill] sm:$0xff] %v11007_v53  ;;  %12598 = vst [vmem:[#allocation26_spill] sm:$0xff] %v11009_v7 }
 0x54d   :  { %4930 = vrot.lane.b32.xlu1 %v4890_v58, %s7693_s0  ;;  %3512 = vrot.lane.b32.xlu0 %v7072_v34, %s7686_s4  ;;  %v12606_v58 = vld [vmem:[#allocation127_spill] sm:$0xff] }
 0x54e   :  { %v5210_v34 = vmul.f32 %v12606_v58, %v10973_v21  ;;  %v3546_v58 = vsel %vm3536_vm3, 0.0, %v10723_v23 }
 0x54f   :  { %v11015_v36 = vpop.permute.xlu1 %4922  ;;  %v11017_v62 = vpop.permute.xlu0 %4602  ;;  %v11056_v32 = vsel %vm3553_vm4, %v3546_v58, 0.0 }
 0x550   :  { %12600 = vst [vmem:[#allocation16_spill] sm:$0xff] %v11015_v36  ;;  %12601 = vst [vmem:[#allocation68_spill] sm:$0xff] %v11017_v62  ;;  %v4411_v5 = vmul.f32 %v12625_v25, %v11056_v32  ;;  %v12629_v36 = vld [vmem:[#allocation185_spill] sm:$0xff]  ;;  %v12681_v62 = vld [vmem:[#allocation75_spill] sm:$0xff] }
 0x551   :  { %5090 = vrot.lane.b32.xlu1 %v5050_v42, %s7695_s13  ;;  %3970 = vrot.lane.b32.xlu0 %v3930_v49, %s7687_s26  ;;  %v12610_v42 = vld [vmem:[#allocation115_spill] sm:$0xff]  ;;  %v5051_v26 = vmul.f32 %v12629_v36, %v11056_v32 }
 0x552   :  { %v5370_v49 = vmul.f32 %v12610_v42, %v10973_v21 }
 0x553   :  { %v11025_v61 = vpop.permute.xlu1 %5082  ;;  %v11027_v41 = vpop.permute.xlu0 %5562 }
 0x554   :  { %12604 = vst [vmem:[#allocation184_spill] sm:$0xff] %v11025_v61  ;;  %12605 = vst [vmem:[#allocation71_spill] sm:$0xff] %v11027_v41  ;;  %v12611_v61 = vld [vmem:[#allocation81_spill] sm:$0xff] }
 0x555   :  { %5250 = vrot.lane.b32.xlu1 %v5210_v34, %s7696_s14  ;;  %4290 = vrot.lane.b32.xlu0 %v4250_v60, %s7689_s1  ;;  %v4570_v41 = vmul.f32 %v12611_v61, %v10973_v21  ;;  %v12613_v34 = vld [vmem:[#allocation154_spill] sm:$0xff] }
 0x557   :  { %v11035_v35 = vpop.permute.xlu1 %5242  ;;  %v11037_v57 = vpop.permute.xlu0 %5722 }
 0x558   :  { %12608 = vst [vmem:[#allocation99_spill] sm:$0xff] %v11035_v35  ;;  %12609 = vst [vmem:[#allocation130_spill] sm:$0xff] %v11037_v57  ;;  %v5530_v57 = vmul.f32 %v12613_v34, %v10973_v21  ;;  %v12614_v35 = vld [vmem:[#allocation96_spill] sm:$0xff] }
 0x559   :  { %5410 = vrot.lane.b32.xlu1 %v5370_v49, %s7697_s15  ;;  %4610 = vrot.lane.b32.xlu0 %v4570_v41, %s7691_s29  ;;  %v4730_v42 = vmul.f32 %v12614_v35, %v10973_v21  ;;  %v12617_v41 = vld [vmem:[#allocation146_spill] sm:$0xff] }
 0x55a   :  { %v5690_v49 = vmul.f32 %v12617_v41, %v10973_v21 }
 0x55b   :  { %v11047_v27 = vpop.permute.xlu1 %5402  ;;  %v11049_v60 = vpop.permute.xlu0 %3804 }
 0x55c   :  { %12612 = vst [vmem:[#allocation56_spill] sm:$0xff] %v11047_v27  ;;  %v12618_v27 = vld [vmem:[#allocation27_spill] sm:$0xff] }
 0x55d   :  { %5570 = vrot.lane.b32.xlu1 %v5530_v57, %s7698_s16  ;;  %4770 = vrot.lane.b32.xlu0 %v4730_v42, %s7694_s30  ;;  %v3771_v34 = vmul.f32 %v12618_v27, %v11056_v32  ;;  %v12620_v57 = vld [vmem:[#allocation123_spill] sm:$0xff] }
 0x55e   :  { %v5850_v42 = vmul.f32 %v12620_v57, %v10973_v21 }
 0x55f   :  { %v11060_v23 = vpop.permute.xlu1 %5882  ;;  %v11062_v61 = vpop.permute.xlu0 %4124 }
 0x560   :  { %12615 = vst [vmem:[#allocation86_spill] sm:$0xff] %v11060_v23  ;;  %12616 = vst [vmem:[#allocation116_spill] sm:$0xff] %v11062_v61  ;;  %v12621_v23 = vld [vmem:[#allocation18_spill] sm:$0xff] }
 0x561   :  { %5730 = vrot.lane.b32.xlu1 %v5690_v49, %s7699_s17  ;;  %3812 = vrot.lane.b32.xlu0 %v3771_v34, %s7688_s27  ;;  %v4091_v48 = vmul.f32 %v12621_v23, %v11056_v32  ;;  %v12624_v49 = vld [vmem:[#allocation168_spill] sm:$0xff] }
 0x562   :  { %v6010_v34 = vmul.f32 %v12624_v49, %v10973_v21 }
 0x563   :  { %v11070_v35 = vpop.permute.xlu1 %3964  ;;  %v11072_v58 = vpop.permute.xlu0 %4444 }
 0x564   :  { %12619 = vst [vmem:[#allocation104_spill] sm:$0xff] %v11072_v58 }
 0x565   :  { %5890 = vrot.lane.b32.xlu1 %v5850_v42, %s7700_s18  ;;  %4132 = vrot.lane.b32.xlu0 %v4091_v48, %s7690_s28  ;;  %v12628_v48 = vld [vmem:[#allocation73_spill] sm:$0xff] }
 0x566   :  { %v3931_v42 = vmul.f32 %v12628_v48, %v11056_v32 }
 0x567   :  { %v11080_v41 = vpop.permute.xlu1 %4284  ;;  %v11082_v27 = vpop.permute.xlu0 %4764 }
 0x568   :  { %12622 = vst [vmem:[#allocation136_spill] sm:$0xff] %v11080_v41  ;;  %12623 = vst [vmem:[#allocation34_spill] sm:$0xff] %v11082_v27 }
 0x569   :  { %6050 = vrot.lane.b32.xlu1 %v6010_v34, %s7701_s5  ;;  %4452 = vrot.lane.b32.xlu0 %v4411_v5, %s7692_s11  ;;  %v12632_v5 = vld [vmem:[#allocation101_spill] sm:$0xff] }
 0x56a   :  { %v4251_v34 = vmul.f32 %v12632_v5, %v11056_v32 }
 0x56b   :  { %v11090_v57 = vpop.permute.xlu1 %4604  ;;  %v11092_v23 = vpop.permute.xlu0 %4924 }
 0x56c   :  { %12626 = vst [vmem:[#allocation127_spill] sm:$0xff] %v11090_v57  ;;  %12627 = vst [vmem:[#allocation52_spill] sm:$0xff] %v11092_v23  ;;  %v5211_v23 = vmul.f32 %v10252_v30, %v11056_v32  ;;  %v12677_v57 = vld [vmem:[#allocation196_spill] sm:$0xff] }
 0x56d   :  { %3972 = vrot.lane.b32.xlu1 %v3931_v42, %s7687_s26  ;;  %5092 = vrot.lane.b32.xlu0 %v5051_v26, %s7695_s13  ;;  %v12635_v26 = vld [vmem:[#allocation131_spill] sm:$0xff] }
 0x56e   :  { %v4571_v42 = vmul.f32 %v12635_v26, %v11056_v32 }
 0x56f   :  { %v11100_v49 = vpop.permute.xlu1 %5724  ;;  %v11102_v25 = vpop.permute.xlu0 %5084 }
 0x570   :  { %12630 = vst [vmem:[#allocation115_spill] sm:$0xff] %v11100_v49  ;;  %12631 = vst [vmem:[#allocation81_spill] sm:$0xff] %v11102_v25  ;;  %v5371_v49 = vmul.f32 %v10319_v38, %v11056_v32  ;;  %v7077_v25 = vpop.f32.mrf.mxu0 }
 0x571   :  { %4292 = vrot.lane.b32.xlu1 %v4251_v34, %s7689_s1  ;;  %5252 = vrot.lane.b32.xlu0 %v5211_v23, %s7696_s14  ;;  %v12637_v23 = vld [vmem:[#allocation169_spill] sm:$0xff] }
 0x572   :  { %v4731_v34 = vmul.f32 %v12637_v23, %v11056_v32  ;;  %v3547_v23 = vsel %vm3536_vm3, 0.0, %v10732_v52 }
 0x573   :  { %v11110_v36 = vpop.permute.xlu1 %5884  ;;  %v11112_v48 = vpop.permute.xlu0 %5244 }
 0x574   :  { %12633 = vst [vmem:[#allocation154_spill] sm:$0xff] %v11110_v36  ;;  %12634 = vst [vmem:[#allocation96_spill] sm:$0xff] %v11112_v48  ;;  %v5531_v36 = vmul.f32 %v10359_v1, %v11056_v32  ;;  %v7079_v48 = vpop.f32.mrf.mxu0 }
 0x575   :  { %4612 = vrot.lane.b32.xlu1 %v4571_v42, %s7691_s29  ;;  %5412 = vrot.lane.b32.xlu0 %v5371_v49, %s7697_s15  ;;  %v12639_v49 = vld [vmem:[#allocation179_spill] sm:$0xff] }
 0x576   :  { %v4891_v42 = vmul.f32 %v12639_v49, %v11056_v32  ;;  %v7080_v4 = vpop.f32.mrf.mxu0  ;;  %v11149_v49 = vsel %vm3553_vm4, %v3547_v23, 0.0 }
 0x577   :  { %v11120_v30 = vpop.permute.xlu1 %3806  ;;  %v11122_v5 = vpop.permute.xlu0 %5404  ;;  %v7081_v1 = vadd.f32 %v7080_v4, %v7079_v48  ;;  %v12645_v4 = vld [vmem:[#allocation17_spill] sm:$0xff]  ;;  %v12646_v48 = vld [vmem:[#allocation58_spill] sm:$0xff]  ;;  %v5852_v12 = vmul.f32 %v12673_v31, %v11149_v49 }
 0x578   :  { %12636 = vst [vmem:[#allocation146_spill] sm:$0xff] %v11122_v5  ;;  %v12640_v5 = vld [vmem:[#allocation194_spill] sm:$0xff] }
 0x579   :  { %4772 = vrot.lane.b32.xlu1 %v4731_v34, %s7694_s30  ;;  %5572 = vrot.lane.b32.xlu0 %v5531_v36, %s7698_s16  ;;  %v5691_v63 = vmul.f32 %v12640_v5, %v11056_v32 }
 0x57b   :  { %v11130_v38 = vpop.permute.xlu1 %4126  ;;  %v11132_v26 = vpop.permute.xlu0 %5564 }
 0x57c   :  { %12638 = vst [vmem:[#allocation27_spill] sm:$0xff] %v11132_v26  ;;  %v12642_v26 = vld [vmem:[#allocation15_spill] sm:$0xff] }
 0x57d   :  { %4932 = vrot.lane.b32.xlu1 %v4891_v42, %s7693_s0  ;;  %5732 = vrot.lane.b32.xlu0 %v5691_v63, %s7699_s17  ;;  %v5851_v27 = vmul.f32 %v12642_v26, %v11056_v32  ;;  %v6011_v63 = vmul.f32 %v12645_v4, %v11056_v32  ;;  %v3772_v42 = vmul.f32 %v12646_v48, %v11149_v49 }
 0x57e   :  { %v7078_v26 = vadd.f32 %v7077_v25, %v7076_v28  ;;  %v12653_v28 = vld [vmem:[#allocation118_spill] sm:$0xff] }
 0x57f   :  { %v11142_v36 = vpop.permute.xlu1 %4446  ;;  %v11144_v34 = vpop.permute.xlu0 %3966  ;;  %v4412_v25 = vmul.f32 %v12653_v28, %v11149_v49 }
 0x580   :  { %12641 = vst [vmem:[#allocation123_spill] sm:$0xff] %v11142_v36 }
 0x581   :  { %5892 = vrot.lane.b32.xlu0 %v5851_v27, %s7700_s18  ;;  %3518 = vrot.lane.b32.xlu1 %v7081_v1, %s7686_s4  ;;  %v12649_v1 = vld [vmem:[#allocation88_spill] sm:$0xff] }
 0x582   :  { %v4092_v53 = vmul.f32 %v12649_v1, %v11149_v49 }
 0x583   :  { %v11153_v52 = vpop.permute.xlu1 %4766  ;;  %v11155_v5 = vpop.permute.xlu0 %4286 }
 0x584   :  { %12643 = vst [vmem:[#allocation18_spill] sm:$0xff] %v11153_v52  ;;  %12644 = vst [vmem:[#allocation168_spill] sm:$0xff] %v11155_v5  ;;  %v12667_v52 = vld [vmem:[#allocation190_spill] sm:$0xff] }
 0x585   :  { %6052 = vrot.lane.b32.xlu0 %v6011_v63, %s7701_s5  ;;  %3814 = vrot.lane.b32.xlu1 %v3772_v42, %s7688_s27  ;;  %v12652_v63 = vld [vmem:[#allocation35_spill] sm:$0xff] }
 0x586   :  { %v3932_v48 = vmul.f32 %v12652_v63, %v11149_v49 }
 0x587   :  { %v11163_v23 = vpop.permute.xlu1 %4926  ;;  %v11165_v27 = vpop.permute.xlu0 %4606 }
 0x588   :  { %12647 = vst [vmem:[#allocation70_spill] sm:$0xff] %v11163_v23  ;;  %12648 = vst [vmem:[#allocation73_spill] sm:$0xff] %v11165_v27  ;;  %v12694_v27 = vld [vmem:[#allocation125_spill] sm:$0xff] }
 0x589   :  { %3516 = vrot.lane.b32.xlu0 %v7078_v26, %s7686_s4  ;;  %4134 = vrot.lane.b32.xlu1 %v4092_v53, %s7690_s28  ;;  %v12656_v53 = vld [vmem:[#allocation54_spill] sm:$0xff] }
 0x58a   :  { %v4252_v26 = vmul.f32 %v12656_v53, %v11149_v49 }
 0x58b   :  { %v11171_v4 = vpop.permute.xlu1 %5086  ;;  %v11173_v44 = vpop.permute.xlu0 %5886 }
 0x58c   :  { %12650 = vst [vmem:[#allocation185_spill] sm:$0xff] %v11171_v4  ;;  %12651 = vst [vmem:[#allocation101_spill] sm:$0xff] %v11173_v44  ;;  %v12657_v4 = vld [vmem:[#allocation161_spill] sm:$0xff] }
 0x58d   :  { %3974 = vrot.lane.b32.xlu0 %v3932_v48, %s7687_s26  ;;  %4454 = vrot.lane.b32.xlu1 %v4412_v25, %s7692_s11  ;;  %v4732_v44 = vmul.f32 %v12657_v4, %v11149_v49  ;;  %v12659_v48 = vld [vmem:[#allocation83_spill] sm:$0xff] }
 0x58e   :  { %v4572_v25 = vmul.f32 %v12659_v48, %v11149_v49  ;;  %v3548_v48 = vsel %vm3536_vm3, 0.0, %v10734_v3 }
 0x58f   :  { %v11181_v42 = vpop.permute.xlu1 %5246  ;;  %v11183_v1 = vpop.permute.xlu0 %6046  ;;  %v11222_v6 = vsel %vm3553_vm4, %v3548_v48, 0.0 }
 0x590   :  { %12654 = vst [vmem:[#allocation131_spill] sm:$0xff] %v11181_v42  ;;  %12655 = vst [vmem:[#allocation169_spill] sm:$0xff] %v11183_v1  ;;  %v12660_v42 = vld [vmem:[#allocation186_spill] sm:$0xff] }
 0x591   :  { %4294 = vrot.lane.b32.xlu0 %v4252_v26, %s7689_s1  ;;  %4774 = vrot.lane.b32.xlu1 %v4732_v44, %s7694_s30  ;;  %v5212_v1 = vmul.f32 %v12660_v42, %v11149_v49  ;;  %v12662_v44 = vld [vmem:[#allocation102_spill] sm:$0xff] }
 0x592   :  { %v4892_v26 = vmul.f32 %v12662_v44, %v11149_v49  ;;  %v5532_v44 = vmul.f32 %v12667_v52, %v11149_v49 }
 0x593   :  { %v11191_v63 = vpop.permute.xlu1 %5406  ;;  %v11193_v28 = vpop.permute.xlu0 %3808 }
 0x594   :  { %12658 = vst [vmem:[#allocation179_spill] sm:$0xff] %v11191_v63  ;;  %v12663_v63 = vld [vmem:[#allocation11_spill] sm:$0xff] }
 0x595   :  { %4614 = vrot.lane.b32.xlu0 %v4572_v25, %s7691_s29  ;;  %5254 = vrot.lane.b32.xlu1 %v5212_v1, %s7696_s14  ;;  %v5372_v23 = vmul.f32 %v12663_v63, %v11149_v49  ;;  %v12666_v25 = vld [vmem:[#allocation180_spill] sm:$0xff] }
 0x596   :  { %v12669_v63 = vld [vmem:[#allocation28_spill] sm:$0xff] }
 0x597   :  { %v11201_v53 = vpop.permute.xlu1 %5566  ;;  %v11203_v4 = vpop.permute.xlu0 %4128 }
 0x598   :  { %12661 = vst [vmem:[#allocation194_spill] sm:$0xff] %v11201_v53  ;;  %v5052_v53 = vmul.f32 %v12666_v25, %v11149_v49 }
 0x599   :  { %4934 = vrot.lane.b32.xlu0 %v4892_v26, %s7693_s0  ;;  %5414 = vrot.lane.b32.xlu1 %v5372_v23, %s7697_s15  ;;  %v3773_v26 = vmul.f32 %v12669_v63, %v11222_v6 }
 0x59b   :  { %v11213_v42 = vpop.permute.xlu1 %5726  ;;  %v11215_v1 = vpop.permute.xlu0 %4448 }
 0x59c   :  { %12664 = vst [vmem:[#allocation15_spill] sm:$0xff] %v11213_v42  ;;  %12665 = vst [vmem:[#allocation17_spill] sm:$0xff] %v11215_v1  ;;  %v12670_v42 = vld [vmem:[#allocation192_spill] sm:$0xff] }
 0x59d   :  { %5094 = vrot.lane.b32.xlu0 %v5052_v53, %s7695_s13  ;;  %5574 = vrot.lane.b32.xlu1 %v5532_v44, %s7698_s16  ;;  %v5692_v25 = vmul.f32 %v12670_v42, %v11149_v49  ;;  %v12672_v53 = vld [vmem:[#allocation20_spill] sm:$0xff] }
 0x59e   :  { %v4093_v44 = vmul.f32 %v12672_v53, %v11222_v6 }
 0x59f   :  { %v11226_v3 = vpop.permute.xlu1 %3968  ;;  %v11228_v23 = vpop.permute.xlu0 %4768 }
 0x5a0   :  { %12668 = vst [vmem:[#allocation58_spill] sm:$0xff] %v11228_v23  ;;  %v12690_v23 = vld [vmem:[#allocation171_spill] sm:$0xff] }
 0x5a1   :  { %3816 = vrot.lane.b32.xlu0 %v3773_v26, %s7688_s27  ;;  %5734 = vrot.lane.b32.xlu1 %v5692_v25, %s7699_s17  ;;  %v12676_v26 = vld [vmem:[#allocation72_spill] sm:$0xff] }
 0x5a2   :  { %v4413_v25 = vmul.f32 %v12676_v26, %v11222_v6 }
 0x5a3   :  { %v11236_v52 = vpop.permute.xlu1 %4288  ;;  %v11238_v48 = vpop.permute.xlu0 %4928 }
 0x5a4   :  { %12671 = vst [vmem:[#allocation88_spill] sm:$0xff] %v11238_v48  ;;  %v6012_v48 = vmul.f32 %v12677_v57, %v11149_v49 }
 0x5a5   :  { %4136 = vrot.lane.b32.xlu0 %v4093_v44, %s7690_s28  ;;  %5894 = vrot.lane.b32.xlu1 %v5852_v12, %s7700_s18  ;;  %v12680_v12 = vld [vmem:[#allocation94_spill] sm:$0xff] }
 0x5a6   :  { %v4733_v44 = vmul.f32 %v12680_v12, %v11222_v6 }
 0x5a7   :  { %v11246_v63 = vpop.permute.xlu1 %4608  ;;  %v11248_v42 = vpop.permute.xlu0 %5088 }
 0x5a8   :  { %12674 = vst [vmem:[#allocation35_spill] sm:$0xff] %v11246_v63  ;;  %12675 = vst [vmem:[#allocation118_spill] sm:$0xff] %v11248_v42  ;;  %v3933_v42 = vmul.f32 %v12681_v62, %v11222_v6 }
 0x5a9   :  { %4456 = vrot.lane.b32.xlu0 %v4413_v25, %s7692_s11  ;;  %6054 = vrot.lane.b32.xlu1 %v6012_v48, %s7701_s5  ;;  %v12683_v48 = vld [vmem:[#allocation100_spill] sm:$0xff] }
 0x5aa   :  { %v4893_v25 = vmul.f32 %v12683_v48, %v11222_v6 }
 0x5ab   :  { %v11256_v53 = vpop.permute.xlu1 %6048  ;;  %v11258_v31 = vpop.permute.xlu0 %5248 }
 0x5ac   :  { %12678 = vst [vmem:[#allocation54_spill] sm:$0xff] %v11256_v53  ;;  %12679 = vst [vmem:[#allocation161_spill] sm:$0xff] %v11258_v31  ;;  %v12684_v53 = vld [vmem:[#allocation103_spill] sm:$0xff] }
 0x5ad   :  { %4776 = vrot.lane.b32.xlu0 %v4733_v44, %s7694_s30  ;;  %3976 = vrot.lane.b32.xlu1 %v3933_v42, %s7687_s26  ;;  %v4253_v31 = vmul.f32 %v12684_v53, %v11222_v6  ;;  %v12686_v42 = vld [vmem:[#allocation113_spill] sm:$0xff] }
 0x5ae   :  { %v5373_v44 = vmul.f32 %v12686_v42, %v11222_v6 }
 0x5af   :  { %v11266_v26 = vpop.permute.xlu1 %3514  ;;  %v11268_v57 = vpop.permute.xlu0 %5408 }
 0x5b0   :  { %12682 = vst [vmem:[#allocation83_spill] sm:$0xff] %v11268_v57  ;;  %v4573_v57 = vmul.f32 %v12687_v19, %v11222_v6 }
 0x5b1   :  { %4936 = vrot.lane.b32.xlu0 %v4893_v25, %s7693_s0  ;;  %4296 = vrot.lane.b32.xlu1 %v4253_v31, %s7689_s1  ;;  %v12689_v31 = vld [vmem:[#allocation152_spill] sm:$0xff] }
 0x5b2   :  { %v5533_v25 = vmul.f32 %v12689_v31, %v11222_v6 }
 0x5b3   :  { %v11276_v12 = vpop.permute.xlu1 %3810  ;;  %v11278_v62 = vpop.permute.xlu0 %5568 }
 0x5b4   :  { %12685 = vst [vmem:[#allocation186_spill] sm:$0xff] %v11278_v62  ;;  %v5053_v62 = vmul.f32 %v12690_v23, %v11222_v6 }
 0x5b5   :  { %5416 = vrot.lane.b32.xlu0 %v5373_v44, %s7697_s15  ;;  %4616 = vrot.lane.b32.xlu1 %v4573_v57, %s7691_s29  ;;  %v12693_v57 = vld [vmem:[#allocation144_spill] sm:$0xff] }
 0x5b6   :  { %v5693_v44 = vmul.f32 %v12693_v57, %v11222_v6  ;;  %v12697_v57 = vld [vmem:[#allocation60_spill] sm:$0xff] }
 0x5b7   :  { %v11286_v48 = vpop.permute.xlu1 %4130  ;;  %v11288_v53 = vpop.permute.xlu0 %5728 }
 0x5b8   :  { %12688 = vst [vmem:[#allocation102_spill] sm:$0xff] %v11288_v53  ;;  %v5213_v53 = vmul.f32 %v12694_v27, %v11222_v6 }
 0x5b9   :  { %5576 = vrot.lane.b32.xlu0 %v5533_v25, %s7698_s16  ;;  %5096 = vrot.lane.b32.xlu1 %v5053_v62, %s7695_s13  ;;  %v12696_v25 = vld [vmem:[#allocation121_spill] sm:$0xff] }
 0x5ba   :  { %v5853_v62 = vmul.f32 %v12696_v25, %v11222_v6 }
 0x5bb   :  { %v11296_v42 = vpop.permute.xlu1 %4450  ;;  %v11298_v19 = vpop.permute.xlu0 %5888 }
 0x5bc   :  { %12691 = vst [vmem:[#allocation11_spill] sm:$0xff] %v11296_v42  ;;  %12692 = vst [vmem:[#allocation180_spill] sm:$0xff] %v11298_v19 }
 0x5bd   :  { %5736 = vrot.lane.b32.xlu0 %v5693_v44, %s7699_s17  ;;  %5256 = vrot.lane.b32.xlu1 %v5213_v53, %s7696_s14  ;;  %v12699_v53 = vld [vmem:[#allocation166_spill] sm:$0xff] }
 0x5be   :  { %v6013_v10 = vmul.f32 %v12699_v53, %v11222_v6  ;;  %v12703_v53 = vld [vmem:[#allocation120_spill] sm:$0xff] }
 0x5bf   :  { %v11306_v31 = vpop.permute.xlu1 %4930  ;;  %v3513_v23 = vpop.permute.xlu0 %3512 }
 0x5c0   :  { %12695 = vst [vmem:[#allocation190_spill] sm:$0xff] %v11306_v31  ;;  %v3549_v14 = vsel %vm3536_vm3, 0.0, %v3513_v23  ;;  %v12700_v23 = vld [vmem:[#allocation89_spill] sm:$0xff] }
 0x5c1   :  { %v11312_v19 = vsel %vm3553_vm4, %v3549_v14, 0.0  ;;  %5896 = vrot.lane.b32.xlu0 %v5853_v62, %s7700_s18 }
 0x5c2   :  { %v3774_v27 = vmul.f32 %v12697_v57, %v11312_v19  ;;  %v4094_v14 = vmul.f32 %v12700_v23, %v11312_v19  ;;  %v12702_v57 = vld [vmem:[#allocation36_spill] sm:$0xff]  ;;  %v12706_v23 = vld [vmem:[#allocation57_spill] sm:$0xff] }
 0x5c3   :  { %v11317_v56 = vpop.permute.xlu1 %5090  ;;  %v11319_v44 = vpop.permute.xlu0 %3970  ;;  %v3934_v31 = vmul.f32 %v12702_v57, %v11312_v19  ;;  %v4254_v58 = vmul.f32 %v12706_v23, %v11312_v19  ;;  %v12707_v57 = vld [vmem:[#allocation155_spill] sm:$0xff] }
 0x5c4   :  { %12698 = vst [vmem:[#allocation28_spill] sm:$0xff] %v11317_v56  ;;  %3818 = vrot.lane.b32.xlu1 %v3774_v27, %s7688_s27  ;;  %v4414_v56 = vmul.f32 %v12703_v53, %v11312_v19  ;;  %v12710_v53 = vld [vmem:[#allocation85_spill] sm:$0xff]  ;;  %v12711_v23 = vld [vmem:[#allocation163_spill] sm:$0xff] }
 0x5c5   :  { %6056 = vrot.lane.b32.xlu0 %v6013_v10, %s7701_s5  ;;  %v4574_v37 = vmul.f32 %v12710_v53, %v11312_v19  ;;  %v12714_v53 = vld [vmem:[#allocation187_spill] sm:$0xff] }
 0x5c7   :  { %v11327_v25 = vpop.permute.xlu1 %5250  ;;  %v11329_v62 = vpop.permute.xlu0 %4290 }
 0x5c8   :  { %12701 = vst [vmem:[#allocation192_spill] sm:$0xff] %v11327_v25  ;;  %4138 = vrot.lane.b32.xlu1 %v4094_v14, %s7690_s28  ;;  %v4894_v25 = vmul.f32 %v12707_v57, %v11312_v19  ;;  %v12713_v57 = vld [vmem:[#allocation149_spill] sm:$0xff] }
 0x5c9   :  { %3978 = vrot.lane.b32.xlu0 %v3934_v31, %s7687_s26  ;;  %v4734_v43 = vmul.f32 %v12713_v57, %v11312_v19 }
 0x5cb   :  { %v11337_v27 = vpop.permute.xlu1 %5410  ;;  %v11339_v10 = vpop.permute.xlu0 %4610 }
 0x5cc   :  { %12704 = vst [vmem:[#allocation20_spill] sm:$0xff] %v11337_v27  ;;  %12705 = vst [vmem:[#allocation195_spill] sm:$0xff] %v11339_v10  ;;  %4458 = vrot.lane.b32.xlu1 %v4414_v56, %s7692_s11  ;;  %v5054_v27 = vmul.f32 %v12711_v23, %v11312_v19  ;;  %v12716_v23 = vld [vmem:[#allocation173_spill] sm:$0xff] }
 0x5cd   :  { %4298 = vrot.lane.b32.xlu0 %v4254_v58, %s7689_s1  ;;  %v5214_v63 = vmul.f32 %v12716_v23, %v11312_v19 }
 0x5cf   :  { %v11347_v14 = vpop.permute.xlu1 %5570  ;;  %v11349_v31 = vpop.permute.xlu0 %4770 }
 0x5d0   :  { %12708 = vst [vmem:[#allocation72_spill] sm:$0xff] %v11347_v14  ;;  %12709 = vst [vmem:[#allocation196_spill] sm:$0xff] %v11349_v31  ;;  %4938 = vrot.lane.b32.xlu1 %v4894_v25, %s7693_s0  ;;  %v5534_v14 = vmul.f32 %v12714_v53, %v11312_v19 }
 0x5d1   :  { %4618 = vrot.lane.b32.xlu0 %v4574_v37, %s7691_s29 }
 0x5d3   :  { %v11357_v56 = vpop.permute.xlu1 %5730  ;;  %v11359_v58 = vpop.permute.xlu0 %3812 }
 0x5d4   :  { %12712 = vst [vmem:[#allocation94_spill] sm:$0xff] %v11357_v56  ;;  %5098 = vrot.lane.b32.xlu1 %v5054_v27, %s7695_s13  ;;  %v3550_v56 = vsel %vm3536_vm3, 0.0, %v11266_v26  ;;  %v12717_v27 = vld [vmem:[#allocation188_spill] sm:$0xff]  ;;  %v12721_v26 = vld [vmem:[#allocation13_spill] sm:$0xff] }
 0x5d5   :  { %4778 = vrot.lane.b32.xlu0 %v4734_v43, %s7694_s30  ;;  %v5694_v43 = vmul.f32 %v12717_v27, %v11312_v19  ;;  %v11386_v9 = vsel %vm3553_vm4, %v3550_v56, 0.0  ;;  %v12723_v27 = vld [vmem:[#allocation29_spill] sm:$0xff] }
 0x5d6   :  { %v12724_v56 = vld [vmem:[#allocation193_spill] sm:$0xff] }
 0x5d7   :  { %v11367_v25 = vpop.permute.xlu1 %5890  ;;  %v11369_v37 = vpop.permute.xlu0 %4132 }
 0x5d8   :  { %12715 = vst [vmem:[#allocation75_spill] sm:$0xff] %v11367_v25  ;;  %5578 = vrot.lane.b32.xlu1 %v5534_v14, %s7698_s16  ;;  %v12720_v25 = vld [vmem:[#allocation181_spill] sm:$0xff] }
 0x5d9   :  { %5258 = vrot.lane.b32.xlu0 %v5214_v63, %s7696_s14  ;;  %v5374_v36 = vmul.f32 %v12720_v25, %v11312_v19  ;;  %v5854_v63 = vmul.f32 %v12721_v26, %v11312_v19  ;;  %v6014_v25 = vmul.f32 %v12724_v56, %v11312_v19  ;;  %v12726_v26 = vld [vmem:[#allocation22_spill] sm:$0xff] }
 0x5da   :  { %v4095_v29 = vmul.f32 %v12726_v26, %v11386_v9  ;;  %v12730_v56 = vld [vmem:[#allocation74_spill] sm:$0xff]  ;;  %v12731_v26 = vld [vmem:[#allocation105_spill] sm:$0xff] }
 0x5db   :  { %v11379_v57 = vpop.permute.xlu1 %6050  ;;  %v11381_v53 = vpop.permute.xlu0 %4452  ;;  %v4415_v31 = vmul.f32 %v12730_v56, %v11386_v9  ;;  %v12735_v56 = vld [vmem:[#allocation135_spill] sm:$0xff] }
 0x5dc   :  { %12718 = vst [vmem:[#allocation100_spill] sm:$0xff] %v11379_v57  ;;  %12719 = vst [vmem:[#allocation103_spill] sm:$0xff] %v11381_v53  ;;  %5738 = vrot.lane.b32.xlu1 %v5694_v43, %s7699_s17  ;;  %v3775_v57 = vmul.f32 %v12723_v27, %v11386_v9  ;;  %v12727_v27 = vld [vmem:[#allocation77_spill] sm:$0xff] }
 0x5dd   :  { %5418 = vrot.lane.b32.xlu0 %v5374_v36, %s7697_s15 }
 0x5df   :  { %v11392_v14 = vpop.permute.xlu1 %3972  ;;  %v11394_v23 = vpop.permute.xlu0 %5092 }
 0x5e0   :  { %12722 = vst [vmem:[#allocation113_spill] sm:$0xff] %v11394_v23  ;;  %5898 = vrot.lane.b32.xlu1 %v5854_v63, %s7700_s18  ;;  %v3935_v23 = vmul.f32 %v12727_v27, %v11386_v9  ;;  %v12734_v27 = vld [vmem:[#allocation157_spill] sm:$0xff] }
 0x5e1   :  { %3820 = vrot.lane.b32.xlu0 %v3775_v57, %s7688_s27  ;;  %v5055_v41 = vmul.f32 %v12734_v27, %v11386_v9  ;;  %v12739_v27 = vld [vmem:[#allocation145_spill] sm:$0xff] }
 0x5e3   :  { %v11402_v43 = vpop.permute.xlu1 %4292  ;;  %v11404_v36 = vpop.permute.xlu0 %5252 }
 0x5e4   :  { %12725 = vst [vmem:[#allocation133_spill] sm:$0xff] %v11404_v36  ;;  %6058 = vrot.lane.b32.xlu1 %v6014_v25, %s7701_s5  ;;  %v4255_v36 = vmul.f32 %v12731_v26, %v11386_v9  ;;  %v12738_v26 = vld [vmem:[#allocation165_spill] sm:$0xff] }
 0x5e5   :  { %4140 = vrot.lane.b32.xlu0 %v4095_v29, %s7690_s28  ;;  %v5215_v7 = vmul.f32 %v12738_v26, %v11386_v9 }
 0x5e7   :  { %v11412_v63 = vpop.permute.xlu1 %4612  ;;  %v11414_v57 = vpop.permute.xlu0 %5412 }
 0x5e8   :  { %12728 = vst [vmem:[#allocation152_spill] sm:$0xff] %v11412_v63  ;;  %12729 = vst [vmem:[#allocation171_spill] sm:$0xff] %v11414_v57  ;;  %3980 = vrot.lane.b32.xlu1 %v3935_v23, %s7687_s26  ;;  %v4575_v57 = vmul.f32 %v12735_v56, %v11386_v9 }
 0x5e9   :  { %4460 = vrot.lane.b32.xlu0 %v4415_v31, %s7692_s11 }
 0x5eb   :  { %v11422_v25 = vpop.permute.xlu1 %4772  ;;  %v11424_v29 = vpop.permute.xlu0 %5572 }
 0x5ec   :  { %12732 = vst [vmem:[#allocation144_spill] sm:$0xff] %v11422_v25  ;;  %12733 = vst [vmem:[#allocation125_spill] sm:$0xff] %v11424_v29  ;;  %4300 = vrot.lane.b32.xlu1 %v4255_v36, %s7689_s1  ;;  %v4735_v29 = vmul.f32 %v12739_v27, %v11386_v9  ;;  %v12741_v25 = vld [vmem:[#allocation37_spill] sm:$0xff] }
 0x5ed   :  { %5100 = vrot.lane.b32.xlu0 %v5055_v41, %s7695_s13  ;;  %v5695_v56 = vmul.f32 %v12741_v25, %v11386_v9  ;;  %v12745_v25 = vld [vmem:[#allocation111_spill] sm:$0xff] }
 0x5ef   :  { %v11432_v23 = vpop.permute.xlu1 %4932  ;;  %v11434_v31 = vpop.permute.xlu0 %5732 }
 0x5f0   :  { %12736 = vst [vmem:[#allocation121_spill] sm:$0xff] %v11432_v23  ;;  %12737 = vst [vmem:[#allocation60_spill] sm:$0xff] %v11434_v31  ;;  %4620 = vrot.lane.b32.xlu1 %v4575_v57, %s7691_s29  ;;  %v12742_v31 = vld [vmem:[#allocation151_spill] sm:$0xff] }
 0x5f1   :  { %5260 = vrot.lane.b32.xlu0 %v5215_v7, %s7696_s14  ;;  %v4895_v26 = vmul.f32 %v12742_v31, %v11386_v9  ;;  %v12744_v7 = vld [vmem:[#allocation189_spill] sm:$0xff] }
 0x5f2   :  { %v5855_v27 = vmul.f32 %v12744_v7, %v11386_v9 }
 0x5f3   :  { %v11442_v36 = vpop.permute.xlu0 %5892  ;;  %v3519_v41 = vpop.permute.xlu1 %3518 }
 0x5f4   :  { %12740 = vst [vmem:[#allocation166_spill] sm:$0xff] %v11442_v36  ;;  %4780 = vrot.lane.b32.xlu1 %v4735_v29, %s7694_s30  ;;  %v5375_v36 = vmul.f32 %v12745_v25, %v11386_v9 }
 0x5f5   :  { %5740 = vrot.lane.b32.xlu0 %v5695_v56, %s7699_s17  ;;  %v12746_v56 = vld [vmem:[#allocation191_spill] sm:$0xff] }
 0x5f6   :  { %v6015_v31 = vmul.f32 %v12746_v56, %v11386_v9 }
 0x5f7   :  { %v11450_v23 = vpop.permute.xlu0 %6052  ;;  %v11452_v57 = vpop.permute.xlu1 %3814 }
 0x5f8   :  { %12743 = vst [vmem:[#allocation89_spill] sm:$0xff] %v11450_v23  ;;  %4940 = vrot.lane.b32.xlu1 %v4895_v26, %s7693_s0  ;;  %v12747_v26 = vld [vmem:[#allocation182_spill] sm:$0xff] }
 0x5f9   :  { %5900 = vrot.lane.b32.xlu0 %v5855_v27, %s7700_s18  ;;  %v5535_v7 = vmul.f32 %v12747_v26, %v11386_v9  ;;  %v12748_v27 = vld [vmem:[#allocation38_spill] sm:$0xff] }
 0x5fb   :  { %v3517_v29 = vpop.permute.xlu0 %3516  ;;  %v11460_v46 = vpop.permute.xlu1 %4134 }
 0x5fc   :  { %v3551_v23 = vsel %vm3536_vm3, 0.0, %v3517_v29  ;;  %5420 = vrot.lane.b32.xlu1 %v5375_v36, %s7697_s15  ;;  %v12749_v36 = vld [vmem:[#allocation61_spill] sm:$0xff] }
 0x5fd   :  { %v11467_v2 = vsel %vm3553_vm4, %v3551_v23, 0.0  ;;  %6060 = vrot.lane.b32.xlu0 %v6015_v31, %s7701_s5  ;;  %v12751_v31 = vld [vmem:[#allocation59_spill] sm:$0xff] }
 0x5fe   :  { %v3936_v25 = vmul.f32 %v12748_v27, %v11467_v2  ;;  %v3776_v23 = vmul.f32 %v12749_v36, %v11467_v2  ;;  %v4256_v26 = vmul.f32 %v12751_v31, %v11467_v2  ;;  %v12752_v27 = vld [vmem:[#allocation91_spill] sm:$0xff]  ;;  %v12756_v31 = vld [vmem:[#allocation122_spill] sm:$0xff] }
 0x5ff   :  { %v11474_v63 = vpop.permute.xlu0 %3974  ;;  %v11476_v10 = vpop.permute.xlu1 %4454  ;;  %v4096_v1 = vmul.f32 %v12752_v27, %v11467_v2  ;;  %v12755_v36 = vld [vmem:[#allocation87_spill] sm:$0xff] }
 0x600   :  { %5580 = vrot.lane.b32.xlu1 %v5535_v7, %s7698_s16  ;;  %v4576_v5 = vmul.f32 %v12755_v36, %v11467_v2  ;;  %v12759_v27 = vld [vmem:[#allocation147_spill] sm:$0xff] }
 0x601   :  { %3982 = vrot.lane.b32.xlu0 %v3936_v25, %s7687_s26  ;;  %v4896_v15 = vmul.f32 %v12759_v27, %v11467_v2  ;;  %v12760_v36 = vld [vmem:[#allocation143_spill] sm:$0xff]  ;;  %v12764_v27 = vld [vmem:[#allocation124_spill] sm:$0xff] }
 0x603   :  { %v11482_v29 = vpop.permute.xlu0 %4294  ;;  %v11484_v56 = vpop.permute.xlu1 %4774 }
 0x604   :  { %12750 = vst [vmem:[#allocation36_spill] sm:$0xff] %v11484_v56  ;;  %3822 = vrot.lane.b32.xlu1 %v3776_v23, %s7688_s27  ;;  %v4416_v56 = vmul.f32 %v12756_v31, %v11467_v2  ;;  %v12763_v31 = vld [vmem:[#allocation134_spill] sm:$0xff] }
 0x605   :  { %4302 = vrot.lane.b32.xlu0 %v4256_v26, %s7689_s1  ;;  %v5056_v39 = vmul.f32 %v12763_v31, %v11467_v2 }
 0x607   :  { %v11492_v7 = vpop.permute.xlu0 %4614  ;;  %v11494_v25 = vpop.permute.xlu1 %5254 }
 0x608   :  { %12753 = vst [vmem:[#allocation120_spill] sm:$0xff] %v11492_v7  ;;  %12754 = vst [vmem:[#allocation57_spill] sm:$0xff] %v11494_v25  ;;  %4142 = vrot.lane.b32.xlu1 %v4096_v1, %s7690_s28  ;;  %v4736_v25 = vmul.f32 %v12760_v36, %v11467_v2  ;;  %v12766_v36 = vld [vmem:[#allocation175_spill] sm:$0xff] }
 0x609   :  { %4622 = vrot.lane.b32.xlu0 %v4576_v5, %s7691_s29 }
 0x60b   :  { %v11502_v23 = vpop.permute.xlu0 %4934  ;;  %v11504_v26 = vpop.permute.xlu1 %5414 }
 0x60c   :  { %12757 = vst [vmem:[#allocation155_spill] sm:$0xff] %v11502_v23  ;;  %12758 = vst [vmem:[#allocation85_spill] sm:$0xff] %v11504_v26  ;;  %4462 = vrot.lane.b32.xlu1 %v4416_v56, %s7692_s11  ;;  %v5216_v26 = vmul.f32 %v12764_v27, %v11467_v2  ;;  %v5536_v23 = vmul.f32 %v12766_v36, %v11467_v2  ;;  %v12769_v27 = vld [vmem:[#allocation142_spill] sm:$0xff] }
 0x60d   :  { %4942 = vrot.lane.b32.xlu0 %v4896_v15, %s7693_s0  ;;  %v5696_v59 = vmul.f32 %v12769_v27, %v11467_v2 }
 0x60f   :  { %v11512_v1 = vpop.permute.xlu0 %5094  ;;  %v11514_v5 = vpop.permute.xlu1 %5574 }
 0x610   :  { %12761 = vst [vmem:[#allocation163_spill] sm:$0xff] %v11512_v1  ;;  %12762 = vst [vmem:[#allocation149_spill] sm:$0xff] %v11514_v5  ;;  %4782 = vrot.lane.b32.xlu1 %v4736_v25, %s7694_s30  ;;  %v3552_v5 = vsel %vm3536_vm3, 0.0, %v3519_v41  ;;  %v12767_v25 = vld [vmem:[#allocation109_spill] sm:$0xff]  ;;  %v12770_v41 = vld [vmem:[#allocation119_spill] sm:$0xff] }
 0x611   :  { %5102 = vrot.lane.b32.xlu0 %v5056_v39, %s7695_s13  ;;  %v5376_v31 = vmul.f32 %v12767_v25, %v11467_v2  ;;  %v12772_v25 = vld [vmem:[#allocation30_spill] sm:$0xff] }
 0x613   :  { %v11522_v56 = vpop.permute.xlu0 %3816  ;;  %v11524_v15 = vpop.permute.xlu1 %5734 }
 0x614   :  { %12765 = vst [vmem:[#allocation187_spill] sm:$0xff] %v11524_v15  ;;  %5262 = vrot.lane.b32.xlu1 %v5216_v26, %s7696_s14  ;;  %v11540_v15 = vsel %vm3553_vm4, %v3552_v5, 0.0  ;;  %v12773_v5 = vld [vmem:[#allocation164_spill] sm:$0xff] }
 0x615   :  { %5582 = vrot.lane.b32.xlu0 %v5536_v23, %s7698_s16  ;;  %v5856_v23 = vmul.f32 %v12770_v41, %v11467_v2  ;;  %v6016_v27 = vmul.f32 %v12773_v5, %v11467_v2  ;;  %v12775_v41 = vld [vmem:[#allocation42_spill] sm:$0xff]  ;;  %v12778_v5 = vld [vmem:[#allocation76_spill] sm:$0xff] }
 0x616   :  { %v4097_v61 = vmul.f32 %v12775_v41, %v11540_v15  ;;  %v4417_v18 = vmul.f32 %v12778_v5, %v11540_v15  ;;  %v12779_v41 = vld [vmem:[#allocation107_spill] sm:$0xff]  ;;  %v12782_v5 = vld [vmem:[#allocation137_spill] sm:$0xff] }
 0x617   :  { %v11533_v39 = vpop.permute.xlu0 %4136  ;;  %v11535_v1 = vpop.permute.xlu1 %5894  ;;  %v4257_v55 = vmul.f32 %v12779_v41, %v11540_v15 }
 0x618   :  { %12768 = vst [vmem:[#allocation173_spill] sm:$0xff] %v11535_v1  ;;  %5422 = vrot.lane.b32.xlu1 %v5376_v31, %s7697_s15  ;;  %v3777_v1 = vmul.f32 %v12772_v25, %v11540_v15  ;;  %v12776_v25 = vld [vmem:[#allocation78_spill] sm:$0xff] }
 0x619   :  { %5742 = vrot.lane.b32.xlu0 %v5696_v59, %s7699_s17 }
 0x61b   :  { %v11546_v26 = vpop.permute.xlu0 %4456  ;;  %v11548_v36 = vpop.permute.xlu1 %6054 }
 0x61c   :  { %12771 = vst [vmem:[#allocation188_spill] sm:$0xff] %v11548_v36  ;;  %5902 = vrot.lane.b32.xlu1 %v5856_v23, %s7700_s18  ;;  %v3937_v36 = vmul.f32 %v12776_v25, %v11540_v15  ;;  %v12781_v25 = vld [vmem:[#allocation93_spill] sm:$0xff] }
 0x61d   :  { %3824 = vrot.lane.b32.xlu0 %v3777_v1, %s7688_s27  ;;  %v4737_v45 = vmul.f32 %v12781_v25, %v11540_v15  ;;  %v12786_v25 = vld [vmem:[#allocation132_spill] sm:$0xff] }
 0x61f   :  { %v11556_v31 = vpop.permute.xlu0 %4776  ;;  %v11558_v59 = vpop.permute.xlu1 %3976 }
 0x620   :  { %12774 = vst [vmem:[#allocation181_spill] sm:$0xff] %v11556_v31  ;;  %6062 = vrot.lane.b32.xlu1 %v6016_v27, %s7701_s5 }
 0x621   :  { %4144 = vrot.lane.b32.xlu0 %v4097_v61, %s7690_s28 }
 0x623   :  { %v11566_v23 = vpop.permute.xlu0 %4936  ;;  %v11568_v1 = vpop.permute.xlu1 %4296 }
 0x624   :  { %12777 = vst [vmem:[#allocation13_spill] sm:$0xff] %v11566_v23  ;;  %3984 = vrot.lane.b32.xlu1 %v3937_v36, %s7687_s26  ;;  %v4577_v23 = vmul.f32 %v12782_v5, %v11540_v15 }
 0x625   :  { %4464 = vrot.lane.b32.xlu0 %v4417_v18, %s7692_s11  ;;  %v12784_v18 = vld [vmem:[#allocation98_spill] sm:$0xff] }
 0x626   :  { %v4897_v31 = vmul.f32 %v12784_v18, %v11540_v15  ;;  %v12790_v18 = vld [vmem:[#allocation153_spill] sm:$0xff] }
 0x627   :  { %v11576_v27 = vpop.permute.xlu0 %5416  ;;  %v11578_v61 = vpop.permute.xlu1 %4616 }
 0x628   :  { %12780 = vst [vmem:[#allocation29_spill] sm:$0xff] %v11576_v27  ;;  %4304 = vrot.lane.b32.xlu1 %v4257_v55, %s7689_s1  ;;  %v5057_v27 = vmul.f32 %v12786_v25, %v11540_v15 }
 0x629   :  { %4784 = vrot.lane.b32.xlu0 %v4737_v45, %s7694_s30  ;;  %v12788_v45 = vld [vmem:[#allocation159_spill] sm:$0xff] }
 0x62a   :  { %v5377_v7 = vmul.f32 %v12788_v45, %v11540_v15  ;;  %v12793_v45 = vld [vmem:[#allocation177_spill] sm:$0xff] }
 0x62b   :  { %v11586_v36 = vpop.permute.xlu0 %5576  ;;  %v11590_v41 = vpop.permute.xlu1 %5096 }
 0x62c   :  { %12783 = vst [vmem:[#allocation193_spill] sm:$0xff] %v11586_v36  ;;  %12785 = vst [vmem:[#allocation22_spill] sm:$0xff] %v11590_v41  ;;  %4624 = vrot.lane.b32.xlu1 %v4577_v23, %s7691_s29  ;;  %v5217_v36 = vmul.f32 %v12790_v18, %v11540_v15  ;;  %v3678_v18 = vmul.f32 %v10526_v50, %v11312_v19  ;;  %v5362_v19 = vmul.f32 %v10502_v54, %v10538_v33 }
 0x62d   :  { %4944 = vrot.lane.b32.xlu0 %v4897_v31, %s7693_s0  ;;  %v12792_v31 = vld [vmem:[#allocation167_spill] sm:$0xff] }
 0x62e   :  { %v5537_v41 = vmul.f32 %v12792_v31, %v11540_v15 }
 0x62f   :  { %v11596_v55 = vpop.permute.xlu0 %5736  ;;  %v11602_v5 = vpop.permute.xlu1 %5256 }
 0x630   :  { %12787 = vst [vmem:[#allocation77_spill] sm:$0xff] %v11596_v55  ;;  %5104 = vrot.lane.b32.xlu1 %v5057_v27, %s7695_s13  ;;  %12789 = vst [vmem:[#allocation74_spill] sm:$0xff] %v11602_v5  ;;  %v5697_v27 = vmul.f32 %v12793_v45, %v11540_v15  ;;  %v12797_v45 = vld [vmem:[#allocation39_spill] sm:$0xff] }
 0x631   :  { %5424 = vrot.lane.b32.xlu0 %v5377_v7, %s7697_s15  ;;  %v12795_v7 = vld [vmem:[#allocation172_spill] sm:$0xff]  ;;  %v6017_v42 = vmul.f32 %v12797_v45, %v11540_v15  ;;  %v12800_v45 = vld [vmem:[#allocation202_spill] sm:$0xff] }
 0x632   :  { %v6007_v5 = vmul.f32 %v12795_v7, %v10741_v24 }
 0x633   :  { %v11606_v23 = vpop.permute.xlu0 %5896 }
 0x634   :  { %12791 = vst [vmem:[#allocation105_spill] sm:$0xff] %v11606_v23  ;;  %5264 = vrot.lane.b32.xlu1 %v5217_v36, %s7696_s14 }
 0x635   :  { %5584 = vrot.lane.b32.xlu0 %v5537_v41, %s7698_s16  ;;  %v12796_v41 = vld [vmem:[#allocation183_spill] sm:$0xff] }
 0x636   :  { %v3819_v25 = vpop.permute.xlu1 %3818  ;;  %v5857_v23 = vmul.f32 %v12796_v41, %v11540_v15 }
 0x637   :  { %v11614_v55 = vpop.permute.xlu0 %6056  ;;  %v3854_v31 = vadd.f32 %v3819_v25, %v3678_v18  ;;  %v12798_v25 = vld [vmem:[#allocation199_spill] sm:$0xff] }
 0x638   :  { %12794 = vst [vmem:[#allocation157_spill] sm:$0xff] %v11614_v55  ;;  %5744 = vrot.lane.b32.xlu1 %v5697_v27, %s7699_s17  ;;  %v5523_v27 = vmul.f32 %v12798_v25, %v10571_v11 }
 0x639   :  { %6044 = vrot.lane.b32.xlu0 %v6007_v5, %s7701_s5 }
 0x63a   :  { %v4139_v36 = vpop.permute.xlu1 %4138 }
 0x63b   :  { %v3979_v53 = vpop.permute.xlu0 %3978 }
 0x63c   :  { %v4014_v55 = vadd.f32 %v3979_v53, %v3854_v31  ;;  %5904 = vrot.lane.b32.xlu1 %v5857_v23, %s7700_s18  ;;  %v12799_v23 = vld [vmem:[#allocation150_spill] sm:$0xff] }
 0x63d   :  { %6064 = vrot.lane.b32.xlu0 %v6017_v42, %s7701_s5  ;;  %v5684_v31 = vmul.f32 %v12799_v23, %v10605_v8 }
 0x63e   :  { %v4459_v7 = vpop.permute.xlu1 %4458  ;;  %v4174_v50 = vadd.f32 %v4139_v36, %v4014_v55  ;;  %v5845_v55 = vmul.f32 %v10512_v47, %v10645_v40 }
 0x63f   :  { %v4299_v5 = vpop.permute.xlu0 %4298 }
 0x640   :  { %v4334_v18 = vadd.f32 %v4299_v5, %v4174_v50  ;;  %5394 = vrot.lane.b32.xlu1 %v5362_v19, %s7697_s15  ;;  %v6006_v50 = vmul.f32 %v12800_v45, %v10685_v0  ;;  %v12801_v5 = vld [vmem:[#allocation162_spill] sm:$0xff] }
 0x641   :  { %5556 = vrot.lane.b32.xlu0 %v5523_v27, %s7698_s16 }
 0x642   :  { %v4939_v41 = vpop.permute.xlu1 %4938  ;;  %v4494_v53 = vadd.f32 %v4459_v7, %v4334_v18  ;;  %v5522_v7 = vmul.f32 %v12801_v5, %v10538_v33  ;;  %v12802_v18 = vld [vmem:[#allocation204_spill] sm:$0xff] }
 0x643   :  { %v4619_v42 = vpop.permute.xlu0 %4618  ;;  %v5683_v23 = vmul.f32 %v12802_v18, %v10571_v11 }
 0x644   :  { %5718 = vrot.lane.b32.xlu1 %v5684_v31, %s7699_s17  ;;  %v4654_v54 = vadd.f32 %v4619_v42, %v4494_v53  ;;  %v12803_v53 = vld [vmem:[#allocation206_spill] sm:$0xff] }
 0x645   :  { %5880 = vrot.lane.b32.xlu0 %v5845_v55, %s7700_s18  ;;  %v5844_v42 = vmul.f32 %v12803_v53, %v10605_v8  ;;  %v6098_v53 = vld [vmem:[#allocation5] sm:$0xff] }
 0x646   :  { %v5099_v36 = vpop.permute.xlu1 %5098  ;;  %7187 = vmatprep.mubr.f32.mxu1 %v6098_v53 }
 0x647   :  { %v4779_v19 = vpop.permute.xlu0 %4778 }
 0x648   :  { %v4814_v25 = vadd.f32 %v4779_v19, %v4654_v54  ;;  %6042 = vrot.lane.b32.xlu1 %v6006_v50, %s7701_s5  ;;  %v12804_v50 = vld [vmem:[#allocation174_spill] sm:$0xff] }
 0x649   :  { %5554 = vrot.lane.b32.xlu0 %v5522_v7, %s7698_s16  ;;  %v6005_v19 = vmul.f32 %v12804_v50, %v10645_v40 }
 0x64a   :  { %v4974_v27 = vadd.f32 %v4939_v41, %v4814_v25  ;;  %v5579_v47 = vpop.permute.xlu1 %5578  ;;  %v12805_v41 = vld [vmem:[#allocation207_spill] sm:$0xff] }
 0x64b   :  { %v5259_v31 = vpop.permute.xlu0 %5258  ;;  %v5682_v7 = vmul.f32 %v12805_v41, %v10538_v33 }
 0x64c   :  { %v5134_v55 = vadd.f32 %v5099_v36, %v4974_v27  ;;  %5716 = vrot.lane.b32.xlu1 %v5683_v23, %s7699_s17  ;;  %v12806_v27 = vld [vmem:[#allocation46_spill] sm:$0xff] }
 0x64d   :  { %5878 = vrot.lane.b32.xlu0 %v5844_v42, %s7700_s18  ;;  %v3679_v23 = vmul.f32 %v12806_v27, %v11386_v9 }
 0x64e   :  { %v5294_v45 = vadd.f32 %v5259_v31, %v5134_v55  ;;  %v5739_v54 = vpop.permute.xlu1 %5738  ;;  %v5843_v31 = vmul.f32 %v10532_v51, %v10571_v11  ;;  %v12807_v55 = vld [vmem:[#allocation176_spill] sm:$0xff]  ;;  %v12809_v51 = vld [vmem:[#allocation178_spill] sm:$0xff] }
 0x64f   :  { %v5419_v5 = vpop.permute.xlu0 %5418  ;;  %v6004_v50 = vmul.f32 %v12807_v55, %v10605_v8  ;;  %v6117_v55 = vld [vmem:[%s12181_s7 + $0x18] sm:$0xff] }
 0x650   :  { %v5454_v25 = vadd.f32 %v5419_v5, %v5294_v45  ;;  %6040 = vrot.lane.b32.xlu1 %v6005_v19, %s7701_s5  ;;  %v12808_v5 = vld [vmem:[#allocation209_spill] sm:$0xff] }
 0x651   :  { %5714 = vrot.lane.b32.xlu0 %v5682_v7, %s7699_s17  ;;  %v5842_v9 = vmul.f32 %v12808_v5, %v10538_v33 }
 0x652   :  { %v5614_v18 = vadd.f32 %v5579_v47, %v5454_v25  ;;  %v5899_v36 = vpop.permute.xlu1 %5898  ;;  %v6003_v25 = vmul.f32 %v12809_v51, %v10571_v11 }
 0x653   :  { %v3821_v42 = vpop.permute.xlu0 %3820 }
 0x654   :  { %v5774_v41 = vadd.f32 %v5739_v54, %v5614_v18  ;;  %v3855_v45 = vadd.f32 %v3821_v42, %v3679_v23  ;;  %5876 = vrot.lane.b32.xlu1 %v5843_v31, %s7700_s18  ;;  %v6002_v18 = vmul.f32 %v10550_v16, %v10538_v33 }
 0x655   :  { %6038 = vrot.lane.b32.xlu0 %v6004_v50, %s7701_s5 }
 0x656   :  { %v5934_v47 = vadd.f32 %v5899_v36, %v5774_v41  ;;  %v6059_v19 = vpop.permute.xlu1 %6058  ;;  %v6114_v36 = vld [vmem:[%s12181_s7] sm:$0xff] }
 0x657   :  { %v4141_v7 = vpop.permute.xlu0 %4140 }
 0x658   :  { %v11670_v27 = vadd.f32 %v6059_v19, %v5934_v47  ;;  %5874 = vrot.lane.b32.xlu1 %v5842_v9, %s7700_s18  ;;  %v6119_v19 = vld [vmem:[%s12181_s7 + $0x28] sm:$0xff] }
 0x659   :  { %6036 = vrot.lane.b32.xlu0 %v6003_v25, %s7701_s5 }
 0x65a   :  { %v3981_v54 = vpop.permute.xlu1 %3980 }
 0x65b   :  { %v4015_v23 = vadd.f32 %v3981_v54, %v3855_v45  ;;  %v4461_v31 = vpop.permute.xlu0 %4460 }
 0x65c   :  { %6034 = vrot.lane.b32.xlu1 %v6002_v18, %s7701_s5  ;;  %v6123_v18 = vld [vmem:[%s12181_s7 + $0x48] sm:$0xff] }
 0x65d   :  { %6132 = vperm.xlu0 %7436, %v6114_v36   ;;  %v4175_v53 = vadd.f32 %v4141_v7, %v4015_v23  ;;  %v6121_v7 = vld [vmem:[%s12181_s7 + $0x38] sm:$0xff] }
 0x65e   :  { %v4301_v42 = vpop.permute.xlu1 %4300 }
 0x65f   :  { %v4335_v50 = vadd.f32 %v4301_v42, %v4175_v53  ;;  %v5101_v41 = vpop.permute.xlu0 %5100  ;;  %v6125_v42 = vld [vmem:[%s12181_s7 + $0x58] sm:$0xff] }
 0x661   :  { %6147 = vperm.xlu0 %7436, %v6117_v55   ;;  %v4495_v47 = vadd.f32 %v4461_v31, %v4335_v50 }
 0x662   :  { %v4621_v16 = vpop.permute.xlu1 %4620 }
 0x663   :  { %v4655_v45 = vadd.f32 %v4621_v16, %v4495_v47  ;;  %v5261_v5 = vpop.permute.xlu0 %5260 }
 0x665   :  { %6157 = vperm.xlu0 %7436, %v6119_v19   ;;  %v6127_v19 = vld [vmem:[%s12181_s7 + $0x68] sm:$0xff] }
 0x666   :  { %v4781_v9 = vpop.permute.xlu1 %4780 }
 0x667   :  { %v5741_v51 = vpop.permute.xlu0 %5740  ;;  %v4815_v25 = vadd.f32 %v4781_v9, %v4655_v45 }
 0x669   :  { %6167 = vperm.xlu0 %7436, %v6121_v7  }
 0x66a   :  { %v4941_v54 = vpop.permute.xlu1 %4940 }
 0x66b   :  { %v4975_v36 = vadd.f32 %v4941_v54, %v4815_v25  ;;  %v5901_v23 = vpop.permute.xlu0 %5900  ;;  %v6116_v54 = vld [vmem:[%s12181_s7 + $0x10] sm:$0xff] }
 0x66d   :  { %v5135_v31 = vadd.f32 %v5101_v41, %v4975_v36  ;;  %6177 = vperm.xlu0 %7436, %v6123_v18   ;;  %v6115_v41 = vld [vmem:[%s12181_s7 + $0x8] sm:$0xff] }
 0x66e   :  { %v5421_v53 = vpop.permute.xlu1 %5420  ;;  %6137 = vperm.xlu1 %7438, %v6115_v41  }
 0x66f   :  { %v5295_v55 = vadd.f32 %v5261_v5, %v5135_v31  ;;  %v6061_v50 = vpop.permute.xlu0 %6060  ;;  %v6129_v5 = vld [vmem:[%s12181_s7 + $0x78] sm:$0xff] }
 0x670   :  { %v12810_v31 = vld [vmem:[#allocation208_spill] sm:$0xff] }
 0x671   :  { %v5455_v47 = vadd.f32 %v5421_v53, %v5295_v55  ;;  %6187 = vperm.xlu0 %7436, %v6125_v42   ;;  %v3680_v53 = vmul.f32 %v12810_v31, %v11467_v2  ;;  %v6118_v55 = vld [vmem:[%s12181_s7 + $0x20] sm:$0xff] }
 0x672   :  { %v5581_v16 = vpop.permute.xlu1 %5580  ;;  %6142 = vperm.xlu1 %7438, %v6116_v54   ;;  %v12811_v2 = vld [vmem:[#allocation45_spill] sm:$0xff] }
 0x673   :  { %v5615_v45 = vadd.f32 %v5581_v16, %v5455_v47  ;;  %v3983_v9 = vpop.permute.xlu0 %3982  ;;  %v12812_v31 = vld [vmem:[#allocation205_spill] sm:$0xff] }
 0x675   :  { %v5775_v7 = vadd.f32 %v5741_v51, %v5615_v45  ;;  %6197 = vperm.xlu0 %7436, %v6127_v19  }
 0x676   :  { %v3823_v25 = vpop.permute.xlu1 %3822  ;;  %6152 = vperm.xlu1 %7438, %v6118_v55  }
 0x677   :  { %v5935_v18 = vadd.f32 %v5901_v23, %v5775_v7  ;;  %v4303_v36 = vpop.permute.xlu0 %4302  ;;  %v3856_v47 = vadd.f32 %v3823_v25, %v3680_v53  ;;  %v6120_v23 = vld [vmem:[%s12181_s7 + $0x30] sm:$0xff]  ;;  %v3676_v53 = vmul.f32 %v12812_v31, %v11149_v49 }
 0x679   :  { %6207 = vperm.xlu0 %7436, %v6129_v5   ;;  %v11709_v42 = vadd.f32 %v6061_v50, %v5935_v18  ;;  %v4016_v45 = vadd.f32 %v3983_v9, %v3856_v47  ;;  %v3677_v50 = vmul.f32 %v12811_v2, %v11222_v6  ;;  %v6122_v5 = vld [vmem:[%s12181_s7 + $0x40] sm:$0xff]  ;;  %v6124_v6 = vld [vmem:[%s12181_s7 + $0x50] sm:$0xff]  ;;  %v3852_v47 = vadd.f32 %v11452_v57, %v3676_v53 }
 0x67a   :  { %v4143_v51 = vpop.permute.xlu1 %4142  ;;  %6162 = vperm.xlu1 %7438, %v6120_v23   ;;  %v6126_v57 = vld [vmem:[%s12181_s7 + $0x60] sm:$0xff] }
 0x67b   :  { %v4623_v16 = vpop.permute.xlu0 %4622  ;;  %v3853_v25 = vadd.f32 %v11522_v56, %v3677_v50  ;;  %v4176_v54 = vadd.f32 %v4143_v51, %v4016_v45  ;;  %v12813_v56 = vld [vmem:[#allocation203_spill] sm:$0xff] }
 0x67c   :  { %v3674_v51 = vmul.f32 %v12813_v56, %v10973_v21  ;;  %v12814_v45 = vld [vmem:[#allocation43_spill] sm:$0xff] }
 0x67d   :  { %v4013_v9 = vadd.f32 %v11558_v59, %v3853_v25  ;;  %v4336_v23 = vadd.f32 %v4303_v36, %v4176_v54  ;;  %v3675_v49 = vmul.f32 %v12814_v45, %v11056_v32  ;;  %v4012_v59 = vadd.f32 %v11474_v63, %v3852_v47  ;;  %v12815_v32 = vld [vmem:[#allocation41_spill] sm:$0xff] }
 0x67e   :  { %v4463_v19 = vpop.permute.xlu1 %4462  ;;  %6172 = vperm.xlu1 %7438, %v6122_v5   ;;  %v3850_v5 = vadd.f32 %v11276_v12, %v3674_v51  ;;  %v3673_v31 = vmul.f32 %v12815_v32, %v10890_v20  ;;  %v12816_v20 = vld [vmem:[#allocation201_spill] sm:$0xff] }
 0x67f   :  { %v11717_v41 = vpop.permute.xlu0 %4942  ;;  %v4173_v50 = vadd.f32 %v11533_v39, %v4013_v9  ;;  %v3851_v36 = vadd.f32 %v11359_v58, %v3675_v49  ;;  %v4496_v54 = vadd.f32 %v4463_v19, %v4336_v23  ;;  %v4172_v12 = vadd.f32 %v11460_v46, %v4012_v59  ;;  %v6128_v58 = vld [vmem:[%s12181_s7 + $0x70] sm:$0xff]  ;;  %v12819_v59 = vld [vmem:[#allocation48_spill] sm:$0xff] }
 0x680   :  { %v4010_v63 = vadd.f32 %v11319_v44, %v3850_v5  ;;  %v3849_v9 = vadd.f32 %v11193_v28, %v3673_v31  ;;  %v3672_v44 = vmul.f32 %v12816_v20, %v10815_v22  ;;  %v12829_v20 = vld [vmem:[#allocation97_spill] sm:$0xff] }
 0x681   :  { %v4011_v39 = vadd.f32 %v11392_v14, %v3851_v36  ;;  %v4333_v53 = vadd.f32 %v11568_v1, %v4173_v50  ;;  %v4656_v19 = vadd.f32 %v4623_v16, %v4496_v54  ;;  %v12817_v1 = vld [vmem:[#allocation200_spill] sm:$0xff]  ;;  %v4332_v56 = vadd.f32 %v11482_v29, %v4172_v12  ;;  %v12825_v12 = vld [vmem:[#allocation103_spill] sm:$0xff] }
 0x682   :  { %v4783_v7 = vpop.permute.xlu1 %4782  ;;  %6182 = vperm.xlu1 %7438, %v6124_v6   ;;  %v4009_v14 = vadd.f32 %v11226_v3, %v3849_v9  ;;  %v4170_v46 = vadd.f32 %v11286_v48, %v4010_v63  ;;  %v3670_v23 = vmul.f32 %v12817_v1, %v10685_v0  ;;  %v12818_v16 = vld [vmem:[#allocation40_spill] sm:$0xff]  ;;  %v3848_v49 = vadd.f32 %v11120_v30, %v3672_v44 }
 0x683   :  { %v11725_v18 = vpop.permute.xlu0 %5102  ;;  %v4171_v28 = vadd.f32 %v11369_v37, %v4011_v39  ;;  %v4493_v51 = vadd.f32 %v11546_v26, %v4333_v53  ;;  %v3671_v45 = vmul.f32 %v12818_v16, %v10741_v24  ;;  %v4816_v48 = vadd.f32 %v4783_v7, %v4656_v19  ;;  %v12820_v7 = vld [vmem:[#allocation197_spill] sm:$0xff]  ;;  %v12824_v39 = vld [vmem:[#allocation11_spill] sm:$0xff]  ;;  %v12826_v9 = vld [vmem:[#allocation120_spill] sm:$0xff] }
 0x684   :  { %v3846_v3 = vadd.f32 %v10977_v13, %v3670_v23  ;;  %v3681_v0 = vmul.f32 %v12819_v59, %v11540_v15  ;;  %v4008_v29 = vadd.f32 %v11144_v34, %v3848_v49  ;;  %v4169_v26 = vadd.f32 %v11203_v4, %v4009_v14  ;;  %v12821_v34 = vld [vmem:[#allocation19_spill] sm:$0xff]  ;;  %v12830_v14 = vld [vmem:[#allocation49_spill] sm:$0xff]  ;;  %v12834_v49 = vld [vmem:[#allocation106_spill] sm:$0xff] }
 0x685   :  { %v3847_v37 = vadd.f32 %v11049_v60, %v3671_v45  ;;  %v4330_v5 = vadd.f32 %v11329_v62, %v4170_v46  ;;  %v4331_v24 = vadd.f32 %v11402_v43, %v4171_v28  ;;  %v4492_v30 = vadd.f32 %v11476_v10, %v4332_v56  ;;  %v12822_v62 = vld [vmem:[#allocation198_spill] sm:$0xff]  ;;  %v12832_v23 = vld [vmem:[#allocation139_spill] sm:$0xff] }
 0x686   :  { %v11730_v55 = vpop.permute.xlu1 %5262  ;;  %6192 = vperm.xlu1 %7438, %v6126_v57   ;;  %v4653_v57 = vadd.f32 %v11578_v61, %v4493_v51  ;;  %v3666_v36 = vmul.f32 %v12820_v7, %v10538_v33  ;;  %v4006_v15 = vadd.f32 %v10999_v17, %v3846_v3  ;;  %v3667_v4 = vmul.f32 %v12821_v34, %v10571_v11  ;;  %v12823_v61 = vld [vmem:[#allocation21_spill] sm:$0xff]  ;;  %v12833_v28 = vld [vmem:[#allocation158_spill] sm:$0xff] }
 0x687   :  { %v11736_v2 = vpop.permute.xlu0 %5582  ;;  %v4007_v60 = vadd.f32 %v11070_v35, %v3847_v37  ;;  %v3668_v32 = vmul.f32 %v12822_v62, %v10605_v8  ;;  %v4976_v43 = vadd.f32 %v11717_v41, %v4816_v48  ;;  %v3669_v63 = vmul.f32 %v12823_v61, %v10645_v40  ;;  %v12831_v40 = vld [vmem:[#allocation116_spill] sm:$0xff]  ;;  %v12837_v37 = vld [vmem:[#allocation195_spill] sm:$0xff] }
 0x688   :  { %v4168_v33 = vadd.f32 %v11130_v38, %v4008_v29  ;;  %v4329_v17 = vadd.f32 %v11236_v52, %v4169_v26  ;;  %v4490_v35 = vadd.f32 %v12824_v39, %v4330_v5  ;;  %v4491_v53 = vadd.f32 %v12825_v12, %v4331_v24  ;;  %v12835_v48 = vld [vmem:[#allocation168_spill] sm:$0xff] }
 0x689   :  { %v4652_v11 = vadd.f32 %v12826_v9, %v4492_v30  ;;  %v3845_v44 = vadd.f32 %v12829_v20, %v3669_v63  ;;  %v4166_v46 = vadd.f32 %v12830_v14, %v4006_v15  ;;  %v4167_v1 = vadd.f32 %v12831_v40, %v4007_v60  ;;  %v12838_v26 = vld [vmem:[#allocation152_spill] sm:$0xff]  ;;  %v12849_v9 = vld [vmem:[#allocation123_spill] sm:$0xff]  ;;  %v12854_v40 = vld [vmem:[#allocation82_spill] sm:$0xff] }
 0x68a   :  { %v11745_v25 = vpop.permute.xlu1 %5422  ;;  %6202 = vperm.xlu1 %7438, %v6128_v58   ;;  %v12827_v58 = vld [vmem:[#allocation181_spill] sm:$0xff]  ;;  %v3843_v52 = vadd.f32 %v12832_v23, %v3667_v4  ;;  %v3844_v56 = vadd.f32 %v12833_v28, %v3668_v32  ;;  %v5136_v51 = vadd.f32 %v11725_v18, %v4976_v43  ;;  %v4328_v59 = vadd.f32 %v12835_v48, %v4168_v33  ;;  %v12839_v24 = vld [vmem:[#allocation36_spill] sm:$0xff] }
 0x68b   :  { %v11751_v21 = vpop.permute.xlu0 %5742  ;;  %v4813_v19 = vadd.f32 %v12827_v58, %v4653_v57  ;;  %v4005_v3 = vadd.f32 %v12834_v49, %v3845_v44  ;;  %v4650_v29 = vadd.f32 %v12837_v37, %v4490_v35  ;;  %v4651_v5 = vadd.f32 %v12838_v26, %v4491_v53  ;;  %v12840_v57 = vld [vmem:[#allocation13_spill] sm:$0xff]  ;;  %v12842_v18 = vld [vmem:[#allocation32_spill] sm:$0xff]  ;;  %v12850_v58 = vld [vmem:[#allocation35_spill] sm:$0xff] }
 0x68c   :  { %v4812_v30 = vadd.f32 %v12839_v24, %v4652_v11  ;;  %v4004_v60 = vadd.f32 %v12842_v18, %v3844_v56  ;;  %v12844_v4 = vld [vmem:[#allocation136_spill] sm:$0xff]  ;;  %v5296_v33 = vadd.f32 %v11730_v55, %v5136_v51  ;;  %v4488_v11 = vadd.f32 %v12849_v9, %v4328_v59  ;;  %v12853_v44 = vld [vmem:[#allocation22_spill] sm:$0xff] }
 0x68d   :  { %v4327_v62 = vadd.f32 %v12844_v4, %v4167_v1  ;;  %v12845_v43 = vld [vmem:[#allocation196_spill] sm:$0xff]  ;;  %v12857_v56 = vld [vmem:[#allocation190_spill] sm:$0xff] }
 0x68e   :  { %v11760_v6 = vpop.permute.xlu1 %5902  ;;  %v12846_v61 = vld [vmem:[#allocation144_spill] sm:$0xff]  ;;  %v4164_v1 = vadd.f32 %v12854_v40, %v4004_v60 }
 0x68f   :  { %v3825_v47 = vpop.permute.xlu0 %3824  ;;  %v4811_v63 = vadd.f32 %v12846_v61, %v4651_v5  ;;  %v12847_v35 = vld [vmem:[#allocation108_spill] sm:$0xff]  ;;  %v12862_v5 = vld [vmem:[#allocation73_spill] sm:$0xff] }
 0x690   :  { %v3857_v13 = vadd.f32 %v3825_v47, %v3681_v0  ;;  %v12828_v47 = vld [vmem:[#allocation63_spill] sm:$0xff]  ;;  %v12836_v0 = vld [vmem:[#allocation17_spill] sm:$0xff]  ;;  %v4003_v12 = vadd.f32 %v12847_v35, %v3843_v52  ;;  %v12855_v55 = vld [vmem:[#allocation80_spill] sm:$0xff]  ;;  %v4648_v24 = vadd.f32 %v12862_v5, %v4488_v11 }
 0x691   :  { %v3842_v41 = vadd.f32 %v12828_v47, %v3666_v36  ;;  %v12841_v36 = vld [vmem:[#allocation23_spill] sm:$0xff]  ;;  %v12856_v23 = vld [vmem:[#allocation104_spill] sm:$0xff]  ;;  %v12870_v61 = vld [vmem:[#allocation57_spill] sm:$0xff] }
 0x692   :  { %v11777_v22 = vpop.permute.xlu1 %6062  ;;  %v4487_v28 = vadd.f32 %v12856_v23, %v4327_v62  ;;  %v12860_v37 = vld [vmem:[#allocation160_spill] sm:$0xff]  ;;  %v12868_v62 = vld [vmem:[#allocation127_spill] sm:$0xff]  ;;  %v12871_v35 = vld [vmem:[#allocation62_spill] sm:$0xff] }
 0x693   :  { %v4145_v50 = vpop.permute.xlu0 %4144  ;;  %v4002_v15 = vadd.f32 %v12841_v36, %v3842_v41  ;;  %v12852_v41 = vld [vmem:[#allocation155_spill] sm:$0xff]  ;;  %v12865_v36 = vld [vmem:[#allocation74_spill] sm:$0xff]  ;;  %v12873_v9 = vld [vmem:[#allocation148_spill] sm:$0xff] }
 0x694   :  { %v4972_v20 = vadd.f32 %v12852_v41, %v4812_v30  ;;  %v12863_v30 = vld [vmem:[#allocation58_spill] sm:$0xff]  ;;  %v12876_v41 = vld [vmem:[#allocation133_spill] sm:$0xff]  ;;  %v12878_v40 = vld [vmem:[#allocation112_spill] sm:$0xff] }
 0x696   :  { %v3985_v54 = vpop.permute.xlu1 %3984 }
 0x697   :  { %v4017_v10 = vadd.f32 %v3985_v54, %v3857_v13  ;;  %v4465_v31 = vpop.permute.xlu0 %4464  ;;  %v4973_v13 = vadd.f32 %v12840_v57, %v4813_v19  ;;  %v12843_v54 = vld [vmem:[#allocation26_spill] sm:$0xff] }
 0x698   :  { %v4326_v34 = vadd.f32 %v12843_v54, %v4166_v46  ;;  %v12866_v54 = vld [vmem:[#allocation47_spill] sm:$0xff] }
 0x699   :  { %v4177_v8 = vadd.f32 %v4145_v50, %v4017_v10  ;;  %v4489_v50 = vadd.f32 %v12836_v0, %v4329_v17  ;;  %v4810_v10 = vadd.f32 %v12845_v43, %v4650_v29  ;;  %v5133_v14 = vadd.f32 %v12853_v44, %v4973_v13  ;;  %v12859_v0 = vld [vmem:[#allocation10_spill] sm:$0xff]  ;;  %v12864_v13 = vld [vmem:[#allocation113_spill] sm:$0xff]  ;;  %v12869_v43 = vld [vmem:[#allocation28_spill] sm:$0xff] }
 0x69a   :  { %v4305_v38 = vpop.permute.xlu1 %4304  ;;  %v4163_v29 = vadd.f32 %v12860_v37, %v4003_v12  ;;  %v12877_v44 = vld [vmem:[#allocation29_spill] sm:$0xff]  ;;  %v12884_v37 = vld [vmem:[#allocation67_spill] sm:$0xff] }
 0x69b   :  { %v4337_v16 = vadd.f32 %v4305_v38, %v4177_v8  ;;  %v4785_v45 = vpop.permute.xlu0 %4784  ;;  %v4649_v19 = vadd.f32 %v12850_v58, %v4489_v50  ;;  %v12851_v8 = vld [vmem:[#allocation121_spill] sm:$0xff]  ;;  %v4486_v38 = vadd.f32 %v12855_v55, %v4326_v34  ;;  %v4970_v51 = vadd.f32 %v12857_v56, %v4810_v10  ;;  %v12874_v58 = vld [vmem:[#allocation18_spill] sm:$0xff] }
 0x69c   :  { %v4971_v47 = vadd.f32 %v12851_v8, %v4811_v63  ;;  %v4162_v50 = vadd.f32 %v12859_v0, %v4002_v15  ;;  %v5293_v18 = vadd.f32 %v12865_v36, %v5133_v14  ;;  %v4324_v34 = vadd.f32 %v12866_v54, %v4164_v1  ;;  %v12875_v8 = vld [vmem:[#allocation88_spill] sm:$0xff]  ;;  %v12883_v0 = vld [vmem:[#allocation50_spill] sm:$0xff] }
 0x69d   :  { %v4497_v7 = vadd.f32 %v4465_v31, %v4337_v16  ;;  %v12848_v31 = vld [vmem:[#allocation128_spill] sm:$0xff]  ;;  %v12858_v16 = vld [vmem:[#allocation163_spill] sm:$0xff]  ;;  %v4809_v57 = vadd.f32 %v12863_v30, %v4649_v19  ;;  %v5130_v10 = vadd.f32 %v12869_v43, %v4970_v51  ;;  %v4808_v19 = vadd.f32 %v12874_v58, %v4648_v24  ;;  %v12882_v51 = vld [vmem:[#allocation85_spill] sm:$0xff] }
 0x69e   :  { %v4625_v32 = vpop.permute.xlu1 %4624  ;;  %v4165_v53 = vadd.f32 %v12848_v31, %v4005_v3  ;;  %v5132_v49 = vadd.f32 %v12858_v16, %v4972_v20  ;;  %v5456_v3 = vadd.f32 %v11745_v25, %v5296_v33  ;;  %v12867_v25 = vld [vmem:[#allocation68_spill] sm:$0xff]  ;;  %v4322_v12 = vadd.f32 %v12871_v35, %v4162_v50  ;;  %v12887_v24 = vld [vmem:[#allocation118_spill] sm:$0xff]  ;;  %v12894_v43 = vld [vmem:[#allocation149_spill] sm:$0xff] }
 0x69f   :  { %v4657_v17 = vadd.f32 %v4625_v32, %v4497_v7  ;;  %v4945_v39 = vpop.permute.xlu0 %4944  ;;  %v5131_v7 = vadd.f32 %v12864_v13, %v4971_v47  ;;  %v4646_v4 = vadd.f32 %v12867_v25, %v4486_v38  ;;  %v4647_v32 = vadd.f32 %v12868_v62, %v4487_v28  ;;  %v12872_v31 = vld [vmem:[#allocation24_spill] sm:$0xff]  ;;  %v12880_v38 = vld [vmem:[#allocation34_spill] sm:$0xff]  ;;  %v12899_v58 = vld [vmem:[#allocation161_spill] sm:$0xff] }
 0x6a0   :  { %v5292_v63 = vadd.f32 %v12870_v61, %v5132_v49  ;;  %v5616_v33 = vadd.f32 %v11736_v2, %v5456_v3  ;;  %v4969_v47 = vadd.f32 %v12875_v8, %v4809_v57  ;;  %v5453_v14 = vadd.f32 %v12877_v44, %v5293_v18  ;;  %v12879_v2 = vld [vmem:[#allocation170_spill] sm:$0xff]  ;;  %v12888_v57 = vld [vmem:[#allocation171_spill] sm:$0xff]  ;;  %v12891_v54 = vld [vmem:[#allocation16_spill] sm:$0xff] }
 0x6a1   :  { %v4817_v46 = vadd.f32 %v4785_v45, %v4657_v17  ;;  %v12861_v45 = vld [vmem:[#allocation138_spill] sm:$0xff]  ;;  %v5291_v20 = vadd.f32 %v12876_v41, %v5131_v7  ;;  %v4484_v1 = vadd.f32 %v12878_v40, %v4324_v34  ;;  %v4806_v55 = vadd.f32 %v12879_v2, %v4646_v4  ;;  %v12889_v7 = vld [vmem:[#allocation193_spill] sm:$0xff]  ;;  %v12892_v25 = vld [vmem:[#allocation52_spill] sm:$0xff] }
 0x6a2   :  { %v5105_v52 = vpop.permute.xlu1 %5104  ;;  %v4325_v26 = vadd.f32 %v12861_v45, %v4165_v53  ;;  %v4323_v53 = vadd.f32 %v12872_v31, %v4163_v29  ;;  %v4807_v23 = vadd.f32 %v12880_v38, %v4647_v32  ;;  %v5452_v16 = vadd.f32 %v12882_v51, %v5292_v63  ;;  %v12885_v29 = vld [vmem:[#allocation129_spill] sm:$0xff]  ;;  %v12893_v32 = vld [vmem:[#allocation20_spill] sm:$0xff] }
 0x6a3   :  { %v4977_v48 = vadd.f32 %v4945_v39, %v4817_v46  ;;  %v5425_v59 = vpop.permute.xlu0 %5424  ;;  %v5776_v49 = vadd.f32 %v11751_v21, %v5616_v33  ;;  %v4482_v50 = vadd.f32 %v12883_v0, %v4322_v12  ;;  %v5129_v30 = vadd.f32 %v12887_v24, %v4969_v47  ;;  %v12896_v35 = vld [vmem:[#allocation12_spill] sm:$0xff]  ;;  %v12897_v31 = vld [vmem:[#allocation117_spill] sm:$0xff] }
 0x6a4   :  { %v4485_v11 = vadd.f32 %v12873_v9, %v4325_v26  ;;  %v12886_v26 = vld [vmem:[#allocation70_spill] sm:$0xff]  ;;  %v5451_v13 = vadd.f32 %v12888_v57, %v5291_v20  ;;  %v5613_v36 = vadd.f32 %v12889_v7, %v5453_v14  ;;  %v4966_v34 = vadd.f32 %v12891_v54, %v4806_v55  ;;  %v12898_v9 = vld [vmem:[#allocation185_spill] sm:$0xff]  ;;  %v12902_v14 = vld [vmem:[#allocation140_spill] sm:$0xff] }
 0x6a5   :  { %v5137_v60 = vadd.f32 %v5105_v52, %v4977_v48  ;;  %v12881_v52 = vld [vmem:[#allocation192_spill] sm:$0xff]  ;;  %v4968_v5 = vadd.f32 %v12886_v26, %v4808_v19  ;;  %v4967_v4 = vadd.f32 %v12892_v25, %v4807_v23  ;;  %v5936_v61 = vadd.f32 %v11760_v6, %v5776_v49  ;;  %v12900_v8 = vld [vmem:[#allocation125_spill] sm:$0xff]  ;;  %v12918_v25 = vld [vmem:[#allocation126_spill] sm:$0xff] }
 0x6a6   :  { %v5265_v15 = vpop.permute.xlu1 %5264  ;;  %v5290_v56 = vadd.f32 %v12881_v52, %v5130_v10  ;;  %v4645_v45 = vadd.f32 %v12885_v29, %v4485_v11  ;;  %v5612_v10 = vadd.f32 %v12894_v43, %v5452_v16  ;;  %v5289_v19 = vadd.f32 %v12899_v58, %v5129_v30  ;;  %v12901_v41 = vld [vmem:[#allocation77_spill] sm:$0xff]  ;;  %v12903_v6 = vld [vmem:[#allocation184_spill] sm:$0xff] }
 0x6a7   :  { %v5297_v17 = vadd.f32 %v5265_v15, %v5137_v60  ;;  %v5585_v39 = vpop.permute.xlu0 %5584  ;;  %v12890_v60 = vld [vmem:[#allocation79_spill] sm:$0xff]  ;;  %v5128_v11 = vadd.f32 %v12898_v9, %v4968_v5  ;;  %v5611_v47 = vadd.f32 %v12900_v8, %v5451_v13  ;;  %v5773_v20 = vadd.f32 %v12901_v41, %v5613_v36  ;;  %v12905_v38 = vld [vmem:[#allocation72_spill] sm:$0xff]  ;;  %v12913_v30 = vld [vmem:[#allocation105_spill] sm:$0xff] }
 0x6a8   :  { %v4644_v21 = vadd.f32 %v12890_v60, %v4484_v1  ;;  %v5450_v15 = vadd.f32 %v12893_v32, %v5290_v56  ;;  %v5126_v40 = vadd.f32 %v12903_v6, %v4966_v34  ;;  %v12904_v1 = vld [vmem:[#allocation81_spill] sm:$0xff]  ;;  %v6096_v56 = vadd.f32 %v11777_v22, %v5936_v61  ;;  %v12907_v16 = vld [vmem:[#allocation44_spill] sm:$0xff] }
 0x6a9   :  { %v5457_v46 = vadd.f32 %v5425_v59, %v5297_v17  ;;  %v4483_v59 = vadd.f32 %v12884_v37, %v4323_v53  ;;  %v12895_v17 = vld [vmem:[#allocation31_spill] sm:$0xff]  ;;  %v4805_v53 = vadd.f32 %v12897_v31, %v4645_v45  ;;  %v5127_v2 = vadd.f32 %v12904_v1, %v4967_v4  ;;  %v12912_v5 = vld [vmem:[#allocation60_spill] sm:$0xff]  ;;  %v12914_v22 = vld [vmem:[#allocation25_spill] sm:$0xff] }
 0x6aa   :  { %v5745_v28 = vpop.permute.xlu1 %5744  ;;  %v5610_v23 = vadd.f32 %v12905_v38, %v5450_v15  ;;  %v12911_v45 = vld [vmem:[#allocation83_spill] sm:$0xff]  ;;  %v5771_v24 = vadd.f32 %v12912_v5, %v5611_v47  ;;  %v5933_v57 = vadd.f32 %v12913_v30, %v5773_v20  ;;  %v12915_v7 = vld [vmem:[#allocation33_spill] sm:$0xff]  ;;  %v12920_v15 = vld [vmem:[#allocation94_spill] sm:$0xff] }
 0x6ab   :  { %v5617_v3 = vadd.f32 %v5585_v39, %v5457_v46  ;;  %v11866_v48 = vpop.permute.xlu0 %6044  ;;  %v4642_v39 = vadd.f32 %v12895_v17, %v4482_v50  ;;  %v4643_v12 = vadd.f32 %v12896_v35, %v4483_v59  ;;  %v4804_v46 = vadd.f32 %v12902_v14, %v4644_v21  ;;  %v12909_v50 = vld [vmem:[#allocation156_spill] sm:$0xff]  ;;  %v12910_v59 = vld [vmem:[#allocation131_spill] sm:$0xff]  ;;  %v12928_v47 = vld [vmem:[#allocation166_spill] sm:$0xff] }
 0x6ac   :  { %v4965_v37 = vadd.f32 %v12909_v50, %v4805_v53  ;;  %v5288_v29 = vadd.f32 %v12910_v59, %v5128_v11  ;;  %v5449_v26 = vadd.f32 %v12911_v45, %v5289_v19  ;;  %v12917_v21 = vld [vmem:[#allocation96_spill] sm:$0xff]  ;;  %v5770_v43 = vadd.f32 %v12920_v15, %v5610_v23  ;;  %v12925_v53 = vld [vmem:[#allocation146_spill] sm:$0xff]  ;;  %v12929_v20 = vld [vmem:[#allocation157_spill] sm:$0xff] }
 0x6ad   :  { %v5777_v18 = vadd.f32 %v5745_v28, %v5617_v3  ;;  %v12906_v28 = vld [vmem:[#allocation187_spill] sm:$0xff]  ;;  %v4802_v49 = vadd.f32 %v12907_v16, %v4642_v39  ;;  %v4964_v13 = vadd.f32 %v12914_v22, %v4804_v46  ;;  %v5287_v54 = vadd.f32 %v12917_v21, %v5127_v2  ;;  %v12923_v39 = vld [vmem:[#allocation114_spill] sm:$0xff]  ;;  %v12940_v5 = vld [vmem:[#allocation180_spill] sm:$0xff] }
 0x6ae   :  { %v5905_v62 = vpop.permute.xlu1 %5904  ;;  %v5772_v52 = vadd.f32 %v12906_v28, %v5612_v10  ;;  %v12908_v3 = vld [vmem:[#allocation95_spill] sm:$0xff]  ;;  %v5125_v36 = vadd.f32 %v12915_v7, %v4965_v37  ;;  %v12921_v10 = vld [vmem:[#allocation173_spill] sm:$0xff]  ;;  %v12926_v11 = vld [vmem:[#allocation194_spill] sm:$0xff]  ;;  %v5931_v41 = vadd.f32 %v12928_v47, %v5771_v24 }
 0x6af   :  { %v5937_v63 = vadd.f32 %v5905_v62, %v5777_v18  ;;  %v6065_v33 = vpop.permute.xlu0 %6064  ;;  %v4803_v0 = vadd.f32 %v12908_v3, %v4643_v12  ;;  %v12916_v18 = vld [vmem:[#allocation99_spill] sm:$0xff]  ;;  %v12924_v12 = vld [vmem:[#allocation56_spill] sm:$0xff]  ;;  %v5447_v9 = vadd.f32 %v12925_v53, %v5287_v54  ;;  %v12927_v19 = vld [vmem:[#allocation186_spill] sm:$0xff] }
 0x6b0   :  { %v5286_v60 = vadd.f32 %v12916_v18, %v5126_v40  ;;  %v12919_v62 = vld [vmem:[#allocation179_spill] sm:$0xff]  ;;  %v5932_v61 = vadd.f32 %v12921_v10, %v5772_v52  ;;  %v5285_v35 = vadd.f32 %v12923_v39, %v5125_v36  ;;  %v5609_v8 = vadd.f32 %v12927_v19, %v5449_v26  ;;  %v12932_v2 = vld [vmem:[#allocation102_spill] sm:$0xff]  ;;  %v12934_v28 = vld [vmem:[#allocation188_spill] sm:$0xff] }
 0x6b1   :  { %v6097_v44 = vadd.f32 %v6065_v33, %v5937_v63  ;;  %v4963_v4 = vadd.f32 %v12918_v25, %v4803_v0  ;;  %v5448_v32 = vadd.f32 %v12919_v62, %v5288_v29  ;;  %v12922_v33 = vld [vmem:[#allocation66_spill] sm:$0xff]  ;;  %v12930_v14 = vld [vmem:[#allocation27_spill] sm:$0xff]  ;;  %v12936_v0 = vld [vmem:[#allocation64_spill] sm:$0xff] }
 0x6b2   :  { %v11891_v55 = vpop.permute.xlu1 %5394  ;;  %v5124_v17 = vadd.f32 %v12922_v33, %v4964_v13  ;;  %v5446_v31 = vadd.f32 %v12924_v12, %v5286_v60  ;;  %v5607_v46 = vadd.f32 %v12930_v14, %v5447_v9  ;;  %v12931_v40 = vld [vmem:[#allocation15_spill] sm:$0xff]  ;;  %v5769_v38 = vadd.f32 %v12932_v2, %v5609_v8  ;;  %v12937_v37 = vld [vmem:[#allocation14_spill] sm:$0xff]  ;;  %v12941_v30 = vld [vmem:[#allocation89_spill] sm:$0xff] }
 0x6b3   :  { %v11896_v51 = vpop.permute.xlu0 %5556  ;;  %7155 = vmatprep.subr.mxu1 %v6097_v44  ;;  %v5608_v58 = vadd.f32 %v12926_v11, %v5448_v32  ;;  %v6092_v52 = vadd.f32 %v12934_v28, %v5932_v61  ;;  %v12935_v16 = vld [vmem:[#allocation51_spill] sm:$0xff]  ;;  %v5123_v50 = vadd.f32 %v12936_v0, %v4963_v4  ;;  %v12943_v36 = vld [vmem:[#allocation101_spill] sm:$0xff]  ;;  %v12944_v18 = vld [vmem:[#allocation100_spill] sm:$0xff] }
 0x6b4   :  { %7156 = vmatpush3.msra.mxu1 %v6097_v44  ;;  %v6093_v44 = vadd.f32 %v12929_v20, %v5933_v57  ;;  %v4962_v3 = vadd.f32 %v12935_v16, %v4802_v49  ;;  %v5284_v59 = vadd.f32 %v12937_v37, %v5124_v17  ;;  %v12938_v29 = vld [vmem:[#allocation55_spill] sm:$0xff]  ;;  %v5929_v24 = vadd.f32 %v12940_v5, %v5769_v38  ;;  %v12945_v54 = vld [vmem:[#allocation110_spill] sm:$0xff]  ;;  %v12947_v32 = vld [vmem:[#allocation69_spill] sm:$0xff] }
 0x6b5   :  { %7157 = vmatprep.subr.mxu1 %v6096_v56  ;;  %v5768_v1 = vadd.f32 %v12931_v40, %v5608_v58  ;;  %v12939_v45 = vld [vmem:[#allocation71_spill] sm:$0xff]  ;;  %v6091_v57 = vadd.f32 %v12941_v30, %v5931_v41  ;;  %v12946_v4 = vld [vmem:[#allocation90_spill] sm:$0xff]  ;;  %v12952_v9 = vld [vmem:[#allocation169_spill] sm:$0xff] }
 0x6b6   :  { %7158 = vmatpush3.msra.mxu1 %v6096_v56  ;;  %v11909_v34 = vpop.permute.xlu1 %5718  ;;  %v5606_v26 = vadd.f32 %v12939_v45, %v5446_v31  ;;  %v12942_v13 = vld [vmem:[#allocation115_spill] sm:$0xff]  ;;  %v5122_v25 = vadd.f32 %v12945_v54, %v4962_v3  ;;  %v5283_v62 = vadd.f32 %v12946_v4, %v5123_v50  ;;  %v5444_v15 = vadd.f32 %v12947_v32, %v5284_v59  ;;  %v12949_v61 = vld [vmem:[#allocation130_spill] sm:$0xff]  ;;  %v12953_v58 = vld [vmem:[#allocation53_spill] sm:$0xff] }
 0x6b7   :  { %v11915_v63 = vpop.permute.xlu0 %5880  ;;  %7159 = vmatprep.subr.mxu1 %v11709_v42  ;;  %v5767_v7 = vadd.f32 %v12942_v13, %v5607_v46  ;;  %v5928_v49 = vadd.f32 %v12943_v36, %v5768_v1  ;;  %v12950_v17 = vld [vmem:[#allocation54_spill] sm:$0xff]  ;;  %v12954_v8 = vld [vmem:[#allocation65_spill] sm:$0xff]  ;;  %v12955_v41 = vld [vmem:[#allocation92_spill] sm:$0xff] }
 0x6b8   :  { %7160 = vmatpush3.msra.mxu1 %v11709_v42  ;;  %v12933_v42 = vld [vmem:[#allocation75_spill] sm:$0xff]  ;;  %v5766_v33 = vadd.f32 %v12949_v61, %v5606_v26  ;;  %v6089_v39 = vadd.f32 %v12950_v17, %v5929_v24  ;;  %v12951_v12 = vld [vmem:[#allocation154_spill] sm:$0xff]  ;;  %v5443_v19 = vadd.f32 %v12953_v58, %v5283_v62  ;;  %v5282_v47 = vadd.f32 %v12954_v8, %v5122_v25  ;;  %v6101_v26 = vld [vmem:[#allocation5 + $0x18] sm:$0xff] }
 0x6b9   :  { %7161 = vmatprep.subr.mxu1 %v11670_v27  ;;  %v5930_v23 = vadd.f32 %v12933_v42, %v5770_v43  ;;  %v12948_v43 = vld [vmem:[#allocation84_spill] sm:$0xff]  ;;  %v5927_v31 = vadd.f32 %v12951_v12, %v5767_v7  ;;  %v6088_v11 = vadd.f32 %v12952_v9, %v5928_v49  ;;  %v5604_v20 = vadd.f32 %v12955_v41, %v5444_v15  ;;  %v12957_v46 = vld [vmem:[#allocation86_spill] sm:$0xff]  ;;  %v6100_v45 = vld [vmem:[#allocation5 + $0x10] sm:$0xff] }
 0x6ba   :  { %7162 = vmatpush3.msra.mxu1 %v11670_v27  ;;  %v6043_v6 = vpop.permute.xlu1 %6042  ;;  %v5445_v27 = vadd.f32 %v12938_v29, %v5285_v35  ;;  %v5926_v40 = vadd.f32 %v12957_v46, %v5766_v33  ;;  %v5603_v2 = vadd.f32 %v11896_v51, %v5443_v19  ;;  %v5442_v42 = vadd.f32 %v11891_v55, %v5282_v47  ;;  %v6102_v5 = vld [vmem:[#allocation5 + $0x20] sm:$0xff]  ;;  %v6103_v24 = vld [vmem:[#allocation5 + $0x28] sm:$0xff]  ;;  %v6104_v30 = vld [vmem:[#allocation5 + $0x30] sm:$0xff] }
 0x6bb   :  { %v5555_v56 = vpop.permute.xlu0 %5554  ;;  %7163 = vmatprep.subr.mxu1 %v6093_v44  ;;  %v6090_v60 = vadd.f32 %v12944_v18, %v5930_v23  ;;  %v6087_v1 = vadd.f32 %v11866_v48, %v5927_v31  ;;  %v5764_v23 = vadd.f32 %v11909_v34, %v5604_v20  ;;  %v6107_v13 = vld [vmem:[#allocation5 + $0x48] sm:$0xff]  ;;  %v6108_v7 = vld [vmem:[#allocation5 + $0x50] sm:$0xff]  ;;  %v6109_v36 = vld [vmem:[#allocation5 + $0x58] sm:$0xff] }
 0x6bc   :  { %7164 = vmatpush3.msra.mxu1 %v6093_v44  ;;  %v5605_v10 = vadd.f32 %v12948_v43, %v5445_v27  ;;  %v12956_v44 = vld [vmem:[#allocation141_spill] sm:$0xff]  ;;  %v5602_v0 = vadd.f32 %v5555_v56, %v5442_v42  ;;  %v6099_v56 = vld [vmem:[#allocation5 + $0x8] sm:$0xff]  ;;  %v6458_v54 = vld [vmem:[%s12182_s8 + $0x38] sm:$0xff] }
 0x6bd   :  { %7165 = vmatprep.subr.mxu1 %v6092_v52  ;;  %v6110_v49 = vld [vmem:[#allocation5 + $0x60] sm:$0xff]  ;;  %v6111_v18 = vld [vmem:[#allocation5 + $0x68] sm:$0xff]  ;;  %v6454_v32 = vld [vmem:[%s12182_s8 + $0x18] sm:$0xff] }
 0x6be   :  { %7166 = vmatpush3.msra.mxu1 %v6092_v52  ;;  %v5717_v22 = vpop.permute.xlu1 %5716  ;;  %v5765_v14 = vadd.f32 %v12956_v44, %v5605_v10  ;;  %v6086_v52 = vadd.f32 %v6043_v6, %v5926_v40  ;;  %v6457_v25 = vld [vmem:[%s12182_s8 + $0x30] sm:$0xff]  ;;  %v6456_v4 = vld [vmem:[%s12182_s8 + $0x28] sm:$0xff]  ;;  %v6455_v62 = vld [vmem:[%s12182_s8 + $0x20] sm:$0xff] }
 0x6bf   :  { %v5879_v21 = vpop.permute.xlu0 %5878  ;;  %7167 = vmatprep.subr.mxu1 %v6091_v57  ;;  %v5763_v3 = vadd.f32 %v5717_v22, %v5603_v2  ;;  %v6106_v22 = vld [vmem:[#allocation5 + $0x40] sm:$0xff]  ;;  %v6453_v15 = vld [vmem:[%s12182_s8 + $0x10] sm:$0xff] }
 0x6c0   :  { %7168 = vmatpush3.msra.mxu1 %v6091_v57  ;;  %v5925_v28 = vadd.f32 %v11915_v63, %v5765_v14  ;;  %v5924_v50 = vadd.f32 %v5879_v21, %v5764_v23  ;;  %v6105_v57 = vld [vmem:[#allocation5 + $0x38] sm:$0xff]  ;;  %v6452_v43 = vld [vmem:[%s12182_s8 + $0x8] sm:$0xff] }
 0x6c1   :  { %7169 = vmatprep.subr.mxu1 %v6090_v60  ;;  %v6113_v21 = vld [vmem:[#allocation5 + $0x78] sm:$0xff] }
 0x6c2   :  { %7170 = vmatpush3.msra.mxu1 %v6090_v60  ;;  %v6041_v35 = vpop.permute.xlu1 %6040  ;;  %v6112_v60 = vld [vmem:[#allocation5 + $0x70] sm:$0xff]  ;;  %v6451_v10 = vld [vmem:[%s12182_s8] sm:$0xff] }
 0x6c3   :  { %v5715_v53 = vpop.permute.xlu0 %5714  ;;  %7171 = vmatprep.subr.mxu1 %v6089_v39  ;;  %v6085_v37 = vadd.f32 %v6041_v35, %v5925_v28 }
 0x6c4   :  { %7172 = vmatpush3.msra.mxu1 %v6089_v39  ;;  %v5762_v59 = vadd.f32 %v5715_v53, %v5602_v0 }
 0x6c5   :  { %7173 = vmatprep.subr.mxu1 %v6088_v11 }
 0x6c6   :  { %7174 = vmatpush3.msra.mxu1 %v6088_v11  ;;  %v5877_v38 = vpop.permute.xlu1 %5876 }
 0x6c7   :  { %v6039_v16 = vpop.permute.xlu0 %6038  ;;  %7175 = vmatprep.subr.mxu1 %v6087_v1  ;;  %v5923_v48 = vadd.f32 %v5877_v38, %v5763_v3 }
 0x6c8   :  { %7176 = vmatpush3.msra.mxu1 %v6087_v1  ;;  %v6084_v29 = vadd.f32 %v6039_v16, %v5924_v50 }
 0x6c9   :  { %7177 = vmatprep.subr.mxu1 %v6086_v52 }
 0x6ca   :  { %7178 = vmatpush3.msra.mxu1 %v6086_v52  ;;  %v5875_v51 = vpop.permute.xlu1 %5874 }
 0x6cb   :  { %v6037_v27 = vpop.permute.xlu0 %6036  ;;  %7179 = vmatprep.subr.mxu1 %v6085_v37  ;;  %v5922_v34 = vadd.f32 %v5875_v51, %v5762_v59 }
 0x6cc   :  { %v6083_v55 = vadd.f32 %v6037_v27, %v5923_v48  ;;  %7180 = vmatpush3.msra.mxu1 %v6085_v37 }
 0x6cd   :  { %7181 = vmatprep.subr.mxu1 %v6084_v29 }
 0x6ce   :  { %7182 = vmatpush3.msra.mxu1 %v6084_v29  ;;  %v6035_v63 = vpop.permute.xlu1 %6034 }
 0x6cf   :  { %v6082_v6 = vadd.f32 %v6035_v63, %v5922_v34  ;;  %7183 = vmatprep.subr.mxu1 %v6083_v55 }
 0x6d0   :  { %7184 = vmatpush3.msra.mxu1 %v6083_v55 }
 0x6d1   :  { %7185 = vmatprep.subr.mxu1 %v6082_v6 }
 0x6d2   :  { %7186 = vmatpush3.msra.mxu1 %v6082_v6 }
 0x6d3   :  { %7188 = vmatmul.mubr.f32.vlgmr.msra.gmra.mxu1 %v6099_v56  ;;  %7211 = vmatprep.subr.mxu1 %v6458_v54 }
 0x6d4   :  { %7190 = vmatprep.mubr.f32.mxu1 %v6100_v45  ;;  %7212 = vmatpush3.msra.mxu1 %v6458_v54 }
 0x6d5   :  { %7213 = vmatprep.subr.mxu1 %v6457_v25 }
 0x6d6   :  { %7214 = vmatpush3.msra.mxu1 %v6457_v25 }
 0x6d7   :  { %7191 = vmatmul.mubr.f32.gmra.mxu1 %v6101_v26  ;;  %7215 = vmatprep.subr.mxu1 %v6456_v4 }
 0x6d8   :  { %7193 = vmatprep.mubr.f32.mxu1 %v6102_v5  ;;  %7216 = vmatpush3.msra.mxu1 %v6456_v4  ;;  %v6133_v61 = vpop.permute.xlu0 %6132 }
 0x6d9   :  { %7217 = vmatprep.subr.mxu1 %v6455_v62 }
 0x6da   :  { %7218 = vmatpush3.msra.mxu1 %v6455_v62 }
 0x6db   :  { %7194 = vmatmul.mubr.f32.gmra.mxu1 %v6103_v24  ;;  %7219 = vmatprep.subr.mxu1 %v6454_v32 }
 0x6dc   :  { %7196 = vmatprep.mubr.f32.mxu1 %v6104_v30  ;;  %7220 = vmatpush3.msra.mxu1 %v6454_v32  ;;  %v6148_v17 = vpop.permute.xlu0 %6147 }
 0x6dd   :  { %7221 = vmatprep.subr.mxu1 %v6453_v15 }
 0x6de   :  { %7222 = vmatpush3.msra.mxu1 %v6453_v15 }
 0x6df   :  { %7197 = vmatmul.mubr.f32.gmra.mxu1 %v6105_v57  ;;  %7223 = vmatprep.subr.mxu1 %v6452_v43 }
 0x6e0   :  { %7199 = vmatprep.mubr.f32.mxu1 %v6106_v22  ;;  %7224 = vmatpush3.msra.mxu1 %v6452_v43  ;;  %v6158_v35 = vpop.permute.xlu0 %6157 }
 0x6e1   :  { %7225 = vmatprep.subr.mxu1 %v6451_v10 }
 0x6e2   :  { %7226 = vmatpush3.msra.mxu1 %v6451_v10 }
 0x6e3   :  { %7200 = vmatmul.mubr.f32.gmra.mxu1 %v6107_v13 }
 0x6e4   :  { %7202 = vmatprep.mubr.f32.mxu1 %v6108_v7  ;;  %v6168_v8 = vpop.permute.xlu0 %6167 }
 0x6e7   :  { %7203 = vmatmul.mubr.f32.gmra.mxu1 %v6109_v36 }
 0x6e8   :  { %7205 = vmatprep.mubr.f32.mxu1 %v6110_v49  ;;  %v6178_v52 = vpop.permute.xlu0 %6177 }
 0x6e9   :  { %v6138_v33 = vpop.permute.xlu1 %6137 }
 0x6eb   :  { %7206 = vmatmul.mubr.f32.gmra.mxu1 %v6111_v18 }
 0x6ec   :  { %7208 = vmatprep.mubr.f32.mxu1 %v6112_v60  ;;  %v6188_v6 = vpop.permute.xlu0 %6187 }
 0x6ed   :  { %v6143_v39 = vpop.permute.xlu1 %6142 }
 0x6ef   :  { %7209 = vmatmul.mubr.f32.gmra.mxu1 %v6113_v21 }
 0x6f0   :  { %v6198_v54 = vpop.permute.xlu0 %6197 }
 0x6f1   :  { %v6153_v12 = vpop.permute.xlu1 %6152 }
 0x6f5   :  { %v6163_v44 = vpop.permute.xlu1 %6162 }
 0x6f9   :  { %v6173_v0 = vpop.permute.xlu1 %6172 }
 0x6fd   :  { %v6183_v26 = vpop.permute.xlu1 %6182 }
 0x701   :  { %v6193_v15 = vpop.permute.xlu1 %6192 }
 0x793   :  { %v7189_v31 = vpop.f32.mrf.mxu1 }
 0x794   :  { %v11986_v53 = vadd.f32 %v7189_v31, %v6138_v33 }
 0x795   :  { %v6276_v9 = vpop.f32.mrf.mxu1 }
 0x796   :  { %v6372_v11 = vmin.f32 %v11986_v53, 0.0  ;;  %v11989_v58 = vadd.f32 %v6276_v9, %v6133_v61  ;;  %vm6356_vm5 = vcmp.gt.f32.partialorder %v11986_v53, 0.0 }
 0x797   :  { %v7192_v19 = vpop.f32.mrf.mxu1 }
 0x798   :  { %v6389_v47 = vmul.f32 1.442695, %v6372_v11  ;;  %v6371_v41 = vmin.f32 %v11989_v58, 0.0  ;;  %v11992_v20 = vadd.f32 %v7192_v19, %v6148_v17  ;;  %vm6355_vm6 = vcmp.gt.f32.partialorder %v11989_v58, 0.0 }
 0x799   :  { %v6286_v14 = vpop.f32.mrf.mxu1 }
 0x79a   :  { %7503 = vpow2.f32 %v6389_v47  ;;  %v6387_v46 = vmul.f32 1.442695, %v6371_v41  ;;  %v6374_v40 = vmin.f32 %v11992_v20, 0.0  ;;  %v11995_v1 = vadd.f32 %v6286_v14, %v6143_v39 }
 0x79b   :  { %v7195_v2 = vpop.f32.mrf.mxu1  ;;  %vm6358_vm7 = vcmp.gt.f32.partialorder %v11992_v20, 0.0 }
 0x79c   :  { %7505 = vpow2.f32 %v6387_v46  ;;  %v6393_v38 = vmul.f32 1.442695, %v6374_v40  ;;  %v11997_v42 = vadd.f32 %v7195_v2, %v6158_v35  ;;  %v6373_v23 = vmin.f32 %v11995_v1, 0.0  ;;  %v6208_v46 = vpop.permute.xlu0 %6207  ;;  %v6203_v40 = vpop.permute.xlu1 %6202 }
 0x79d   :  { %v6296_v28 = vpop.f32.mrf.mxu1  ;;  %vm6357_vm8 = vcmp.gt.f32.partialorder %v11995_v1, 0.0 }
 0x79e   :  { %7507 = vpow2.f32 %v6393_v38  ;;  %v6376_v16 = vmin.f32 %v11997_v42, 0.0  ;;  %v12001_v3 = vadd.f32 %v6296_v28, %v6153_v12  ;;  %v6391_v50 = vmul.f32 1.442695, %v6373_v23 }
 0x79f   :  { %v7198_v37 = vpop.f32.mrf.mxu1  ;;  %vm6360_vm10 = vcmp.gt.f32.partialorder %v11997_v42, 0.0 }
 0x7a0   :  { %v6397_v48 = vmul.f32 1.442695, %v6376_v16  ;;  %v6375_v51 = vmin.f32 %v12001_v3, 0.0  ;;  %v12004_v59 = vadd.f32 %v7198_v37, %v6168_v8  ;;  %7509 = vpow2.f32 %v6391_v50 }
 0x7a1   :  { %v6306_v29 = vpop.f32.mrf.mxu1  ;;  %vm6359_vm9 = vcmp.gt.f32.partialorder %v12001_v3, 0.0 }
 0x7a2   :  { %7511 = vpow2.f32 %v6397_v48  ;;  %v6395_v27 = vmul.f32 1.442695, %v6375_v51  ;;  %v6378_v55 = vmin.f32 %v12004_v59, 0.0  ;;  %v12007_v34 = vadd.f32 %v6306_v29, %v6163_v44 }
 0x7a3   :  { %v7201_v63 = vpop.f32.mrf.mxu1  ;;  %vm6362_vm12 = vcmp.gt.f32.partialorder %v12004_v59, 0.0 }
 0x7a4   :  { %7513 = vpow2.f32 %v6395_v27  ;;  %v6401_v56 = vmul.f32 1.442695, %v6378_v55  ;;  %v12009_v45 = vadd.f32 %v7201_v63, %v6178_v52  ;;  %v6377_v5 = vmin.f32 %v12007_v34, 0.0 }
 0x7a5   :  { %v6316_v24 = vpop.f32.mrf.mxu1  ;;  %vm6361_vm11 = vcmp.gt.f32.partialorder %v12007_v34, 0.0 }
 0x7a6   :  { %7515 = vpow2.f32 %v6401_v56  ;;  %v6380_v30 = vmin.f32 %v12009_v45, 0.0  ;;  %v12013_v57 = vadd.f32 %v6316_v24, %v6173_v0  ;;  %v6399_v13 = vmul.f32 1.442695, %v6377_v5 }
 0x7a7   :  { %v7504_v22 = vpop.eup %7503  ;;  %v7204_v7 = vpop.f32.mrf.mxu1  ;;  %vm6364_vm14 = vcmp.gt.f32.partialorder %v12009_v45, 0.0 }
 0x7a8   :  { %v6405_v36 = vmul.f32 1.442695, %v6380_v30  ;;  %v6379_v49 = vmin.f32 %v12013_v57, 0.0  ;;  %7517 = vpow2.f32 %v6399_v13  ;;  %v12016_v60 = vadd.f32 %v7204_v7, %v6188_v6 }
 0x7a9   :  { %v7506_v18 = vpop.eup %7505  ;;  %v6326_v21 = vpop.f32.mrf.mxu1  ;;  %v6890_v25 = vadd.f32 -1.0, %v7504_v22  ;;  %vm6363_vm13 = vcmp.gt.f32.partialorder %v12013_v57, 0.0 }
 0x7aa   :  { %7519 = vpow2.f32 %v6405_v36  ;;  %v6403_v4 = vmul.f32 1.442695, %v6379_v49  ;;  %v12018_v62 = vadd.f32 %v6326_v21, %v6183_v26  ;;  %v6382_v43 = vmin.f32 %v12016_v60, 0.0 }
 0x7ab   :  { %v7508_v32 = vpop.eup %7507  ;;  %v7207_v10 = vpop.f32.mrf.mxu1  ;;  %v6889_v61 = vadd.f32 -1.0, %v7506_v18  ;;  %v6436_v11 = vsel %vm6356_vm5, %v11986_v53, %v6890_v25  ;;  %vm6366_vm1 = vcmp.gt.f32.partialorder %v12016_v60, 0.0 }
 0x7ac   :  { %7521 = vpow2.f32 %v6403_v4  ;;  %v6381_v33 = vmin.f32 %v12018_v62, 0.0  ;;  %v6892_v17 = vadd.f32 -1.0, %v7508_v32  ;;  %v6409_v39 = vmul.f32 1.442695, %v6382_v43 }
 0x7ad   :  { %v12024_v35 = vadd.f32 %v7207_v10, %v6198_v54  ;;  %v6336_v12 = vpop.f32.mrf.mxu1  ;;  %v6435_v31 = vsel %vm6355_vm6, %v11989_v58, %v6889_v61  ;;  %v7510_v9 = vpop.eup %7509  ;;  %vm6365_vm15 = vcmp.gt.f32.partialorder %v12018_v62, 0.0  ;;  %vm7702_vm6 = vmmov 0  }
 0x7ae   :  { %v6407_v19 = vmul.f32 1.442695, %v6381_v33  ;;  %v12028_v8 = vadd.f32 %v6336_v12, %v6193_v15  ;;  %7227 = vmatprep.mubr.msk.f32.mxu1 %vm314_vm0, %v6435_v31  ;;  %7523 = vpow2.f32 %v6409_v39  ;;  %v6891_v14 = vadd.f32 -1.0, %v7510_v9 }
 0x7af   :  { %v7512_v47 = vpop.eup %7511  ;;  %v6384_v41 = vmin.f32 %v12024_v35, 0.0  ;;  %7228 = vmatmul.mubr.msk.f32.vlgmr.msra.gmra.mxu1 %vm314_vm0, %v6436_v11  ;;  %v7210_v44 = vpop.f32.mrf.mxu1  ;;  %v6438_v2 = vsel %vm6358_vm7, %v11992_v20, %v6892_v17  ;;  %vm6368_vm3 = vcmp.gt.f32.partialorder %v12024_v35, 0.0  ;;  %vm6817_vm7 = vcmask 7168  }
 0x7b0   :  { %7525 = vpow2.f32 %v6407_v19  ;;  %v6383_v53 = vmin.f32 %v12028_v8, 0.0  ;;  %v12037_v23 = vadd.f32 %v7210_v44, %v6208_v46  ;;  %v6437_v52 = vsel %vm6357_vm8, %v11995_v1, %v6891_v14  ;;  %v6667_v14 = vld [vmem:[%s12183_s9 + $0x78] sm:$0xff]  ;;  %v6664_v46 = vld [vmem:[%s12183_s9 + $0x60] sm:$0xff] }
 0x7b1   :  { %v7514_v58 = vpop.eup %7513  ;;  %v6413_v38 = vmul.f32 1.442695, %v6384_v41  ;;  %v6346_v28 = vpop.f32.mrf.mxu1  ;;  %v6894_v16 = vadd.f32 -1.0, %v7512_v47  ;;  %7230 = vmatprep.mubr.msk.f32.mxu1 %vm314_vm0, %v6437_v52  ;;  %vm6367_vm2 = vcmp.gt.f32.partialorder %v12028_v8, 0.0 }
 0x7b2   :  { %v6411_v0 = vmul.f32 1.442695, %v6383_v53  ;;  %v12040_v50 = vadd.f32 %v6346_v28, %v6203_v40  ;;  %v6893_v37 = vadd.f32 -1.0, %v7514_v58  ;;  %v6386_v51 = vmin.f32 %v12037_v23, 0.0  ;;  %v6666_v58 = vld [vmem:[%s12183_s9 + $0x70] sm:$0xff] }
 0x7b3   :  { %v7516_v48 = vpop.eup %7515  ;;  %7527 = vpow2.f32 %v6413_v38  ;;  %7231 = vmatmul.mubr.msk.f32.gmra.mxu1 %vm314_vm0, %v6438_v2  ;;  %v6440_v55 = vsel %vm6360_vm10, %v11997_v42, %v6894_v16  ;;  %vm6370_vm5 = vcmp.gt.f32.partialorder %v12037_v23, 0.0  ;;  %v6665_v2 = vld [vmem:[%s12183_s9 + $0x68] sm:$0xff]  ;;  %v6662_v16 = vld [vmem:[%s12183_s9 + $0x50] sm:$0xff] }
 0x7b4   :  { %7529 = vpow2.f32 %v6411_v0  ;;  %v6385_v20 = vmin.f32 %v12040_v50, 0.0  ;;  %v6417_v1 = vmul.f32 1.442695, %v6386_v51  ;;  %v6439_v29 = vsel %vm6359_vm9, %v12001_v3, %v6893_v37  ;;  %v6663_v37 = vld [vmem:[%s12183_s9 + $0x58] sm:$0xff] }
 0x7b5   :  { %v7518_v27 = vpop.eup %7517  ;;  %v6896_v63 = vadd.f32 -1.0, %v7516_v48  ;;  %7233 = vmatprep.mubr.msk.f32.mxu1 %vm314_vm0, %v6439_v29  ;;  %vm6369_vm4 = vcmp.gt.f32.partialorder %v12040_v50, 0.0 }
 0x7b6   :  { %v6415_v6 = vmul.f32 1.442695, %v6385_v20  ;;  %7531 = vpow2.f32 %v6417_v1  ;;  %v6895_v26 = vadd.f32 -1.0, %v7518_v27  ;;  %v6660_v20 = vld [vmem:[%s12183_s9 + $0x40] sm:$0xff]  ;;  %v6661_v27 = vld [vmem:[%s12183_s9 + $0x48] sm:$0xff] }
 0x7b7   :  { %v7520_v56 = vpop.eup %7519  ;;  %7234 = vmatmul.mubr.msk.f32.gmra.mxu1 %vm314_vm0, %v6440_v55  ;;  %v6442_v24 = vsel %vm6362_vm12, %v12004_v59, %v6896_v63 }
 0x7b8   :  { %7533 = vpow2.f32 %v6415_v6  ;;  %v6441_v3 = vsel %vm6361_vm11, %v12007_v34, %v6895_v26  ;;  %v6898_v42 = vadd.f32 -1.0, %v7520_v56  ;;  %v6658_v6 = vld [vmem:[%s12183_s9 + $0x30] sm:$0xff] }
 0x7b9   :  { %v7522_v5 = vpop.eup %7521  ;;  %7236 = vmatprep.mubr.msk.f32.mxu1 %vm314_vm0, %v6441_v3 }
 0x7ba   :  { %v6897_v30 = vadd.f32 -1.0, %v7522_v5  ;;  %v6444_v34 = vsel %vm6364_vm14, %v12009_v45, %v6898_v42  ;;  %v6659_v5 = vld [vmem:[%s12183_s9 + $0x38] sm:$0xff]  ;;  %v6656_v42 = vld [vmem:[%s12183_s9 + $0x20] sm:$0xff] }
 0x7bb   :  { %7237 = vmatmul.mubr.msk.f32.gmra.mxu1 %vm314_vm0, %v6442_v24  ;;  %v7524_v22 = vpop.eup %7523 }
 0x7bc   :  { %v6443_v13 = vsel %vm6363_vm13, %v12013_v57, %v6897_v30  ;;  %v6900_v36 = vadd.f32 -1.0, %v7524_v22 }
 0x7bd   :  { %v7526_v7 = vpop.eup %7525  ;;  %7239 = vmatprep.mubr.msk.f32.mxu1 %vm314_vm0, %v6443_v13  ;;  %v6657_v13 = vld [vmem:[%s12183_s9 + $0x28] sm:$0xff] }
 0x7be   :  { %v6899_v59 = vadd.f32 -1.0, %v7526_v7  ;;  %v6446_v57 = vsel %vm6366_vm1, %v12016_v60, %v6900_v36  ;;  %v6654_v36 = vld [vmem:[%s12183_s9 + $0x10] sm:$0xff] }
 0x7bf   :  { %7240 = vmatmul.mubr.msk.f32.gmra.mxu1 %vm314_vm0, %v6444_v34 }
 0x7c0   :  { %v7528_v49 = vpop.eup %7527  ;;  %v6445_v18 = vsel %vm6365_vm15, %v12018_v62, %v6899_v59 }
 0x7c1   :  { %v7530_v21 = vpop.eup %7529  ;;  %7242 = vmatprep.mubr.msk.f32.mxu1 %vm314_vm0, %v6445_v18  ;;  %v6902_v54 = vadd.f32 -1.0, %v7528_v49  ;;  %v6655_v18 = vld [vmem:[%s12183_s9 + $0x18] sm:$0xff] }
 0x7c2   :  { %v6901_v25 = vadd.f32 -1.0, %v7530_v21 }
 0x7c3   :  { %7243 = vmatmul.mubr.msk.f32.gmra.mxu1 %vm314_vm0, %v6446_v57  ;;  %v7532_v45 = vpop.eup %7531  ;;  %v6448_v62 = vsel %vm6368_vm3, %v12024_v35, %v6902_v54  ;;  %v6652_v54 = vld [vmem:[%s12183_s9] sm:$0xff] }
 0x7c4   :  { %v6447_v4 = vsel %vm6367_vm2, %v12028_v8, %v6901_v25  ;;  %v6904_v15 = vadd.f32 -1.0, %v7532_v45 }
 0x7c5   :  { %v7534_v32 = vpop.eup %7533  ;;  %7245 = vmatprep.mubr.msk.f32.mxu1 %vm314_vm0, %v6447_v4  ;;  %v6653_v4 = vld [vmem:[%s12183_s9 + $0x8] sm:$0xff] }
 0x7c6   :  { %v6903_v43 = vadd.f32 -1.0, %v7534_v32  ;;  %v6450_v10 = vsel %vm6370_vm5, %v12037_v23, %v6904_v15 }
 0x7c7   :  { %7246 = vmatmul.mubr.msk.f32.gmra.mxu1 %vm314_vm0, %v6448_v62 }
 0x7c8   :  { %v6449_v60 = vsel %vm6369_vm4, %v12040_v50, %v6903_v43 }
 0x7c9   :  { %7248 = vmatprep.mubr.msk.f32.mxu1 %vm314_vm0, %v6449_v60 }
 0x7cb   :  { %7249 = vmatmul.mubr.msk.f32.gmra.mxu1 %vm314_vm0, %v6450_v10  ;;  %vm6684_vm0 = vcmask 64512  }
 0x86f   :  { %v12082_v61 = vpop.f32.mrf.mxu1 }
 0x870   :  { %v6669_v15 = vmul.f32 %v12082_v61, %v6653_v4 }
 0x871   :  { %v12084_v33 = vpop.f32.mrf.mxu1 }
 0x872   :  { %v6668_v32 = vmul.f32 %v6652_v54, %v12084_v33  ;;  %v6688_v10 = vsel %vm6684_vm0, %v6669_v15, 0.0 }
 0x873   :  { %v12086_v17 = vpop.f32.mrf.mxu1 }
 0x874   :  { %v6671_v25 = vmul.f32 %v12086_v17, %v6655_v18  ;;  %v6685_v60 = vsel %vm6684_vm0, %v6668_v32, 0.0  ;;  %v12958_v17 = vmov 0.0  }
 0x875   :  { %v6583_v39 = vpop.f32.mrf.mxu1  ;;  %7283 = vmatprep.mubr.msk.f32.mxu0 %vm7702_vm6, %v12958_v17 }
 0x876   :  { %v6670_v21 = vmul.f32 %v6654_v36, %v6583_v39  ;;  %v6694_v43 = vsel %vm6684_vm0, %v6671_v25, 0.0 }
 0x877   :  { %v7235_v35 = vpop.f32.mrf.mxu1 }
 0x878   :  { %v6673_v59 = vmul.f32 %v7235_v35, %v6657_v13  ;;  %v6691_v62 = vsel %vm6684_vm0, %v6670_v21, 0.0 }
 0x879   :  { %v6593_v12 = vpop.f32.mrf.mxu1 }
 0x87a   :  { %v6672_v7 = vmul.f32 %v6656_v42, %v6593_v12  ;;  %v6700_v45 = vsel %vm6684_vm0, %v6673_v59, 0.0 }
 0x87b   :  { %v7238_v31 = vpop.f32.mrf.mxu1 }
 0x87c   :  { %v6675_v30 = vmul.f32 %v7238_v31, %v6659_v5  ;;  %v6697_v57 = vsel %vm6684_vm0, %v6672_v7, 0.0 }
 0x87d   :  { %v6603_v9 = vpop.f32.mrf.mxu1 }
 0x87e   :  { %v6674_v3 = vmul.f32 %v6658_v6, %v6603_v9  ;;  %v6706_v49 = vsel %vm6684_vm0, %v6675_v30, 0.0 }
 0x87f   :  { %v7241_v11 = vpop.f32.mrf.mxu1 }
 0x880   :  { %v6677_v56 = vmul.f32 %v7241_v11, %v6661_v27  ;;  %v6703_v34 = vsel %vm6684_vm0, %v6674_v3, 0.0 }
 0x881   :  { %v6613_v19 = vpop.f32.mrf.mxu1 }
 0x882   :  { %v6676_v55 = vmul.f32 %v6660_v20, %v6613_v19  ;;  %v6712_v22 = vsel %vm6684_vm0, %v6677_v56, 0.0 }
 0x883   :  { %v7244_v8 = vpop.f32.mrf.mxu1 }
 0x884   :  { %v6679_v1 = vmul.f32 %v7244_v8, %v6663_v37  ;;  %v6709_v24 = vsel %vm6684_vm0, %v6676_v55, 0.0 }
 0x885   :  { %v6623_v47 = vpop.f32.mrf.mxu1 }
 0x886   :  { %v6678_v48 = vmul.f32 %v6662_v16, %v6623_v47  ;;  %v6718_v26 = vsel %vm6684_vm0, %v6679_v1, 0.0 }
 0x887   :  { %v7247_v41 = vpop.f32.mrf.mxu1 }
 0x888   :  { %v6681_v0 = vmul.f32 %v7247_v41, %v6665_v2  ;;  %v6715_v63 = vsel %vm6684_vm0, %v6678_v48, 0.0 }
 0x889   :  { %v6633_v44 = vpop.f32.mrf.mxu1 }
 0x88a   :  { %v6680_v23 = vmul.f32 %v6664_v46, %v6633_v44  ;;  %v6724_v29 = vsel %vm6684_vm0, %v6681_v0, 0.0 }
 0x88b   :  { %v7250_v53 = vpop.f32.mrf.mxu1 }
 0x88c   :  { %v6683_v40 = vmul.f32 %v7250_v53, %v6667_v14  ;;  %v6721_v51 = vsel %vm6684_vm0, %v6680_v23, 0.0  ;;  %v6733_v53 = vld [vmem:[#allocation7] sm:$0xff] }
 0x88d   :  { %v6643_v38 = vpop.f32.mrf.mxu1 }
 0x88e   :  { %v6682_v28 = vmul.f32 %v6666_v58, %v6643_v38  ;;  %v6730_v52 = vsel %vm6684_vm0, %v6683_v40, 0.0  ;;  %v6921_v40 = vld [vmem:[#allocation2] ss:$0 sm:$0xff] }
 0x88f   :  { %6731 = vadd.xlane.f32.xlu1 %v6730_v52 }
 0x890   :  { %v6727_v50 = vsel %vm6684_vm0, %v6682_v28, 0.0 }
 0x891   :  { %6728 = vadd.xlane.f32.xlu0 %v6727_v50 }
 0x893   :  { %6722 = vadd.xlane.f32.xlu1 %v6721_v51 }
 0x895   :  { %6725 = vadd.xlane.f32.xlu0 %v6724_v29 }
 0x897   :  { %6716 = vadd.xlane.f32.xlu1 %v6715_v63 }
 0x899   :  { %6719 = vadd.xlane.f32.xlu0 %v6718_v26 }
 0x89b   :  { %6710 = vadd.xlane.f32.xlu1 %v6709_v24 }
 0x89d   :  { %6713 = vadd.xlane.f32.xlu0 %v6712_v22 }
 0x89f   :  { %6704 = vadd.xlane.f32.xlu1 %v6703_v34 }
 0x8a1   :  { %6707 = vadd.xlane.f32.xlu0 %v6706_v49 }
 0x8a3   :  { %6698 = vadd.xlane.f32.xlu1 %v6697_v57 }
 0x8a5   :  { %6701 = vadd.xlane.f32.xlu0 %v6700_v45 }
 0x8a7   :  { %6692 = vadd.xlane.f32.xlu1 %v6691_v62 }
 0x8a9   :  { %6695 = vadd.xlane.f32.xlu0 %v6694_v43 }
 0x8ab   :  { %6686 = vadd.xlane.f32.xlu1 %v6685_v60 }
 0x8ad   :  { %6689 = vadd.xlane.f32.xlu0 %v6688_v10 }
 0x918   :  { %v6732_v39 = vpop.xlane.xlu1 %6731 }
 0x919   :  { %7252 = vmatpush3.msra.mxu0 %v6732_v39 }
 0x91a   :  { %7253 = vmatprep.subr.mxu0 %v12958_v17  ;;  %v6729_v33 = vpop.xlane.xlu0 %6728 }
 0x91b   :  { %7254 = vmatpush3.msra.mxu0 %v6729_v33 }
 0x91c   :  { %v6723_v35 = vpop.xlane.xlu1 %6722  ;;  %7255 = vmatprep.subr.mxu0 %v12958_v17 }
 0x91e   :  { %v6726_v61 = vpop.xlane.xlu0 %6725 }
 0x91f   :  { %7256 = vmatpush3.msra.mxu0 %v6726_v61 }
 0x920   :  { %v6717_v12 = vpop.xlane.xlu1 %6716  ;;  %7257 = vmatprep.subr.mxu0 %v12958_v17 }
 0x921   :  { %7258 = vmatpush3.msra.mxu0 %v6723_v35 }
 0x922   :  { %7259 = vmatprep.subr.mxu0 %v12958_v17  ;;  %v6720_v31 = vpop.xlane.xlu0 %6719 }
 0x923   :  { %7260 = vmatpush3.msra.mxu0 %v6720_v31 }
 0x924   :  { %v6711_v9 = vpop.xlane.xlu1 %6710  ;;  %7261 = vmatprep.subr.mxu0 %v12958_v17 }
 0x925   :  { %7262 = vmatpush3.msra.mxu0 %v6717_v12 }
 0x926   :  { %7263 = vmatprep.subr.mxu0 %v12958_v17  ;;  %v6714_v11 = vpop.xlane.xlu0 %6713 }
 0x927   :  { %7264 = vmatpush3.msra.mxu0 %v6714_v11 }
 0x928   :  { %v6705_v19 = vpop.xlane.xlu1 %6704  ;;  %7265 = vmatprep.subr.mxu0 %v12958_v17 }
 0x929   :  { %7266 = vmatpush3.msra.mxu0 %v6711_v9 }
 0x92a   :  { %7267 = vmatprep.subr.mxu0 %v12958_v17  ;;  %v6708_v8 = vpop.xlane.xlu0 %6707 }
 0x92b   :  { %7268 = vmatpush3.msra.mxu0 %v6708_v8 }
 0x92c   :  { %v6699_v47 = vpop.xlane.xlu1 %6698  ;;  %7269 = vmatprep.subr.mxu0 %v12958_v17 }
 0x92d   :  { %7270 = vmatpush3.msra.mxu0 %v6705_v19 }
 0x92e   :  { %7271 = vmatprep.subr.mxu0 %v12958_v17  ;;  %v6702_v41 = vpop.xlane.xlu0 %6701 }
 0x92f   :  { %7272 = vmatpush3.msra.mxu0 %v6702_v41 }
 0x930   :  { %7273 = vmatprep.subr.mxu0 %v12958_v17  ;;  %v6693_v44 = vpop.xlane.xlu1 %6692 }
 0x931   :  { %7274 = vmatpush3.msra.mxu0 %v6699_v47 }
 0x932   :  { %7275 = vmatprep.subr.mxu0 %v12958_v17  ;;  %v6696_v14 = vpop.xlane.xlu0 %6695 }
 0x933   :  { %7276 = vmatpush3.msra.mxu0 %v6696_v14 }
 0x934   :  { %7277 = vmatprep.subr.mxu0 %v12958_v17  ;;  %v6687_v58 = vpop.xlane.xlu1 %6686 }
 0x935   :  { %7278 = vmatpush3.msra.mxu0 %v6693_v44 }
 0x936   :  { %7279 = vmatprep.subr.mxu0 %v12958_v17  ;;  %v6690_v46 = vpop.xlane.xlu0 %6689 }
 0x937   :  { %7280 = vmatpush3.msra.mxu0 %v6690_v46 }
 0x938   :  { %7281 = vmatprep.subr.mxu0 %v12958_v17 }
 0x939   :  { %7282 = vmatpush3.msra.mxu0 %v6687_v58 }
 0x93a   :  { %7284 = vmatmul.mubr.f32.vlgmr.msra.gmra.mxu0 %v6733_v53 }
 0x9fa   :  { %v6807_v2 = vpop.f32.mrf.mxu0 }
 0x9fb   :  { %v6808_v38 = vadd.f32 %v6921_v40, %v6807_v2 }
 0x9fc   :  { %v7285_v23 = vpop.f32.mrf.mxu0 }
 0x9fd   :  { %v6811_v28 = vsub.f32 0.0, %v6808_v38 }
 0x9ff   :  { %v6812_v52 = vmul.f32 1.442695, %v6811_v28 }
 0xa01   :  { %7535 = vpow2.f32 %v6812_v52 }
 0xa0e   :  { %v7536_v16 = vpop.eup %7535 }
 0xa0f   :  { %v6814_v0 = vadd.f32 1.0, %v7536_v16 }
 0xa11   :  { %7537 = vrcp.f32 %v6814_v0 }
 0xa1e   :  { %v7538_v50 = vpop.eup %7537 }
 0xa1f   :  { %6818 = vst.msk [vmem:[%s12186_s12] sm:$0xff] %vm6817_vm7, %v7538_v50 }
 0xa20   :  { %6823 = vsyncpa [#allocation4], 1 }
 0xa21   :  { %6824 = vsyncpa [#allocation6], 1 }

</bundles_post_ra>
